<compile_context>
chip_gen: v6e
topology: v6e:2x2x1
jax: 0.10.0
libtpu: 0.0.40
codegen_flags: <defaults>
</compile_context>

<pallas_src>
import jax
import jax.numpy as jnp
from jax.experimental import pallas as pl
from jax.experimental.pallas import tpu as pltpu


# ---------------------------------------------------------------------------
# Tile chooser: largest multiple of 128 that divides `total` and is <= target;
# falls back to the full extent (always a legal block).
# ---------------------------------------------------------------------------
def _pick_tile(total, target):
    if total <= target:
        return total
    t = (target // 128) * 128
    while t >= 128:
        if total % t == 0:
            return t
        t -= 128
    return total


# ---------------------------------------------------------------------------
# Kernel 1: localization head as a tiled matmul with fused epilogue.
#   grid = (cloc_tiles, k_tiles), k innermost ("arbitrary" reduction axis).
#   Per step: acc += im2col_block(bf16) @ w_block(bf16)   (f32 accumulation)
#   At last k: +bias, BatchNorm (batch stats), ReLU,
#              MaxPool2d(3, stride=2, pad=1, -inf pad), global average pool.
# ---------------------------------------------------------------------------
def loc_head_kernel(x_ref, w_ref, b_ref, out_ref, acc_ref, pad_ref):
    k = pl.program_id(1)

    @pl.when(k == 0)
    def _init():
        acc_ref[...] = jnp.zeros_like(acc_ref)

    acc_ref[...] += jnp.dot(x_ref[...], w_ref[...],
                            preferred_element_type=jnp.float32)

    @pl.when(k == pl.num_programs(1) - 1)
    def _epilogue():
        n, hpad, wpad, ct = pad_ref.shape          # hpad=H, wpad=W (pad=1 each side)
        ho, wo = hpad - 2, wpad - 2
        hp, wp = ho // 2, wo // 2                  # MaxPool(3,2,1) output size (even ho/wo)

        # Conv bias + BatchNorm2d (training-mode batch stats, biased variance,
        # gamma=1, beta=0) + ReLU.  Channel tiles are independent for BN.
        y = acc_ref[...] + b_ref[...]
        mean = jnp.mean(y, axis=0, keepdims=True)
        var = jnp.mean((y - mean) ** 2, axis=0, keepdims=True)
        y = jnp.maximum((y - mean) * jax.lax.rsqrt(var + 1e-5), 0.0)

        # MaxPool2d(kernel=3, stride=2, padding=1) with implicit -inf padding.
        pad_ref[...] = jnp.full(pad_ref.shape, -jnp.inf, jnp.float32)
        pad_ref[:, 1:1 + ho, 1:1 + wo, :] = y.reshape(n, ho, wo, ct)
        padded = pad_ref[...]

        # Separable 3x3 max, stride 1 (valid): 3 + 3 slices instead of 49 windows.
        mw = jnp.maximum(jnp.maximum(padded[:, :, 0:wo, :],
                                     padded[:, :, 1:wo + 1, :]),
                         padded[:, :, 2:wo + 2, :])        # (n, hpad, wo, ct)
        m = jnp.maximum(jnp.maximum(mw[:, 0:ho, :, :],
                                    mw[:, 1:ho + 1, :, :]),
                        mw[:, 2:ho + 2, :, :])             # (n, ho, wo, ct)

        # Stride-2 downsample via reshape + static index (requires even ho/wo).
        m = m.reshape(n, hp, 2, wo, ct)[:, :, 0, :, :]     # (n, hp, wo, ct)
        m = m.reshape(n, hp, wp, 2, ct)[:, :, :, 0, :]     # (n, hp, wp, ct)

        # adaptive_avg_pool2d((1,1)) == mean over pooled spatial positions.
        out_ref[...] = jnp.mean(m, axis=(1, 2))            # (n, ct)


# ---------------------------------------------------------------------------
# Kernel 2: fc_loc  (Linear -> ReLU -> Linear).  Kept as its own tiny call:
# it needs the full C_loc vector, so fusing it into the (cloc-parallel)
# loc_head epilogue would force the cloc axis to be sequential.
# ---------------------------------------------------------------------------
def fc_loc_kernel(xs_ref, w1_ref, b1_ref, w2_ref, b2_ref, out_ref):
    h = jnp.dot(xs_ref[...], w1_ref[...], preferred_element_type=jnp.float32)
    h = jnp.maximum(h + b1_ref[...], 0.0)
    out_ref[...] = jnp.dot(h, w2_ref[...],
                           preferred_element_type=jnp.float32) + b2_ref[...]


# ---------------------------------------------------------------------------
# Kernel 3: affine grid_sample (bilinear, zero padding, align_corners=False).
#   Gather-free:  out[n, c, p] = sum_q tent(iy[n,p]-qy[q]) * tent(ix[n,p]-qx[q]) * x[n, c, q]
#   -> batched (C x HW) @ (HW x TP) bf16 matmul on the MXU, f32 accumulation.
#   Grid = (stripe, p_tile); qy/qx are precomputed (1, HW) f32 vectors, so the
#   weight build is pure f32 VPU broadcasting (no per-element idiv/imod).
#   Output block is (1, N, C, TP): lane-dense (TP multiple of 128) and already
#   NCHW-flat, so the wrapper only reshapes HW -> (H, W).
# ---------------------------------------------------------------------------
def grid_sample_kernel(iy_ref, ix_ref, qy_ref, qx_ref, x_ref, out_ref):
    iy = iy_ref[0]          # (N, TP) source-pixel y coords for this output tile
    ix = ix_ref[0]          # (N, TP)
    qy = qy_ref[...]        # (1, HW) input-pixel y coords
    qx = qx_ref[...]        # (1, HW)

    wy = jnp.maximum(1.0 - jnp.abs(iy[:, :, None] - qy[None, :, :]), 0.0)  # (N, TP, HW)
    wx = jnp.maximum(1.0 - jnp.abs(ix[:, :, None] - qx[None, :, :]), 0.0)
    wmat = (wy * wx).astype(jnp.bfloat16)                                  # (N, TP, HW)

    # (N, C, HW) x (N, TP, HW) contracting HW, batched over N -> (N, C, TP)
    out = jax.lax.dot_general(
        x_ref[...], wmat,
        dimension_numbers=(((2,), (2,)), ((0,), (0,))),
        preferred_element_type=jnp.float32)
    out_ref[0] = out.astype(out_ref.dtype)


# ---------------------------------------------------------------------------
# Parameter init (deterministic, mirrors the torch __init__ semantics)
# ---------------------------------------------------------------------------
def init_params(key, c_in, c_loc, hidden):
    k_cw, k_cb, k_w1, k_b1 = jax.random.split(key, 4)

    # Conv2d(c_in, c_loc, 3): kaiming_normal_(mode='fan_out', nonlinearity='relu')
    fan_out = c_loc * 9
    conv_w_oihw = jax.random.normal(k_cw, (c_loc, c_in, 3, 3), jnp.float32) * \
        jnp.sqrt(2.0 / fan_out)
    conv_w = jnp.transpose(conv_w_oihw, (2, 3, 1, 0))  # HWIO
    fan_in = c_in * 9
    cb = 1.0 / jnp.sqrt(float(fan_in))
    conv_b = jax.random.uniform(k_cb, (1, c_loc), jnp.float32, -cb, cb)

    # Linear(c_loc, hidden): PyTorch default init
    lb = 1.0 / jnp.sqrt(float(c_loc))
    w1 = jax.random.uniform(k_w1, (hidden, c_loc), jnp.float32, -lb, lb)
    b1 = jax.random.uniform(k_b1, (1, hidden), jnp.float32, -lb, lb)

    # Linear(hidden, 36): weight zeroed, bias = path_postion
    path_postion = jnp.array(
        [1, 0, 0, 0, 1 / 6, -5 / 6,
         1, 0, 0, 0, 1 / 6, -3 / 6,
         1, 0, 0, 0, 1 / 6, -1 / 6,
         1, 0, 0, 0, 1 / 6, 1 / 6,
         1, 0, 0, 0, 1 / 6, 3 / 6,
         1, 0, 0, 0, 1 / 6, 5 / 6], jnp.float32)
    w2 = jnp.zeros((36, hidden), jnp.float32)
    b2 = path_postion.reshape(1, 36)

    return dict(conv_w=conv_w, conv_b=conv_b,
                w1t=jnp.transpose(w1), b1=b1,
                w2t=jnp.transpose(w2), b2=b2)


# ---------------------------------------------------------------------------
# Forward pass (wrapper = layout plumbing; hot paths run inside Pallas kernels)
# ---------------------------------------------------------------------------
def patch_generator_forward(x_nchw, params, *,
                            k_tile_target=512,
                            cloc_tile_target=256,
                            p_tile_target=128):
    N, C, H, W = x_nchw.shape
    assert H % 2 == 0 and W % 2 == 0 and H >= 4 and W >= 4, \
        "even spatial dims >= 4 required (MaxPool stride-2 reshape trick)"
    x_f32 = x_nchw.astype(jnp.float32)

    C_loc = params['conv_w'].shape[-1]
    hidden = params['w1t'].shape[1]
    Ho, Wo = H - 2, W - 2
    R = N * Ho * Wo
    K = 9 * C

    # --- im2col (layout plumbing, one-time) + bf16 operands for the MXU ---
    x_nhwc = jnp.transpose(x_f32, (0, 2, 3, 1))
    patches = [x_nhwc[:, ky:ky + Ho, kx:kx + Wo, :]
               for ky in range(3) for kx in range(3)]
    im2col = jnp.concatenate(patches, axis=-1).reshape(R, K).astype(jnp.bfloat16)
    w2d = params['conv_w'].reshape(K, C_loc).astype(jnp.bfloat16)

    KT = _pick_tile(K, k_tile_target)          # weight-streaming reduction tile
    CT = _pick_tile(C_loc, cloc_tile_target)   # output-channel tile

    # --- localization head kernel (tiled matmul + fused BN/ReLU/pool epilogue) ---
    xs = pl.pallas_call(
        loc_head_kernel,
        out_shape=jax.ShapeDtypeStruct((N, C_loc), jnp.float32),
        grid=(C_loc // CT, K // KT),
        in_specs=[
            pl.BlockSpec((R, KT), lambda cj, ck: (0, ck)),
            pl.BlockSpec((KT, CT), lambda cj, ck: (ck, cj)),
            pl.BlockSpec((1, CT), lambda cj, ck: (0, cj)),
        ],
        out_specs=pl.BlockSpec((N, CT), lambda cj, ck: (0, cj)),
        scratch_shapes=[pltpu.VMEM((R, CT), jnp.float32),
                        pltpu.VMEM((N, H, W, CT), jnp.float32)],
        compiler_params=pltpu.CompilerParams(
            dimension_semantics=("parallel", "arbitrary")),
    )(im2col, w2d, params['conv_b'])

    # --- fc_loc kernel -> theta (N, 36) ---
    theta36 = pl.pallas_call(
        fc_loc_kernel,
        out_shape=jax.ShapeDtypeStruct((N, 36), jnp.float32),
        grid=(1,),
        in_specs=[
            pl.BlockSpec((N, C_loc), lambda i: (0, 0)),
            pl.BlockSpec((C_loc, hidden), lambda i: (0, 0)),
            pl.BlockSpec((1, hidden), lambda i: (0, 0)),
            pl.BlockSpec((hidden, 36), lambda i: (0, 0)),
            pl.BlockSpec((1, 36), lambda i: (0, 0)),
        ],
        out_specs=pl.BlockSpec((N, 36), lambda i: (0, 0)),
    )(xs, params['w1t'], params['b1'], params['w2t'], params['b2'])

    # --- affine_grid coordinate math (tiny elementwise glue) ---
    theta = theta36.reshape(N, 6, 2, 3).transpose(1, 0, 2, 3)       # (6, N, 2, 3)
    xt = (2.0 * jnp.arange(W, dtype=jnp.float32) + 1.0) / W - 1.0   # align_corners=False
    yt = (2.0 * jnp.arange(H, dtype=jnp.float32) + 1.0) / H - 1.0
    xs_n = (theta[:, :, 0, 0, None, None] * xt[None, None, None, :]
            + theta[:, :, 0, 1, None, None] * yt[None, None, :, None]
            + theta[:, :, 0, 2, None, None])                        # (6, N, H, W)
    ys_n = (theta[:, :, 1, 0, None, None] * xt[None, None, None, :]
            + theta[:, :, 1, 1, None, None] * yt[None, None, :, None]
            + theta[:, :, 1, 2, None, None])
    ix = (((xs_n + 1.0) * W - 1.0) * 0.5).reshape(6, N, H * W)      # pixel coords
    iy = (((ys_n + 1.0) * H - 1.0) * 0.5).reshape(6, N, H * W)

    # hoisted input-pixel coordinates (no per-stripe idiv/imod in the kernel)
    jj = jnp.arange(H * W, dtype=jnp.int32)
    qyv = (jj // W).astype(jnp.float32).reshape(1, H * W)
    qxv = (jj % W).astype(jnp.float32).reshape(1, H * W)

    # --- grid_sample kernel: grid = (stripe, output-pixel tile) ---
    TP = _pick_tile(H * W, p_tile_target)
    x_ncq = x_f32.reshape(N, C, H * W).astype(jnp.bfloat16)

    sampled = pl.pallas_call(
        grid_sample_kernel,
        out_shape=jax.ShapeDtypeStruct((6, N, C, H * W), jnp.float32),
        grid=(6, (H * W) // TP),
        in_specs=[
            pl.BlockSpec((1, N, TP), lambda s, p: (s, 0, p)),
            pl.BlockSpec((1, N, TP), lambda s, p: (s, 0, p)),
            pl.BlockSpec((1, H * W), lambda s, p: (0, 0)),
            pl.BlockSpec((1, H * W), lambda s, p: (0, 0)),
            pl.BlockSpec((N, C, H * W), lambda s, p: (0, 0, 0)),
        ],
        out_specs=pl.BlockSpec((1, N, C, TP), lambda s, p: (s, 0, 0, p)),
        compiler_params=pltpu.CompilerParams(
            dimension_semantics=("parallel", "parallel")),
    )(iy, ix, qyv, qxv, x_ncq)

    out = sampled.reshape(6, N, C, H, W)    # already NCHW per stripe; no transpose
    return [out[i] for i in range(6)]


if __name__ == "__main__":
    # Scaled-down shapes (the reference module uses C_in=2048, C_loc=4096,
    # hidden=512; channel widths reduced to keep the demo small while still
    # exercising the cloc / K-reduction / output-pixel tiling grids).
    N, C_IN, H, W = 2, 128, 16, 16
    C_LOC, HIDDEN = 512, 64

    key = jax.random.PRNGKey(0)
    k_x, k_p = jax.random.split(key)
    x = jax.random.normal(k_x, (N, C_IN, H, W), jnp.float32)  # NCHW like torch
    params = init_params(k_p, C_IN, C_LOC, HIDDEN)

    outputs = patch_generator_forward(x, params)
    outputs = jax.block_until_ready(outputs)

    assert len(outputs) == 6
    for o in outputs:
        assert o.shape == (N, C_IN, H, W)
        assert bool(jnp.all(jnp.isfinite(o)))
    print("KERNEL_OK")
</pallas_src>

<mosaic_0001>
module attributes {stable_mosaic.version = 11 : i64} {
  func.func @loc_head_kernel(%arg0: i32, %arg1: i32, %arg2: memref<392x384xbf16, #tpu.memory_space<vmem>>, %arg3: memref<384x256xbf16, #tpu.memory_space<vmem>>, %arg4: memref<1x256xf32, #tpu.memory_space<vmem>>, %arg5: memref<2x256xf32, #tpu.memory_space<vmem>>, %arg6: memref<392x256xf32, #tpu.memory_space<vmem>>, %arg7: memref<2x16x16x256xf32, #tpu.memory_space<vmem>>) attributes {dimension_semantics = [#tpu.dimension_semantics<parallel>, #tpu.dimension_semantics<arbitrary>], iteration_bounds = array<i64: 2, 3>, scalar_prefetch = 0 : i64, scratch_operands = 2 : i64, tpu.core_type = #tpu.core_type<tc>, window_params = [{transform_indices = @transform_0, window_bounds = array<i64: 392, 384>}, {transform_indices = @transform_1, window_bounds = array<i64: 384, 256>}, {transform_indices = @transform_2, window_bounds = array<i64: 1, 256>}, {transform_indices = @transform_3, window_bounds = array<i64: 2, 256>}]} {
    %c0_i32 = arith.constant 0 : i32
    %0 = arith.cmpi eq, %arg1, %c0_i32 : i32
    %1 = arith.extui %0 : i1 to i32
    %c0_i32_0 = arith.constant 0 : i32
    %2 = arith.cmpi ne, %1, %c0_i32_0 : i32
    scf.if %2 {
      %cst_9 = arith.constant 0.000000e+00 : f32
      %12 = vector.broadcast %cst_9 : f32 to vector<392x256xf32>
      %c0_10 = arith.constant 0 : index
      %c0_11 = arith.constant 0 : index
      %13 = vector.load %arg6[%c0_10, %c0_11] : memref<392x256xf32, #tpu.memory_space<vmem>>, vector<392x256xf32>
      tpu.vector_store %arg6[%c0_10, %c0_11], %12 {strides = array<i32>} : memref<392x256xf32, #tpu.memory_space<vmem>>, vector<392x256xf32>,
    } else {
    }
    %c0 = arith.constant 0 : index
    %c0_1 = arith.constant 0 : index
    %3 = vector.load %arg6[%c0, %c0_1] : memref<392x256xf32, #tpu.memory_space<vmem>>, vector<392x256xf32>
    %c0_2 = arith.constant 0 : index
    %c0_3 = arith.constant 0 : index
    %4 = vector.load %arg2[%c0_2, %c0_3] : memref<392x384xbf16, #tpu.memory_space<vmem>>, vector<392x384xbf16>
    %c0_4 = arith.constant 0 : index
    %c0_5 = arith.constant 0 : index
    %5 = vector.load %arg3[%c0_4, %c0_5] : memref<384x256xbf16, #tpu.memory_space<vmem>>, vector<384x256xbf16>
    %cst = arith.constant dense<0.000000e+00> : vector<392x256xf32>
    %6 = tpu.matmul %4, %5, %cst {dimension_numbers = #tpu.dot_dimension_numbers<[1], [0], [0], [1], [0, 0, 1, 1], [], []>} : vector<392x384xbf16>, vector<384x256xbf16>, vector<392x256xf32> -> vector<392x256xf32>
    %7 = arith.addf %3, %6 : vector<392x256xf32>
    %c0_6 = arith.constant 0 : index
    %c0_7 = arith.constant 0 : index
    %8 = vector.load %arg6[%c0_6, %c0_7] : memref<392x256xf32, #tpu.memory_space<vmem>>, vector<392x256xf32>
    tpu.vector_store %arg6[%c0_6, %c0_7], %7 {strides = array<i32>} : memref<392x256xf32, #tpu.memory_space<vmem>>, vector<392x256xf32>,
    %c2_i32 = arith.constant 2 : i32
    %9 = arith.cmpi eq, %arg1, %c2_i32 : i32
    %10 = arith.extui %9 : i1 to i32
    %c0_i32_8 = arith.constant 0 : i32
    %11 = arith.cmpi ne, %10, %c0_i32_8 : i32
    scf.if %11 {
      %c0_9 = arith.constant 0 : index
      %c0_10 = arith.constant 0 : index
      %12 = vector.load %arg6[%c0_9, %c0_10] : memref<392x256xf32, #tpu.memory_space<vmem>>, vector<392x256xf32>
      %c0_11 = arith.constant 0 : index
      %c0_12 = arith.constant 0 : index
      %13 = vector.load %arg4[%c0_11, %c0_12] : memref<1x256xf32, #tpu.memory_space<vmem>>, vector<1x256xf32>
      %14 = vector.broadcast %13 : vector<1x256xf32> to vector<392x256xf32>
      %15 = arith.addf %12, %14 : vector<392x256xf32>
      %cst_13 = arith.constant dense<0.000000e+00> : vector<256xf32>
      %16 = vector.multi_reduction <add>, %15, %cst_13 [0] : vector<392x256xf32> to vector<256xf32>
      %17 = vector.shape_cast %16 : vector<256xf32> to vector<1x256xf32>
      %cst_14 = arith.constant 3.920000e+02 : f32
      %18 = vector.broadcast %cst_14 : f32 to vector<1x256xf32>
      %19 = arith.divf %17, %18 : vector<1x256xf32>
      %20 = vector.broadcast %19 : vector<1x256xf32> to vector<392x256xf32>
      %21 = arith.subf %15, %20 : vector<392x256xf32>
      %22 = arith.mulf %21, %21 : vector<392x256xf32>
      %cst_15 = arith.constant dense<0.000000e+00> : vector<256xf32>
      %23 = vector.multi_reduction <add>, %22, %cst_15 [0] : vector<392x256xf32> to vector<256xf32>
      %24 = vector.shape_cast %23 : vector<256xf32> to vector<1x256xf32>
      %cst_16 = arith.constant 3.920000e+02 : f32
      %25 = vector.broadcast %cst_16 : f32 to vector<1x256xf32>
      %26 = arith.divf %24, %25 : vector<1x256xf32>
      %27 = vector.broadcast %19 : vector<1x256xf32> to vector<392x256xf32>
      %28 = arith.subf %15, %27 : vector<392x256xf32>
      %cst_17 = arith.constant 9.99999974E-6 : f32
      %29 = vector.broadcast %cst_17 : f32 to vector<1x256xf32>
      %30 = arith.addf %26, %29 : vector<1x256xf32>
      %31 = math.rsqrt %30 : vector<1x256xf32>
      %32 = vector.broadcast %31 : vector<1x256xf32> to vector<392x256xf32>
      %33 = arith.mulf %28, %32 : vector<392x256xf32>
      %cst_18 = arith.constant 0.000000e+00 : f32
      %34 = vector.broadcast %cst_18 : f32 to vector<392x256xf32>
      %35 = arith.maximumf %33, %34 : vector<392x256xf32>
      %cst_19 = arith.constant 0xFF800000 : f32
      %36 = vector.broadcast %cst_19 : f32 to vector<2x16x16x256xf32>
      %c0_20 = arith.constant 0 : index
      %c0_21 = arith.constant 0 : index
      %c0_22 = arith.constant 0 : index
      %c0_23 = arith.constant 0 : index
      %37 = vector.load %arg7[%c0_20, %c0_21, %c0_22, %c0_23] : memref<2x16x16x256xf32, #tpu.memory_space<vmem>>, vector<2x16x16x256xf32>
      tpu.vector_store %arg7[%c0_20, %c0_21, %c0_22, %c0_23], %36 {strides = array<i32>} : memref<2x16x16x256xf32, #tpu.memory_space<vmem>>, vector<2x16x16x256xf32>,
      %38 = vector.shape_cast %35 : vector<392x256xf32> to vector<2x14x14x256xf32>
      %c0_24 = arith.constant 0 : index
      %c1 = arith.constant 1 : index
      %c1_25 = arith.constant 1 : index
      %c0_26 = arith.constant 0 : index
      %39 = vector.load %arg7[%c0_24, %c1, %c1_25, %c0_26] : memref<2x16x16x256xf32, #tpu.memory_space<vmem>>, vector<2x14x14x256xf32>
      tpu.vector_store %arg7[%c0_24, %c1, %c1_25, %c0_26], %38 {strides = array<i32>} : memref<2x16x16x256xf32, #tpu.memory_space<vmem>>, vector<2x14x14x256xf32>,
      %c0_27 = arith.constant 0 : index
      %c0_28 = arith.constant 0 : index
      %c0_29 = arith.constant 0 : index
      %c0_30 = arith.constant 0 : index
      %40 = vector.load %arg7[%c0_27, %c0_28, %c0_29, %c0_30] : memref<2x16x16x256xf32, #tpu.memory_space<vmem>>, vector<2x16x16x256xf32>
      %41 = vector.extract_strided_slice %40 {offsets = [0, 0, 0, 0], sizes = [2, 16, 14, 256], strides = [1, 1, 1, 1]} : vector<2x16x16x256xf32> to vector<2x16x14x256xf32>
      %42 = vector.extract_strided_slice %40 {offsets = [0, 0, 1, 0], sizes = [2, 16, 14, 256], strides = [1, 1, 1, 1]} : vector<2x16x16x256xf32> to vector<2x16x14x256xf32>
      %43 = arith.maximumf %41, %42 : vector<2x16x14x256xf32>
      %44 = vector.extract_strided_slice %40 {offsets = [0, 0, 2, 0], sizes = [2, 16, 14, 256], strides = [1, 1, 1, 1]} : vector<2x16x16x256xf32> to vector<2x16x14x256xf32>
      %45 = arith.maximumf %43, %44 : vector<2x16x14x256xf32>
      %46 = vector.extract_strided_slice %45 {offsets = [0, 0, 0, 0], sizes = [2, 14, 14, 256], strides = [1, 1, 1, 1]} : vector<2x16x14x256xf32> to vector<2x14x14x256xf32>
      %47 = vector.extract_strided_slice %45 {offsets = [0, 1, 0, 0], sizes = [2, 14, 14, 256], strides = [1, 1, 1, 1]} : vector<2x16x14x256xf32> to vector<2x14x14x256xf32>
      %48 = arith.maximumf %46, %47 : vector<2x14x14x256xf32>
      %49 = vector.extract_strided_slice %45 {offsets = [0, 2, 0, 0], sizes = [2, 14, 14, 256], strides = [1, 1, 1, 1]} : vector<2x16x14x256xf32> to vector<2x14x14x256xf32>
      %50 = arith.maximumf %48, %49 : vector<2x14x14x256xf32>
      %51 = vector.shape_cast %50 : vector<2x14x14x256xf32> to vector<2x7x2x14x256xf32>
      %52 = vector.extract_strided_slice %51 {offsets = [0, 0, 0, 0, 0], sizes = [2, 7, 1, 14, 256], strides = [1, 1, 1, 1, 1]} : vector<2x7x2x14x256xf32> to vector<2x7x1x14x256xf32>
      %53 = vector.shape_cast %52 : vector<2x7x1x14x256xf32> to vector<2x7x14x256xf32>
      %54 = vector.shape_cast %53 : vector<2x7x14x256xf32> to vector<2x7x7x2x256xf32>
      %55 = vector.extract_strided_slice %54 {offsets = [0, 0, 0, 0, 0], sizes = [2, 7, 7, 1, 256], strides = [1, 1, 1, 1, 1]} : vector<2x7x7x2x256xf32> to vector<2x7x7x1x256xf32>
      %56 = vector.shape_cast %55 : vector<2x7x7x1x256xf32> to vector<2x7x7x256xf32>
      %cst_31 = arith.constant dense<0.000000e+00> : vector<2x256xf32>
      %57 = vector.multi_reduction <add>, %56, %cst_31 [1, 2] : vector<2x7x7x256xf32> to vector<2x256xf32>
      %cst_32 = arith.constant 4.900000e+01 : f32
      %58 = vector.broadcast %cst_32 : f32 to vector<2x256xf32>
      %59 = arith.divf %57, %58 : vector<2x256xf32>
      %c0_33 = arith.constant 0 : index
      %c0_34 = arith.constant 0 : index
      %60 = vector.load %arg5[%c0_33, %c0_34] : memref<2x256xf32, #tpu.memory_space<vmem>>, vector<2x256xf32>
      tpu.vector_store %arg5[%c0_33, %c0_34], %59 {strides = array<i32>} : memref<2x256xf32, #tpu.memory_space<vmem>>, vector<2x256xf32>,
    } else {
    }
    return
  }
  func.func @transform_0(%arg0: i32, %arg1: i32) -> (i32, i32) {
    %c0_i32 = arith.constant 0 : i32
    %c0_i32_0 = arith.constant 0 : i32
    return %c0_i32, %arg1 : i32, i32
  }
  func.func @transform_1(%arg0: i32, %arg1: i32) -> (i32, i32) {
    %c0_i32 = arith.constant 0 : i32
    return %arg1, %arg0 : i32, i32
  }
  func.func @transform_2(%arg0: i32, %arg1: i32) -> (i32, i32) {
    %c0_i32 = arith.constant 0 : i32
    %c0_i32_0 = arith.constant 0 : i32
    return %c0_i32, %arg0 : i32, i32
  }
  func.func @transform_3(%arg0: i32, %arg1: i32) -> (i32, i32) {
    %c0_i32 = arith.constant 0 : i32
    %c0_i32_0 = arith.constant 0 : i32
    return %c0_i32, %arg0 : i32, i32
  }
}

</mosaic_0001>

<bundles_post_ra>
// kernel: tpu_custom_call.1
= control target key start
LH: loop header
LB: loop body
LE: loop exit
PB: predicated region body
PF: predicated region fallthrough
CT: control target
= control target key end

     0   :  { %s14383_s0 = inlined_call_operand.hbm [shape: bf16[392,1152], index: 0, kind: input, shape index: {}]   ;;  %s14384_s1 = inlined_call_operand.hbm [shape: bf16[1152,512], index: 1, kind: input, shape index: {}]   ;;  %s14385_s2 = inlined_call_operand.hbm [shape: f32[1,512], index: 2, kind: input, shape index: {}]   ;;  %s14386_s3 = inlined_call_operand.hbm [shape: f32[2,512], index: 3, kind: output, shape index: {}]  }
   0x1   :  { %14741 = sst [smem:[#allocation123_spill]] %s14383_s0 }
   0x2   :  { %14742 = sst [smem:[#allocation124_spill]] %s14384_s1 }
   0x3   :  { %14743 = sst [smem:[#allocation125_spill]] %s14385_s2 }
   0x4   :  { %14744 = sst [smem:[#allocation126_spill]] %s14386_s3 }
   0x5   :  { %8 = vsyncpa [#allocation5], 0 }
   0x6   :  { %10 = vsyncpa [#allocation5 + $0x1], 0 }
   0x7   :  { %11 = vsyncpa [#allocation8], 0 }
   0x8   :  { %13 = vsyncpa [#allocation8 + $0x1], 0 }
   0x9   :  { %14 = vsyncpa [#allocation6], 0 }
   0xa   :  { %16 = vsyncpa [#allocation6 + $0x1], 0  ;;  %s9068_s12 = smov 0   ;;  %s9070_s13 = smov 0  }
   0xb   :  { %s9072_s14 = smov 0   ;;  %s9074_s15 = smov 0  }
   0xc   :  { %s9076_s16 = smov 0   ;;  %s9078_s17 = smov 0  }
   0xd   :  { %s9080_s18 = smov 0   ;;  %s9082_s19 = smov 0  }
   0xe   :  { %s9084_s20 = smov 0   ;;  %s9086_s21 = smov 0  }
   0xf   :  { %s9088_s22 = smov 0   ;;  %s9090_s23 = smov 0  }
  0x10   :  { %s9092_s24 = smov 0   ;;  %s9094_s25 = smov 0  }
  0x11 LB: > { %14745 = sst [smem:[#allocation15_spill]] %s8980_s12  ;;  %s31_s26 = sadd.s32 1, %s9024_s23  ;;  %s9032_s25 = sphi %s9094_s25, %s22_s25   ;;  %s9028_s24 = sphi %s9092_s24, %s15644_s24   ;;  %s9024_s23 = sphi %s9090_s23, %s15643_s23   ;;  %s9020_s22 = sphi %s9088_s22, %s15642_s22   ;;  %s9016_s21 = sphi %s9086_s21, %s15641_s21   ;;  %s9012_s20 = sphi %s9084_s20, %s15653_s20   ;;  %s9008_s19 = sphi %s9082_s19, %s15652_s19   ;;  %s9004_s18 = sphi %s9080_s18, %s15651_s18   ;;  %s9000_s17 = sphi %s9078_s17, %s15650_s17   ;;  %s8996_s16 = sphi %s9076_s16, %s15649_s16   ;;  %s8992_s15 = sphi %s9074_s15, %s15648_s15   ;;  %s8988_s14 = sphi %s9072_s14, %s15647_s14   ;;  %s8984_s13 = sphi %s9070_s13, %s15646_s13   ;;  %s8980_s12 = sphi %s9068_s12, %s15645_s12  }
  0x12   : > { %14746 = sst [smem:[#allocation16_spill]] %s8992_s15  ;;  %s34_s27 = sadd.s32 1, %s9028_s24 }
  0x13   : > { %14747 = sst [smem:[#allocation17_spill]] %s9016_s21  ;;  %p32_p0 = scmp.ge.s32.totalorder %s31_s26, 3 }
  0x14   : > { %14748 = sst [smem:[#allocation18_spill]] %s9020_s22  ;;  %p49_p1 = scmp.eq.s32.totalorder %s9032_s25, 0 }
  0x15   : > { %14749 = sst [smem:[#allocation19_spill]] %s9024_s23  ;;  %s69_s28 = sadd.s32 1, %s9000_s17 }
  0x16   : > { %14750 = sst [smem:[#allocation20_spill]] %s9028_s24  ;;  %p76_p2 = scmp.ne.s32.totalorder %s9000_s17, %s8996_s16 }
  0x17   : > { %s15655_s26 = smov (%p32_p0, %s31_s26), 0  ;;  %s15657_s27 = smov (!%p32_p0, %s34_s27), %s9028_s24 }
  0x18   : > { %14751 = sst [smem:[#allocation21_spill]] %s15655_s26  ;;  %s9149_s29 = ssub.s32 %s9024_s23, %s15655_s26 }
  0x19   : > { %p9153_p3 = por %p76_p2, %p49_p1  ;;  %p36_p4 = scmp.ge.s32.totalorder %s15657_s27, 2 }
  0x1a   : > { %p39_p5 = scmp.eq.s32.totalorder %s9149_s29, 0  ;;  %p82_p6 = scmp.ne.s32.totalorder %s8996_s16, %s8992_s15 }
  0x1b   : > { %s15659_s27 = smov (%p36_p4, %s15657_s27), 0  ;;  %p8490_p7 = scmp.lt.s32.totalorder %s9032_s25, 6 }
  0x1c   : > { %14753 = sst [smem:[#allocation22_spill]] %s15659_s27  ;;  %s8460_s4 = smul.u32 192, %s9024_s23 }
  0x1d   : > { %s9166_s5 = ssub.s32 %s9028_s24, %s15659_s27  ;;  %s179_s6 = sand.u32 1, %s9032_s25  }
  0x1e   : > { %s66_s7 = sor.u32 %s9166_s5, %s9149_s29  ;;  %s181_s8 = sand.u32 1, %s9000_s17  }
  0x1f   : > { %p67_p8 = scmp.eq.s32.totalorder %s66_s7, 0  ;;  %s8465_s9 = smul.u32 384, %s181_s8 }
  0x20   : > { %s8321_s10 = sshll.u32 %s9028_s24, 1  ;;  %s14754_s1 = sld [smem:[#allocation124_spill]] }
  0x21   : > { %s9174_s11 = scalar_select %p67_p8, %s9000_s17, %s69_s28  }
  0x22   : > { %s190_s26 = sadd.s32 %s8460_s4, %s8321_s10  ;;  %s183_s22 = scalar_lea.vmem [#allocation7], %s8465_s9 }
  0x23   : > { %s8323_s3 = sshll.u32 %s190_s26, 6  ;;  %s193_s21 = sshll.u32 %s183_s22, 4  ;;  %s194_s21 = int_to_ptr.vmem [resolvable:$true] %s193_s21 }
  0x24   : > { %p9185_p9 = pnand %p8490_p7, %p9153_p3  ;;  %p8327_p10 = scmp.ge.s32.totalorder %s9032_s25, 1 }
  0x25   : > { %s9190_s28 = scalar_lea.sflag [#allocation8], %s179_s6  ;;  %s8809_s26 = scalar_lea.vmem %s194_s21, 6144 }
  0x26   : > { %s192_s15 = scalar_lea.hbm %s14754_s1, %s8323_s3  ;;  %p8798_p11 = pneg %p9185_p9 }
  0x27   : > { %p8810_p12 = scmp.ne.s32.totalorder %s194_s21, %s8809_s26  ;;  %s9034_s22 = smov [#allocation7]  }
  0x28   : > { %s8814_s2 = sshll.u32 %s9034_s22, 4  ;;  %s8815_s2 = int_to_ptr.vmem [resolvable:$false] %s8814_s2 }
  0x29   : > { %p8812_p13 = pnand %p8810_p12, %p8798_p11  ;;  %s8816_s3 = scalar_lea.vmem %s8815_s2, 12288 }
  0x2a   : > { %p8817_p2 = scmp.lt.s32.totalorder %s194_s21, %s8815_s2  ;;  %p8818_p4 = scmp.lt.s32.totalorder %s8816_s3, %s8809_s26 }
  0x2b   : > { %p8813_p0 = pneg %p8812_p13 }
  0x2c   : > { %p8819_p3 = por %p8818_p4, %p8817_p2 }
  0x2e   : > { %p8820_p8 = pnand %p8819_p3, %p8813_p0 }
  0x30   : > { %8823 = shalt.err (!%p8820_p8)
}
  0x31   : > { %s9035_s12 = smov 256   ;;  %s9036_s30 = smov 128  }
  0x32   : > { %s9037_s6 = smov 8   ;;  %p220_p11 = scmp.lt.s32.totalorder %s9032_s25, 7 }
  0x33   : > { %8482 = dma.hbm_to_vmem [thread:$0]  (!%p9185_p9), %s192_s15, 6144, %s194_s21, %s9190_s28, %s9035_s12, %s9036_s30, %s9037_s6  }
  0x34   : > { %p9200_p12 = pnand %p8327_p10, %p220_p11  ;;  %s41_s8 = sadd.s32 1, %s9012_s20 }
  0x35   : > { %p48_p13 = scmp.ne.s32.totalorder %s9012_s20, %s9008_s19  ;;  %p54_p2 = scmp.ne.s32.totalorder %s9008_s19, %s9004_s18 }
  0x36   : > { %s9210_s9 = scalar_select %p39_p5, %s9012_s20, %s41_s8  }
  0x37   : > { %p50_p0 = por %p49_p1, %p48_p13  ;;  %s158_s10 = sand.u32 1, %s9012_s20  }
  0x38   : > { %s14757_s0 = sld [smem:[#allocation123_spill]]  ;;  %s8464_s21 = smul.u32 588, %s158_s10 }
  0x39   : > { %p9224_p9 = pnand %p8490_p7, %p50_p0  ;;  %s159_s3 = scalar_lea.sflag [#allocation5], %s158_s10 }
  0x3a   : > { %s162_s2 = scalar_lea.vmem [#allocation4], %s8464_s21  ;;  %s9038_s30 = smov [#allocation4]  }
  0x3b   : > { %s169_s29 = sshll.u32 %s162_s2, 4  ;;  %p8826_p5 = pneg %p9224_p9  ;;  %s170_s29 = int_to_ptr.vmem [resolvable:$true] %s169_s29 }
  0x3c   : > { %s8837_s12 = scalar_lea.vmem %s170_s29, 9408  ;;  %s8842_s6 = sshll.u32 %s9038_s30, 4  ;;  %s8843_s6 = int_to_ptr.vmem [resolvable:$false] %s8842_s6 }
  0x3d   : > { %p8838_p10 = scmp.ne.s32.totalorder %s170_s29, %s8837_s12  ;;  %p8845_p8 = scmp.lt.s32.totalorder %s170_s29, %s8843_s6 }
  0x3e   : > { %s168_s15 = scalar_lea.hbm %s14757_s0, %s8460_s4  ;;  %s8844_s4 = scalar_lea.vmem %s8843_s6, 18816 }
  0x3f   : > { %p8840_p4 = pnand %p8838_p10, %p8826_p5  ;;  %p8846_p11 = scmp.lt.s32.totalorder %s8844_s4, %s8837_s12 }
  0x41   : > { %p8841_p3 = pneg %p8840_p4  ;;  %p8847_p13 = por %p8846_p11, %p8845_p8 }
  0x43   : > { %p8848_p0 = pnand %p8847_p13, %p8841_p3 }
  0x45   : > { %8851 = shalt.err (!%p8848_p0)
}
  0x46   : > { %s9039_s8 = smov 576   ;;  %s14760_s26 = sld [smem:[#allocation15_spill]] }
  0x47   : > { %s9040_s22 = smov 192   ;;  %s9041_s21 = smov 12  }
  0x48   : > { %8479 = dma.hbm_to_vmem [thread:$0]  (!%p9224_p9), %s168_s15, 9408, %s170_s29, %s159_s3, %s9039_s8, %s9040_s22, %s9041_s21  }
  0x49   : > { %s9233_s2 = sadd.s32 4294967295, %s9032_s25   ;;  %s8317_s12 = sadd.s32 4294967294, %s9032_s25  }
  0x4a   : > { %p55_p5 = scmp.eq.s32.totalorder %s9233_s2, 0  ;;  %p93_p10 = scmp.eq.s32.totalorder %s9166_s5, 0 }
  0x4b   : > { %s95_s30 = sadd.s32 1, %s8988_s14  ;;  %p102_p4 = scmp.ne.s32.totalorder %s8988_s14, %s8984_s13 }
  0x4c   : > { %p9244_p3 = por %p55_p5, %p54_p2  ;;  %p9251_p8 = por %p82_p6, %p55_p5 }
  0x4d   : > { %s9256_s15 = scalar_select %p93_p10, %s8988_s14, %s95_s30  }
  0x4e   : > { %p9260_p9 = por %p102_p4, %p49_p1  ;;  %p108_p11 = scmp.ne.s32.totalorder %s8984_s13, %s14760_s26 }
  0x4f   : > { %p132_p13 = scmp.eq.s32.totalorder %s9233_s2, 5  ;;  %p138_p2 = scmp.eq.s32.totalorder %s8317_s12, 5 }
  0x50   : > { %p9267_p0 = por %p108_p11, %p55_p5  ;;  %s205_s5 = sand.u32 1, %s8988_s14  }
  0x51   : > { %p9272_p6 = por %p132_p13, %p102_p4  ;;  %p9276_p10 = por %p138_p2, %p108_p11 }
  0x52   : > { %s14764_s18 = scalar_select %p9267_p0, 1, 0 }
  0x53   : > { %s14765_s3 = scalar_select %p9272_p6, 1, 0 }
  0x54   : > { %s14766_s4 = scalar_select %p9276_p10, 1, 0 }
  0x55   : > { %s8324_s8 = sshll.u32 %s205_s5, 1  ;;  %s8462_s10 = sshll.u32 %s9028_s24, 5 }
  0x56   : > { %s14767_s26 = sld [smem:[#allocation125_spill]]  ;;  %s207_s12 = scalar_lea.vmem [#allocation9], %s8324_s8 }
  0x57   : > { %s215_s0 = sshll.u32 %s207_s12, 4  ;;  %p9288_p1 = pnand %p8490_p7, %p9260_p9  ;;  %s216_s0 = int_to_ptr.vmem [resolvable:$true] %s215_s0 }
  0x58   : > { %s8865_s23 = scalar_lea.vmem %s216_s0, 32  ;;  %s9042_s5 = smov [#allocation9]  }
  0x59   : > { %p8854_p5 = pneg %p9288_p1  ;;  %p8866_p4 = scmp.ne.s32.totalorder %s216_s0, %s8865_s23 }
  0x5a   : > { %s8870_s24 = sshll.u32 %s9042_s5, 4  ;;  %s8871_s24 = int_to_ptr.vmem [resolvable:$false] %s8870_s24 }
  0x5b   : > { %p8868_p11 = pnand %p8866_p4, %p8854_p5  ;;  %p8873_p2 = scmp.lt.s32.totalorder %s216_s0, %s8871_s24 }
  0x5c   : > { %s213_s30 = scalar_lea.hbm %s14767_s26, %s8462_s10  ;;  %s8872_s10 = scalar_lea.vmem %s8871_s24, 64 }
  0x5d   : > { %p8869_p13 = pneg %p8868_p11  ;;  %p8874_p10 = scmp.lt.s32.totalorder %s8872_s10, %s8865_s23 }
  0x5f   : > { %p8875_p6 = por %p8874_p10, %p8873_p2 }
  0x61   : > { %p8876_p0 = pnand %p8875_p6, %p8869_p13 }
  0x63   : > { %8879 = shalt.err (!%p8876_p0)
}
  0x64   : > { %8485 = dma.hbm_to_vmem [thread:$0]  (!%p9288_p1), %s213_s30, 32, %s216_s0, %s9190_s28  }
  0x65   : > { %224 = sbr.rel (%p9200_p12) target bundleno = 1553 (0x611), region = 32  ;;  %s226_s29 = sand.u32 (!%p9200_p12), 1, %s9008_s19  }
  0x66   : > { %s8466_s8 = smul.u32 (!%p9200_p12), 588, %s226_s29  ;;  %s227_s22 = scalar_lea.sflag (!%p9200_p12), [#allocation5], %s226_s29 }
  0x68   : > { %s9300_s21 = scalar_lea.vmem (!%p9200_p12), [#allocation4], %s8466_s8 }
  0x6a   : > { %8963 = dma.done.wait (%p9244_p3), %s227_s22, 9408  }
  0x6b   : > { %8965 = vsyncadd (%p9244_p3), %s227_s22, 4294957888  ;;  %s235_s1 = sand.u32 1, %s9233_s2   ;;  %s237_s0 = sand.u32 1, %s8996_s16  }
  0x6c   : > { %s8467_s23 = smul.u32 384, %s237_s0  ;;  %s236_s24 = scalar_lea.sflag [#allocation8], %s235_s1 }
  0x6e   : > { %s9308_s28 = scalar_lea.vmem [#allocation7], %s8467_s23 }
  0x6f   : > { %8967 = dma.done.wait (%p9251_p8), %s236_s24, 6144  }
  0x70   : > { %8969 = vsyncadd (%p9251_p8), %s236_s24, 4294961152  ;;  %s9315_s7 = sand.u32 1, %s8984_s13   ;;  %p14769_p7 = scmp.ne.s32.totalorder %s14764_s18, 0 }
  0x71   : > { %s8328_s6 = sshll.u32 %s9315_s7, 1 }
  0x72   : > { %s9318_s26 = scalar_lea.vmem [#allocation9], %s8328_s6 }
  0x73   : > { %8971 = dma.done.wait (%p14769_p7), %s236_s24, 32  }
  0x74   : > { %8973 = vsyncadd (%p14769_p7), %s236_s24, 4294967264  ;;  %s8329_s2 = sshll.u32 %s9315_s7, 2  ;;  %s14770_s12 = sld [smem:[#allocation17_spill]] }
  0x75   : > { %s9325_s30 = scalar_lea.vmem [#allocation10], %s8329_s2 }
  0x7a   : > { %p8330_p12 = scmp.ne.s32.totalorder %s14770_s12, 0 }
  0x7c   : > { %290 = sbr.rel (%p8330_p12) target bundleno = 179 (0xb3), region = 48 }
  0x81   : > { %v9043_v0 = vmov 0.0  }
  0x82   : > { %291 = vst [vmem:[#allocation2 + $0x2b0] sm:$0xff] %v9043_v0  ;;  %292 = vst [vmem:[#allocation2 + $0xd0] sm:$0xff] %v9043_v0 }
  0x83   : > { %293 = vst [vmem:[#allocation2 + $0x10] sm:$0xff] %v9043_v0  ;;  %294 = vst [vmem:[#allocation2 + $0x48] sm:$0xff] %v9043_v0 }
  0x84   : > { %295 = vst [vmem:[#allocation2 + $0x30] sm:$0xff] %v9043_v0  ;;  %296 = vst [vmem:[#allocation2 + $0xf0] sm:$0xff] %v9043_v0 }
  0x85   : > { %297 = vst [vmem:[#allocation2 + $0xf8] sm:$0xff] %v9043_v0  ;;  %298 = vst [vmem:[#allocation2 + $0x78] sm:$0xff] %v9043_v0 }
  0x86   : > { %299 = vst [vmem:[#allocation2 + $0x300] sm:$0xff] %v9043_v0  ;;  %300 = vst [vmem:[#allocation2 + $0x130] sm:$0xff] %v9043_v0 }
  0x87   : > { %301 = vst [vmem:[#allocation2 + $0xe8] sm:$0xff] %v9043_v0  ;;  %302 = vst [vmem:[#allocation2 + $0x40] sm:$0xff] %v9043_v0 }
  0x88   : > { %303 = vst [vmem:[#allocation2 + $0x2c0] sm:$0xff] %v9043_v0  ;;  %304 = vst [vmem:[#allocation2 + $0x2a8] sm:$0xff] %v9043_v0 }
  0x89   : > { %305 = vst [vmem:[#allocation2 + $0x170] sm:$0xff] %v9043_v0  ;;  %306 = vst [vmem:[#allocation2 + $0x180] sm:$0xff] %v9043_v0 }
  0x8a   : > { %307 = vst [vmem:[#allocation2 + $0x18] sm:$0xff] %v9043_v0  ;;  %308 = vst [vmem:[#allocation2 + $0x2b8] sm:$0xff] %v9043_v0 }
  0x8b   : > { %309 = vst [vmem:[#allocation2 + $0x250] sm:$0xff] %v9043_v0  ;;  %310 = vst [vmem:[#allocation2 + $0x28] sm:$0xff] %v9043_v0 }
  0x8c   : > { %311 = vst [vmem:[#allocation2 + $0x70] sm:$0xff] %v9043_v0  ;;  %312 = vst [vmem:[#allocation2 + $0x230] sm:$0xff] %v9043_v0 }
  0x8d   : > { %313 = vst [vmem:[#allocation2 + $0xb0] sm:$0xff] %v9043_v0  ;;  %314 = vst [vmem:[#allocation2 + $0x100] sm:$0xff] %v9043_v0 }
  0x8e   : > { %315 = vst [vmem:[#allocation2 + $0x1b8] sm:$0xff] %v9043_v0  ;;  %316 = vst [vmem:[#allocation2 + $0x228] sm:$0xff] %v9043_v0 }
  0x8f   : > { %317 = vst [vmem:[#allocation2 + $0x260] sm:$0xff] %v9043_v0  ;;  %318 = vst [vmem:[#allocation2 + $0x240] sm:$0xff] %v9043_v0 }
  0x90   : > { %319 = vst [vmem:[#allocation2 + $0x138] sm:$0xff] %v9043_v0  ;;  %320 = vst [vmem:[#allocation2 + $0x160] sm:$0xff] %v9043_v0 }
  0x91   : > { %321 = vst [vmem:[#allocation2 + $0xa0] sm:$0xff] %v9043_v0  ;;  %322 = vst [vmem:[#allocation2 + $0x2e8] sm:$0xff] %v9043_v0 }
  0x92   : > { %323 = vst [vmem:[#allocation2 + $0x1b0] sm:$0xff] %v9043_v0  ;;  %324 = vst [vmem:[#allocation2 + $0x1c0] sm:$0xff] %v9043_v0 }
  0x93   : > { %325 = vst [vmem:[#allocation2 + $0x88] sm:$0xff] %v9043_v0  ;;  %326 = vst [vmem:[#allocation2 + $0x190] sm:$0xff] %v9043_v0 }
  0x94   : > { %327 = vst [vmem:[#allocation2 + $0x210] sm:$0xff] %v9043_v0  ;;  %328 = vst [vmem:[#allocation2 + $0x80] sm:$0xff] %v9043_v0 }
  0x95   : > { %329 = vst [vmem:[#allocation2 + $0x198] sm:$0xff] %v9043_v0  ;;  %330 = vst [vmem:[#allocation2 + $0x220] sm:$0xff] %v9043_v0 }
  0x96   : > { %331 = vst [vmem:[#allocation2 + $0x258] sm:$0xff] %v9043_v0  ;;  %332 = vst [vmem:[#allocation2 + $0x1d0] sm:$0xff] %v9043_v0 }
  0x97   : > { %333 = vst [vmem:[#allocation2 + $0x288] sm:$0xff] %v9043_v0  ;;  %334 = vst [vmem:[#allocation2 + $0x108] sm:$0xff] %v9043_v0 }
  0x98   : > { %335 = vst [vmem:[#allocation2 + $0xc0] sm:$0xff] %v9043_v0  ;;  %336 = vst [vmem:[#allocation2 + $0x290] sm:$0xff] %v9043_v0 }
  0x99   : > { %337 = vst [vmem:[#allocation2 + $0x308] sm:$0xff] %v9043_v0  ;;  %338 = vst [vmem:[#allocation2] sm:$0xff] %v9043_v0 }
  0x9a   : > { %339 = vst [vmem:[#allocation2 + $0xe0] sm:$0xff] %v9043_v0  ;;  %340 = vst [vmem:[#allocation2 + $0x98] sm:$0xff] %v9043_v0 }
  0x9b   : > { %341 = vst [vmem:[#allocation2 + $0x1f8] sm:$0xff] %v9043_v0  ;;  %342 = vst [vmem:[#allocation2 + $0x2e0] sm:$0xff] %v9043_v0 }
  0x9c   : > { %343 = vst [vmem:[#allocation2 + $0x200] sm:$0xff] %v9043_v0  ;;  %344 = vst [vmem:[#allocation2 + $0x2f0] sm:$0xff] %v9043_v0 }
  0x9d   : > { %345 = vst [vmem:[#allocation2 + $0x8] sm:$0xff] %v9043_v0  ;;  %346 = vst [vmem:[#allocation2 + $0x268] sm:$0xff] %v9043_v0 }
  0x9e   : > { %347 = vst [vmem:[#allocation2 + $0x2c8] sm:$0xff] %v9043_v0  ;;  %348 = vst [vmem:[#allocation2 + $0x148] sm:$0xff] %v9043_v0 }
  0x9f   : > { %349 = vst [vmem:[#allocation2 + $0x68] sm:$0xff] %v9043_v0  ;;  %350 = vst [vmem:[#allocation2 + $0x188] sm:$0xff] %v9043_v0 }
  0xa0   : > { %351 = vst [vmem:[#allocation2 + $0x158] sm:$0xff] %v9043_v0  ;;  %352 = vst [vmem:[#allocation2 + $0x1a0] sm:$0xff] %v9043_v0 }
  0xa1   : > { %353 = vst [vmem:[#allocation2 + $0x90] sm:$0xff] %v9043_v0  ;;  %354 = vst [vmem:[#allocation2 + $0x118] sm:$0xff] %v9043_v0 }
  0xa2   : > { %355 = vst [vmem:[#allocation2 + $0x208] sm:$0xff] %v9043_v0  ;;  %356 = vst [vmem:[#allocation2 + $0xb8] sm:$0xff] %v9043_v0 }
  0xa3   : > { %357 = vst [vmem:[#allocation2 + $0x238] sm:$0xff] %v9043_v0  ;;  %358 = vst [vmem:[#allocation2 + $0x150] sm:$0xff] %v9043_v0 }
  0xa4   : > { %359 = vst [vmem:[#allocation2 + $0x248] sm:$0xff] %v9043_v0  ;;  %360 = vst [vmem:[#allocation2 + $0x2d0] sm:$0xff] %v9043_v0 }
  0xa5   : > { %361 = vst [vmem:[#allocation2 + $0x280] sm:$0xff] %v9043_v0  ;;  %362 = vst [vmem:[#allocation2 + $0x2a0] sm:$0xff] %v9043_v0 }
  0xa6   : > { %363 = vst [vmem:[#allocation2 + $0x110] sm:$0xff] %v9043_v0  ;;  %364 = vst [vmem:[#allocation2 + $0x58] sm:$0xff] %v9043_v0 }
  0xa7   : > { %365 = vst [vmem:[#allocation2 + $0x1f0] sm:$0xff] %v9043_v0  ;;  %366 = vst [vmem:[#allocation2 + $0x1c8] sm:$0xff] %v9043_v0 }
  0xa8   : > { %367 = vst [vmem:[#allocation2 + $0x2d8] sm:$0xff] %v9043_v0  ;;  %368 = vst [vmem:[#allocation2 + $0x1e0] sm:$0xff] %v9043_v0 }
  0xa9   : > { %369 = vst [vmem:[#allocation2 + $0x1d8] sm:$0xff] %v9043_v0  ;;  %370 = vst [vmem:[#allocation2 + $0xd8] sm:$0xff] %v9043_v0 }
  0xaa   : > { %371 = vst [vmem:[#allocation2 + $0x298] sm:$0xff] %v9043_v0  ;;  %372 = vst [vmem:[#allocation2 + $0x20] sm:$0xff] %v9043_v0 }
  0xab   : > { %373 = vst [vmem:[#allocation2 + $0xa8] sm:$0xff] %v9043_v0  ;;  %374 = vst [vmem:[#allocation2 + $0x38] sm:$0xff] %v9043_v0 }
  0xac   : > { %375 = vst [vmem:[#allocation2 + $0x178] sm:$0xff] %v9043_v0  ;;  %376 = vst [vmem:[#allocation2 + $0x50] sm:$0xff] %v9043_v0 }
  0xad   : > { %377 = vst [vmem:[#allocation2 + $0x120] sm:$0xff] %v9043_v0  ;;  %378 = vst [vmem:[#allocation2 + $0xc8] sm:$0xff] %v9043_v0 }
  0xae   : > { %379 = vst [vmem:[#allocation2 + $0x1e8] sm:$0xff] %v9043_v0  ;;  %380 = vst [vmem:[#allocation2 + $0x2f8] sm:$0xff] %v9043_v0 }
  0xaf   : > { %381 = vst [vmem:[#allocation2 + $0x270] sm:$0xff] %v9043_v0  ;;  %382 = vst [vmem:[#allocation2 + $0x278] sm:$0xff] %v9043_v0 }
  0xb0   : > { %383 = vst [vmem:[#allocation2 + $0x140] sm:$0xff] %v9043_v0  ;;  %384 = vst [vmem:[#allocation2 + $0x128] sm:$0xff] %v9043_v0 }
  0xb1   : > { %385 = vst [vmem:[#allocation2 + $0x60] sm:$0xff] %v9043_v0  ;;  %386 = vst [vmem:[#allocation2 + $0x1a8] sm:$0xff] %v9043_v0 }
  0xb2   : > { %387 = vst [vmem:[#allocation2 + $0x168] sm:$0xff] %v9043_v0  ;;  %388 = vst [vmem:[#allocation2 + $0x218] sm:$0xff] %v9043_v0 }
  0xb3 PF: > { %v8614_v1 = vld [vmem:[%s9308_s28 + $0x74] ss:$8 sps:$4 sm:$0xff]   ;;  %v8616_v2 = vld [vmem:[%s9308_s28 + $0x70] ss:$8 sps:$4 sm:$0xff]   ;;  %v9044_v3 = vmov 0   ;;  %s14771_s27 = sld [smem:[#allocation17_spill]] }
  0xb4   : > { %1581 = vmatprep.mubr.bf16.mxu1 %v9044_v3  ;;  %1268 = vmatprep.subr.bf16.mxu0 %v8614_v1  ;;  %v8617_v4 = vld [vmem:[%s9308_s28 + $0x64] ss:$8 sps:$4 sm:$0xff]   ;;  %v8619_v5 = vld [vmem:[%s9308_s28 + $0x60] ss:$8 sps:$4 sm:$0xff]   ;;  %v8620_v6 = vld [vmem:[%s9308_s28 + $0x54] ss:$8 sps:$4 sm:$0xff]  }
  0xb5   : > { %1269 = vmatpush1.bf16.msra.mxu0 %v8616_v2  ;;  %v8622_v7 = vld [vmem:[%s9308_s28 + $0x50] ss:$8 sps:$4 sm:$0xff]   ;;  %v8623_v8 = vld [vmem:[%s9308_s28 + $0x44] ss:$8 sps:$4 sm:$0xff]   ;;  %v8635_v9 = vld [vmem:[%s9308_s28 + $0x174] ss:$8 sps:$4 sm:$0xff]  }
  0xb6   : > { %1270 = vmatprep.subr.bf16.mxu0 %v8617_v4  ;;  %v8637_v10 = vld [vmem:[%s9308_s28 + $0x170] ss:$8 sps:$4 sm:$0xff]   ;;  %v8625_v11 = vld [vmem:[%s9308_s28 + $0x40] ss:$8 sps:$4 sm:$0xff]   ;;  %v8626_v12 = vld [vmem:[%s9308_s28 + $0x34] ss:$8 sps:$4 sm:$0xff]   ;;  %1549 = vmatprep.subr.bf16.mxu1 %v8635_v9 }
  0xb7   : > { %v8641_v13 = vld [vmem:[%s9308_s28 + $0x164] ss:$8 sps:$4 sm:$0xff]   ;;  %1550 = vmatpush1.bf16.msra.mxu1 %v8637_v10  ;;  %v8643_v14 = vld [vmem:[%s9308_s28 + $0x160] ss:$8 sps:$4 sm:$0xff]   ;;  %v8628_v15 = vld [vmem:[%s9308_s28 + $0x30] ss:$8 sps:$4 sm:$0xff]  }
  0xb8   : > { %1551 = vmatprep.subr.bf16.mxu1 %v8641_v13  ;;  %v8647_v16 = vld [vmem:[%s9308_s28 + $0x154] ss:$8 sps:$4 sm:$0xff]   ;;  %v8629_v17 = vld [vmem:[%s9308_s28 + $0x24] ss:$8 sps:$4 sm:$0xff]   ;;  %v8649_v18 = vld [vmem:[%s9308_s28 + $0x150] ss:$8 sps:$4 sm:$0xff]  }
  0xb9   : > { %1271 = vmatpush1.bf16.msra.mxu0 %v8619_v5  ;;  %v8653_v19 = vld [vmem:[%s9308_s28 + $0x144] ss:$8 sps:$4 sm:$0xff]   ;;  %v8631_v20 = vld [vmem:[%s9308_s28 + $0x20] ss:$8 sps:$4 sm:$0xff]   ;;  %v8632_v21 = vld [vmem:[%s9308_s28 + $0x14] ss:$8 sps:$4 sm:$0xff]  }
  0xba   : > { %1272 = vmatprep.subr.bf16.mxu0 %v8620_v6  ;;  %v8655_v22 = vld [vmem:[%s9308_s28 + $0x140] ss:$8 sps:$4 sm:$0xff]   ;;  %v8659_v23 = vld [vmem:[%s9308_s28 + $0x134] ss:$8 sps:$4 sm:$0xff]   ;;  %v8634_v24 = vld [vmem:[%s9308_s28 + $0x10] ss:$8 sps:$4 sm:$0xff]  }
  0xbb   : > { %1552 = vmatpush1.bf16.msra.mxu1 %v8643_v14  ;;  %v8638_v25 = vld [vmem:[%s9308_s28 + $0x4] ss:$8 sps:$4 sm:$0xff]   ;;  %v8661_v26 = vld [vmem:[%s9308_s28 + $0x130] ss:$8 sps:$4 sm:$0xff]   ;;  %v8640_v28 = vld [vmem:[%s9308_s28] ss:$8 sps:$4 sm:$0xff]  }
  0xbc   : > { %1553 = vmatprep.subr.bf16.mxu1 %v8647_v16  ;;  %v8665_v27 = vld [vmem:[%s9308_s28 + $0x124] ss:$8 sps:$4 sm:$0xff]   ;;  %v8644_v29 = vld [vmem:[%s9308_s28 + $0xf4] ss:$8 sps:$4 sm:$0xff]   ;;  %v8667_v30 = vld [vmem:[%s9308_s28 + $0x120] ss:$8 sps:$4 sm:$0xff]  }
  0xbd   : > { %1273 = vmatpush1.bf16.msra.mxu0 %v8622_v7  ;;  %v8671_v31 = vld [vmem:[%s9308_s28 + $0x114] ss:$8 sps:$4 sm:$0xff]   ;;  %v8646_v32 = vld [vmem:[%s9308_s28 + $0xf0] ss:$8 sps:$4 sm:$0xff]   ;;  %v8650_v33 = vld [vmem:[%s9308_s28 + $0xe4] ss:$8 sps:$4 sm:$0xff]  }
  0xbe   : > { %1274 = vmatprep.subr.bf16.mxu0 %v8623_v8  ;;  %v8673_v34 = vld [vmem:[%s9308_s28 + $0x110] ss:$8 sps:$4 sm:$0xff]   ;;  %v8677_v35 = vld [vmem:[%s9308_s28 + $0x104] ss:$8 sps:$4 sm:$0xff]   ;;  %v8652_v37 = vld [vmem:[%s9308_s28 + $0xe0] ss:$8 sps:$4 sm:$0xff]  }
  0xbf   : > { %1554 = vmatpush1.bf16.msra.mxu1 %v8649_v18  ;;  %v8689_v36 = vld [vmem:[%s9300_s21 + $0x4] ss:$12 sps:$4 sm:$0xff]   ;;  %v8656_v38 = vld [vmem:[%s9308_s28 + $0xd4] ss:$8 sps:$4 sm:$0xff]   ;;  %v8679_v39 = vld [vmem:[%s9308_s28 + $0x100] ss:$8 sps:$4 sm:$0xff]  }
  0xc0   : > { %1555 = vmatprep.subr.bf16.mxu1 %v8653_v19  ;;  %1300 = vmatprep.mubr.bf16.mxu0 %v8689_v36  ;;  %v8658_v40 = vld [vmem:[%s9308_s28 + $0xd0] ss:$8 sps:$4 sm:$0xff]   ;;  %v8662_v41 = vld [vmem:[%s9308_s28 + $0xc4] ss:$8 sps:$4 sm:$0xff]   ;;  %v8664_v43 = vld [vmem:[%s9308_s28 + $0xc0] ss:$8 sps:$4 sm:$0xff]  }
  0xc1   : > { %1275 = vmatpush1.bf16.msra.mxu0 %v8625_v11  ;;  %v8683_v42 = vld [vmem:[%s9300_s21 + $0x8] ss:$12 sps:$4 sm:$0xff]   ;;  %v8674_v46 = vld [vmem:[%s9308_s28 + $0xa4] ss:$8 sps:$4 sm:$0xff]   ;;  %v8690_v47 = vld [vmem:[%s9300_s21 + $0x20] ss:$12 sps:$4 sm:$0xff]  }
  0xc2   : > { %1276 = vmatprep.subr.bf16.mxu0 %v8626_v12  ;;  %v8668_v44 = vld [vmem:[%s9308_s28 + $0xb4] ss:$8 sps:$4 sm:$0xff]   ;;  %v8670_v45 = vld [vmem:[%s9308_s28 + $0xb0] ss:$8 sps:$4 sm:$0xff]   ;;  %v8676_v48 = vld [vmem:[%s9308_s28 + $0xa0] ss:$8 sps:$4 sm:$0xff]  }
  0xc3   : > { %1556 = vmatpush1.bf16.msra.mxu1 %v8655_v22  ;;  %v8680_v49 = vld [vmem:[%s9308_s28 + $0x94] ss:$8 sps:$4 sm:$0xff]   ;;  %v8682_v50 = vld [vmem:[%s9308_s28 + $0x90] ss:$8 sps:$4 sm:$0xff]   ;;  %v8684_v51 = vld [vmem:[%s9308_s28 + $0x84] ss:$8 sps:$4 sm:$0xff]  }
  0xc4   : > { %1557 = vmatprep.subr.bf16.mxu1 %v8659_v23  ;;  %v8694_v52 = vld [vmem:[%s9300_s21 + $0x38] ss:$12 sps:$4 sm:$0xff]   ;;  %v8687_v54 = vld [vmem:[%s9300_s21] ss:$12 sps:$4 sm:$0xff]   ;;  %v8691_v55 = vld [vmem:[%s9300_s21 + $0x1c] ss:$12 sps:$4 sm:$0xff]  }
  0xc5   : > { %1277 = vmatpush1.bf16.msra.mxu0 %v8628_v15  ;;  %v8686_v53 = vld [vmem:[%s9308_s28 + $0x80] ss:$8 sps:$4 sm:$0xff]   ;;  %v8698_v56 = vld [vmem:[%s9300_s21 + $0x50] ss:$12 sps:$4 sm:$0xff]   ;;  %p8454_p3 = scmp.ne.s32.totalorder %s14771_s27, 2 }
  0xc6   : > { %1278 = vmatprep.subr.bf16.mxu0 %v8629_v17  ;;  %v8693_v57 = vld [vmem:[%s9300_s21 + $0x18] ss:$12 sps:$4 sm:$0xff]   ;;  %v8695_v58 = vld [vmem:[%s9300_s21 + $0x34] ss:$12 sps:$4 sm:$0xff]   ;;  %v8697_v60 = vld [vmem:[%s9300_s21 + $0x30] ss:$12 sps:$4 sm:$0xff]  }
  0xc7   : > { %1558 = vmatpush1.bf16.msra.mxu1 %v8661_v26  ;;  %v8702_v59 = vld [vmem:[%s9300_s21 + $0x68] ss:$12 sps:$4 sm:$0xff]   ;;  %v8699_v61 = vld [vmem:[%s9300_s21 + $0x4c] ss:$12 sps:$4 sm:$0xff]   ;;  %v8703_v0 = vld [vmem:[%s9300_s21 + $0x64] ss:$12 sps:$4 sm:$0xff]  }
  0xc8   : > { %1559 = vmatprep.subr.bf16.mxu1 %v8665_v27  ;;  %v8706_v62 = vld [vmem:[%s9300_s21 + $0x80] ss:$12 sps:$4 sm:$0xff]   ;;  %v8701_v63 = vld [vmem:[%s9300_s21 + $0x48] ss:$12 sps:$4 sm:$0xff]   ;;  %v8710_v1 = vld [vmem:[%s9300_s21 + $0x98] ss:$12 sps:$4 sm:$0xff]  }
  0xc9   : > { %1279 = vmatpush1.bf16.msra.mxu0 %v8631_v20  ;;  %v8705_v2 = vld [vmem:[%s9300_s21 + $0x60] ss:$12 sps:$4 sm:$0xff]   ;;  %v8707_v4 = vld [vmem:[%s9300_s21 + $0x7c] ss:$12 sps:$4 sm:$0xff]   ;;  %v8709_v6 = vld [vmem:[%s9300_s21 + $0x78] ss:$12 sps:$4 sm:$0xff]  }
  0xca   : > { %1280 = vmatprep.subr.bf16.mxu0 %v8632_v21  ;;  %v8714_v5 = vld [vmem:[%s9300_s21 + $0xb0] ss:$12 sps:$4 sm:$0xff]   ;;  %v8711_v7 = vld [vmem:[%s9300_s21 + $0x94] ss:$12 sps:$4 sm:$0xff]   ;;  %v8715_v10 = vld [vmem:[%s9300_s21 + $0xac] ss:$12 sps:$4 sm:$0xff]  }
  0xcb   : > { %1560 = vmatpush1.bf16.msra.mxu1 %v8667_v30  ;;  %v8718_v8 = vld [vmem:[%s9300_s21 + $0xc8] ss:$12 sps:$4 sm:$0xff]   ;;  %v8713_v9 = vld [vmem:[%s9300_s21 + $0x90] ss:$12 sps:$4 sm:$0xff]   ;;  %v8722_v11 = vld [vmem:[%s9300_s21 + $0xe0] ss:$12 sps:$4 sm:$0xff]  }
  0xcc   : > { %1561 = vmatprep.subr.bf16.mxu1 %v8671_v31  ;;  %v8717_v12 = vld [vmem:[%s9300_s21 + $0xa8] ss:$12 sps:$4 sm:$0xff]   ;;  %v8719_v13 = vld [vmem:[%s9300_s21 + $0xc4] ss:$12 sps:$4 sm:$0xff]   ;;  %v8721_v15 = vld [vmem:[%s9300_s21 + $0xc0] ss:$12 sps:$4 sm:$0xff]  }
  0xcd   : > { %1281 = vmatpush1.bf16.msra.mxu0 %v8634_v24  ;;  %v8726_v14 = vld [vmem:[%s9300_s21 + $0xf8] ss:$12 sps:$4 sm:$0xff]   ;;  %v8723_v16 = vld [vmem:[%s9300_s21 + $0xdc] ss:$12 sps:$4 sm:$0xff]   ;;  %v8727_v19 = vld [vmem:[%s9300_s21 + $0xf4] ss:$12 sps:$4 sm:$0xff]  }
  0xce   : > { %1282 = vmatprep.subr.bf16.mxu0 %v8638_v25  ;;  %v8730_v17 = vld [vmem:[%s9300_s21 + $0x110] ss:$12 sps:$4 sm:$0xff]   ;;  %v8725_v18 = vld [vmem:[%s9300_s21 + $0xd8] ss:$12 sps:$4 sm:$0xff]   ;;  %v8734_v20 = vld [vmem:[%s9300_s21 + $0x128] ss:$12 sps:$4 sm:$0xff]  }
  0xcf   : > { %1562 = vmatpush1.bf16.msra.mxu1 %v8673_v34  ;;  %v8729_v21 = vld [vmem:[%s9300_s21 + $0xf0] ss:$12 sps:$4 sm:$0xff]   ;;  %v8731_v22 = vld [vmem:[%s9300_s21 + $0x10c] ss:$12 sps:$4 sm:$0xff]   ;;  %v8733_v24 = vld [vmem:[%s9300_s21 + $0x108] ss:$12 sps:$4 sm:$0xff]  }
  0xd0   : > { %1563 = vmatprep.subr.bf16.mxu1 %v8677_v35  ;;  %v8738_v23 = vld [vmem:[%s9300_s21 + $0x140] ss:$12 sps:$4 sm:$0xff]   ;;  %v8735_v25 = vld [vmem:[%s9300_s21 + $0x124] ss:$12 sps:$4 sm:$0xff]   ;;  %v8749_v36 = vld [vmem:[%s9300_s21 + $0x168] ss:$12 sps:$4 sm:$0xff]  }
  0xd1   : > { %1283 = vmatpush1.bf16.msra.mxu0 %v8640_v28  ;;  %v8742_v26 = vld [vmem:[%s9300_s21 + $0x158] ss:$12 sps:$4 sm:$0xff]   ;;  %v8737_v27 = vld [vmem:[%s9300_s21 + $0x120] ss:$12 sps:$4 sm:$0xff]   ;;  %v8739_v28 = vld [vmem:[%s9300_s21 + $0x13c] ss:$12 sps:$4 sm:$0xff]  }
  0xd2   : > { %1284 = vmatprep.subr.bf16.mxu0 %v8644_v29  ;;  %v8746_v29 = vld [vmem:[%s9300_s21 + $0x170] ss:$12 sps:$4 sm:$0xff]   ;;  %v8741_v30 = vld [vmem:[%s9300_s21 + $0x138] ss:$12 sps:$4 sm:$0xff]   ;;  %v8743_v31 = vld [vmem:[%s9300_s21 + $0x154] ss:$12 sps:$4 sm:$0xff]  }
  0xd3   : > { %1564 = vmatpush1.bf16.msra.mxu1 %v8679_v39  ;;  %v8747_v34 = vld [vmem:[%s9300_s21 + $0x16c] ss:$12 sps:$4 sm:$0xff]  }
  0xd4   : > { %v8754_v35 = vld [vmem:[%s9300_s21 + $0x1a0] ss:$12 sps:$4 sm:$0xff]  }
  0xd5   : > { %1285 = vmatpush2.bf16.msra.mxu0 %v8646_v32  ;;  %v8750_v32 = vld [vmem:[%s9300_s21 + $0x188] ss:$12 sps:$4 sm:$0xff]   ;;  %v8753_v39 = vld [vmem:[%s9300_s21 + $0x180] ss:$12 sps:$4 sm:$0xff]  }
  0xd6   : > { %1286 = vmatprep.subr.bf16.mxu0 %v8650_v33  ;;  %1582 = vmatmul.mubr.bf16.vlgmr.msra.gmra.mxu1 %v8683_v42  ;;  %v8745_v33 = vld [vmem:[%s9300_s21 + $0x150] ss:$12 sps:$4 sm:$0xff]   ;;  %v8757_v42 = vld [vmem:[%s9300_s21 + $0x198] ss:$12 sps:$4 sm:$0xff]  }
  0xd7   : > { %1591 = vmatprep.mubr.bf16.mxu1 %v9044_v3 }
  0xd9   : > { %1287 = vmatpush2.bf16.msra.mxu0 %v8652_v37  ;;  %v8751_v37 = vld [vmem:[%s9300_s21 + $0x184] ss:$12 sps:$4 sm:$0xff]  }
  0xda   : > { %1288 = vmatprep.subr.bf16.mxu0 %v8656_v38  ;;  %v8758_v38 = vld [vmem:[%s9300_s21 + $0x1b8] ss:$12 sps:$4 sm:$0xff]  }
  0xdd   : > { %1289 = vmatpush2.bf16.msra.mxu0 %v8658_v40  ;;  %v8755_v40 = vld [vmem:[%s9300_s21 + $0x19c] ss:$12 sps:$4 sm:$0xff]  }
  0xde   : > { %1290 = vmatprep.subr.bf16.mxu0 %v8662_v41  ;;  %1592 = vmatmul.mubr.bf16.gmra.mxu1 %v8690_v47  ;;  %v8762_v41 = vld [vmem:[%s9300_s21 + $0x1d0] ss:$12 sps:$4 sm:$0xff]   ;;  %v8770_v47 = vld [vmem:[%s9300_s21 + $0x200] ss:$12 sps:$4 sm:$0xff]  }
  0xdf   : > { %1601 = vmatprep.mubr.bf16.mxu1 %v9044_v3 }
  0xe1   : > { %1291 = vmatpush2.bf16.msra.mxu0 %v8664_v43  ;;  %v8759_v43 = vld [vmem:[%s9300_s21 + $0x1b4] ss:$12 sps:$4 sm:$0xff]  }
  0xe2   : > { %1292 = vmatprep.subr.bf16.mxu0 %v8668_v44  ;;  %v8766_v44 = vld [vmem:[%s9300_s21 + $0x1e8] ss:$12 sps:$4 sm:$0xff]  }
  0xe5   : > { %1293 = vmatpush2.bf16.msra.mxu0 %v8670_v45  ;;  %v8761_v45 = vld [vmem:[%s9300_s21 + $0x1b0] ss:$12 sps:$4 sm:$0xff]  }
  0xe6   : > { %1294 = vmatprep.subr.bf16.mxu0 %v8674_v46  ;;  %1602 = vmatmul.mubr.bf16.gmra.mxu1 %v8694_v52  ;;  %v8763_v46 = vld [vmem:[%s9300_s21 + $0x1cc] ss:$12 sps:$4 sm:$0xff]   ;;  %v8771_v52 = vld [vmem:[%s9300_s21 + $0x1fc] ss:$12 sps:$4 sm:$0xff]  }
  0xe7   : > { %1611 = vmatprep.mubr.bf16.mxu1 %v9044_v3 }
  0xe9   : > { %1295 = vmatpush2.bf16.msra.mxu0 %v8676_v48  ;;  %v8765_v48 = vld [vmem:[%s9300_s21 + $0x1c8] ss:$12 sps:$4 sm:$0xff]  }
  0xea   : > { %1296 = vmatprep.subr.bf16.mxu0 %v8680_v49  ;;  %v8767_v49 = vld [vmem:[%s9300_s21 + $0x1e4] ss:$12 sps:$4 sm:$0xff]  }
  0xed   : > { %1297 = vmatpush2.bf16.msra.mxu0 %v8682_v50  ;;  %v8774_v50 = vld [vmem:[%s9300_s21 + $0x218] ss:$12 sps:$4 sm:$0xff]  }
  0xee   : > { %1298 = vmatprep.subr.bf16.mxu0 %v8684_v51  ;;  %1612 = vmatmul.mubr.bf16.gmra.mxu1 %v8698_v56  ;;  %v8769_v51 = vld [vmem:[%s9300_s21 + $0x1e0] ss:$12 sps:$4 sm:$0xff]   ;;  %v8782_v56 = vld [vmem:[%s9300_s21 + $0x248] ss:$0 sps:$4 sm:$0xff]  }
  0xef   : > { %1621 = vmatprep.mubr.bf16.mxu1 %v9044_v3 }
  0xf1   : > { %1299 = vmatpush2.bf16.msra.mxu0 %v8686_v53  ;;  %v8778_v53 = vld [vmem:[%s9300_s21 + $0x230] ss:$12 sps:$4 sm:$0xff]  }
  0xf4   : > { %1301 = vmatmul.mubr.bf16.vlgmr.msra.gmra.mxu0 %v8687_v54  ;;  %v8773_v54 = vld [vmem:[%s9300_s21 + $0x1f8] ss:$12 sps:$4 sm:$0xff]  }
  0xf5   : > { %1310 = vmatprep.mubr.bf16.mxu0 %v8691_v55  ;;  %v8775_v55 = vld [vmem:[%s9300_s21 + $0x214] ss:$12 sps:$4 sm:$0xff]  }
  0xf6   : > { %1622 = vmatmul.mubr.bf16.gmra.mxu1 %v8702_v59 }
  0xf7   : > { %1631 = vmatprep.mubr.bf16.mxu1 %v9044_v3 }
  0xfc   : > { %1311 = vmatmul.mubr.bf16.gmra.mxu0 %v8693_v57 }
  0xfd   : > { %1320 = vmatprep.mubr.bf16.mxu0 %v8695_v58  ;;  %v8777_v58 = vld [vmem:[%s9300_s21 + $0x210] ss:$12 sps:$4 sm:$0xff]  }
  0xfe   : > { %1632 = vmatmul.mubr.bf16.gmra.mxu1 %v8706_v62 }
  0xff   : > { %1641 = vmatprep.mubr.bf16.mxu1 %v9044_v3 }
 0x104   : > { %1321 = vmatmul.mubr.bf16.gmra.mxu0 %v8697_v60  ;;  %v8779_v60 = vld [vmem:[%s9300_s21 + $0x22c] ss:$12 sps:$4 sm:$0xff]  }
 0x105   : > { %1330 = vmatprep.mubr.bf16.mxu0 %v8699_v61 }
 0x106   : > { %1642 = vmatmul.mubr.bf16.gmra.mxu1 %v8710_v1  ;;  %v8781_v1 = vld [vmem:[%s9300_s21 + $0x228] ss:$12 sps:$4 sm:$0xff]  }
 0x107   : > { %1651 = vmatprep.mubr.bf16.mxu1 %v9044_v3 }
 0x10c   : > { %1331 = vmatmul.mubr.bf16.gmra.mxu0 %v8701_v63  ;;  %v583_v63 = vld [vmem:[%s9300_s21 + $0x240] sm:$0xff] }
 0x10d   : > { %1340 = vmatprep.mubr.bf16.mxu0 %v8703_v0 }
 0x10e   : > { %1652 = vmatmul.mubr.bf16.gmra.mxu1 %v8714_v5 }
 0x10f   : > { %1661 = vmatprep.mubr.bf16.mxu1 %v9044_v3 }
 0x114   : > { %1341 = vmatmul.mubr.bf16.gmra.mxu0 %v8705_v2 }
 0x115   : > { %1350 = vmatprep.mubr.bf16.mxu0 %v8707_v4 }
 0x116   : > { %1662 = vmatmul.mubr.bf16.gmra.mxu1 %v8718_v8 }
 0x117   : > { %1671 = vmatprep.mubr.bf16.mxu1 %v9044_v3 }
 0x11c   : > { %1351 = vmatmul.mubr.bf16.gmra.mxu0 %v8709_v6 }
 0x11d   : > { %1360 = vmatprep.mubr.bf16.mxu0 %v8711_v7  ;;  %v8403_v7 = vcombine.low %v583_v63, %v583_v63 }
 0x11e   : > { %1672 = vmatmul.mubr.bf16.gmra.mxu1 %v8722_v11 }
 0x11f   : > { %1681 = vmatprep.mubr.bf16.mxu1 %v9044_v3 }
 0x124   : > { %1361 = vmatmul.mubr.bf16.gmra.mxu0 %v8713_v9 }
 0x125   : > { %1370 = vmatprep.mubr.bf16.mxu0 %v8715_v10  ;;  %v389_v10 = vld [vmem:[#allocation2 + $0x2b0] sm:$0xff] }
 0x126   : > { %1682 = vmatmul.mubr.bf16.gmra.mxu1 %v8726_v14  ;;  %v390_v14 = vld [vmem:[#allocation2 + $0xd0] sm:$0xff] }
 0x127   : > { %1691 = vmatprep.mubr.bf16.mxu1 %v9044_v3 }
 0x12c   : > { %1371 = vmatmul.mubr.bf16.gmra.mxu0 %v8717_v12 }
 0x12d   : > { %1380 = vmatprep.mubr.bf16.mxu0 %v8719_v13 }
 0x12e   : > { %1692 = vmatmul.mubr.bf16.gmra.mxu1 %v8730_v17 }
 0x12f   : > { %1701 = vmatprep.mubr.bf16.mxu1 %v9044_v3 }
 0x134   : > { %1381 = vmatmul.mubr.bf16.gmra.mxu0 %v8721_v15 }
 0x135   : > { %1390 = vmatprep.mubr.bf16.mxu0 %v8723_v16 }
 0x136   : > { %1702 = vmatmul.mubr.bf16.gmra.mxu1 %v8734_v20 }
 0x137   : > { %1711 = vmatprep.mubr.bf16.mxu1 %v9044_v3 }
 0x13c   : > { %1391 = vmatmul.mubr.bf16.gmra.mxu0 %v8725_v18 }
 0x13d   : > { %1400 = vmatprep.mubr.bf16.mxu0 %v8727_v19  ;;  %v391_v19 = vld [vmem:[#allocation2 + $0x10] sm:$0xff] }
 0x13e   : > { %1712 = vmatmul.mubr.bf16.gmra.mxu1 %v8738_v23 }
 0x13f   : > { %1721 = vmatprep.mubr.bf16.mxu1 %v9044_v3 }
 0x144   : > { %1401 = vmatmul.mubr.bf16.gmra.mxu0 %v8729_v21 }
 0x145   : > { %1410 = vmatprep.mubr.bf16.mxu0 %v8731_v22 }
 0x146   : > { %1722 = vmatmul.mubr.bf16.gmra.mxu1 %v8742_v26 }
 0x147   : > { %1731 = vmatprep.mubr.bf16.mxu1 %v9044_v3 }
 0x14c   : > { %1411 = vmatmul.mubr.bf16.gmra.mxu0 %v8733_v24  ;;  %v392_v24 = vld [vmem:[#allocation2 + $0x48] sm:$0xff] }
 0x14d   : > { %1420 = vmatprep.mubr.bf16.mxu0 %v8735_v25 }
 0x14e   : > { %1732 = vmatmul.mubr.bf16.gmra.mxu1 %v8746_v29  ;;  %v393_v29 = vld [vmem:[#allocation2 + $0x30] sm:$0xff] }
 0x14f   : > { %1741 = vmatprep.mubr.bf16.mxu1 %v9044_v3 }
 0x154   : > { %1421 = vmatmul.mubr.bf16.gmra.mxu0 %v8737_v27 }
 0x155   : > { %1430 = vmatprep.mubr.bf16.mxu0 %v8739_v28 }
 0x156   : > { %1742 = vmatmul.mubr.bf16.gmra.mxu1 %v8750_v32 }
 0x157   : > { %1751 = vmatprep.mubr.bf16.mxu1 %v9044_v3 }
 0x15c   : > { %1431 = vmatmul.mubr.bf16.gmra.mxu0 %v8741_v30 }
 0x15d   : > { %1440 = vmatprep.mubr.bf16.mxu0 %v8743_v31 }
 0x15e   : > { %1752 = vmatmul.mubr.bf16.gmra.mxu1 %v8754_v35 }
 0x15f   : > { %1761 = vmatprep.mubr.bf16.mxu1 %v9044_v3 }
 0x164   : > { %1441 = vmatmul.mubr.bf16.gmra.mxu0 %v8745_v33 }
 0x165   : > { %1450 = vmatprep.mubr.bf16.mxu0 %v8747_v34  ;;  %v394_v34 = vld [vmem:[#allocation2 + $0xf0] sm:$0xff] }
 0x166   : > { %1762 = vmatmul.mubr.bf16.gmra.mxu1 %v8758_v38 }
 0x167   : > { %1771 = vmatprep.mubr.bf16.mxu1 %v9044_v3 }
 0x16c   : > { %1451 = vmatmul.mubr.bf16.gmra.mxu0 %v8749_v36 }
 0x16d   : > { %1460 = vmatprep.mubr.bf16.mxu0 %v8751_v37 }
 0x16e   : > { %1772 = vmatmul.mubr.bf16.gmra.mxu1 %v8762_v41 }
 0x16f   : > { %1781 = vmatprep.mubr.bf16.mxu1 %v9044_v3 }
 0x174   : > { %1461 = vmatmul.mubr.bf16.gmra.mxu0 %v8753_v39  ;;  %v395_v39 = vld [vmem:[#allocation2 + $0xf8] sm:$0xff] }
 0x175   : > { %1470 = vmatprep.mubr.bf16.mxu0 %v8755_v40 }
 0x176   : > { %1782 = vmatmul.mubr.bf16.gmra.mxu1 %v8766_v44  ;;  %v396_v44 = vld [vmem:[#allocation2 + $0x78] sm:$0xff] }
 0x177   : > { %1791 = vmatprep.mubr.bf16.mxu1 %v9044_v3 }
 0x17c   : > { %1471 = vmatmul.mubr.bf16.gmra.mxu0 %v8757_v42 }
 0x17d   : > { %1480 = vmatprep.mubr.bf16.mxu0 %v8759_v43 }
 0x17e   : > { %1792 = vmatmul.mubr.bf16.gmra.mxu1 %v8770_v47 }
 0x17f   : > { %1801 = vmatprep.mubr.bf16.mxu1 %v9044_v3 }
 0x184   : > { %1481 = vmatmul.mubr.bf16.gmra.mxu0 %v8761_v45 }
 0x185   : > { %1490 = vmatprep.mubr.bf16.mxu0 %v8763_v46 }
 0x186   : > { %1802 = vmatmul.mubr.bf16.gmra.mxu1 %v8774_v50 }
 0x187   : > { %1811 = vmatprep.mubr.bf16.mxu1 %v9044_v3 }
 0x18c   : > { %1491 = vmatmul.mubr.bf16.gmra.mxu0 %v8765_v48 }
 0x18d   : > { %1500 = vmatprep.mubr.bf16.mxu0 %v8767_v49  ;;  %v397_v49 = vld [vmem:[#allocation2 + $0x300] sm:$0xff] }
 0x18e   : > { %1812 = vmatmul.mubr.bf16.gmra.mxu1 %v8778_v53 }
 0x18f   : > { %1821 = vmatprep.mubr.bf16.mxu1 %v9044_v3  ;;  %v8404_v3 = vcombine.high %v583_v63, %v583_v63 }
 0x194   : > { %1501 = vmatmul.mubr.bf16.gmra.mxu0 %v8769_v51 }
 0x195   : > { %1510 = vmatprep.mubr.bf16.mxu0 %v8771_v52 }
 0x196   : > { %v1583_v57 = vpop.f32.mrf.mxu1  ;;  %1822 = vmatmul.mubr.bf16.gmra.mxu1 %v8782_v56 }
 0x198   : > { %v1585_v59 = vpop.f32.mrf.mxu1 }
 0x19a   : > { %v1587_v61 = vpop.f32.mrf.mxu1 }
 0x19c   : > { %1511 = vmatmul.mubr.bf16.gmra.mxu0 %v8773_v54  ;;  %v1589_v62 = vpop.f32.mrf.mxu1  ;;  %v398_v54 = vld [vmem:[#allocation2 + $0x130] sm:$0xff] }
 0x19d   : > { %1520 = vmatprep.mubr.bf16.mxu0 %v8775_v55 }
 0x19e   : > { %v1593_v0 = vpop.f32.mrf.mxu1 }
 0x1a0   : > { %v1595_v2 = vpop.f32.mrf.mxu1 }
 0x1a2   : > { %v1597_v4 = vpop.f32.mrf.mxu1 }
 0x1a4   : > { %1521 = vmatmul.mubr.bf16.gmra.mxu0 %v8777_v58  ;;  %v1599_v5 = vpop.f32.mrf.mxu1 }
 0x1a5   : > { %1530 = vmatprep.mubr.bf16.mxu0 %v8779_v60 }
 0x1a6   : > { %v1603_v6 = vpop.f32.mrf.mxu1 }
 0x1a8   : > { %v1605_v8 = vpop.f32.mrf.mxu1 }
 0x1aa   : > { %v9573_v9 = vpop.f32.mrf.mxu1 }
 0x1ac   : > { %1531 = vmatmul.mubr.bf16.gmra.mxu0 %v8781_v1  ;;  %v9575_v12 = vpop.f32.mrf.mxu1 }
 0x1ad   : > { %1540 = vmatprep.mubr.bf16.mxu0 %v8404_v3 }
 0x1ae   : > { %v9577_v16 = vpop.f32.mrf.mxu1 }
 0x1b0   : > { %v9579_v21 = vpop.f32.mrf.mxu1 }
 0x1b2   : > { %v9581_v26 = vpop.f32.mrf.mxu1 }
 0x1b4   : > { %v1302_v11 = vpop.f32.mrf.mxu0  ;;  %1541 = vmatmul.mubr.bf16.gmra.mxu0 %v8403_v7  ;;  %v9583_v31 = vpop.f32.mrf.mxu1 }
 0x1b5   : > { %v1584_v13 = vadd.f32 %v1583_v57, %v1302_v11  ;;  %v402_v11 = vld [vmem:[#allocation2 + $0x2a8] sm:$0xff] }
 0x1b6   : > { %v1304_v15 = vpop.f32.mrf.mxu0  ;;  %v9585_v36 = vpop.f32.mrf.mxu1 }
 0x1b7   : > { %v1830_v17 = vadd.f32 %v1584_v13, %v389_v10  ;;  %v1586_v18 = vadd.f32 %v1585_v59, %v1304_v15  ;;  %v399_v59 = vld [vmem:[#allocation2 + $0xe8] sm:$0xff] }
 0x1b8   : > { %v1306_v20 = vpop.f32.mrf.mxu0  ;;  %v9587_v41 = vpop.f32.mrf.mxu1 }
 0x1b9   : > { %1928 = vst [vmem:[#allocation2 + $0x2b0] sm:$0xff] %v1830_v17  ;;  %v1831_v22 = vadd.f32 %v1586_v18, %v390_v14  ;;  %v1588_v23 = vadd.f32 %v1587_v61, %v1306_v20  ;;  %v403_v17 = vld [vmem:[#allocation2 + $0x170] sm:$0xff] }
 0x1ba   : > { %v1308_v25 = vpop.f32.mrf.mxu0  ;;  %v9589_v46 = vpop.f32.mrf.mxu1 }
 0x1bb   : > { %1929 = vst [vmem:[#allocation2 + $0xd0] sm:$0xff] %v1831_v22  ;;  %v1832_v27 = vadd.f32 %v1588_v23, %v391_v19  ;;  %v1590_v28 = vadd.f32 %v1589_v62, %v1308_v25  ;;  %v404_v22 = vld [vmem:[#allocation2 + $0x180] sm:$0xff] }
 0x1bc   : > { %v1312_v30 = vpop.f32.mrf.mxu0  ;;  %v9591_v51 = vpop.f32.mrf.mxu1 }
 0x1bd   : > { %1930 = vst [vmem:[#allocation2 + $0x10] sm:$0xff] %v1832_v27  ;;  %v1833_v32 = vadd.f32 %v1590_v28, %v392_v24  ;;  %v1594_v33 = vadd.f32 %v1593_v0, %v1312_v30  ;;  %v400_v0 = vld [vmem:[#allocation2 + $0x40] sm:$0xff]  ;;  %v405_v27 = vld [vmem:[#allocation2 + $0x18] sm:$0xff] }
 0x1be   : > { %v1314_v35 = vpop.f32.mrf.mxu0  ;;  %v9593_v56 = vpop.f32.mrf.mxu1 }
 0x1bf   : > { %1931 = vst [vmem:[#allocation2 + $0x48] sm:$0xff] %v1833_v32  ;;  %v1834_v37 = vadd.f32 %v1594_v33, %v393_v29  ;;  %v1596_v38 = vadd.f32 %v1595_v2, %v1314_v35  ;;  %v406_v32 = vld [vmem:[#allocation2 + $0x2b8] sm:$0xff] }
 0x1c0   : > { %v1316_v40 = vpop.f32.mrf.mxu0  ;;  %v9595_v61 = vpop.f32.mrf.mxu1 }
 0x1c1   : > { %1932 = vst [vmem:[#allocation2 + $0x30] sm:$0xff] %v1834_v37  ;;  %v1835_v42 = vadd.f32 %v1596_v38, %v394_v34  ;;  %v1598_v43 = vadd.f32 %v1597_v4, %v1316_v40  ;;  %v407_v37 = vld [vmem:[#allocation2 + $0x250] sm:$0xff] }
 0x1c2   : > { %v1318_v45 = vpop.f32.mrf.mxu0  ;;  %v9598_v2 = vpop.f32.mrf.mxu1 }
 0x1c3   : > { %1933 = vst [vmem:[#allocation2 + $0xf0] sm:$0xff] %v1835_v42  ;;  %v1836_v47 = vadd.f32 %v1598_v43, %v395_v39  ;;  %v1600_v48 = vadd.f32 %v1599_v5, %v1318_v45  ;;  %v401_v5 = vld [vmem:[#allocation2 + $0x2c0] sm:$0xff]  ;;  %v408_v42 = vld [vmem:[#allocation2 + $0x28] sm:$0xff] }
 0x1c4   : > { %v1322_v50 = vpop.f32.mrf.mxu0  ;;  %v9601_v7 = vpop.f32.mrf.mxu1 }
 0x1c5   : > { %1934 = vst [vmem:[#allocation2 + $0xf8] sm:$0xff] %v1836_v47  ;;  %v1837_v52 = vadd.f32 %v1600_v48, %v396_v44  ;;  %v1604_v53 = vadd.f32 %v1603_v6, %v1322_v50  ;;  %v409_v47 = vld [vmem:[#allocation2 + $0x70] sm:$0xff] }
 0x1c6   : > { %v1324_v55 = vpop.f32.mrf.mxu0  ;;  %v9604_v14 = vpop.f32.mrf.mxu1 }
 0x1c7   : > { %1935 = vst [vmem:[#allocation2 + $0x78] sm:$0xff] %v1837_v52  ;;  %v1838_v57 = vadd.f32 %v1604_v53, %v397_v49  ;;  %v1606_v58 = vadd.f32 %v1605_v8, %v1324_v55  ;;  %v410_v52 = vld [vmem:[#allocation2 + $0x230] sm:$0xff] }
 0x1c8   : > { %v1326_v60 = vpop.f32.mrf.mxu0  ;;  %v9607_v19 = vpop.f32.mrf.mxu1 }
 0x1c9   : > { %1936 = vst [vmem:[#allocation2 + $0x300] sm:$0xff] %v1838_v57  ;;  %v1839_v62 = vadd.f32 %v1606_v58, %v398_v54  ;;  %v1608_v63 = vadd.f32 %v9573_v9, %v1326_v60  ;;  %v411_v57 = vld [vmem:[#allocation2 + $0xb0] sm:$0xff] }
 0x1ca   : > { %v1328_v1 = vpop.f32.mrf.mxu0  ;;  %v9610_v24 = vpop.f32.mrf.mxu1 }
 0x1cb   : > { %1937 = vst [vmem:[#allocation2 + $0x130] sm:$0xff] %v1839_v62  ;;  %v1840_v3 = vadd.f32 %v1608_v63, %v399_v59  ;;  %v1610_v4 = vadd.f32 %v9575_v12, %v1328_v1  ;;  %v412_v62 = vld [vmem:[#allocation2 + $0x100] sm:$0xff] }
 0x1cc   : > { %v1332_v6 = vpop.f32.mrf.mxu0  ;;  %v9613_v29 = vpop.f32.mrf.mxu1 }
 0x1cd   : > { %1938 = vst [vmem:[#allocation2 + $0xe8] sm:$0xff] %v1840_v3  ;;  %v1841_v8 = vadd.f32 %v1610_v4, %v400_v0  ;;  %v1614_v10 = vadd.f32 %v9577_v16, %v1332_v6  ;;  %v413_v3 = vld [vmem:[#allocation2 + $0x1b8] sm:$0xff] }
 0x1ce   : > { %v1334_v13 = vpop.f32.mrf.mxu0  ;;  %v9616_v34 = vpop.f32.mrf.mxu1 }
 0x1cf   : > { %1939 = vst [vmem:[#allocation2 + $0x40] sm:$0xff] %v1841_v8  ;;  %v1842_v9 = vadd.f32 %v1614_v10, %v401_v5  ;;  %v1616_v15 = vadd.f32 %v9579_v21, %v1334_v13  ;;  %v414_v8 = vld [vmem:[#allocation2 + $0x228] sm:$0xff] }
 0x1d0   : > { %v1336_v18 = vpop.f32.mrf.mxu0  ;;  %v9619_v39 = vpop.f32.mrf.mxu1 }
 0x1d1   : > { %1940 = vst [vmem:[#allocation2 + $0x2c0] sm:$0xff] %v1842_v9  ;;  %v1843_v12 = vadd.f32 %v1616_v15, %v402_v11  ;;  %v1618_v20 = vadd.f32 %v9581_v26, %v1336_v18  ;;  %v415_v9 = vld [vmem:[#allocation2 + $0x260] sm:$0xff] }
 0x1d2   : > { %v1338_v23 = vpop.f32.mrf.mxu0  ;;  %v9622_v44 = vpop.f32.mrf.mxu1 }
 0x1d3   : > { %1941 = vst [vmem:[#allocation2 + $0x2a8] sm:$0xff] %v1843_v12  ;;  %v1844_v16 = vadd.f32 %v1618_v20, %v403_v17  ;;  %v1620_v25 = vadd.f32 %v9583_v31, %v1338_v23  ;;  %v416_v12 = vld [vmem:[#allocation2 + $0x240] sm:$0xff] }
 0x1d4   : > { %v1342_v28 = vpop.f32.mrf.mxu0  ;;  %v9625_v49 = vpop.f32.mrf.mxu1 }
 0x1d5   : > { %1942 = vst [vmem:[#allocation2 + $0x170] sm:$0xff] %v1844_v16  ;;  %v1845_v21 = vadd.f32 %v1620_v25, %v404_v22  ;;  %v1624_v30 = vadd.f32 %v9585_v36, %v1342_v28  ;;  %v417_v16 = vld [vmem:[#allocation2 + $0x138] sm:$0xff] }
 0x1d6   : > { %v1344_v33 = vpop.f32.mrf.mxu0  ;;  %v9628_v54 = vpop.f32.mrf.mxu1 }
 0x1d7   : > { %1943 = vst [vmem:[#allocation2 + $0x180] sm:$0xff] %v1845_v21  ;;  %v1846_v26 = vadd.f32 %v1624_v30, %v405_v27  ;;  %v1626_v35 = vadd.f32 %v9587_v41, %v1344_v33  ;;  %v418_v21 = vld [vmem:[#allocation2 + $0x160] sm:$0xff] }
 0x1d8   : > { %v1346_v38 = vpop.f32.mrf.mxu0  ;;  %v9631_v59 = vpop.f32.mrf.mxu1 }
 0x1d9   : > { %1944 = vst [vmem:[#allocation2 + $0x18] sm:$0xff] %v1846_v26  ;;  %v1847_v31 = vadd.f32 %v1626_v35, %v406_v32  ;;  %v1628_v40 = vadd.f32 %v9589_v46, %v1346_v38  ;;  %v419_v26 = vld [vmem:[#allocation2 + $0xa0] sm:$0xff] }
 0x1da   : > { %v1348_v43 = vpop.f32.mrf.mxu0  ;;  %v9634_v0 = vpop.f32.mrf.mxu1 }
 0x1db   : > { %1945 = vst [vmem:[#allocation2 + $0x2b8] sm:$0xff] %v1847_v31  ;;  %v1848_v36 = vadd.f32 %v1628_v40, %v407_v37  ;;  %v1630_v45 = vadd.f32 %v9591_v51, %v1348_v43  ;;  %v420_v31 = vld [vmem:[#allocation2 + $0x2e8] sm:$0xff] }
 0x1dc   : > { %v1352_v48 = vpop.f32.mrf.mxu0  ;;  %v9637_v5 = vpop.f32.mrf.mxu1 }
 0x1dd   : > { %1946 = vst [vmem:[#allocation2 + $0x250] sm:$0xff] %v1848_v36  ;;  %v1849_v41 = vadd.f32 %v1630_v45, %v408_v42  ;;  %v1634_v50 = vadd.f32 %v9593_v56, %v1352_v48  ;;  %v421_v36 = vld [vmem:[#allocation2 + $0x1b0] sm:$0xff] }
 0x1de   : > { %v1354_v53 = vpop.f32.mrf.mxu0  ;;  %v9640_v11 = vpop.f32.mrf.mxu1 }
 0x1df   : > { %1947 = vst [vmem:[#allocation2 + $0x28] sm:$0xff] %v1849_v41  ;;  %v1850_v46 = vadd.f32 %v1634_v50, %v409_v47  ;;  %v1636_v55 = vadd.f32 %v9595_v61, %v1354_v53  ;;  %v422_v41 = vld [vmem:[#allocation2 + $0x1c0] sm:$0xff] }
 0x1e0   : > { %v1356_v58 = vpop.f32.mrf.mxu0  ;;  %v9643_v17 = vpop.f32.mrf.mxu1 }
 0x1e1   : > { %1948 = vst [vmem:[#allocation2 + $0x70] sm:$0xff] %v1850_v46  ;;  %v1851_v51 = vadd.f32 %v1636_v55, %v410_v52  ;;  %v1638_v60 = vadd.f32 %v9598_v2, %v1356_v58  ;;  %v423_v46 = vld [vmem:[#allocation2 + $0x88] sm:$0xff] }
 0x1e2   : > { %v1358_v63 = vpop.f32.mrf.mxu0  ;;  %v9646_v22 = vpop.f32.mrf.mxu1 }
 0x1e3   : > { %1949 = vst [vmem:[#allocation2 + $0x230] sm:$0xff] %v1851_v51  ;;  %v1852_v56 = vadd.f32 %v1638_v60, %v411_v57  ;;  %v1640_v1 = vadd.f32 %v9601_v7, %v1358_v63  ;;  %v424_v51 = vld [vmem:[#allocation2 + $0x190] sm:$0xff] }
 0x1e4   : > { %v1362_v4 = vpop.f32.mrf.mxu0  ;;  %v9649_v27 = vpop.f32.mrf.mxu1 }
 0x1e5   : > { %1950 = vst [vmem:[#allocation2 + $0xb0] sm:$0xff] %v1852_v56  ;;  %v1853_v61 = vadd.f32 %v1640_v1, %v412_v62  ;;  %v1644_v6 = vadd.f32 %v9604_v14, %v1362_v4  ;;  %v425_v56 = vld [vmem:[#allocation2 + $0x210] sm:$0xff] }
 0x1e6   : > { %v1364_v10 = vpop.f32.mrf.mxu0  ;;  %v9652_v32 = vpop.f32.mrf.mxu1 }
 0x1e7   : > { %1951 = vst [vmem:[#allocation2 + $0x100] sm:$0xff] %v1853_v61  ;;  %v1854_v2 = vadd.f32 %v1644_v6, %v413_v3  ;;  %v1646_v13 = vadd.f32 %v9607_v19, %v1364_v10  ;;  %v426_v61 = vld [vmem:[#allocation2 + $0x80] sm:$0xff] }
 0x1e8   : > { %v1366_v15 = vpop.f32.mrf.mxu0  ;;  %v9655_v37 = vpop.f32.mrf.mxu1 }
 0x1e9   : > { %1952 = vst [vmem:[#allocation2 + $0x1b8] sm:$0xff] %v1854_v2  ;;  %v1855_v7 = vadd.f32 %v1646_v13, %v414_v8  ;;  %v1648_v18 = vadd.f32 %v9610_v24, %v1366_v15  ;;  %v427_v2 = vld [vmem:[#allocation2 + $0x198] sm:$0xff] }
 0x1ea   : > { %v1368_v20 = vpop.f32.mrf.mxu0  ;;  %v9658_v42 = vpop.f32.mrf.mxu1 }
 0x1eb   : > { %1953 = vst [vmem:[#allocation2 + $0x228] sm:$0xff] %v1855_v7  ;;  %v1856_v14 = vadd.f32 %v1648_v18, %v415_v9  ;;  %v1650_v23 = vadd.f32 %v9613_v29, %v1368_v20  ;;  %v428_v7 = vld [vmem:[#allocation2 + $0x220] sm:$0xff] }
 0x1ec   : > { %v1372_v25 = vpop.f32.mrf.mxu0  ;;  %v9661_v47 = vpop.f32.mrf.mxu1 }
 0x1ed   : > { %1954 = vst [vmem:[#allocation2 + $0x260] sm:$0xff] %v1856_v14  ;;  %v1857_v19 = vadd.f32 %v1650_v23, %v416_v12  ;;  %v1654_v28 = vadd.f32 %v9616_v34, %v1372_v25  ;;  %v429_v14 = vld [vmem:[#allocation2 + $0x258] sm:$0xff] }
 0x1ee   : > { %v1374_v30 = vpop.f32.mrf.mxu0  ;;  %v9664_v52 = vpop.f32.mrf.mxu1 }
 0x1ef   : > { %1955 = vst [vmem:[#allocation2 + $0x240] sm:$0xff] %v1857_v19  ;;  %v1858_v24 = vadd.f32 %v1654_v28, %v417_v16  ;;  %v1656_v33 = vadd.f32 %v9619_v39, %v1374_v30  ;;  %v430_v19 = vld [vmem:[#allocation2 + $0x1d0] sm:$0xff] }
 0x1f0   : > { %v1376_v35 = vpop.f32.mrf.mxu0  ;;  %v9667_v57 = vpop.f32.mrf.mxu1 }
 0x1f1   : > { %1956 = vst [vmem:[#allocation2 + $0x138] sm:$0xff] %v1858_v24  ;;  %v1859_v29 = vadd.f32 %v1656_v33, %v418_v21  ;;  %v1658_v38 = vadd.f32 %v9622_v44, %v1376_v35  ;;  %v431_v24 = vld [vmem:[#allocation2 + $0x288] sm:$0xff] }
 0x1f2   : > { %v1378_v40 = vpop.f32.mrf.mxu0  ;;  %v9670_v62 = vpop.f32.mrf.mxu1 }
 0x1f3   : > { %1957 = vst [vmem:[#allocation2 + $0x160] sm:$0xff] %v1859_v29  ;;  %v1860_v34 = vadd.f32 %v1658_v38, %v419_v26  ;;  %v1660_v43 = vadd.f32 %v9625_v49, %v1378_v40  ;;  %v432_v29 = vld [vmem:[#allocation2 + $0x108] sm:$0xff] }
 0x1f4   : > { %v1382_v45 = vpop.f32.mrf.mxu0  ;;  %v9673_v3 = vpop.f32.mrf.mxu1 }
 0x1f5   : > { %1958 = vst [vmem:[#allocation2 + $0xa0] sm:$0xff] %v1860_v34  ;;  %v1861_v39 = vadd.f32 %v1660_v43, %v420_v31  ;;  %v1664_v48 = vadd.f32 %v9628_v54, %v1382_v45  ;;  %v433_v34 = vld [vmem:[#allocation2 + $0xc0] sm:$0xff] }
 0x1f6   : > { %v1384_v50 = vpop.f32.mrf.mxu0  ;;  %v9676_v8 = vpop.f32.mrf.mxu1 }
 0x1f7   : > { %1959 = vst [vmem:[#allocation2 + $0x2e8] sm:$0xff] %v1861_v39  ;;  %v1862_v44 = vadd.f32 %v1664_v48, %v421_v36  ;;  %v1666_v53 = vadd.f32 %v9631_v59, %v1384_v50  ;;  %v434_v39 = vld [vmem:[#allocation2 + $0x290] sm:$0xff] }
 0x1f8   : > { %v1386_v55 = vpop.f32.mrf.mxu0  ;;  %v9679_v9 = vpop.f32.mrf.mxu1 }
 0x1f9   : > { %1960 = vst [vmem:[#allocation2 + $0x1b0] sm:$0xff] %v1862_v44  ;;  %v1863_v49 = vadd.f32 %v1666_v53, %v422_v41  ;;  %v1668_v58 = vadd.f32 %v9634_v0, %v1386_v55  ;;  %v435_v44 = vld [vmem:[#allocation2 + $0x308] sm:$0xff] }
 0x1fa   : > { %v1388_v60 = vpop.f32.mrf.mxu0  ;;  %v9682_v12 = vpop.f32.mrf.mxu1 }
 0x1fb   : > { %1961 = vst [vmem:[#allocation2 + $0x1c0] sm:$0xff] %v1863_v49  ;;  %v1864_v54 = vadd.f32 %v1668_v58, %v423_v46  ;;  %v1670_v63 = vadd.f32 %v9637_v5, %v1388_v60  ;;  %v436_v49 = vld [vmem:[#allocation2] sm:$0xff] }
 0x1fc   : > { %v1392_v1 = vpop.f32.mrf.mxu0  ;;  %v9685_v16 = vpop.f32.mrf.mxu1 }
 0x1fd   : > { %1962 = vst [vmem:[#allocation2 + $0x88] sm:$0xff] %v1864_v54  ;;  %v1865_v59 = vadd.f32 %v1670_v63, %v424_v51  ;;  %v1674_v4 = vadd.f32 %v9640_v11, %v1392_v1  ;;  %v437_v54 = vld [vmem:[#allocation2 + $0xe0] sm:$0xff] }
 0x1fe   : > { %v1394_v6 = vpop.f32.mrf.mxu0  ;;  %v9688_v21 = vpop.f32.mrf.mxu1 }
 0x1ff   : > { %1963 = vst [vmem:[#allocation2 + $0x190] sm:$0xff] %v1865_v59  ;;  %v1866_v0 = vadd.f32 %v1674_v4, %v425_v56  ;;  %v1676_v10 = vadd.f32 %v9643_v17, %v1394_v6  ;;  %v438_v59 = vld [vmem:[#allocation2 + $0x98] sm:$0xff] }
 0x200   : > { %v1396_v13 = vpop.f32.mrf.mxu0  ;;  %v9691_v26 = vpop.f32.mrf.mxu1 }
 0x201   : > { %1964 = vst [vmem:[#allocation2 + $0x210] sm:$0xff] %v1866_v0  ;;  %v1867_v5 = vadd.f32 %v1676_v10, %v426_v61  ;;  %v1678_v15 = vadd.f32 %v9646_v22, %v1396_v13  ;;  %v439_v0 = vld [vmem:[#allocation2 + $0x1f8] sm:$0xff] }
 0x202   : > { %v1398_v18 = vpop.f32.mrf.mxu0  ;;  %v9694_v31 = vpop.f32.mrf.mxu1 }
 0x203   : > { %1965 = vst [vmem:[#allocation2 + $0x80] sm:$0xff] %v1867_v5  ;;  %v1868_v11 = vadd.f32 %v1678_v15, %v427_v2  ;;  %v1680_v20 = vadd.f32 %v9649_v27, %v1398_v18  ;;  %v440_v5 = vld [vmem:[#allocation2 + $0x2e0] sm:$0xff] }
 0x204   : > { %v1402_v23 = vpop.f32.mrf.mxu0  ;;  %v9697_v36 = vpop.f32.mrf.mxu1 }
 0x205   : > { %1966 = vst [vmem:[#allocation2 + $0x198] sm:$0xff] %v1868_v11  ;;  %v1869_v17 = vadd.f32 %v1680_v20, %v428_v7  ;;  %v1684_v25 = vadd.f32 %v9652_v32, %v1402_v23  ;;  %v441_v11 = vld [vmem:[#allocation2 + $0x200] sm:$0xff] }
 0x206   : > { %v1404_v28 = vpop.f32.mrf.mxu0  ;;  %v9700_v41 = vpop.f32.mrf.mxu1 }
 0x207   : > { %1967 = vst [vmem:[#allocation2 + $0x220] sm:$0xff] %v1869_v17  ;;  %v1870_v22 = vadd.f32 %v1684_v25, %v429_v14  ;;  %v1686_v30 = vadd.f32 %v9655_v37, %v1404_v28  ;;  %v442_v17 = vld [vmem:[#allocation2 + $0x2f0] sm:$0xff] }
 0x208   : > { %v1406_v33 = vpop.f32.mrf.mxu0  ;;  %v9703_v46 = vpop.f32.mrf.mxu1 }
 0x209   : > { %1968 = vst [vmem:[#allocation2 + $0x258] sm:$0xff] %v1870_v22  ;;  %v1871_v27 = vadd.f32 %v1686_v30, %v430_v19  ;;  %v1688_v35 = vadd.f32 %v9658_v42, %v1406_v33  ;;  %v443_v22 = vld [vmem:[#allocation2 + $0x8] sm:$0xff] }
 0x20a   : > { %v1408_v38 = vpop.f32.mrf.mxu0  ;;  %v9706_v51 = vpop.f32.mrf.mxu1 }
 0x20b   : > { %1969 = vst [vmem:[#allocation2 + $0x1d0] sm:$0xff] %v1871_v27  ;;  %v1872_v32 = vadd.f32 %v1688_v35, %v431_v24  ;;  %v1690_v40 = vadd.f32 %v9661_v47, %v1408_v38  ;;  %v444_v27 = vld [vmem:[#allocation2 + $0x268] sm:$0xff] }
 0x20c   : > { %v1412_v43 = vpop.f32.mrf.mxu0  ;;  %v9709_v56 = vpop.f32.mrf.mxu1 }
 0x20d   : > { %1970 = vst [vmem:[#allocation2 + $0x288] sm:$0xff] %v1872_v32  ;;  %v1873_v37 = vadd.f32 %v1690_v40, %v432_v29  ;;  %v1694_v45 = vadd.f32 %v9664_v52, %v1412_v43  ;;  %v445_v32 = vld [vmem:[#allocation2 + $0x2c8] sm:$0xff] }
 0x20e   : > { %v1414_v48 = vpop.f32.mrf.mxu0  ;;  %v9712_v61 = vpop.f32.mrf.mxu1 }
 0x20f   : > { %1971 = vst [vmem:[#allocation2 + $0x108] sm:$0xff] %v1873_v37  ;;  %v1874_v42 = vadd.f32 %v1694_v45, %v433_v34  ;;  %v1696_v50 = vadd.f32 %v9667_v57, %v1414_v48  ;;  %v446_v37 = vld [vmem:[#allocation2 + $0x148] sm:$0xff] }
 0x210   : > { %v1416_v53 = vpop.f32.mrf.mxu0  ;;  %v9715_v2 = vpop.f32.mrf.mxu1 }
 0x211   : > { %1972 = vst [vmem:[#allocation2 + $0xc0] sm:$0xff] %v1874_v42  ;;  %v1875_v47 = vadd.f32 %v1696_v50, %v434_v39  ;;  %v1698_v55 = vadd.f32 %v9670_v62, %v1416_v53  ;;  %v447_v42 = vld [vmem:[#allocation2 + $0x68] sm:$0xff] }
 0x212   : > { %v1418_v58 = vpop.f32.mrf.mxu0  ;;  %v9718_v7 = vpop.f32.mrf.mxu1 }
 0x213   : > { %1973 = vst [vmem:[#allocation2 + $0x290] sm:$0xff] %v1875_v47  ;;  %v1876_v52 = vadd.f32 %v1698_v55, %v435_v44  ;;  %v1700_v60 = vadd.f32 %v9673_v3, %v1418_v58  ;;  %v448_v47 = vld [vmem:[#allocation2 + $0x188] sm:$0xff] }
 0x214   : > { %v1422_v63 = vpop.f32.mrf.mxu0  ;;  %v9721_v14 = vpop.f32.mrf.mxu1 }
 0x215   : > { %1974 = vst [vmem:[#allocation2 + $0x308] sm:$0xff] %v1876_v52  ;;  %v1877_v57 = vadd.f32 %v1700_v60, %v436_v49  ;;  %v1704_v1 = vadd.f32 %v9676_v8, %v1422_v63  ;;  %v449_v52 = vld [vmem:[#allocation2 + $0x158] sm:$0xff] }
 0x216   : > { %v1424_v4 = vpop.f32.mrf.mxu0  ;;  %v9724_v19 = vpop.f32.mrf.mxu1 }
 0x217   : > { %1975 = vst [vmem:[#allocation2] sm:$0xff] %v1877_v57  ;;  %v1878_v62 = vadd.f32 %v1704_v1, %v437_v54  ;;  %v1706_v6 = vadd.f32 %v9679_v9, %v1424_v4  ;;  %v450_v57 = vld [vmem:[#allocation2 + $0x1a0] sm:$0xff] }
 0x218   : > { %v1426_v10 = vpop.f32.mrf.mxu0  ;;  %v9727_v24 = vpop.f32.mrf.mxu1 }
 0x219   : > { %1976 = vst [vmem:[#allocation2 + $0xe0] sm:$0xff] %v1878_v62  ;;  %v1879_v3 = vadd.f32 %v1706_v6, %v438_v59  ;;  %v1708_v13 = vadd.f32 %v9682_v12, %v1426_v10  ;;  %v451_v62 = vld [vmem:[#allocation2 + $0x90] sm:$0xff] }
 0x21a   : > { %v1428_v15 = vpop.f32.mrf.mxu0  ;;  %v9730_v29 = vpop.f32.mrf.mxu1 }
 0x21b   : > { %1977 = vst [vmem:[#allocation2 + $0x98] sm:$0xff] %v1879_v3  ;;  %v1880_v8 = vadd.f32 %v1708_v13, %v439_v0  ;;  %v1710_v18 = vadd.f32 %v9685_v16, %v1428_v15  ;;  %v452_v3 = vld [vmem:[#allocation2 + $0x118] sm:$0xff] }
 0x21c   : > { %v1432_v20 = vpop.f32.mrf.mxu0  ;;  %v9733_v34 = vpop.f32.mrf.mxu1 }
 0x21d   : > { %1978 = vst [vmem:[#allocation2 + $0x1f8] sm:$0xff] %v1880_v8  ;;  %v1881_v9 = vadd.f32 %v1710_v18, %v440_v5  ;;  %v1714_v23 = vadd.f32 %v9688_v21, %v1432_v20  ;;  %v453_v8 = vld [vmem:[#allocation2 + $0x208] sm:$0xff] }
 0x21e   : > { %v1434_v25 = vpop.f32.mrf.mxu0  ;;  %v9736_v39 = vpop.f32.mrf.mxu1 }
 0x21f   : > { %1979 = vst [vmem:[#allocation2 + $0x2e0] sm:$0xff] %v1881_v9  ;;  %v1882_v12 = vadd.f32 %v1714_v23, %v441_v11  ;;  %v1716_v28 = vadd.f32 %v9691_v26, %v1434_v25  ;;  %v454_v9 = vld [vmem:[#allocation2 + $0xb8] sm:$0xff] }
 0x220   : > { %v1436_v30 = vpop.f32.mrf.mxu0  ;;  %v9739_v44 = vpop.f32.mrf.mxu1 }
 0x221   : > { %1980 = vst [vmem:[#allocation2 + $0x200] sm:$0xff] %v1882_v12  ;;  %v1883_v16 = vadd.f32 %v1716_v28, %v442_v17  ;;  %v1718_v33 = vadd.f32 %v9694_v31, %v1436_v30  ;;  %v455_v12 = vld [vmem:[#allocation2 + $0x238] sm:$0xff] }
 0x222   : > { %v1438_v35 = vpop.f32.mrf.mxu0  ;;  %v9742_v49 = vpop.f32.mrf.mxu1 }
 0x223   : > { %1981 = vst [vmem:[#allocation2 + $0x2f0] sm:$0xff] %v1883_v16  ;;  %v1884_v21 = vadd.f32 %v1718_v33, %v443_v22  ;;  %v1720_v38 = vadd.f32 %v9697_v36, %v1438_v35  ;;  %v456_v16 = vld [vmem:[#allocation2 + $0x150] sm:$0xff] }
 0x224   : > { %v1442_v40 = vpop.f32.mrf.mxu0  ;;  %v9745_v54 = vpop.f32.mrf.mxu1 }
 0x225   : > { %1982 = vst [vmem:[#allocation2 + $0x8] sm:$0xff] %v1884_v21  ;;  %v1885_v26 = vadd.f32 %v1720_v38, %v444_v27  ;;  %v1724_v43 = vadd.f32 %v9700_v41, %v1442_v40  ;;  %v457_v21 = vld [vmem:[#allocation2 + $0x248] sm:$0xff] }
 0x226   : > { %v1444_v45 = vpop.f32.mrf.mxu0  ;;  %v9748_v59 = vpop.f32.mrf.mxu1 }
 0x227   : > { %1983 = vst [vmem:[#allocation2 + $0x268] sm:$0xff] %v1885_v26  ;;  %v1886_v31 = vadd.f32 %v1724_v43, %v445_v32  ;;  %v1726_v48 = vadd.f32 %v9703_v46, %v1444_v45  ;;  %v458_v26 = vld [vmem:[#allocation2 + $0x2d0] sm:$0xff] }
 0x228   : > { %v1446_v50 = vpop.f32.mrf.mxu0  ;;  %v9751_v0 = vpop.f32.mrf.mxu1 }
 0x229   : > { %1984 = vst [vmem:[#allocation2 + $0x2c8] sm:$0xff] %v1886_v31  ;;  %v1887_v36 = vadd.f32 %v1726_v48, %v446_v37  ;;  %v1728_v53 = vadd.f32 %v9706_v51, %v1446_v50  ;;  %v459_v31 = vld [vmem:[#allocation2 + $0x280] sm:$0xff] }
 0x22a   : > { %v1448_v55 = vpop.f32.mrf.mxu0  ;;  %v9754_v5 = vpop.f32.mrf.mxu1 }
 0x22b   : > { %1985 = vst [vmem:[#allocation2 + $0x148] sm:$0xff] %v1887_v36  ;;  %v1888_v41 = vadd.f32 %v1728_v53, %v447_v42  ;;  %v1730_v58 = vadd.f32 %v9709_v56, %v1448_v55  ;;  %v460_v36 = vld [vmem:[#allocation2 + $0x2a0] sm:$0xff] }
 0x22c   : > { %v1452_v60 = vpop.f32.mrf.mxu0  ;;  %v9757_v11 = vpop.f32.mrf.mxu1 }
 0x22d   : > { %1986 = vst [vmem:[#allocation2 + $0x68] sm:$0xff] %v1888_v41  ;;  %v1889_v46 = vadd.f32 %v1730_v58, %v448_v47  ;;  %v1734_v63 = vadd.f32 %v9712_v61, %v1452_v60  ;;  %v461_v41 = vld [vmem:[#allocation2 + $0x110] sm:$0xff] }
 0x22e   : > { %v1454_v1 = vpop.f32.mrf.mxu0  ;;  %v9760_v17 = vpop.f32.mrf.mxu1 }
 0x22f   : > { %1987 = vst [vmem:[#allocation2 + $0x188] sm:$0xff] %v1889_v46  ;;  %v1890_v51 = vadd.f32 %v1734_v63, %v449_v52  ;;  %v1736_v4 = vadd.f32 %v9715_v2, %v1454_v1  ;;  %v462_v46 = vld [vmem:[#allocation2 + $0x58] sm:$0xff] }
 0x230   : > { %v1456_v6 = vpop.f32.mrf.mxu0  ;;  %v9763_v22 = vpop.f32.mrf.mxu1 }
 0x231   : > { %1988 = vst [vmem:[#allocation2 + $0x158] sm:$0xff] %v1890_v51  ;;  %v1891_v56 = vadd.f32 %v1736_v4, %v450_v57  ;;  %v1738_v10 = vadd.f32 %v9718_v7, %v1456_v6  ;;  %v463_v51 = vld [vmem:[#allocation2 + $0x1f0] sm:$0xff] }
 0x232   : > { %v1458_v13 = vpop.f32.mrf.mxu0  ;;  %v9766_v27 = vpop.f32.mrf.mxu1 }
 0x233   : > { %1989 = vst [vmem:[#allocation2 + $0x1a0] sm:$0xff] %v1891_v56  ;;  %v1892_v61 = vadd.f32 %v1738_v10, %v451_v62  ;;  %v1740_v15 = vadd.f32 %v9721_v14, %v1458_v13  ;;  %v464_v56 = vld [vmem:[#allocation2 + $0x1c8] sm:$0xff] }
 0x234   : > { %v1462_v18 = vpop.f32.mrf.mxu0  ;;  %v9769_v32 = vpop.f32.mrf.mxu1 }
 0x235   : > { %1990 = vst [vmem:[#allocation2 + $0x90] sm:$0xff] %v1892_v61  ;;  %v1893_v2 = vadd.f32 %v1740_v15, %v452_v3  ;;  %v1744_v20 = vadd.f32 %v9724_v19, %v1462_v18  ;;  %v465_v61 = vld [vmem:[#allocation2 + $0x2d8] sm:$0xff] }
 0x236   : > { %v1464_v23 = vpop.f32.mrf.mxu0  ;;  %v9772_v37 = vpop.f32.mrf.mxu1 }
 0x237   : > { %1991 = vst [vmem:[#allocation2 + $0x118] sm:$0xff] %v1893_v2  ;;  %v1894_v7 = vadd.f32 %v1744_v20, %v453_v8  ;;  %v1746_v25 = vadd.f32 %v9727_v24, %v1464_v23  ;;  %v466_v2 = vld [vmem:[#allocation2 + $0x1e0] sm:$0xff] }
 0x238   : > { %v1466_v28 = vpop.f32.mrf.mxu0  ;;  %v9775_v42 = vpop.f32.mrf.mxu1 }
 0x239   : > { %1992 = vst [vmem:[#allocation2 + $0x208] sm:$0xff] %v1894_v7  ;;  %v1895_v14 = vadd.f32 %v1746_v25, %v454_v9  ;;  %v1748_v30 = vadd.f32 %v9730_v29, %v1466_v28  ;;  %v467_v7 = vld [vmem:[#allocation2 + $0x1d8] sm:$0xff] }
 0x23a   : > { %v1468_v33 = vpop.f32.mrf.mxu0  ;;  %v9778_v47 = vpop.f32.mrf.mxu1 }
 0x23b   : > { %1993 = vst [vmem:[#allocation2 + $0xb8] sm:$0xff] %v1895_v14  ;;  %v1896_v19 = vadd.f32 %v1748_v30, %v455_v12  ;;  %v1750_v35 = vadd.f32 %v9733_v34, %v1468_v33  ;;  %v468_v14 = vld [vmem:[#allocation2 + $0xd8] sm:$0xff] }
 0x23c   : > { %v1472_v38 = vpop.f32.mrf.mxu0  ;;  %v9781_v52 = vpop.f32.mrf.mxu1 }
 0x23d   : > { %1994 = vst [vmem:[#allocation2 + $0x238] sm:$0xff] %v1896_v19  ;;  %v1897_v24 = vadd.f32 %v1750_v35, %v456_v16  ;;  %v1754_v40 = vadd.f32 %v9736_v39, %v1472_v38  ;;  %v469_v19 = vld [vmem:[#allocation2 + $0x298] sm:$0xff] }
 0x23e   : > { %v1474_v43 = vpop.f32.mrf.mxu0  ;;  %v9784_v57 = vpop.f32.mrf.mxu1 }
 0x23f   : > { %1995 = vst [vmem:[#allocation2 + $0x150] sm:$0xff] %v1897_v24  ;;  %v1898_v29 = vadd.f32 %v1754_v40, %v457_v21  ;;  %v1756_v45 = vadd.f32 %v9739_v44, %v1474_v43  ;;  %v470_v24 = vld [vmem:[#allocation2 + $0x20] sm:$0xff] }
 0x240   : > { %v1476_v48 = vpop.f32.mrf.mxu0  ;;  %v9787_v62 = vpop.f32.mrf.mxu1 }
 0x241   : > { %1996 = vst [vmem:[#allocation2 + $0x248] sm:$0xff] %v1898_v29  ;;  %v1899_v34 = vadd.f32 %v1756_v45, %v458_v26  ;;  %v1758_v50 = vadd.f32 %v9742_v49, %v1476_v48  ;;  %v471_v29 = vld [vmem:[#allocation2 + $0xa8] sm:$0xff] }
 0x242   : > { %v1478_v53 = vpop.f32.mrf.mxu0  ;;  %v9790_v3 = vpop.f32.mrf.mxu1 }
 0x243   : > { %1997 = vst [vmem:[#allocation2 + $0x2d0] sm:$0xff] %v1899_v34  ;;  %v1900_v39 = vadd.f32 %v1758_v50, %v459_v31  ;;  %v1760_v55 = vadd.f32 %v9745_v54, %v1478_v53  ;;  %v472_v34 = vld [vmem:[#allocation2 + $0x38] sm:$0xff] }
 0x244   : > { %v1482_v58 = vpop.f32.mrf.mxu0  ;;  %v9793_v8 = vpop.f32.mrf.mxu1 }
 0x245   : > { %1998 = vst [vmem:[#allocation2 + $0x280] sm:$0xff] %v1900_v39  ;;  %v1901_v44 = vadd.f32 %v1760_v55, %v460_v36  ;;  %v1764_v60 = vadd.f32 %v9748_v59, %v1482_v58  ;;  %v473_v39 = vld [vmem:[#allocation2 + $0x178] sm:$0xff] }
 0x246   : > { %v1484_v63 = vpop.f32.mrf.mxu0  ;;  %v9796_v9 = vpop.f32.mrf.mxu1 }
 0x247   : > { %1999 = vst [vmem:[#allocation2 + $0x2a0] sm:$0xff] %v1901_v44  ;;  %v1902_v49 = vadd.f32 %v1764_v60, %v461_v41  ;;  %v1766_v1 = vadd.f32 %v9751_v0, %v1484_v63  ;;  %v474_v44 = vld [vmem:[#allocation2 + $0x50] sm:$0xff] }
 0x248   : > { %v1486_v4 = vpop.f32.mrf.mxu0  ;;  %v9799_v12 = vpop.f32.mrf.mxu1 }
 0x249   : > { %2000 = vst [vmem:[#allocation2 + $0x110] sm:$0xff] %v1902_v49  ;;  %v1903_v54 = vadd.f32 %v1766_v1, %v462_v46  ;;  %v1768_v6 = vadd.f32 %v9754_v5, %v1486_v4  ;;  %v475_v49 = vld [vmem:[#allocation2 + $0x120] sm:$0xff] }
 0x24a   : > { %v1488_v10 = vpop.f32.mrf.mxu0  ;;  %v9802_v16 = vpop.f32.mrf.mxu1 }
 0x24b   : > { %2001 = vst [vmem:[#allocation2 + $0x58] sm:$0xff] %v1903_v54  ;;  %v1904_v59 = vadd.f32 %v1768_v6, %v463_v51  ;;  %v1770_v13 = vadd.f32 %v9757_v11, %v1488_v10  ;;  %v476_v54 = vld [vmem:[#allocation2 + $0xc8] sm:$0xff] }
 0x24c   : > { %v1492_v15 = vpop.f32.mrf.mxu0  ;;  %v9805_v21 = vpop.f32.mrf.mxu1 }
 0x24d   : > { %2002 = vst [vmem:[#allocation2 + $0x1f0] sm:$0xff] %v1904_v59  ;;  %v1905_v0 = vadd.f32 %v1770_v13, %v464_v56  ;;  %v1774_v18 = vadd.f32 %v9760_v17, %v1492_v15  ;;  %v477_v59 = vld [vmem:[#allocation2 + $0x1e8] sm:$0xff] }
 0x24e   : > { %v1494_v20 = vpop.f32.mrf.mxu0  ;;  %v9808_v26 = vpop.f32.mrf.mxu1 }
 0x24f   : > { %2003 = vst [vmem:[#allocation2 + $0x1c8] sm:$0xff] %v1905_v0  ;;  %v1906_v5 = vadd.f32 %v1774_v18, %v465_v61  ;;  %v1776_v23 = vadd.f32 %v9763_v22, %v1494_v20  ;;  %v478_v0 = vld [vmem:[#allocation2 + $0x2f8] sm:$0xff]  ;;  %v479_v20 = vld [vmem:[#allocation2 + $0x270] sm:$0xff] }
 0x250   : > { %v1496_v25 = vpop.f32.mrf.mxu0  ;;  %v9811_v31 = vpop.f32.mrf.mxu1 }
 0x251   : > { %2004 = vst [vmem:[#allocation2 + $0x2d8] sm:$0xff] %v1906_v5  ;;  %v1907_v11 = vadd.f32 %v1776_v23, %v466_v2  ;;  %v1778_v28 = vadd.f32 %v9766_v27, %v1496_v25 }
 0x252   : > { %v1498_v30 = vpop.f32.mrf.mxu0  ;;  %v9814_v36 = vpop.f32.mrf.mxu1 }
 0x253   : > { %2005 = vst [vmem:[#allocation2 + $0x1e0] sm:$0xff] %v1907_v11  ;;  %v1908_v17 = vadd.f32 %v1778_v28, %v467_v7  ;;  %v1780_v33 = vadd.f32 %v9769_v32, %v1498_v30 }
 0x254   : > { %v1502_v35 = vpop.f32.mrf.mxu0  ;;  %v1819_v41 = vpop.f32.mrf.mxu1 }
 0x255   : > { %2006 = vst [vmem:[#allocation2 + $0x1d8] sm:$0xff] %v1908_v17  ;;  %v1909_v22 = vadd.f32 %v1780_v33, %v468_v14  ;;  %v1784_v38 = vadd.f32 %v9772_v37, %v1502_v35  ;;  %v481_v14 = vld [vmem:[#allocation2 + $0x140] sm:$0xff]  ;;  %v482_v33 = vld [vmem:[#allocation2 + $0x128] sm:$0xff] }
 0x256   : > { %v1504_v40 = vpop.f32.mrf.mxu0  ;;  %v1823_v46 = vpop.f32.mrf.mxu1 }
 0x257   : > { %2007 = vst [vmem:[#allocation2 + $0xd8] sm:$0xff] %v1909_v22  ;;  %v1910_v27 = vadd.f32 %v1784_v38, %v469_v19  ;;  %v1786_v43 = vadd.f32 %v9775_v42, %v1504_v40  ;;  %v483_v22 = vld [vmem:[#allocation2 + $0x60] sm:$0xff]  ;;  %v484_v40 = vld [vmem:[#allocation2 + $0x1a8] sm:$0xff] }
 0x258   : > { %v1506_v45 = vpop.f32.mrf.mxu0  ;;  %v1825_v51 = vpop.f32.mrf.mxu1 }
 0x259   : > { %2008 = vst [vmem:[#allocation2 + $0x298] sm:$0xff] %v1910_v27  ;;  %v1911_v32 = vadd.f32 %v1786_v43, %v470_v24  ;;  %v1788_v48 = vadd.f32 %v9778_v47, %v1506_v45 }
 0x25a   : > { %v1508_v50 = vpop.f32.mrf.mxu0  ;;  %v1827_v56 = vpop.f32.mrf.mxu1 }
 0x25b   : > { %2009 = vst [vmem:[#allocation2 + $0x20] sm:$0xff] %v1911_v32  ;;  %v1912_v37 = vadd.f32 %v1788_v48, %v471_v29  ;;  %v1790_v53 = vadd.f32 %v9781_v52, %v1508_v50  ;;  %v485_v29 = vld [vmem:[#allocation2 + $0x168] sm:$0xff]  ;;  %v486_v48 = vld [vmem:[#allocation2 + $0x218] sm:$0xff] }
 0x25c   : > { %v1512_v55 = vpop.f32.mrf.mxu0  ;;  %v1828_v61 = vpop.f32.mrf.mxu1 }
 0x25d   : > { %2010 = vst [vmem:[#allocation2 + $0xa8] sm:$0xff] %v1912_v37  ;;  %v1913_v42 = vadd.f32 %v1790_v53, %v472_v34  ;;  %v1794_v58 = vadd.f32 %v9784_v57, %v1512_v55 }
 0x25e   : > { %v1514_v60 = vpop.f32.mrf.mxu0 }
 0x25f   : > { %2011 = vst [vmem:[#allocation2 + $0x38] sm:$0xff] %v1913_v42  ;;  %v1914_v47 = vadd.f32 %v1794_v58, %v473_v39  ;;  %v1796_v63 = vadd.f32 %v9787_v62, %v1514_v60 }
 0x260   : > { %v1516_v1 = vpop.f32.mrf.mxu0 }
 0x261   : > { %2012 = vst [vmem:[#allocation2 + $0x178] sm:$0xff] %v1914_v47  ;;  %v1915_v4 = vadd.f32 %v1796_v63, %v474_v44  ;;  %v1798_v52 = vadd.f32 %v9790_v3, %v1516_v1 }
 0x262   : > { %v1518_v6 = vpop.f32.mrf.mxu0 }
 0x263   : > { %2013 = vst [vmem:[#allocation2 + $0x50] sm:$0xff] %v1915_v4  ;;  %v1916_v10 = vadd.f32 %v1798_v52, %v475_v49  ;;  %v1800_v57 = vadd.f32 %v9793_v8, %v1518_v6  ;;  %v480_v8 = vld [vmem:[#allocation2 + $0x278] sm:$0xff] }
 0x264   : > { %v1522_v13 = vpop.f32.mrf.mxu0 }
 0x265   : > { %2014 = vst [vmem:[#allocation2 + $0x120] sm:$0xff] %v1916_v10  ;;  %v1917_v15 = vadd.f32 %v1800_v57, %v476_v54  ;;  %v1804_v62 = vadd.f32 %v9796_v9, %v1522_v13 }
 0x266   : > { %v1524_v18 = vpop.f32.mrf.mxu0 }
 0x267   : > { %2015 = vst [vmem:[#allocation2 + $0xc8] sm:$0xff] %v1917_v15  ;;  %v1918_v2 = vadd.f32 %v1804_v62, %v477_v59  ;;  %v1806_v3 = vadd.f32 %v9799_v12, %v1524_v18 }
 0x268   : > { %v1526_v5 = vpop.f32.mrf.mxu0 }
 0x269   : > { %2016 = vst [vmem:[#allocation2 + $0x1e8] sm:$0xff] %v1918_v2  ;;  %v1919_v23 = vadd.f32 %v1806_v3, %v478_v0  ;;  %v1808_v7 = vadd.f32 %v9802_v16, %v1526_v5 }
 0x26a   : > { %v1528_v25 = vpop.f32.mrf.mxu0 }
 0x26b   : > { %2017 = vst [vmem:[#allocation2 + $0x2f8] sm:$0xff] %v1919_v23  ;;  %v1920_v11 = vadd.f32 %v1808_v7, %v479_v20  ;;  %v1810_v28 = vadd.f32 %v9805_v21, %v1528_v25 }
 0x26c   : > { %v1532_v9 = vpop.f32.mrf.mxu0 }
 0x26d   : > { %2018 = vst [vmem:[#allocation2 + $0x270] sm:$0xff] %v1920_v11  ;;  %v1921_v30 = vadd.f32 %v1810_v28, %v480_v8  ;;  %v1814_v17 = vadd.f32 %v9808_v26, %v1532_v9 }
 0x26e   : > { %v1534_v12 = vpop.f32.mrf.mxu0 }
 0x26f   : > { %2019 = vst [vmem:[#allocation2 + $0x278] sm:$0xff] %v1921_v30  ;;  %v1922_v19 = vadd.f32 %v1814_v17, %v481_v14  ;;  %v1816_v35 = vadd.f32 %v9811_v31, %v1534_v12 }
 0x270   : > { %v1536_v16 = vpop.f32.mrf.mxu0 }
 0x271   : > { %2020 = vst [vmem:[#allocation2 + $0x140] sm:$0xff] %v1922_v19  ;;  %v1923_v38 = vadd.f32 %v1816_v35, %v482_v33  ;;  %v1818_v24 = vadd.f32 %v9814_v36, %v1536_v16 }
 0x272   : > { %v1538_v21 = vpop.f32.mrf.mxu0 }
 0x273   : > { %2021 = vst [vmem:[#allocation2 + $0x128] sm:$0xff] %v1923_v38  ;;  %v1924_v27 = vadd.f32 %v1818_v24, %v483_v22  ;;  %v1820_v43 = vadd.f32 %v1819_v41, %v1538_v21 }
 0x274   : > { %v1542_v45 = vpop.f32.mrf.mxu0 }
 0x275   : > { %2022 = vst [vmem:[#allocation2 + $0x60] sm:$0xff] %v1924_v27  ;;  %v1925_v26 = vadd.f32 %v1820_v43, %v484_v40  ;;  %v1824_v32 = vadd.f32 %v1823_v46, %v1542_v45 }
 0x276   : > { %v1544_v34 = vpop.f32.mrf.mxu0 }
 0x277   : > { %2023 = vst [vmem:[#allocation2 + $0x1a8] sm:$0xff] %v1925_v26  ;;  %v1926_v31 = vadd.f32 %v1824_v32, %v485_v29  ;;  %v1826_v50 = vadd.f32 %v1825_v51, %v1544_v34  ;;  %2029 = sbr.rel (%p8454_p3) target bundleno = 1527 (0x5f7), region = 52 }
 0x278   : > { %v1546_v37 = vpop.f32.mrf.mxu0 }
 0x279   : > { %2024 = vst [vmem:[#allocation2 + $0x168] sm:$0xff] %v1926_v31  ;;  %v1927_v53 = vadd.f32 %v1826_v50, %v486_v48 }
 0x27a   : > { %v1547_v39 = vpop.f32.mrf.mxu0 }
 0x27b   : > { %2025 = vst [vmem:[#allocation2 + $0x218] sm:$0xff] %v1927_v53 }
 0x27c   : > { %v9045_v36 = vmov -inf   ;;  %v2130_v55 = vlaneseq  ;;  %v2128_v44 = vld [vmem:[%s9318_s26] sm:$0x3]  ;;  %v2030_v60 = vld [vmem:[#allocation2 + $0x2b0] sm:$0xff]  ;;  %v2036_v10 = vld [vmem:[#allocation2 + $0xf8] sm:$0xff]  ;;  %vm5577_vm0 = vcmask 1046528  }
 0x27d   : > { %2919 = vst [vmem:[#allocation3 + $0x3e0] sm:$0xff] %v9045_v36  ;;  %2859 = vst [vmem:[#allocation3 + $0x220] sm:$0xff] %v9045_v36  ;;  %v2031_v63 = vld [vmem:[#allocation2 + $0xd0] sm:$0xff]  ;;  %v2033_v1 = vld [vmem:[#allocation2 + $0x48] sm:$0xff]  ;;  %vm5998_vm1 = vcmask 1045504   ;;  %vm4943_vm2 = vcmask 1040384  }
 0x27e   : > { %2860 = vst [vmem:[#allocation3 + $0x360] sm:$0xff] %v9045_v36  ;;  %2861 = vst [vmem:[#allocation3 + $0x2d8] sm:$0xff] %v9045_v36  ;;  %v9942_v41 = vshrl.u32 %v2130_v55, 7  ;;  %v2032_v49 = vld [vmem:[#allocation2 + $0x10] sm:$0xff]  ;;  %v2037_v57 = vld [vmem:[#allocation2 + $0x78] sm:$0xff]  ;;  %vm7861_vm3 = vcmask 1041409  }
 0x27f   : > { %2862 = vst [vmem:[#allocation3 + $0x80] sm:$0xff] %v9045_v36  ;;  %2863 = vst [vmem:[#allocation3 + $0x150] sm:$0xff] %v9045_v36  ;;  %v2034_v51 = vld [vmem:[#allocation2 + $0x30] sm:$0xff]  ;;  %v2038_v61 = vld [vmem:[#allocation2 + $0x300] sm:$0xff]  ;;  %vm7863_vm4 = vcmask 1042434   ;;  %vm7865_vm5 = vcmask 1043459  }
 0x280   : > { %2864 = vst [vmem:[#allocation3] sm:$0xff] %v9045_v36  ;;  %2865 = vst [vmem:[#allocation3 + $0x2a0] sm:$0xff] %v9045_v36  ;;  %v9945_v42 = vsub.s32 0, %v9942_v41  ;;  %v2136_v58 = vsub.s32 1, %v9942_v41  ;;  %v2035_v4 = vld [vmem:[#allocation2 + $0xf0] sm:$0xff]  ;;  %v2040_v3 = vld [vmem:[#allocation2 + $0xe8] sm:$0xff] }
 0x281   : > { %2866 = vst [vmem:[#allocation3 + $0xf0] sm:$0xff] %v9045_v36  ;;  %2867 = vst [vmem:[#allocation3 + $0x320] sm:$0xff] %v9045_v36  ;;  %v2039_v15 = vld [vmem:[#allocation2 + $0x130] sm:$0xff]  ;;  %v2041_v20 = vld [vmem:[#allocation2 + $0x40] sm:$0xff]  ;;  %vm7867_vm6 = vcmask 1044484   ;;  %vm7869_vm7 = vcmask 1045509  }
 0x282   : > { %2868 = vst [vmem:[#allocation3 + $0x398] sm:$0xff] %v9045_v36  ;;  %2869 = vst [vmem:[#allocation3 + $0x60] sm:$0xff] %v9045_v36  ;;  %v9950_v46 = vrot.slane %v2128_v44, %v9945_v42  ;;  %v9952_v47 = vrot.slane %v2128_v44, %v2136_v58  ;;  %v2042_v25 = vld [vmem:[#allocation2 + $0x2c0] sm:$0xff]  ;;  %v2043_v11 = vld [vmem:[#allocation2 + $0x2a8] sm:$0xff]  ;;  %vm7871_vm8 = vcmask 1046534   ;;  %vm8170_vm9 = vcmask 1047559  }
 0x283   : > { %2870 = vst [vmem:[#allocation3 + $0x328] sm:$0xff] %v9045_v36  ;;  %2871 = vst [vmem:[#allocation3 + $0x230] sm:$0xff] %v9045_v36  ;;  %v2044_v17 = vld [vmem:[#allocation2 + $0x170] sm:$0xff]  ;;  %v2045_v33 = vld [vmem:[#allocation2 + $0x180] sm:$0xff] }
 0x284   : > { %2872 = vst [vmem:[#allocation3 + $0x3c0] sm:$0xff] %v9045_v36  ;;  %2873 = vst [vmem:[#allocation3 + $0x140] sm:$0xff] %v9045_v36  ;;  %v9955_v52 = vadd.f32 %v9950_v46, %v2030_v60  ;;  %v9958_v54 = vadd.f32 %v9952_v47, %v2031_v63  ;;  %v9961_v6 = vadd.f32 %v9950_v46, %v2032_v49  ;;  %v2046_v16 = vld [vmem:[#allocation2 + $0x18] sm:$0xff]  ;;  %v2048_v43 = vld [vmem:[#allocation2 + $0x250] sm:$0xff] }
 0x285   : > { %2874 = vst [vmem:[#allocation3 + $0x158] sm:$0xff] %v9045_v36  ;;  %2875 = vst [vmem:[#allocation3 + $0x128] sm:$0xff] %v9045_v36  ;;  %v9964_v56 = vadd.f32 %v9952_v47, %v2033_v1  ;;  %v9967_v59 = vadd.f32 %v9950_v46, %v2034_v51  ;;  %v9970_v13 = vadd.f32 %v9952_v47, %v2035_v4  ;;  %v2047_v38 = vld [vmem:[#allocation2 + $0x2b8] sm:$0xff]  ;;  %v2049_v29 = vld [vmem:[#allocation2 + $0x28] sm:$0xff] }
 0x286   : > { %2876 = vst [vmem:[#allocation3 + $0x18] sm:$0xff] %v9045_v36  ;;  %2877 = vst [vmem:[#allocation3 + $0x1c0] sm:$0xff] %v9045_v36  ;;  %v9973_v62 = vadd.f32 %v9950_v46, %v2036_v10  ;;  %v9976_v0 = vadd.f32 %v9952_v47, %v2037_v57  ;;  %v2238_v18 = vadd.f32 %v9961_v6, %v9955_v52  ;;  %v2050_v34 = vld [vmem:[#allocation2 + $0x70] sm:$0xff]  ;;  %v2053_v55 = vld [vmem:[#allocation2 + $0x100] sm:$0xff] }
 0x287   : > { %2878 = vst [vmem:[#allocation3 + $0x3b0] sm:$0xff] %v9045_v36  ;;  %2879 = vst [vmem:[#allocation3 + $0x3e8] sm:$0xff] %v9045_v36  ;;  %v2292_v2 = vadd.f32 %v9964_v56, %v9958_v54  ;;  %v9983_v5 = vadd.f32 %v9950_v46, %v2038_v61  ;;  %v9986_v23 = vadd.f32 %v9952_v47, %v2039_v15  ;;  %v2051_v31 = vld [vmem:[#allocation2 + $0x230] sm:$0xff]  ;;  %v2054_v49 = vld [vmem:[#allocation2 + $0x1b8] sm:$0xff] }
 0x288   : > { %2880 = vst [vmem:[#allocation3 + $0x2e0] sm:$0xff] %v9045_v36  ;;  %2881 = vst [vmem:[#allocation3 + $0x1b0] sm:$0xff] %v9045_v36  ;;  %v2239_v7 = vadd.f32 %v2238_v18, %v9967_v59  ;;  %v9991_v28 = vadd.f32 %v9950_v46, %v2040_v3  ;;  %v9994_v14 = vadd.f32 %v9952_v47, %v2041_v20  ;;  %v2055_v1 = vld [vmem:[#allocation2 + $0x228] sm:$0xff]  ;;  %v2056_v61 = vld [vmem:[#allocation2 + $0x260] sm:$0xff] }
 0x289   : > { %2882 = vst [vmem:[#allocation3 + $0xc0] sm:$0xff] %v9045_v36  ;;  %2883 = vst [vmem:[#allocation3 + $0x130] sm:$0xff] %v9045_v36  ;;  %v2293_v8 = vadd.f32 %v2292_v2, %v9970_v13  ;;  %v9999_v12 = vadd.f32 %v9950_v46, %v2042_v25  ;;  %v10002_v19 = vadd.f32 %v9952_v47, %v2043_v11  ;;  %v2057_v15 = vld [vmem:[#allocation2 + $0x240] sm:$0xff] }
 0x28a   : > { %2884 = vst [vmem:[#allocation3 + $0xa8] sm:$0xff] %v9045_v36  ;;  %2885 = vst [vmem:[#allocation3 + $0x40] sm:$0xff] %v9045_v36  ;;  %v2240_v9 = vadd.f32 %v2239_v7, %v9973_v62  ;;  %v10007_v24 = vadd.f32 %v9950_v46, %v2044_v17  ;;  %v10010_v40 = vadd.f32 %v9952_v47, %v2045_v33  ;;  %v2058_v7 = vld [vmem:[#allocation2 + $0x138] sm:$0xff]  ;;  %v2060_v17 = vld [vmem:[#allocation2 + $0xa0] sm:$0xff] }
 0x28b   : > { %2886 = vst [vmem:[#allocation3 + $0x48] sm:$0xff] %v9045_v36  ;;  %2887 = vst [vmem:[#allocation3 + $0x1f8] sm:$0xff] %v9045_v36  ;;  %v2294_v30 = vadd.f32 %v2293_v8, %v9976_v0  ;;  %v10015_v45 = vadd.f32 %v9950_v46, %v2046_v16  ;;  %v10018_v26 = vadd.f32 %v9952_v47, %v2047_v38  ;;  %v2059_v8 = vld [vmem:[#allocation2 + $0x160] sm:$0xff]  ;;  %v2061_v33 = vld [vmem:[#allocation2 + $0x2e8] sm:$0xff] }
 0x28c   : > { %2888 = vst [vmem:[#allocation3 + $0x88] sm:$0xff] %v9045_v36  ;;  %2889 = vst [vmem:[#allocation3 + $0xd8] sm:$0xff] %v9045_v36  ;;  %v2241_v35 = vadd.f32 %v2240_v9, %v9983_v5  ;;  %v10023_v50 = vadd.f32 %v9950_v46, %v2048_v43  ;;  %v10026_v37 = vadd.f32 %v9952_v47, %v2049_v29 }
 0x28d   : > { %2890 = vst [vmem:[#allocation3 + $0x330] sm:$0xff] %v9045_v36  ;;  %2891 = vst [vmem:[#allocation3 + $0xb8] sm:$0xff] %v9045_v36  ;;  %v2295_v22 = vadd.f32 %v2294_v30, %v9986_v23  ;;  %v10031_v58 = vadd.f32 %v9950_v46, %v2050_v34  ;;  %v10034_v44 = vadd.f32 %v9952_v47, %v2051_v31  ;;  %v2064_v34 = vld [vmem:[#allocation2 + $0x88] sm:$0xff]  ;;  %v2065_v31 = vld [vmem:[#allocation2 + $0x190] sm:$0xff] }
 0x28e   : > { %2892 = vst [vmem:[#allocation3 + $0x110] sm:$0xff] %v9045_v36  ;;  %2893 = vst [vmem:[#allocation3 + $0x120] sm:$0xff] %v9045_v36  ;;  %v2242_v21 = vadd.f32 %v2241_v35, %v9991_v28  ;;  %v10042_v4 = vadd.f32 %v9952_v47, %v2053_v55  ;;  %v10047_v18 = vadd.f32 %v9950_v46, %v2054_v49 }
 0x28f   : > { %2894 = vst [vmem:[#allocation3 + $0x30] sm:$0xff] %v9045_v36  ;;  %2895 = vst [vmem:[#allocation3 + $0x1e8] sm:$0xff] %v9045_v36  ;;  %v2296_v27 = vadd.f32 %v2295_v22, %v9994_v14  ;;  %v10050_v2 = vadd.f32 %v9952_v47, %v2055_v1  ;;  %v10055_v25 = vadd.f32 %v9950_v46, %v2056_v61  ;;  %v2068_v61 = vld [vmem:[#allocation2 + $0x198] sm:$0xff] }
 0x290   : > { %2896 = vst [vmem:[#allocation3 + $0x308] sm:$0xff] %v9045_v36  ;;  %2897 = vst [vmem:[#allocation3 + $0x178] sm:$0xff] %v9045_v36  ;;  %v2243_v32 = vadd.f32 %v2242_v21, %v9999_v12  ;;  %v10058_v11 = vadd.f32 %v9952_v47, %v2057_v15  ;;  %v10063_v35 = vadd.f32 %v9950_v46, %v2058_v7  ;;  %v2062_v21 = vld [vmem:[#allocation2 + $0x1b0] sm:$0xff]  ;;  %v2069_v15 = vld [vmem:[#allocation2 + $0x220] sm:$0xff] }
 0x291   : > { %2898 = vst [vmem:[#allocation3 + $0x290] sm:$0xff] %v9045_v36  ;;  %2899 = vst [vmem:[#allocation3 + $0x3f8] sm:$0xff] %v9045_v36  ;;  %v2297_v48 = vadd.f32 %v2296_v27, %v10002_v19  ;;  %v10066_v22 = vadd.f32 %v9952_v47, %v2059_v8  ;;  %v2063_v27 = vld [vmem:[#allocation2 + $0x1c0] sm:$0xff]  ;;  %v10071_v43 = vadd.f32 %v9950_v46, %v2060_v17 }
 0x292   : > { %2900 = vst [vmem:[#allocation3 + $0xb0] sm:$0xff] %v9045_v36  ;;  %2901 = vst [vmem:[#allocation3 + $0x3d8] sm:$0xff] %v9045_v36  ;;  %v2244_v53 = vadd.f32 %v2243_v32, %v10007_v24  ;;  %v10074_v29 = vadd.f32 %v9952_v47, %v2061_v33  ;;  %v10087_v49 = vadd.f32 %v9950_v46, %v2064_v34 }
 0x293   : > { %2902 = vst [vmem:[#allocation3 + $0x100] sm:$0xff] %v9045_v36  ;;  %2903 = vst [vmem:[#allocation3 + $0x58] sm:$0xff] %v9045_v36  ;;  %v2298_v39 = vadd.f32 %v2297_v48, %v10010_v40  ;;  %v10090_v1 = vadd.f32 %v9952_v47, %v2065_v31  ;;  %v10103_v17 = vadd.f32 %v9950_v46, %v2068_v61  ;;  %v2076_v61 = vld [vmem:[#allocation2 + $0x308] sm:$0xff] }
 0x294   : > { %2904 = vst [vmem:[#allocation3 + $0x3b8] sm:$0xff] %v9045_v36  ;;  %2905 = vst [vmem:[#allocation3 + $0x380] sm:$0xff] %v9045_v36  ;;  %v2245_v60 = vadd.f32 %v2244_v53, %v10015_v45  ;;  %v10079_v53 = vadd.f32 %v9950_v46, %v2062_v21  ;;  %v10106_v33 = vadd.f32 %v9952_v47, %v2069_v15  ;;  %v2072_v21 = vld [vmem:[#allocation2 + $0x288] sm:$0xff]  ;;  %v2077_v15 = vld [vmem:[#allocation2] sm:$0xff] }
 0x295   : > { %2906 = vst [vmem:[#allocation3 + $0xe0] sm:$0xff] %v9045_v36  ;;  %2907 = vst [vmem:[#allocation3 + $0x348] sm:$0xff] %v9045_v36  ;;  %v2299_v63 = vadd.f32 %v2298_v39, %v10018_v26  ;;  %v10082_v39 = vadd.f32 %v9952_v47, %v2063_v27  ;;  %v2073_v27 = vld [vmem:[#allocation2 + $0x108] sm:$0xff] }
 0x296   : > { %2908 = vst [vmem:[#allocation3 + $0x210] sm:$0xff] %v9045_v36  ;;  %2909 = vst [vmem:[#allocation3 + $0x248] sm:$0xff] %v9045_v36  ;;  %v2246_v10 = vadd.f32 %v2245_v60, %v10023_v50  ;;  %v2066_v60 = vld [vmem:[#allocation2 + $0x210] sm:$0xff] }
 0x297   : > { %2910 = vst [vmem:[#allocation3 + $0x318] sm:$0xff] %v9045_v36  ;;  %2911 = vst [vmem:[#allocation3 + $0x1f0] sm:$0xff] %v9045_v36  ;;  %v2300_v57 = vadd.f32 %v2299_v63, %v10026_v37  ;;  %v2067_v63 = vld [vmem:[#allocation2 + $0x80] sm:$0xff] }
 0x298   : > { %2912 = vst [vmem:[#allocation3 + $0x218] sm:$0xff] %v9045_v36  ;;  %2913 = vst [vmem:[#allocation3 + $0x2f0] sm:$0xff] %v9045_v36  ;;  %v2247_v3 = vadd.f32 %v2246_v10, %v10031_v58 }
 0x299   : > { %2914 = vst [vmem:[#allocation3 + $0x168] sm:$0xff] %v9045_v36  ;;  %2923 = vst [vmem:[#allocation3 + $0x268] sm:$0xff] %v9045_v36  ;;  %v2301_v20 = vadd.f32 %v2300_v57, %v10034_v44 }
 0x29a   : > { %2924 = vst [vmem:[#allocation3 + $0x3a0] sm:$0xff] %v9045_v36  ;;  %2925 = vst [vmem:[#allocation3 + $0x270] sm:$0xff] %v9045_v36 }
 0x29b   : > { %2926 = vst [vmem:[#allocation3 + $0x208] sm:$0xff] %v9045_v36  ;;  %2927 = vst [vmem:[#allocation3 + $0x50] sm:$0xff] %v9045_v36  ;;  %v2302_v30 = vadd.f32 %v2301_v20, %v10042_v4  ;;  %v10098_v20 = vadd.f32 %v9952_v47, %v2067_v63  ;;  %v10122_v63 = vadd.f32 %v9952_v47, %v2073_v27 }
 0x29c   : > { %2928 = vst [vmem:[#allocation3 + $0xd0] sm:$0xff] %v9045_v36  ;;  %2929 = vst [vmem:[#allocation3 + $0x1d8] sm:$0xff] %v9045_v36  ;;  %v10138_v27 = vadd.f32 %v9952_v47, %v2077_v15 }
 0x29d   : > { %2930 = vst [vmem:[#allocation3 + $0x70] sm:$0xff] %v9045_v36  ;;  %2931 = vst [vmem:[#allocation3 + $0x350] sm:$0xff] %v9045_v36  ;;  %v2303_v38 = vadd.f32 %v2302_v30, %v10050_v2  ;;  %v2071_v30 = vld [vmem:[#allocation2 + $0x1d0] sm:$0xff] }
 0x29e   : > { %2932 = vst [vmem:[#allocation3 + $0x378] sm:$0xff] %v9045_v36  ;;  %2933 = vst [vmem:[#allocation3 + $0x38] sm:$0xff] %v9045_v36 }
 0x29f   : > { %2934 = vst [vmem:[#allocation3 + $0x3c8] sm:$0xff] %v9045_v36  ;;  %2935 = vst [vmem:[#allocation3 + $0x2b8] sm:$0xff] %v9045_v36  ;;  %v2304_v48 = vadd.f32 %v2303_v38, %v10058_v11 }
 0x2a0   : > { %2936 = vst [vmem:[#allocation3 + $0x3d0] sm:$0xff] %v9045_v36  ;;  %2937 = vst [vmem:[#allocation3 + $0x118] sm:$0xff] %v9045_v36 }
 0x2a1   : > { %2938 = vst [vmem:[#allocation3 + $0x2e8] sm:$0xff] %v9045_v36  ;;  %2939 = vst [vmem:[#allocation3 + $0x98] sm:$0xff] %v9045_v36  ;;  %v2305_v55 = vadd.f32 %v2304_v48, %v10066_v22  ;;  %v10114_v48 = vadd.f32 %v9952_v47, %v2071_v30 }
 0x2a2   : > { %2940 = vst [vmem:[#allocation3 + $0x250] sm:$0xff] %v9045_v36  ;;  %2941 = vst [vmem:[#allocation3 + $0x278] sm:$0xff] %v9045_v36 }
 0x2a3   : > { %2942 = vst [vmem:[#allocation3 + $0x188] sm:$0xff] %v9045_v36  ;;  %2943 = vst [vmem:[#allocation3 + $0x260] sm:$0xff] %v9045_v36  ;;  %v2306_v57 = vadd.f32 %v2305_v55, %v10074_v29  ;;  %v2075_v55 = vld [vmem:[#allocation2 + $0x290] sm:$0xff] }
 0x2a4   : > { %2944 = vst [vmem:[#allocation3 + $0x8] sm:$0xff] %v9045_v36  ;;  %2945 = vst [vmem:[#allocation3 + $0x10] sm:$0xff] %v9045_v36 }
 0x2a5   : > { %2946 = vst [vmem:[#allocation3 + $0x388] sm:$0xff] %v9045_v36  ;;  %2947 = vst [vmem:[#allocation3 + $0x68] sm:$0xff] %v9045_v36  ;;  %v2307_v8 = vadd.f32 %v2306_v57, %v10082_v39 }
 0x2a6   : > { %2948 = vst [vmem:[#allocation3 + $0x1a0] sm:$0xff] %v9045_v36  ;;  %2949 = vst [vmem:[#allocation3 + $0x390] sm:$0xff] %v9045_v36 }
 0x2a7   : > { %2950 = vst [vmem:[#allocation3 + $0x3f0] sm:$0xff] %v9045_v36  ;;  %2951 = vst [vmem:[#allocation3 + $0x108] sm:$0xff] %v9045_v36  ;;  %v2308_v38 = vadd.f32 %v2307_v8, %v10090_v1  ;;  %v10130_v8 = vadd.f32 %v9952_v47, %v2075_v55 }
 0x2a8   : > { %2952 = vst [vmem:[#allocation3 + $0x2a8] sm:$0xff] %v9045_v36  ;;  %2953 = vst [vmem:[#allocation3 + $0x358] sm:$0xff] %v9045_v36 }
 0x2a9   : > { %2954 = vst [vmem:[#allocation3 + $0x200] sm:$0xff] %v9045_v36  ;;  %2955 = vst [vmem:[#allocation3 + $0x310] sm:$0xff] %v9045_v36  ;;  %v2309_v31 = vadd.f32 %v2308_v38, %v10098_v20  ;;  %v2079_v38 = vld [vmem:[#allocation2 + $0x98] sm:$0xff] }
 0x2aa   : > { %2956 = vst [vmem:[#allocation3 + $0x138] sm:$0xff] %v9045_v36  ;;  %2957 = vst [vmem:[#allocation3 + $0x28] sm:$0xff] %v9045_v36 }
 0x2ab   : > { %2958 = vst [vmem:[#allocation3 + $0x198] sm:$0xff] %v9045_v36  ;;  %2959 = vst [vmem:[#allocation3 + $0x2d0] sm:$0xff] %v9045_v36  ;;  %v2310_v57 = vadd.f32 %v2309_v31, %v10106_v33 }
 0x2ac   : > { %2960 = vst [vmem:[#allocation3 + $0x300] sm:$0xff] %v9045_v36  ;;  %2961 = vst [vmem:[#allocation3 + $0x170] sm:$0xff] %v9045_v36 }
 0x2ad   : > { %2962 = vst [vmem:[#allocation3 + $0x160] sm:$0xff] %v9045_v36  ;;  %2963 = vst [vmem:[#allocation3 + $0x90] sm:$0xff] %v9045_v36  ;;  %v2311_v30 = vadd.f32 %v2310_v57, %v10114_v48 }
 0x2ae   : > { %2964 = vst [vmem:[#allocation3 + $0xf8] sm:$0xff] %v9045_v36  ;;  %2965 = vst [vmem:[#allocation3 + $0x280] sm:$0xff] %v9045_v36 }
 0x2af   : > { %2966 = vst [vmem:[#allocation3 + $0xa0] sm:$0xff] %v9045_v36  ;;  %2967 = vst [vmem:[#allocation3 + $0x1e0] sm:$0xff] %v9045_v36  ;;  %v2312_v31 = vadd.f32 %v2311_v30, %v10122_v63 }
 0x2b0   : > { %2968 = vst [vmem:[#allocation3 + $0x78] sm:$0xff] %v9045_v36  ;;  %2969 = vst [vmem:[#allocation3 + $0x258] sm:$0xff] %v9045_v36 }
 0x2b1   : > { %2970 = vst [vmem:[#allocation3 + $0xe8] sm:$0xff] %v9045_v36  ;;  %2971 = vst [vmem:[#allocation3 + $0x1b8] sm:$0xff] %v9045_v36 }
 0x2b2   : > { %2972 = vst [vmem:[#allocation3 + $0x190] sm:$0xff] %v9045_v36  ;;  %2973 = vst [vmem:[#allocation3 + $0x1d0] sm:$0xff] %v9045_v36 }
 0x2b3   : > { %2974 = vst [vmem:[#allocation3 + $0x1c8] sm:$0xff] %v9045_v36  ;;  %2975 = vst [vmem:[#allocation3 + $0x340] sm:$0xff] %v9045_v36 }
 0x2b4   : > { %2976 = vst [vmem:[#allocation3 + $0x288] sm:$0xff] %v9045_v36  ;;  %2977 = vst [vmem:[#allocation3 + $0x338] sm:$0xff] %v9045_v36 }
 0x2b5   : > { %2978 = vst [vmem:[#allocation3 + $0x228] sm:$0xff] %v9045_v36  ;;  %14772 = vst [vmem:[#allocation23_spill] sm:$0xff] %v9942_v41  ;;  %v2052_v36 = vld [vmem:[#allocation2 + $0xb0] sm:$0xff]  ;;  %v2082_v41 = vld [vmem:[#allocation2 + $0x200] sm:$0xff] }
 0x2b6   : > { %14773 = vst [vmem:[#allocation24_spill] sm:$0xff] %v9945_v42  ;;  %14774 = vst [vmem:[#allocation25_spill] sm:$0xff] %v9976_v0  ;;  %v10039_v51 = vadd.f32 %v9950_v46, %v2052_v36  ;;  %v2081_v42 = vld [vmem:[#allocation2 + $0x2e0] sm:$0xff] }
 0x2b7   : > { %14775 = vst [vmem:[#allocation26_spill] sm:$0xff] %v9983_v5  ;;  %14776 = vst [vmem:[#allocation27_spill] sm:$0xff] %v9986_v23 }
 0x2b8   : > { %14777 = vst [vmem:[#allocation28_spill] sm:$0xff] %v9991_v28  ;;  %14778 = vst [vmem:[#allocation29_spill] sm:$0xff] %v9994_v14  ;;  %v2248_v9 = vadd.f32 %v2247_v3, %v10039_v51  ;;  %v10095_v3 = vadd.f32 %v9950_v46, %v2066_v60  ;;  %v10119_v60 = vadd.f32 %v9950_v46, %v2072_v21 }
 0x2b9   : > { %14779 = vst [vmem:[#allocation30_spill] sm:$0xff] %v9999_v12  ;;  %14780 = vst [vmem:[#allocation31_spill] sm:$0xff] %v10002_v19  ;;  %v10135_v21 = vadd.f32 %v9950_v46, %v2076_v61  ;;  %v2313_v61 = vadd.f32 %v2312_v31, %v10130_v8 }
 0x2ba   : > { %14781 = vst [vmem:[#allocation32_spill] sm:$0xff] %v10007_v24  ;;  %14782 = vst [vmem:[#allocation33_spill] sm:$0xff] %v10010_v40  ;;  %v2249_v16 = vadd.f32 %v2248_v9, %v10047_v18  ;;  %v2070_v9 = vld [vmem:[#allocation2 + $0x258] sm:$0xff] }
 0x2bb   : > { %14783 = vst [vmem:[#allocation34_spill] sm:$0xff] %v10015_v45  ;;  %14784 = vst [vmem:[#allocation35_spill] sm:$0xff] %v10018_v26 }
 0x2bc   : > { %14785 = vst [vmem:[#allocation36_spill] sm:$0xff] %v10023_v50  ;;  %14786 = vst [vmem:[#allocation37_spill] sm:$0xff] %v10026_v37  ;;  %v2250_v32 = vadd.f32 %v2249_v16, %v10055_v25  ;;  %v2126_v50 = vld [vmem:[#allocation2 + $0x168] sm:$0xff] }
 0x2bd   : > { %14787 = vst [vmem:[#allocation38_spill] sm:$0xff] %v10031_v58  ;;  %14788 = vst [vmem:[#allocation39_spill] sm:$0xff] %v10034_v44  ;;  %v2125_v44 = vld [vmem:[#allocation2 + $0x1a8] sm:$0xff] }
 0x2be   : > { %14789 = vst [vmem:[#allocation40_spill] sm:$0xff] %v10039_v51  ;;  %14790 = vst [vmem:[#allocation41_spill] sm:$0xff] %v10042_v4  ;;  %v2251_v36 = vadd.f32 %v2250_v32, %v10063_v35  ;;  %v10111_v32 = vadd.f32 %v9950_v46, %v2070_v9  ;;  %v2123_v4 = vld [vmem:[#allocation2 + $0x128] sm:$0xff]  ;;  %v2124_v51 = vld [vmem:[#allocation2 + $0x60] sm:$0xff]  ;;  %v2235_v37 = vadd.f32 %v9952_v47, %v2125_v44 }
 0x2bf   : > { %14791 = vst [vmem:[#allocation42_spill] sm:$0xff] %v10047_v18  ;;  %14792 = vst [vmem:[#allocation43_spill] sm:$0xff] %v10050_v2  ;;  %v2121_v2 = vld [vmem:[#allocation2 + $0x278] sm:$0xff]  ;;  %v2122_v18 = vld [vmem:[#allocation2 + $0x140] sm:$0xff] }
 0x2c0   : > { %14793 = vst [vmem:[#allocation44_spill] sm:$0xff] %v10055_v25  ;;  %14794 = vst [vmem:[#allocation45_spill] sm:$0xff] %v10058_v11  ;;  %v2252_v10 = vadd.f32 %v2251_v36, %v10071_v43  ;;  %v2074_v36 = vld [vmem:[#allocation2 + $0xc0] sm:$0xff]  ;;  %v2119_v11 = vld [vmem:[#allocation2 + $0x2f8] sm:$0xff] }
 0x2c1   : > { %14795 = vst [vmem:[#allocation46_spill] sm:$0xff] %v10063_v35  ;;  %14796 = vst [vmem:[#allocation47_spill] sm:$0xff] %v10066_v22  ;;  %v2117_v22 = vld [vmem:[#allocation2 + $0xc8] sm:$0xff]  ;;  %v2120_v25 = vld [vmem:[#allocation2 + $0x270] sm:$0xff] }
 0x2c2   : > { %14797 = vst [vmem:[#allocation48_spill] sm:$0xff] %v10071_v43  ;;  %14798 = vst [vmem:[#allocation49_spill] sm:$0xff] %v10074_v29  ;;  %v2253_v7 = vadd.f32 %v2252_v10, %v10079_v53  ;;  %v2115_v29 = vld [vmem:[#allocation2 + $0x50] sm:$0xff]  ;;  %v2116_v43 = vld [vmem:[#allocation2 + $0x120] sm:$0xff] }
 0x2c3   : > { %14799 = vst [vmem:[#allocation50_spill] sm:$0xff] %v10079_v53  ;;  %14800 = vst [vmem:[#allocation51_spill] sm:$0xff] %v10082_v39  ;;  %v2113_v39 = vld [vmem:[#allocation2 + $0x38] sm:$0xff]  ;;  %v2118_v35 = vld [vmem:[#allocation2 + $0x1e8] sm:$0xff] }
 0x2c4   : > { %14801 = vst [vmem:[#allocation52_spill] sm:$0xff] %v10087_v49  ;;  %14802 = vst [vmem:[#allocation53_spill] sm:$0xff] %v10090_v1  ;;  %v2254_v16 = vadd.f32 %v2253_v7, %v10087_v49  ;;  %v10127_v7 = vadd.f32 %v9950_v46, %v2074_v36  ;;  %v2080_v36 = vld [vmem:[#allocation2 + $0x1f8] sm:$0xff]  ;;  %v2111_v1 = vld [vmem:[#allocation2 + $0x20] sm:$0xff] }
 0x2c5   : > { %14803 = vst [vmem:[#allocation54_spill] sm:$0xff] %v10095_v3  ;;  %14804 = vst [vmem:[#allocation55_spill] sm:$0xff] %v10098_v20  ;;  %v10151_v15 = vadd.f32 %v9950_v46, %v2080_v36  ;;  %v2109_v20 = vld [vmem:[#allocation2 + $0xd8] sm:$0xff]  ;;  %v2112_v49 = vld [vmem:[#allocation2 + $0xa8] sm:$0xff] }
 0x2c6   : > { %14805 = vst [vmem:[#allocation56_spill] sm:$0xff] %v10103_v17  ;;  %14806 = vst [vmem:[#allocation57_spill] sm:$0xff] %v10106_v33  ;;  %v2255_v34 = vadd.f32 %v2254_v16, %v10095_v3  ;;  %v2078_v16 = vld [vmem:[#allocation2 + $0xe0] sm:$0xff]  ;;  %v2110_v3 = vld [vmem:[#allocation2 + $0x298] sm:$0xff] }
 0x2c7   : > { %14807 = vst [vmem:[#allocation58_spill] sm:$0xff] %v10111_v32  ;;  %14808 = vst [vmem:[#allocation59_spill] sm:$0xff] %v10114_v48  ;;  %v10143_v55 = vadd.f32 %v9950_v46, %v2078_v16  ;;  %v2083_v48 = vld [vmem:[#allocation2 + $0x2f0] sm:$0xff]  ;;  %v2314_v16 = vadd.f32 %v2313_v61, %v10138_v27  ;;  %v2107_v33 = vld [vmem:[#allocation2 + $0x1e0] sm:$0xff] }
 0x2c8   : > { %14809 = vst [vmem:[#allocation60_spill] sm:$0xff] %v10119_v60  ;;  %14810 = vst [vmem:[#allocation61_spill] sm:$0xff] %v10122_v63  ;;  %v2256_v10 = vadd.f32 %v2255_v34, %v10103_v17  ;;  %v2084_v63 = vld [vmem:[#allocation2 + $0x8] sm:$0xff]  ;;  %v2108_v17 = vld [vmem:[#allocation2 + $0x1d8] sm:$0xff] }
 0x2c9   : > { %14811 = vst [vmem:[#allocation62_spill] sm:$0xff] %v10127_v7  ;;  %14812 = vst [vmem:[#allocation63_spill] sm:$0xff] %v10130_v8  ;;  %v2086_v8 = vld [vmem:[#allocation2 + $0x2c8] sm:$0xff]  ;;  %v2114_v53 = vld [vmem:[#allocation2 + $0x178] sm:$0xff] }
 0x2ca   : > { %v2257_v9 = vadd.f32 %v2256_v10, %v10111_v32  ;;  %14813 = vst [vmem:[#allocation64_spill] sm:$0xff] %v10135_v21  ;;  %14814 = vst [vmem:[#allocation65_spill] sm:$0xff] %v10138_v27  ;;  %v10146_v10 = vadd.f32 %v9952_v47, %v2079_v38  ;;  %v10159_v38 = vadd.f32 %v9950_v46, %v2082_v41  ;;  %v2088_v27 = vld [vmem:[#allocation2 + $0x68] sm:$0xff]  ;;  %v2106_v32 = vld [vmem:[#allocation2 + $0x2d8] sm:$0xff] }
 0x2cb   : > { %14815 = vst [vmem:[#allocation66_spill] sm:$0xff] %v10143_v55  ;;  %14817 = vst [vmem:[#allocation68_spill] sm:$0xff] %v10151_v15 }
 0x2cc   : > { %v2258_v34 = vadd.f32 %v2257_v9, %v10119_v60  ;;  %14816 = vst [vmem:[#allocation67_spill] sm:$0xff] %v10146_v10  ;;  %v10154_v9 = vadd.f32 %v9952_v47, %v2081_v42  ;;  %v2085_v60 = vld [vmem:[#allocation2 + $0x268] sm:$0xff]  ;;  %14819 = vst [vmem:[#allocation70_spill] sm:$0xff] %v10159_v38  ;;  %v2315_v36 = vadd.f32 %v2314_v16, %v10146_v10  ;;  %v2090_v10 = vld [vmem:[#allocation2 + $0x158] sm:$0xff] }
 0x2cd   : > { %v10167_v42 = vadd.f32 %v9950_v46, %v2084_v63 }
 0x2ce   : > { %v2259_v57 = vadd.f32 %v2258_v34, %v10127_v7  ;;  %14818 = vst [vmem:[#allocation69_spill] sm:$0xff] %v10154_v9  ;;  %v10162_v34 = vadd.f32 %v9952_v47, %v2083_v48  ;;  %v2087_v7 = vld [vmem:[#allocation2 + $0x148] sm:$0xff]  ;;  %v2316_v41 = vadd.f32 %v2315_v36, %v10154_v9  ;;  %v10175_v48 = vadd.f32 %v9950_v46, %v2086_v8  ;;  %v2092_v9 = vld [vmem:[#allocation2 + $0x90] sm:$0xff] }
 0x2cf   : > { %14821 = vst [vmem:[#allocation72_spill] sm:$0xff] %v10167_v42 }
 0x2d0   : > { %v2260_v30 = vadd.f32 %v2259_v57, %v10135_v21  ;;  %14820 = vst [vmem:[#allocation71_spill] sm:$0xff] %v10162_v34  ;;  %v10170_v57 = vadd.f32 %v9952_v47, %v2085_v60  ;;  %v2089_v21 = vld [vmem:[#allocation2 + $0x188] sm:$0xff]  ;;  %14823 = vst [vmem:[#allocation74_spill] sm:$0xff] %v10175_v48  ;;  %v2317_v63 = vadd.f32 %v2316_v41, %v10162_v34 }
 0x2d1   : > { %v10183_v60 = vadd.f32 %v9950_v46, %v2088_v27  ;;  %v2094_v34 = vld [vmem:[#allocation2 + $0x208] sm:$0xff] }
 0x2d2   : > { %v2261_v31 = vadd.f32 %v2260_v30, %v10143_v55  ;;  %14822 = vst [vmem:[#allocation73_spill] sm:$0xff] %v10170_v57  ;;  %v10178_v30 = vadd.f32 %v9952_v47, %v2087_v7  ;;  %v2091_v55 = vld [vmem:[#allocation2 + $0x1a0] sm:$0xff]  ;;  %v2318_v8 = vadd.f32 %v2317_v63, %v10170_v57  ;;  %v10191_v7 = vadd.f32 %v9950_v46, %v2090_v10  ;;  %v2096_v57 = vld [vmem:[#allocation2 + $0x238] sm:$0xff] }
 0x2d3   : > { %14825 = vst [vmem:[#allocation76_spill] sm:$0xff] %v10183_v60 }
 0x2d4   : > { %v2262_v61 = vadd.f32 %v2261_v31, %v10151_v15  ;;  %14824 = vst [vmem:[#allocation75_spill] sm:$0xff] %v10178_v30  ;;  %v10186_v31 = vadd.f32 %v9952_v47, %v2089_v21  ;;  %v2093_v15 = vld [vmem:[#allocation2 + $0x118] sm:$0xff]  ;;  %14827 = vst [vmem:[#allocation78_spill] sm:$0xff] %v10191_v7  ;;  %v2319_v27 = vadd.f32 %v2318_v8, %v10178_v30  ;;  %v2098_v30 = vld [vmem:[#allocation2 + $0x248] sm:$0xff] }
 0x2d5   : > { %v10199_v21 = vadd.f32 %v9950_v46, %v2092_v9 }
 0x2d6   : > { %v2263_v16 = vadd.f32 %v2262_v61, %v10159_v38  ;;  %14826 = vst [vmem:[#allocation77_spill] sm:$0xff] %v10186_v31  ;;  %v10194_v61 = vadd.f32 %v9952_v47, %v2091_v55  ;;  %v2095_v38 = vld [vmem:[#allocation2 + $0xb8] sm:$0xff]  ;;  %v2320_v10 = vadd.f32 %v2319_v27, %v10186_v31  ;;  %v10207_v55 = vadd.f32 %v9950_v46, %v2094_v34  ;;  %v2100_v31 = vld [vmem:[#allocation2 + $0x280] sm:$0xff] }
 0x2d7   : > { %14829 = vst [vmem:[#allocation80_spill] sm:$0xff] %v10199_v21 }
 0x2d8   : > { %v2264_v36 = vadd.f32 %v2263_v16, %v10167_v42  ;;  %14828 = vst [vmem:[#allocation79_spill] sm:$0xff] %v10194_v61  ;;  %v10202_v16 = vadd.f32 %v9952_v47, %v2093_v15  ;;  %v2097_v42 = vld [vmem:[#allocation2 + $0x150] sm:$0xff]  ;;  %v2321_v9 = vadd.f32 %v2320_v10, %v10194_v61  ;;  %v10215_v15 = vadd.f32 %v9950_v46, %v2096_v57 }
 0x2d9   : > { %v2102_v61 = vld [vmem:[#allocation2 + $0x110] sm:$0xff] }
 0x2da   : > { %v2265_v41 = vadd.f32 %v2264_v36, %v10175_v48  ;;  %14830 = vst [vmem:[#allocation81_spill] sm:$0xff] %v10202_v16  ;;  %v10210_v36 = vadd.f32 %v9952_v47, %v2095_v38  ;;  %v2099_v48 = vld [vmem:[#allocation2 + $0x2d0] sm:$0xff]  ;;  %v2322_v34 = vadd.f32 %v2321_v9, %v10202_v16  ;;  %v10223_v38 = vadd.f32 %v9950_v46, %v2098_v30 }
 0x2db   : > { %v2104_v16 = vld [vmem:[#allocation2 + $0x1f0] sm:$0xff] }
 0x2dc   : > { %v2266_v63 = vadd.f32 %v2265_v41, %v10183_v60  ;;  %v10218_v41 = vadd.f32 %v9952_v47, %v2097_v42  ;;  %v2101_v60 = vld [vmem:[#allocation2 + $0x2a0] sm:$0xff]  ;;  %v2323_v57 = vadd.f32 %v2322_v34, %v10210_v36  ;;  %v10231_v42 = vadd.f32 %v9950_v46, %v2100_v31 }
 0x2de   : > { %v2267_v8 = vadd.f32 %v2266_v63, %v10191_v7  ;;  %v10226_v63 = vadd.f32 %v9952_v47, %v2099_v48  ;;  %v2103_v7 = vld [vmem:[#allocation2 + $0x58] sm:$0xff]  ;;  %v2324_v30 = vadd.f32 %v2323_v57, %v10218_v41  ;;  %v10239_v48 = vadd.f32 %v9950_v46, %v2102_v61 }
 0x2e0   : > { %v2268_v27 = vadd.f32 %v2267_v8, %v10199_v21  ;;  %v10234_v8 = vadd.f32 %v9952_v47, %v2101_v60  ;;  %v2105_v21 = vld [vmem:[#allocation2 + $0x1c8] sm:$0xff]  ;;  %v2325_v31 = vadd.f32 %v2324_v30, %v10226_v63  ;;  %v10247_v60 = vadd.f32 %v9950_v46, %v2104_v16 }
 0x2e2   : > { %v2269_v10 = vadd.f32 %v2268_v27, %v10207_v55  ;;  %v10242_v27 = vadd.f32 %v9952_v47, %v2103_v7  ;;  %v2326_v61 = vadd.f32 %v2325_v31, %v10234_v8  ;;  %v10255_v7 = vadd.f32 %v9950_v46, %v2106_v32 }
 0x2e4   : > { %v2270_v9 = vadd.f32 %v2269_v10, %v10215_v15  ;;  %v10250_v10 = vadd.f32 %v9952_v47, %v2105_v21  ;;  %v2327_v16 = vadd.f32 %v2326_v61, %v10242_v27  ;;  %v10263_v21 = vadd.f32 %v9950_v46, %v2108_v17 }
 0x2e6   : > { %v2271_v34 = vadd.f32 %v2270_v9, %v10223_v38  ;;  %v10258_v9 = vadd.f32 %v9952_v47, %v2107_v33  ;;  %v2328_v32 = vadd.f32 %v2327_v16, %v10250_v10  ;;  %v10271_v33 = vadd.f32 %v9950_v46, %v2110_v3 }
 0x2e8   : > { %v2272_v57 = vadd.f32 %v2271_v34, %v10231_v42  ;;  %v10266_v34 = vadd.f32 %v9952_v47, %v2109_v20  ;;  %v2329_v17 = vadd.f32 %v2328_v32, %v10258_v9  ;;  %v10279_v20 = vadd.f32 %v9950_v46, %v2112_v49 }
 0x2ea   : > { %v2273_v30 = vadd.f32 %v2272_v57, %v10239_v48  ;;  %v10274_v57 = vadd.f32 %v9952_v47, %v2111_v1  ;;  %v2330_v3 = vadd.f32 %v2329_v17, %v10266_v34  ;;  %v10287_v1 = vadd.f32 %v9950_v46, %v2114_v53 }
 0x2ec   : > { %v2274_v31 = vadd.f32 %v2273_v30, %v10247_v60  ;;  %v10282_v30 = vadd.f32 %v9952_v47, %v2113_v39  ;;  %v2331_v49 = vadd.f32 %v2330_v3, %v10274_v57  ;;  %v10295_v39 = vadd.f32 %v9950_v46, %v2116_v43 }
 0x2ee   : > { %v2275_v61 = vadd.f32 %v2274_v31, %v10255_v7  ;;  %v10290_v31 = vadd.f32 %v9952_v47, %v2115_v29  ;;  %v2332_v53 = vadd.f32 %v2331_v49, %v10282_v30  ;;  %v10303_v29 = vadd.f32 %v9950_v46, %v2118_v35 }
 0x2f0   : > { %v2276_v16 = vadd.f32 %v2275_v61, %v10263_v21  ;;  %v10298_v61 = vadd.f32 %v9952_v47, %v2117_v22  ;;  %v2333_v43 = vadd.f32 %v2332_v53, %v10290_v31  ;;  %v10311_v22 = vadd.f32 %v9950_v46, %v2120_v25 }
 0x2f1   : > { %v2234_v25 = vadd.f32 %v9950_v46, %v2124_v51 }
 0x2f2   : > { %v2277_v32 = vadd.f32 %v2276_v16, %v10271_v33  ;;  %v10306_v16 = vadd.f32 %v9952_v47, %v2119_v11  ;;  %v2334_v35 = vadd.f32 %v2333_v43, %v10298_v61  ;;  %v2232_v11 = vadd.f32 %v9950_v46, %v2122_v18  ;;  %v2127_v43 = vld [vmem:[#allocation2 + $0x218] sm:$0xff] }
 0x2f3   : > { %v2236_v18 = vadd.f32 %v9950_v46, %v2126_v50 }
 0x2f4   : > { %v2278_v17 = vadd.f32 %v2277_v32, %v10279_v20  ;;  %v10314_v32 = vadd.f32 %v9952_v47, %v2121_v2  ;;  %v2335_v58 = vadd.f32 %v2334_v35, %v10306_v16 }
 0x2f6   : > { %v2279_v3 = vadd.f32 %v2278_v17, %v10287_v1  ;;  %v2233_v17 = vadd.f32 %v9952_v47, %v2123_v4  ;;  %v2237_v4 = vadd.f32 %v9952_v47, %v2127_v43 }
 0x2f8   : > { %v2280_v49 = vadd.f32 %v2279_v3, %v10295_v39  ;;  %v2336_v3 = vadd.f32 %v2335_v58, %v10314_v32 }
 0x2fa   : > { %v2281_v53 = vadd.f32 %v2280_v49, %v10303_v29  ;;  %v2337_v45 = vadd.f32 %v2336_v3, %v2233_v17 }
 0x2fc   : > { %v2282_v2 = vadd.f32 %v2281_v53, %v10311_v22  ;;  %v2338_v49 = vadd.f32 %v2337_v45, %v2235_v37 }
 0x2fe   : > { %v2283_v26 = vadd.f32 %v2282_v2, %v2232_v11  ;;  %v2339_v35 = vadd.f32 %v2338_v49, %v2237_v4 }
 0x300   : > { %v2284_v40 = vadd.f32 %v2283_v26, %v2234_v25  ;;  %v2340_v51 = vrot.slane %v2339_v35, 4 }
 0x302   : > { %v2285_v24 = vadd.f32 %v2284_v40, %v2236_v18  ;;  %v2341_v44 = vadd.f32 %v2340_v51, %v2339_v35  ;;  %v14880_v35 = vld [vmem:[#allocation29_spill] sm:$0xff] }
 0x304   : > { %v2286_v19 = vrot.slane %v2285_v24, 4  ;;  %v2342_v53 = vrot.slane %v2341_v44, 2 }
 0x306   : > { %v2287_v12 = vadd.f32 %v2286_v19, %v2285_v24  ;;  %v2343_v58 = vadd.f32 %v2342_v53, %v2341_v44 }
 0x308   : > { %v2288_v14 = vrot.slane %v2287_v12, 2  ;;  %v2344_v5 = vrot.slane %v2343_v58, 1 }
 0x30a   : > { %v2289_v28 = vadd.f32 %v2288_v14, %v2287_v12  ;;  %v2345_v3 = vadd.f32 %v2344_v5, %v2343_v58 }
 0x30c   : > { %v2290_v23 = vrot.slane %v2289_v28, 1  ;;  %v10330_v46 = vmul.f32 0.0025510204, %v2345_v3  ;;  %v14882_v3 = vld [vmem:[#allocation30_spill] sm:$0xff] }
 0x30e   : > { %v2291_v2 = vadd.f32 %v2290_v23, %v2289_v28  ;;  %v10338_v19 = vsub.f32 %v10210_v36, %v10330_v46  ;;  %v10346_v23 = vsub.f32 %v10218_v41, %v10330_v46  ;;  %v10354_v28 = vsub.f32 %v10226_v63, %v10330_v46 }
 0x30f   : > { %v10362_v24 = vsub.f32 %v10234_v8, %v10330_v46  ;;  %v10370_v45 = vsub.f32 %v10242_v27, %v10330_v46  ;;  %v10378_v50 = vsub.f32 %v10250_v10, %v10330_v46  ;;  %v10386_v36 = vsub.f32 %v10258_v9, %v10330_v46 }
 0x310   : > { %v10328_v0 = vmul.f32 0.0025510204, %v2291_v2  ;;  %14832 = vst [vmem:[#allocation83_spill] sm:$0xff] %v10338_v19  ;;  %14834 = vst [vmem:[#allocation85_spill] sm:$0xff] %v10346_v23  ;;  %v10394_v41 = vsub.f32 %v10266_v34, %v10330_v46  ;;  %v10402_v63 = vsub.f32 %v10274_v57, %v10330_v46  ;;  %v10410_v8 = vsub.f32 %v10282_v30, %v10330_v46 }
 0x311   : > { %14836 = vst [vmem:[#allocation87_spill] sm:$0xff] %v10354_v28  ;;  %14838 = vst [vmem:[#allocation89_spill] sm:$0xff] %v10362_v24  ;;  %v10418_v27 = vsub.f32 %v10290_v31, %v10330_v46  ;;  %v10426_v10 = vsub.f32 %v10298_v61, %v10330_v46  ;;  %v10434_v9 = vsub.f32 %v10306_v16, %v10330_v46 }
 0x312   : > { %v10334_v47 = vsub.f32 %v10207_v55, %v10328_v0  ;;  %v10342_v14 = vsub.f32 %v10215_v15, %v10328_v0  ;;  %v10350_v5 = vsub.f32 %v10223_v38, %v10328_v0  ;;  %v10358_v12 = vsub.f32 %v10231_v42, %v10328_v0  ;;  %14840 = vst [vmem:[#allocation91_spill] sm:$0xff] %v10370_v45 }
 0x313   : > { %v10366_v40 = vsub.f32 %v10239_v48, %v10328_v0  ;;  %v10374_v26 = vsub.f32 %v10247_v60, %v10328_v0  ;;  %14842 = vst [vmem:[#allocation93_spill] sm:$0xff] %v10378_v50  ;;  %v10382_v55 = vsub.f32 %v10255_v7, %v10328_v0  ;;  %14844 = vst [vmem:[#allocation95_spill] sm:$0xff] %v10386_v36 }
 0x314   : > { %14831 = vst [vmem:[#allocation82_spill] sm:$0xff] %v10334_v47  ;;  %14833 = vst [vmem:[#allocation84_spill] sm:$0xff] %v10342_v14  ;;  %v10390_v15 = vsub.f32 %v10263_v21, %v10328_v0  ;;  %v10398_v38 = vsub.f32 %v10271_v33, %v10328_v0  ;;  %v10406_v42 = vsub.f32 %v10279_v20, %v10328_v0 }
 0x315   : > { %14835 = vst [vmem:[#allocation86_spill] sm:$0xff] %v10350_v5  ;;  %14837 = vst [vmem:[#allocation88_spill] sm:$0xff] %v10358_v12  ;;  %v10414_v48 = vsub.f32 %v10287_v1, %v10328_v0  ;;  %v10422_v60 = vsub.f32 %v10295_v39, %v10328_v0  ;;  %v10430_v7 = vsub.f32 %v10303_v29, %v10328_v0 }
 0x316   : > { %14839 = vst [vmem:[#allocation90_spill] sm:$0xff] %v10366_v40  ;;  %14841 = vst [vmem:[#allocation92_spill] sm:$0xff] %v10374_v26  ;;  %v10438_v21 = vsub.f32 %v10311_v22, %v10328_v0  ;;  %v10442_v34 = vsub.f32 %v10314_v32, %v10330_v46  ;;  %v10445_v33 = vsub.f32 %v2232_v11, %v10328_v0  ;;  %v14872_v22 = vld [vmem:[#allocation25_spill] sm:$0xff]  ;;  %v14874_v11 = vld [vmem:[#allocation26_spill] sm:$0xff] }
 0x317   : > { %14843 = vst [vmem:[#allocation94_spill] sm:$0xff] %v10382_v55  ;;  %14845 = vst [vmem:[#allocation96_spill] sm:$0xff] %v10390_v15  ;;  %v10448_v57 = vsub.f32 %v2233_v17, %v10330_v46  ;;  %v10451_v20 = vsub.f32 %v2234_v25, %v10328_v0  ;;  %v10454_v30 = vsub.f32 %v2235_v37, %v10330_v46  ;;  %v14876_v17 = vld [vmem:[#allocation27_spill] sm:$0xff] }
 0x318   : > { %14846 = vst [vmem:[#allocation97_spill] sm:$0xff] %v10394_v41  ;;  %14847 = vst [vmem:[#allocation98_spill] sm:$0xff] %v10398_v38  ;;  %v10457_v1 = vsub.f32 %v2236_v18, %v10328_v0  ;;  %v10460_v31 = vsub.f32 %v2237_v4, %v10330_v46  ;;  %v10464_v39 = vsub.f32 %v9955_v52, %v10328_v0  ;;  %v14878_v4 = vld [vmem:[#allocation28_spill] sm:$0xff] }
 0x319   : > { %14848 = vst [vmem:[#allocation99_spill] sm:$0xff] %v10402_v63  ;;  %14849 = vst [vmem:[#allocation100_spill] sm:$0xff] %v10406_v42  ;;  %v10468_v61 = vsub.f32 %v9958_v54, %v10330_v46  ;;  %v10472_v29 = vsub.f32 %v9961_v6, %v10328_v0  ;;  %v10476_v37 = vsub.f32 %v9964_v56, %v10330_v46 }
 0x31a   : > { %14850 = vst [vmem:[#allocation101_spill] sm:$0xff] %v10410_v8  ;;  %14851 = vst [vmem:[#allocation102_spill] sm:$0xff] %v10414_v48  ;;  %v10480_v16 = vsub.f32 %v9967_v59, %v10328_v0  ;;  %v10484_v52 = vsub.f32 %v9970_v13, %v10330_v46  ;;  %v10488_v54 = vsub.f32 %v9973_v62, %v10328_v0 }
 0x31b   : > { %14852 = vst [vmem:[#allocation103_spill] sm:$0xff] %v10418_v27  ;;  %14853 = vst [vmem:[#allocation104_spill] sm:$0xff] %v10422_v60  ;;  %v10492_v6 = vsub.f32 %v14872_v22, %v10330_v46  ;;  %v2447_v56 = vmul.f32 %v10464_v39, %v10464_v39  ;;  %v2448_v32 = vmul.f32 %v10468_v61, %v10468_v61 }
 0x31c   : > { %14854 = vst [vmem:[#allocation105_spill] sm:$0xff] %v10426_v10  ;;  %14855 = vst [vmem:[#allocation106_spill] sm:$0xff] %v10430_v7  ;;  %v2449_v59 = vmul.f32 %v10472_v29, %v10472_v29  ;;  %v2450_v13 = vmul.f32 %v10476_v37, %v10476_v37  ;;  %v10504_v62 = vsub.f32 %v14874_v11, %v10328_v0  ;;  %v14884_v11 = vld [vmem:[#allocation31_spill] sm:$0xff] }
 0x31d   : > { %14856 = vst [vmem:[#allocation107_spill] sm:$0xff] %v10434_v9  ;;  %14857 = vst [vmem:[#allocation108_spill] sm:$0xff] %v10438_v21  ;;  %v10508_v25 = vsub.f32 %v14876_v17, %v10330_v46  ;;  %v2451_v43 = vmul.f32 %v10480_v16, %v10480_v16  ;;  %v2452_v18 = vmul.f32 %v10484_v52, %v10484_v52 }
 0x31e   : > { %14858 = vst [vmem:[#allocation109_spill] sm:$0xff] %v10442_v34  ;;  %14859 = vst [vmem:[#allocation110_spill] sm:$0xff] %v10445_v33  ;;  %v10516_v49 = vsub.f32 %v14878_v4, %v10328_v0  ;;  %v10520_v51 = vsub.f32 %v14880_v35, %v10330_v46  ;;  %v2453_v44 = vmul.f32 %v10488_v54, %v10488_v54 }
 0x31f   : > { %14860 = vst [vmem:[#allocation111_spill] sm:$0xff] %v10448_v57  ;;  %14861 = vst [vmem:[#allocation112_spill] sm:$0xff] %v10451_v20  ;;  %v2454_v53 = vmul.f32 %v10492_v6, %v10492_v6  ;;  %v2545_v58 = vadd.f32 %v2449_v59, %v2447_v56  ;;  %v2599_v2 = vadd.f32 %v2450_v13, %v2448_v32  ;;  %v14888_v32 = vld [vmem:[#allocation33_spill] sm:$0xff] }
 0x320   : > { %14862 = vst [vmem:[#allocation113_spill] sm:$0xff] %v10454_v30  ;;  %14863 = vst [vmem:[#allocation114_spill] sm:$0xff] %v10457_v1  ;;  %v10528_v22 = vsub.f32 %v14882_v3, %v10328_v0  ;;  %v10532_v17 = vsub.f32 %v14884_v11, %v10330_v46  ;;  %v2455_v4 = vmul.f32 %v10504_v62, %v10504_v62 }
 0x321   : > { %14864 = vst [vmem:[#allocation115_spill] sm:$0xff] %v10460_v31  ;;  %14865 = vst [vmem:[#allocation116_spill] sm:$0xff] %v10464_v39  ;;  %v2456_v35 = vmul.f32 %v10508_v25, %v10508_v25  ;;  %v10544_v59 = vsub.f32 %v14888_v32, %v10330_v46  ;;  %v2457_v13 = vmul.f32 %v10516_v49, %v10516_v49 }
 0x322   : > { %14866 = vst [vmem:[#allocation117_spill] sm:$0xff] %v10468_v61  ;;  %14867 = vst [vmem:[#allocation118_spill] sm:$0xff] %v10472_v29  ;;  %v2458_v3 = vmul.f32 %v10520_v51, %v10520_v51  ;;  %v14968_v61 = vld [vmem:[#allocation76_spill] sm:$0xff] }
 0x323   : > { %14868 = vst [vmem:[#allocation119_spill] sm:$0xff] %v10476_v37  ;;  %14869 = vst [vmem:[#allocation120_spill] sm:$0xff] %v10480_v16  ;;  %v14965_v37 = vld [vmem:[#allocation74_spill] sm:$0xff] }
 0x324   : > { %14870 = vst [vmem:[#allocation121_spill] sm:$0xff] %v10484_v52  ;;  %14871 = vst [vmem:[#allocation122_spill] sm:$0xff] %v10488_v54  ;;  %v2546_v54 = vadd.f32 %v2545_v58, %v2451_v43  ;;  %v2600_v52 = vadd.f32 %v2599_v2, %v2452_v18  ;;  %v14892_v18 = vld [vmem:[#allocation35_spill] sm:$0xff]  ;;  %v2459_v58 = vmul.f32 %v10528_v22, %v10528_v22 }
 0x325   : > { %14873 = vst [vmem:[#allocation25_spill] sm:$0xff] %v10492_v6  ;;  %14875 = vst [vmem:[#allocation26_spill] sm:$0xff] %v10504_v62  ;;  %v14886_v6 = vld [vmem:[#allocation32_spill] sm:$0xff]  ;;  %v2460_v2 = vmul.f32 %v10532_v17, %v10532_v17 }
 0x326   : > { %14877 = vst [vmem:[#allocation27_spill] sm:$0xff] %v10508_v25  ;;  %14879 = vst [vmem:[#allocation28_spill] sm:$0xff] %v10516_v49  ;;  %v10540_v56 = vsub.f32 %v14886_v6, %v10328_v0  ;;  %v2547_v11 = vadd.f32 %v2546_v54, %v2453_v44  ;;  %v2601_v62 = vadd.f32 %v2600_v52, %v2454_v53  ;;  %v14890_v25 = vld [vmem:[#allocation34_spill] sm:$0xff]  ;;  %v14896_v52 = vld [vmem:[#allocation37_spill] sm:$0xff] }
 0x327   : > { %14881 = vst [vmem:[#allocation29_spill] sm:$0xff] %v10520_v51  ;;  %14883 = vst [vmem:[#allocation30_spill] sm:$0xff] %v10528_v22  ;;  %v10552_v43 = vsub.f32 %v14890_v25, %v10328_v0  ;;  %v10556_v6 = vsub.f32 %v14892_v18, %v10330_v46  ;;  %v14894_v51 = vld [vmem:[#allocation36_spill] sm:$0xff]  ;;  %v10568_v25 = vsub.f32 %v14896_v52, %v10330_v46 }
 0x328   : > { %14885 = vst [vmem:[#allocation31_spill] sm:$0xff] %v10532_v17  ;;  %14887 = vst [vmem:[#allocation32_spill] sm:$0xff] %v10540_v56  ;;  %v2548_v32 = vadd.f32 %v2547_v11, %v2455_v4  ;;  %v2602_v49 = vadd.f32 %v2601_v62, %v2456_v35  ;;  %v10564_v54 = vsub.f32 %v14894_v51, %v10328_v0  ;;  %v14898_v17 = vld [vmem:[#allocation38_spill] sm:$0xff]  ;;  %v14900_v62 = vld [vmem:[#allocation39_spill] sm:$0xff] }
 0x329   : > { %14889 = vst [vmem:[#allocation33_spill] sm:$0xff] %v10544_v59  ;;  %14891 = vst [vmem:[#allocation34_spill] sm:$0xff] %v10552_v43  ;;  %v2461_v44 = vmul.f32 %v10540_v56, %v10540_v56  ;;  %v2462_v53 = vmul.f32 %v10544_v59, %v10544_v59  ;;  %v10576_v4 = vsub.f32 %v14898_v17, %v10328_v0  ;;  %v14902_v59 = vld [vmem:[#allocation40_spill] sm:$0xff] }
 0x32a   : > { %14893 = vst [vmem:[#allocation35_spill] sm:$0xff] %v10556_v6  ;;  %14895 = vst [vmem:[#allocation36_spill] sm:$0xff] %v10564_v54  ;;  %v2549_v18 = vadd.f32 %v2548_v32, %v2457_v13  ;;  %v2603_v22 = vadd.f32 %v2602_v49, %v2458_v3  ;;  %v10580_v51 = vsub.f32 %v14900_v62, %v10330_v46  ;;  %v14904_v49 = vld [vmem:[#allocation41_spill] sm:$0xff] }
 0x32b   : > { %14897 = vst [vmem:[#allocation37_spill] sm:$0xff] %v10568_v25  ;;  %14899 = vst [vmem:[#allocation38_spill] sm:$0xff] %v10576_v4  ;;  %v2463_v35 = vmul.f32 %v10552_v43, %v10552_v43  ;;  %v2464_v11 = vmul.f32 %v10556_v6, %v10556_v6  ;;  %v10588_v13 = vsub.f32 %v14902_v59, %v10328_v0  ;;  %v14906_v6 = vld [vmem:[#allocation42_spill] sm:$0xff] }
 0x32c   : > { %14901 = vst [vmem:[#allocation39_spill] sm:$0xff] %v10580_v51  ;;  %v2550_v52 = vadd.f32 %v2549_v18, %v2459_v58  ;;  %v2604_v56 = vadd.f32 %v2603_v22, %v2460_v2  ;;  %v10592_v17 = vsub.f32 %v14904_v49, %v10330_v46  ;;  %v2465_v3 = vmul.f32 %v10564_v54, %v10564_v54  ;;  %v14908_v22 = vld [vmem:[#allocation43_spill] sm:$0xff] }
 0x32d   : > { %14903 = vst [vmem:[#allocation40_spill] sm:$0xff] %v10588_v13  ;;  %v2466_v32 = vmul.f32 %v10568_v25, %v10568_v25  ;;  %v10600_v58 = vsub.f32 %v14906_v6, %v10328_v0  ;;  %v10604_v59 = vsub.f32 %v14908_v22, %v10330_v46  ;;  %v2467_v2 = vmul.f32 %v10576_v4, %v10576_v4  ;;  %v14910_v25 = vld [vmem:[#allocation44_spill] sm:$0xff] }
 0x32e   : > { %14905 = vst [vmem:[#allocation41_spill] sm:$0xff] %v10592_v17  ;;  %v2551_v62 = vadd.f32 %v2550_v52, %v2461_v44  ;;  %v2605_v43 = vadd.f32 %v2604_v56, %v2462_v53  ;;  %v2468_v18 = vmul.f32 %v10580_v51, %v10580_v51  ;;  %v10612_v44 = vsub.f32 %v14910_v25, %v10328_v0  ;;  %v14912_v56 = vld [vmem:[#allocation45_spill] sm:$0xff]  ;;  %v14914_v51 = vld [vmem:[#allocation46_spill] sm:$0xff] }
 0x32f   : > { %14907 = vst [vmem:[#allocation42_spill] sm:$0xff] %v10600_v58  ;;  %14909 = vst [vmem:[#allocation43_spill] sm:$0xff] %v10604_v59  ;;  %v10616_v6 = vsub.f32 %v14912_v56, %v10330_v46  ;;  %v2469_v53 = vmul.f32 %v10588_v13, %v10588_v13  ;;  %v2470_v52 = vmul.f32 %v10592_v17, %v10592_v17  ;;  %v14918_v17 = vld [vmem:[#allocation48_spill] sm:$0xff] }
 0x330   : > { %v2552_v49 = vadd.f32 %v2551_v62, %v2463_v35  ;;  %v2606_v54 = vadd.f32 %v2605_v43, %v2464_v11  ;;  %14911 = vst [vmem:[#allocation44_spill] sm:$0xff] %v10612_v44  ;;  %v10624_v35 = vsub.f32 %v14914_v51, %v10328_v0  ;;  %v14916_v43 = vld [vmem:[#allocation47_spill] sm:$0xff]  ;;  %v2471_v11 = vmul.f32 %v10600_v58, %v10600_v58 }
 0x331   : > { %14913 = vst [vmem:[#allocation45_spill] sm:$0xff] %v10616_v6  ;;  %v10628_v25 = vsub.f32 %v14916_v43, %v10330_v46  ;;  %v2472_v62 = vmul.f32 %v10604_v59, %v10604_v59  ;;  %v14922_v59 = vld [vmem:[#allocation50_spill] sm:$0xff] }
 0x332   : > { %v2553_v22 = vadd.f32 %v2552_v49, %v2465_v3  ;;  %v2607_v4 = vadd.f32 %v2606_v54, %v2466_v32  ;;  %14915 = vst [vmem:[#allocation46_spill] sm:$0xff] %v10624_v35  ;;  %v10636_v3 = vsub.f32 %v14918_v17, %v10328_v0  ;;  %v14920_v54 = vld [vmem:[#allocation49_spill] sm:$0xff]  ;;  %v2473_v32 = vmul.f32 %v10612_v44, %v10612_v44 }
 0x333   : > { %14917 = vst [vmem:[#allocation47_spill] sm:$0xff] %v10628_v25  ;;  %v10640_v51 = vsub.f32 %v14920_v54, %v10330_v46  ;;  %v2474_v49 = vmul.f32 %v10616_v6, %v10616_v6  ;;  %v14926_v6 = vld [vmem:[#allocation52_spill] sm:$0xff] }
 0x334   : > { %v2554_v56 = vadd.f32 %v2553_v22, %v2467_v2  ;;  %v2608_v13 = vadd.f32 %v2607_v4, %v2468_v18  ;;  %14919 = vst [vmem:[#allocation48_spill] sm:$0xff] %v10636_v3  ;;  %v10648_v2 = vsub.f32 %v14922_v59, %v10328_v0  ;;  %v14924_v4 = vld [vmem:[#allocation51_spill] sm:$0xff]  ;;  %v2475_v18 = vmul.f32 %v10624_v35, %v10624_v35 }
 0x335   : > { %14921 = vst [vmem:[#allocation49_spill] sm:$0xff] %v10640_v51  ;;  %v10652_v17 = vsub.f32 %v14924_v4, %v10330_v46  ;;  %v2476_v22 = vmul.f32 %v10628_v25, %v10628_v25  ;;  %v14930_v25 = vld [vmem:[#allocation54_spill] sm:$0xff] }
 0x336   : > { %v2555_v43 = vadd.f32 %v2554_v56, %v2469_v53  ;;  %v2609_v58 = vadd.f32 %v2608_v13, %v2470_v52  ;;  %14923 = vst [vmem:[#allocation50_spill] sm:$0xff] %v10648_v2  ;;  %v10660_v53 = vsub.f32 %v14926_v6, %v10328_v0  ;;  %v14928_v13 = vld [vmem:[#allocation53_spill] sm:$0xff]  ;;  %v2477_v52 = vmul.f32 %v10636_v3, %v10636_v3 }
 0x337   : > { %14925 = vst [vmem:[#allocation51_spill] sm:$0xff] %v10652_v17  ;;  %v10664_v59 = vsub.f32 %v14928_v13, %v10330_v46  ;;  %v2478_v56 = vmul.f32 %v10640_v51, %v10640_v51  ;;  %v14934_v51 = vld [vmem:[#allocation56_spill] sm:$0xff] }
 0x338   : > { %v2556_v54 = vadd.f32 %v2555_v43, %v2471_v11  ;;  %v2610_v44 = vadd.f32 %v2609_v58, %v2472_v62  ;;  %14927 = vst [vmem:[#allocation52_spill] sm:$0xff] %v10660_v53  ;;  %v10672_v11 = vsub.f32 %v14930_v25, %v10328_v0  ;;  %v14932_v58 = vld [vmem:[#allocation55_spill] sm:$0xff]  ;;  %v2479_v62 = vmul.f32 %v10648_v2, %v10648_v2 }
 0x339   : > { %14929 = vst [vmem:[#allocation53_spill] sm:$0xff] %v10664_v59  ;;  %v10676_v6 = vsub.f32 %v14932_v58, %v10330_v46  ;;  %v2480_v43 = vmul.f32 %v10652_v17, %v10652_v17  ;;  %v14938_v17 = vld [vmem:[#allocation58_spill] sm:$0xff] }
 0x33a   : > { %v2557_v4 = vadd.f32 %v2556_v54, %v2473_v32  ;;  %v2611_v35 = vadd.f32 %v2610_v44, %v2474_v49  ;;  %14931 = vst [vmem:[#allocation54_spill] sm:$0xff] %v10672_v11  ;;  %v10684_v32 = vsub.f32 %v14934_v51, %v10328_v0  ;;  %v14936_v44 = vld [vmem:[#allocation57_spill] sm:$0xff]  ;;  %v2481_v49 = vmul.f32 %v10660_v53, %v10660_v53 }
 0x33b   : > { %14933 = vst [vmem:[#allocation55_spill] sm:$0xff] %v10676_v6  ;;  %v10688_v25 = vsub.f32 %v14936_v44, %v10330_v46  ;;  %v2482_v54 = vmul.f32 %v10664_v59, %v10664_v59  ;;  %v14942_v59 = vld [vmem:[#allocation60_spill] sm:$0xff] }
 0x33c   : > { %v2558_v13 = vadd.f32 %v2557_v4, %v2475_v18  ;;  %v2612_v3 = vadd.f32 %v2611_v35, %v2476_v22  ;;  %14935 = vst [vmem:[#allocation56_spill] sm:$0xff] %v10684_v32  ;;  %v10696_v18 = vsub.f32 %v14938_v17, %v10328_v0  ;;  %v14940_v35 = vld [vmem:[#allocation59_spill] sm:$0xff]  ;;  %v2483_v22 = vmul.f32 %v10672_v11, %v10672_v11 }
 0x33d   : > { %14937 = vst [vmem:[#allocation57_spill] sm:$0xff] %v10688_v25  ;;  %v10700_v51 = vsub.f32 %v14940_v35, %v10330_v46  ;;  %v2484_v4 = vmul.f32 %v10676_v6, %v10676_v6  ;;  %v14946_v6 = vld [vmem:[#allocation62_spill] sm:$0xff] }
 0x33e   : > { %v2559_v58 = vadd.f32 %v2558_v13, %v2477_v52  ;;  %v2613_v2 = vadd.f32 %v2612_v3, %v2478_v56  ;;  %14939 = vst [vmem:[#allocation58_spill] sm:$0xff] %v10696_v18  ;;  %v10708_v52 = vsub.f32 %v14942_v59, %v10328_v0  ;;  %v14944_v3 = vld [vmem:[#allocation61_spill] sm:$0xff]  ;;  %v2485_v56 = vmul.f32 %v10684_v32, %v10684_v32 }
 0x33f   : > { %14941 = vst [vmem:[#allocation59_spill] sm:$0xff] %v10700_v51  ;;  %v10712_v17 = vsub.f32 %v14944_v3, %v10330_v46  ;;  %v2486_v13 = vmul.f32 %v10688_v25, %v10688_v25  ;;  %v14950_v25 = vld [vmem:[#allocation64_spill] sm:$0xff] }
 0x340   : > { %v2560_v44 = vadd.f32 %v2559_v58, %v2479_v62  ;;  %v2614_v53 = vadd.f32 %v2613_v2, %v2480_v43  ;;  %14943 = vst [vmem:[#allocation60_spill] sm:$0xff] %v10708_v52  ;;  %v10720_v62 = vsub.f32 %v14946_v6, %v10328_v0  ;;  %v14948_v2 = vld [vmem:[#allocation63_spill] sm:$0xff]  ;;  %v2487_v43 = vmul.f32 %v10696_v18, %v10696_v18 }
 0x341   : > { %14945 = vst [vmem:[#allocation61_spill] sm:$0xff] %v10712_v17  ;;  %v10724_v59 = vsub.f32 %v14948_v2, %v10330_v46  ;;  %v2488_v58 = vmul.f32 %v10700_v51, %v10700_v51  ;;  %v14954_v51 = vld [vmem:[#allocation66_spill] sm:$0xff] }
 0x342   : > { %v2561_v35 = vadd.f32 %v2560_v44, %v2481_v49  ;;  %v2615_v11 = vadd.f32 %v2614_v53, %v2482_v54  ;;  %14947 = vst [vmem:[#allocation62_spill] sm:$0xff] %v10720_v62  ;;  %v10732_v49 = vsub.f32 %v14950_v25, %v10328_v0  ;;  %v14952_v53 = vld [vmem:[#allocation65_spill] sm:$0xff]  ;;  %v2489_v54 = vmul.f32 %v10708_v52, %v10708_v52 }
 0x343   : > { %14949 = vst [vmem:[#allocation63_spill] sm:$0xff] %v10724_v59  ;;  %v10736_v6 = vsub.f32 %v14952_v53, %v10330_v46  ;;  %v2490_v44 = vmul.f32 %v10712_v17, %v10712_v17  ;;  %v14956_v17 = vld [vmem:[#allocation68_spill] sm:$0xff] }
 0x344   : > { %v2562_v3 = vadd.f32 %v2561_v35, %v2483_v22  ;;  %v2616_v32 = vadd.f32 %v2615_v11, %v2484_v4  ;;  %14951 = vst [vmem:[#allocation64_spill] sm:$0xff] %v10732_v49  ;;  %v10744_v22 = vsub.f32 %v14954_v51, %v10328_v0  ;;  %v14955_v11 = vld [vmem:[#allocation67_spill] sm:$0xff]  ;;  %v2491_v4 = vmul.f32 %v10720_v62, %v10720_v62 }
 0x345   : > { %14953 = vst [vmem:[#allocation65_spill] sm:$0xff] %v10736_v6  ;;  %v10748_v25 = vsub.f32 %v14955_v11, %v10330_v46  ;;  %v2492_v35 = vmul.f32 %v10724_v59, %v10724_v59  ;;  %v14959_v59 = vld [vmem:[#allocation70_spill] sm:$0xff] }
 0x346   : > { %v2563_v2 = vadd.f32 %v2562_v3, %v2485_v56  ;;  %v2617_v18 = vadd.f32 %v2616_v32, %v2486_v13  ;;  %v10756_v56 = vsub.f32 %v14956_v17, %v10328_v0  ;;  %v14957_v32 = vld [vmem:[#allocation69_spill] sm:$0xff]  ;;  %v2493_v13 = vmul.f32 %v10732_v49, %v10732_v49 }
 0x347   : > { %v10760_v51 = vsub.f32 %v14957_v32, %v10330_v46  ;;  %v2494_v3 = vmul.f32 %v10736_v6, %v10736_v6  ;;  %v14962_v6 = vld [vmem:[#allocation72_spill] sm:$0xff] }
 0x348   : > { %v2564_v53 = vadd.f32 %v2563_v2, %v2487_v43  ;;  %v2618_v52 = vadd.f32 %v2617_v18, %v2488_v58  ;;  %v10768_v43 = vsub.f32 %v14959_v59, %v10328_v0  ;;  %v14960_v18 = vld [vmem:[#allocation71_spill] sm:$0xff]  ;;  %v2495_v58 = vmul.f32 %v10744_v22, %v10744_v22 }
 0x349   : > { %14958 = vst [vmem:[#allocation66_spill] sm:$0xff] %v10760_v51  ;;  %v10772_v17 = vsub.f32 %v14960_v18, %v10330_v46  ;;  %v2496_v2 = vmul.f32 %v10748_v25, %v10748_v25 }
 0x34a   : > { %v2565_v11 = vadd.f32 %v2564_v53, %v2489_v54  ;;  %v2619_v62 = vadd.f32 %v2618_v52, %v2490_v44  ;;  %v10780_v54 = vsub.f32 %v14962_v6, %v10328_v0  ;;  %v14963_v52 = vld [vmem:[#allocation73_spill] sm:$0xff]  ;;  %v2497_v44 = vmul.f32 %v10756_v56, %v10756_v56 }
 0x34b   : > { %14961 = vst [vmem:[#allocation67_spill] sm:$0xff] %v10772_v17  ;;  %v10784_v59 = vsub.f32 %v14963_v52, %v10330_v46  ;;  %v2498_v53 = vmul.f32 %v10760_v51, %v10760_v51 }
 0x34c   : > { %v2566_v32 = vadd.f32 %v2565_v11, %v2491_v4  ;;  %v2620_v49 = vadd.f32 %v2619_v62, %v2492_v35  ;;  %v10792_v4 = vsub.f32 %v14965_v37, %v10328_v0  ;;  %v14967_v62 = vld [vmem:[#allocation75_spill] sm:$0xff]  ;;  %v2499_v35 = vmul.f32 %v10768_v43, %v10768_v43 }
 0x34d   : > { %14964 = vst [vmem:[#allocation68_spill] sm:$0xff] %v10784_v59  ;;  %v10796_v6 = vsub.f32 %v14967_v62, %v10330_v46  ;;  %v2500_v11 = vmul.f32 %v10772_v17, %v10772_v17  ;;  %v14970_v17 = vld [vmem:[#allocation78_spill] sm:$0xff] }
 0x34e   : > { %v2567_v18 = vadd.f32 %v2566_v32, %v2493_v13  ;;  %v2621_v16 = vadd.f32 %v2620_v49, %v2494_v3  ;;  %14966 = vst [vmem:[#allocation69_spill] sm:$0xff] %v10792_v4  ;;  %v10804_v13 = vsub.f32 %v14968_v61, %v10328_v0  ;;  %v14969_v49 = vld [vmem:[#allocation77_spill] sm:$0xff]  ;;  %v2501_v3 = vmul.f32 %v10780_v54, %v10780_v54 }
 0x34f   : > { %v10808_v37 = vsub.f32 %v14969_v49, %v10330_v46  ;;  %v2502_v32 = vmul.f32 %v10784_v59, %v10784_v59  ;;  %v14972_v59 = vld [vmem:[#allocation80_spill] sm:$0xff] }
 0x350   : > { %v2568_v52 = vadd.f32 %v2567_v18, %v2495_v58  ;;  %v2622_v29 = vadd.f32 %v2621_v16, %v2496_v2  ;;  %v10816_v58 = vsub.f32 %v14970_v17, %v10328_v0  ;;  %v14971_v16 = vld [vmem:[#allocation79_spill] sm:$0xff]  ;;  %v2503_v2 = vmul.f32 %v10792_v4, %v10792_v4 }
 0x351   : > { %v10820_v61 = vsub.f32 %v14971_v16, %v10330_v46  ;;  %v2504_v18 = vmul.f32 %v10796_v6, %v10796_v6 }
 0x352   : > { %v2569_v62 = vadd.f32 %v2568_v52, %v2497_v44  ;;  %v2623_v39 = vadd.f32 %v2622_v29, %v2498_v53  ;;  %v10828_v44 = vsub.f32 %v14972_v59, %v10328_v0  ;;  %v14974_v29 = vld [vmem:[#allocation81_spill] sm:$0xff]  ;;  %v2505_v53 = vmul.f32 %v10804_v13, %v10804_v13 }
 0x353   : > { %v10832_v17 = vsub.f32 %v14974_v29, %v10330_v46  ;;  %v2506_v52 = vmul.f32 %v10808_v37, %v10808_v37 }
 0x354   : > { %v2570_v49 = vadd.f32 %v2569_v62, %v2499_v35  ;;  %v2624_v51 = vadd.f32 %v2623_v39, %v2500_v11  ;;  %14973 = vst [vmem:[#allocation70_spill] sm:$0xff] %v10828_v44  ;;  %v2507_v35 = vmul.f32 %v10816_v58, %v10816_v58  ;;  %v2508_v39 = vmul.f32 %v10820_v61, %v10820_v61 }
 0x355   : > { %14975 = vst [vmem:[#allocation71_spill] sm:$0xff] %v10832_v17  ;;  %v2509_v46 = vmul.f32 %v10828_v44, %v10828_v44  ;;  %v2510_v11 = vmul.f32 %v10832_v17, %v10832_v17 }
 0x356   : > { %v2571_v16 = vadd.f32 %v2570_v49, %v2501_v3  ;;  %v2625_v4 = vadd.f32 %v2624_v51, %v2502_v32  ;;  %v2511_v3 = vmul.f32 %v10334_v47, %v10334_v47  ;;  %v2512_v51 = vmul.f32 %v10338_v19, %v10338_v19 }
 0x358   : > { %v2572_v0 = vadd.f32 %v2571_v16, %v2503_v2  ;;  %v2626_v59 = vadd.f32 %v2625_v4, %v2504_v18  ;;  %v2513_v2 = vmul.f32 %v10342_v14, %v10342_v14  ;;  %v2514_v4 = vmul.f32 %v10346_v23, %v10346_v23 }
 0x35a   : > { %v2573_v62 = vadd.f32 %v2572_v0, %v2505_v53  ;;  %v2627_v29 = vadd.f32 %v2626_v59, %v2506_v52  ;;  %v2515_v53 = vmul.f32 %v10350_v5, %v10350_v5  ;;  %v2516_v52 = vmul.f32 %v10354_v28, %v10354_v28 }
 0x35c   : > { %v2574_v32 = vadd.f32 %v2573_v62, %v2507_v35  ;;  %v2628_v49 = vadd.f32 %v2627_v29, %v2508_v39  ;;  %v2517_v35 = vmul.f32 %v10358_v12, %v10358_v12  ;;  %v2518_v39 = vmul.f32 %v10362_v24, %v10362_v24 }
 0x35e   : > { %v2575_v18 = vadd.f32 %v2574_v32, %v2509_v46  ;;  %v2629_v16 = vadd.f32 %v2628_v49, %v2510_v11  ;;  %v2519_v46 = vmul.f32 %v10366_v40, %v10366_v40  ;;  %v2520_v11 = vmul.f32 %v10370_v45, %v10370_v45 }
 0x360   : > { %v2576_v0 = vadd.f32 %v2575_v18, %v2511_v3  ;;  %v2630_v59 = vadd.f32 %v2629_v16, %v2512_v51  ;;  %v2521_v3 = vmul.f32 %v10374_v26, %v10374_v26  ;;  %v2522_v51 = vmul.f32 %v10378_v50, %v10378_v50 }
 0x362   : > { %v2577_v62 = vadd.f32 %v2576_v0, %v2513_v2  ;;  %v2631_v29 = vadd.f32 %v2630_v59, %v2514_v4  ;;  %v2523_v2 = vmul.f32 %v10382_v55, %v10382_v55  ;;  %v2524_v4 = vmul.f32 %v10386_v36, %v10386_v36 }
 0x364   : > { %v2578_v32 = vadd.f32 %v2577_v62, %v2515_v53  ;;  %v2632_v49 = vadd.f32 %v2631_v29, %v2516_v52  ;;  %v2525_v53 = vmul.f32 %v10390_v15, %v10390_v15  ;;  %v2526_v52 = vmul.f32 %v10394_v41, %v10394_v41 }
 0x366   : > { %v2579_v18 = vadd.f32 %v2578_v32, %v2517_v35  ;;  %v2633_v16 = vadd.f32 %v2632_v49, %v2518_v39  ;;  %v2527_v35 = vmul.f32 %v10398_v38, %v10398_v38  ;;  %v2528_v39 = vmul.f32 %v10402_v63, %v10402_v63 }
 0x368   : > { %v2580_v0 = vadd.f32 %v2579_v18, %v2519_v46  ;;  %v2634_v59 = vadd.f32 %v2633_v16, %v2520_v11  ;;  %v2529_v46 = vmul.f32 %v10406_v42, %v10406_v42  ;;  %v2530_v11 = vmul.f32 %v10410_v8, %v10410_v8 }
 0x36a   : > { %v2581_v62 = vadd.f32 %v2580_v0, %v2521_v3  ;;  %v2635_v29 = vadd.f32 %v2634_v59, %v2522_v51  ;;  %v2531_v3 = vmul.f32 %v10414_v48, %v10414_v48  ;;  %v2532_v51 = vmul.f32 %v10418_v27, %v10418_v27 }
 0x36c   : > { %v2582_v32 = vadd.f32 %v2581_v62, %v2523_v2  ;;  %v2636_v49 = vadd.f32 %v2635_v29, %v2524_v4  ;;  %v2533_v2 = vmul.f32 %v10422_v60, %v10422_v60  ;;  %v2534_v4 = vmul.f32 %v10426_v10, %v10426_v10 }
 0x36e   : > { %v2583_v18 = vadd.f32 %v2582_v32, %v2525_v53  ;;  %v2637_v16 = vadd.f32 %v2636_v49, %v2526_v52  ;;  %v2535_v53 = vmul.f32 %v10430_v7, %v10430_v7  ;;  %v2536_v52 = vmul.f32 %v10434_v9, %v10434_v9 }
 0x370   : > { %v2584_v0 = vadd.f32 %v2583_v18, %v2527_v35  ;;  %v2638_v59 = vadd.f32 %v2637_v16, %v2528_v39  ;;  %v2537_v35 = vmul.f32 %v10438_v21, %v10438_v21  ;;  %v2538_v39 = vmul.f32 %v10442_v34, %v10442_v34 }
 0x372   : > { %v2585_v62 = vadd.f32 %v2584_v0, %v2529_v46  ;;  %v2639_v29 = vadd.f32 %v2638_v59, %v2530_v11  ;;  %v2539_v46 = vmul.f32 %v10445_v33, %v10445_v33  ;;  %v2540_v11 = vmul.f32 %v10448_v57, %v10448_v57 }
 0x374   : > { %v2586_v32 = vadd.f32 %v2585_v62, %v2531_v3  ;;  %v2640_v49 = vadd.f32 %v2639_v29, %v2532_v51  ;;  %v2541_v3 = vmul.f32 %v10451_v20, %v10451_v20  ;;  %v2542_v51 = vmul.f32 %v10454_v30, %v10454_v30 }
 0x376   : > { %v2587_v18 = vadd.f32 %v2586_v32, %v2533_v2  ;;  %v2641_v16 = vadd.f32 %v2640_v49, %v2534_v4  ;;  %v2543_v2 = vmul.f32 %v10457_v1, %v10457_v1  ;;  %v2544_v4 = vmul.f32 %v10460_v31, %v10460_v31 }
 0x378   : > { %v2588_v0 = vadd.f32 %v2587_v18, %v2535_v53  ;;  %v2642_v59 = vadd.f32 %v2641_v16, %v2536_v52 }
 0x37a   : > { %v2589_v62 = vadd.f32 %v2588_v0, %v2537_v35  ;;  %v2643_v29 = vadd.f32 %v2642_v59, %v2538_v39 }
 0x37c   : > { %v2590_v32 = vadd.f32 %v2589_v62, %v2539_v46  ;;  %v2644_v49 = vadd.f32 %v2643_v29, %v2540_v11 }
 0x37e   : > { %v2591_v33 = vadd.f32 %v2590_v32, %v2541_v3  ;;  %v2645_v57 = vadd.f32 %v2644_v49, %v2542_v51  ;;  %v9046_v3 = vmov 1983009808   ;;  %v14980_v32 = vld [vmem:[#allocation66_spill] sm:$0xff] }
 0x37f   : > { %v3084_v51 = vunpack.c.l.s4 %v9046_v3 }
 0x380   : > { %v2592_v53 = vadd.f32 %v2591_v33, %v2543_v2  ;;  %v2646_v52 = vadd.f32 %v2645_v57, %v2544_v4  ;;  %v10914_v33 = vld [vmem:[#allocation3 + $0x3e0] sm:$0xff] }
 0x381   : > { %v5668_v57 = vrot.slane %v10914_v33, 1  ;;  %v14995_v63 = vrot.slane %v10914_v33, 2 }
 0x382   : > { %v2593_v18 = vrot.slane %v2592_v53, 4  ;;  %v2647_v16 = vrot.slane %v2646_v52, 4 }
 0x384   : > { %v2594_v20 = vadd.f32 %v2593_v18, %v2592_v53  ;;  %v2648_v34 = vadd.f32 %v2647_v16, %v2646_v52 }
 0x386   : > { %v2595_v21 = vrot.slane %v2594_v20, 2  ;;  %v2649_v30 = vrot.slane %v2648_v34, 2 }
 0x388   : > { %v2596_v35 = vadd.f32 %v2595_v21, %v2594_v20  ;;  %v2650_v39 = vadd.f32 %v2649_v30, %v2648_v34  ;;  %v3085_v34 = vunpack.c.0.s8 %v3084_v51  ;;  %v10919_v20 = vmax.f32 %v10914_v33, %v5668_v57  ;;  %v14984_v57 = vld [vmem:[#allocation116_spill] sm:$0xff]  ;;  %v14985_v51 = vld [vmem:[#allocation117_spill] sm:$0xff] }
 0x38a   : > { %v2597_v0 = vrot.slane %v2596_v35, 1  ;;  %v2651_v59 = vrot.slane %v2650_v39, 1 }
 0x38c   : > { %v2598_v1 = vadd.f32 %v2597_v0, %v2596_v35  ;;  %v2652_v9 = vadd.f32 %v2651_v59, %v2650_v39  ;;  %v14983_v59 = vld [vmem:[#allocation69_spill] sm:$0xff] }
 0x38e   : > { %v2653_v7 = vmul.f32 0.0025510204, %v2598_v1  ;;  %v2654_v31 = vmul.f32 0.0025510204, %v2652_v9 }
 0x390   : > { %v2655_v46 = vadd.f32 1e-05, %v2653_v7  ;;  %v2656_v11 = vadd.f32 1e-05, %v2654_v31  ;;  %v14976_v7 = vld [vmem:[#allocation23_spill] sm:$0xff] }
 0x391   : > { %v10924_v9 = vsub.s32 %v3085_v34, %v14976_v7 }
 0x392   : > { %8785 = vrsqrt.f32 %v2655_v46 }
 0x393   : > { %8787 = vrsqrt.f32 %v2656_v11  ;;  %14977 = vst [vmem:[#allocation72_spill] sm:$0xff] %v10924_v9 }
 0x39f   : > { %v10921_v30 = vpop.eup %8785 }
 0x3a0   : > { %v10926_v1 = vpop.eup %8787  ;;  %v10930_v31 = vmul.f32 %v10921_v30, %v10744_v22  ;;  %v10934_v62 = vmul.f32 %v10921_v30, %v10756_v56  ;;  %v2711_v29 = vmul.f32 %v10921_v30, %v10768_v43  ;;  %v10940_v2 = vmul.f32 %v10921_v30, %v10780_v54  ;;  %v14981_v22 = vld [vmem:[#allocation67_spill] sm:$0xff]  ;;  %v14982_v56 = vld [vmem:[#allocation68_spill] sm:$0xff] }
 0x3a1   : > { %v10944_v4 = vmul.f32 %v10926_v1, %v10748_v25  ;;  %v10948_v49 = vmul.f32 %v10926_v1, %v14980_v32  ;;  %v2712_v53 = vmul.f32 %v10926_v1, %v14981_v22  ;;  %v10954_v52 = vmul.f32 %v10926_v1, %v14982_v56 }
 0x3a2   : > { %14978 = vst [vmem:[#allocation73_spill] sm:$0xff] %v10930_v31  ;;  %v14518_v43 = vmax.f32 %v10930_v31, 0.0  ;;  %v14520_v54 = vmax.f32 %v10934_v62, 0.0  ;;  %v2809_v18 = vmax.f32 %v2711_v29, 0.0  ;;  %v14523_v16 = vmax.f32 %v10940_v2, 0.0 }
 0x3a3   : > { %14979 = vst [vmem:[#allocation74_spill] sm:$0xff] %v10944_v4  ;;  %v14519_v25 = vmax.f32 %v10944_v4, 0.0  ;;  %v14521_v35 = vmax.f32 %v10948_v49, 0.0  ;;  %v2810_v39 = vmax.f32 %v2712_v53, 0.0  ;;  %v14524_v0 = vmax.f32 %v10954_v52, 0.0 }
 0x3a4   : > { %v2715_v46 = vmul.f32 %v10921_v30, %v14983_v59  ;;  %v2716_v11 = vmul.f32 %v10926_v1, %v10796_v6  ;;  %v2659_v3 = vmul.f32 %v10921_v30, %v14984_v57  ;;  %v2660_v34 = vmul.f32 %v10926_v1, %v14985_v51 }
 0x3a5   : > { %v3514_v29 = vcombine.high %v14518_v43, %v14519_v25  ;;  %v3531_v32 = vcombine.low %v14520_v54, %v14521_v35  ;;  %v3549_v22 = vcombine.low %v2809_v18, %v2810_v39  ;;  %v3550_v53 = vcombine.high %v2809_v18, %v2810_v39 }
 0x3a6   : > { %v3567_v6 = vcombine.low %v14523_v16, %v14524_v0  ;;  %v2813_v56 = vmax.f32 %v2715_v46, 0.0  ;;  %v2814_v59 = vmax.f32 %v2716_v11, 0.0  ;;  %v2757_v57 = vmax.f32 %v2659_v3, 0.0 }
 0x3a7   : > { %v3528_v51 = vrot.slane %v3514_v29, %v10924_v9  ;;  %v3539_v21 = vrot.slane %v3531_v32, %v10924_v9  ;;  %v10985_v43 = vrot.slane %v3549_v22, %v10924_v9  ;;  %v3564_v25 = vrot.slane %v3550_v53, %v10924_v9 }
 0x3a8   : > { %v10989_v54 = vrot.slane %v3567_v6, %v10924_v9  ;;  %v3585_v18 = vcombine.low %v2813_v56, %v2814_v59  ;;  %v3586_v39 = vcombine.high %v2813_v56, %v2814_v59  ;;  %v2758_v35 = vmax.f32 %v2660_v34, 0.0 }
 0x3a9   : > { %v3530_v31 = vcombine.high %v3528_v51, %v3528_v51  ;;  %v3547_v16 = vcombine.high %v3539_v21, %v3539_v21  ;;  %v3565_v46 = vcombine.high %v10985_v43, %v10985_v43  ;;  %v3566_v11 = vcombine.high %v3564_v25, %v3564_v25 }
 0x3aa   : > { %v3593_v3 = vrot.slane %v3585_v18, %v10924_v9  ;;  %v3600_v29 = vrot.slane %v3586_v39, %v10924_v9  ;;  %v3081_v32 = vcombine.low %v2757_v57, %v2758_v35  ;;  %v3082_v56 = vcombine.high %v2757_v57, %v2758_v35 }
 0x3ab   : > { %v4453_v22 = vcombine.low %v3528_v51, %v3530_v31  ;;  %v4454_v0 = vcombine.low %v3539_v21, %v3547_v16  ;;  %v4488_v53 = vcombine.low %v3565_v46, %v3564_v25  ;;  %v4489_v6 = vcombine.low %v3566_v11, %v10989_v54 }
 0x3ac   : > { %v3601_v4 = vcombine.high %v3593_v3, %v3593_v3  ;;  %v3602_v10 = vcombine.high %v3600_v29, %v3600_v29  ;;  %v3089_v34 = vrot.slane %v3081_v32, %v10924_v9  ;;  %v3096_v21 = vrot.slane %v3082_v56, %v10924_v9 }
 0x3ad   : > { %v4461_v59 = vrot.slane %v4453_v22, %v10924_v9  ;;  %v4468_v60 = vrot.slane %v4454_v0, %v10924_v9  ;;  %v4496_v27 = vrot.slane %v4488_v53, %v10924_v9  ;;  %v4503_v18 = vrot.slane %v4489_v6, %v10924_v9  ;;  %v14988_v6 = vld [vmem:[#allocation119_spill] sm:$0xff] }
 0x3ae   : > { %v4523_v39 = vcombine.low %v3593_v3, %v3601_v4  ;;  %v4524_v48 = vcombine.low %v3600_v29, %v3602_v10  ;;  %v3097_v31 = vcombine.high %v3089_v34, %v3089_v34  ;;  %v3098_v11 = vcombine.high %v3096_v21, %v3096_v21 }
 0x3af   : > { %v4469_v16 = vcombine.low %v4461_v59, %v4468_v60  ;;  %v4470_v25 = vcombine.high %v4461_v59, %v4468_v60  ;;  %v4504_v51 = vcombine.low %v4496_v27, %v4503_v18  ;;  %v4505_v46 = vcombine.high %v4496_v27, %v4503_v18  ;;  %v14990_v18 = vld [vmem:[#allocation121_spill] sm:$0xff] }
 0x3b0   : > { %v4531_v35 = vrot.slane %v4523_v39, %v10924_v9  ;;  %v4538_v57 = vrot.slane %v4524_v48, %v10924_v9  ;;  %v3963_v32 = vcombine.low %v3089_v34, %v3097_v31  ;;  %v3964_v29 = vcombine.low %v3096_v21, %v3098_v11  ;;  %v14987_v48 = vld [vmem:[#allocation118_spill] sm:$0xff]  ;;  %v14989_v34 = vld [vmem:[#allocation120_spill] sm:$0xff] }
 0x3b1   : > { %v11004_v0 = vrot.slane %v4469_v16, 7  ;;  %v11006_v22 = vrot.slane %v4470_v25, 7  ;;  %v11008_v53 = vrot.slane %v4504_v51, 7  ;;  %v11010_v10 = vrot.slane %v4505_v46, 7  ;;  %v14993_v25 = vld [vmem:[#allocation122_spill] sm:$0xff] }
 0x3b2   : > { %v4539_v4 = vcombine.low %v4531_v35, %v4538_v57  ;;  %v4540_v3 = vcombine.high %v4531_v35, %v4538_v57  ;;  %v3971_v60 = vrot.slane %v3963_v32, %v10924_v9  ;;  %v2661_v27 = vmul.f32 %v10921_v30, %v14987_v48 }
 0x3b3   : > { %14986 = vst [vmem:[#allocation75_spill] sm:$0xff] %v11010_v10  ;;  %5281 = vst [vmem:[#allocation3 + $0x268] sm:$0xfe] %v11004_v0  ;;  %v2662_v56 = vmul.f32 %v10926_v1, %v14988_v6  ;;  %v2663_v59 = vmul.f32 %v10921_v30, %v14989_v34  ;;  %v2664_v39 = vmul.f32 %v10926_v1, %v14990_v18  ;;  %v14994_v6 = vld [vmem:[#allocation25_spill] sm:$0xff] }
 0x3b4   : > { %5282 = vst [vmem:[#allocation3 + $0x3a0] sm:$0xfe] %v11006_v22  ;;  %5285 = vst [vmem:[#allocation3 + $0x50] sm:$0xfe] %v11008_v53  ;;  %v11025_v21 = vrot.slane %v4539_v4, 7  ;;  %v11027_v31 = vrot.slane %v4540_v3, 7  ;;  %v3978_v16 = vrot.slane %v3964_v29, %v10924_v9  ;;  %v2665_v51 = vmul.f32 %v10921_v30, %v14993_v25 }
 0x3b5   : > { %5286 = vst [vmem:[#allocation3 + $0xd0] sm:$0xfe] %v11010_v10  ;;  %v2759_v46 = vmax.f32 %v2661_v27, 0.0  ;;  %v2760_v35 = vmax.f32 %v2662_v56, 0.0  ;;  %v2761_v57 = vmax.f32 %v2663_v59, 0.0  ;;  %v2762_v11 = vmax.f32 %v2664_v39, 0.0 }
 0x3b6   : > { %14991 = vst [vmem:[#allocation76_spill] sm:$0xff] %v11025_v21  ;;  %14992 = vst [vmem:[#allocation77_spill] sm:$0xff] %v11027_v31  ;;  %v3979_v32 = vcombine.low %v3971_v60, %v3978_v16  ;;  %v3980_v48 = vcombine.high %v3971_v60, %v3978_v16  ;;  %v2666_v4 = vmul.f32 %v10926_v1, %v14994_v6  ;;  %v2763_v29 = vmax.f32 %v2665_v51, 0.0  ;;  %v14997_v16 = vld [vmem:[#allocation26_spill] sm:$0xff] }
 0x3b7   : > { %5289 = vst [vmem:[#allocation3 + $0x350] sm:$0xfe] %v11025_v21  ;;  %5290 = vst [vmem:[#allocation3 + $0x378] sm:$0xfe] %v11027_v31  ;;  %v3099_v3 = vcombine.low %v2759_v46, %v2760_v35  ;;  %v3100_v34 = vcombine.high %v2759_v46, %v2760_v35  ;;  %v3117_v18 = vcombine.low %v2761_v57, %v2762_v11  ;;  %v11051_v35 = vsub.s32 2, %v14976_v7 }
 0x3b8   : > { %v4944_v8 = vrot.slane %v3979_v32, 7  ;;  %v4945_v42 = vrot.slane %v3980_v48, 7  ;;  %v3118_v25 = vcombine.high %v2761_v57, %v2762_v11  ;;  %v2764_v27 = vmax.f32 %v2666_v4, 0.0  ;;  %v15000_v32 = vld [vmem:[#allocation27_spill] sm:$0xff] }
 0x3b9   : > { %v3107_v56 = vrot.slane %v3099_v3, %v10924_v9  ;;  %v3114_v59 = vrot.slane %v3100_v34, %v10924_v9  ;;  %v3125_v39 = vrot.slane %v3117_v18, %v10924_v9  ;;  %v11042_v60 = vmax.f32 %v10919_v20, %v14995_v63  ;;  %14999 = vst [vmem:[#allocation80_spill] sm:$0xff] %v11051_v35 }
 0x3ba   : > { %5225 = vst [vmem:[#allocation3 + $0x220] sm:$0xfe] %v4944_v8  ;;  %5226 = vst [vmem:[#allocation3 + $0x360] sm:$0xfe] %v4945_v42  ;;  %v11046_v51 = vmul.f32 %v10921_v30, %v14997_v16  ;;  %v11048_v46 = vld [vmem:[#allocation3 + $0x268] sm:$0xff]  ;;  %v3132_v57 = vrot.slane %v3118_v25, %v10924_v9  ;;  %v3135_v11 = vcombine.low %v2763_v29, %v2764_v27 }
 0x3bb   : > { %14996 = vst [vmem:[#allocation78_spill] sm:$0xff] %v11042_v60  ;;  %14998 = vst [vmem:[#allocation79_spill] sm:$0xff] %v11048_v46  ;;  %v2668_v33 = vmul.f32 %v10926_v1, %v15000_v32  ;;  %v3136_v48 = vcombine.high %v2763_v29, %v2764_v27  ;;  %v3115_v63 = vcombine.high %v3107_v56, %v3107_v56  ;;  %v11058_v34 = vld [vmem:[#allocation3 + $0x3a0] sm:$0xff]  ;;  %v11063_v25 = vld [vmem:[#allocation3 + $0x50] sm:$0xff] }
 0x3bc   : > { %v3116_v20 = vcombine.high %v3114_v59, %v3114_v59  ;;  %v3133_v6 = vcombine.high %v3125_v39, %v3125_v39  ;;  %15001 = vst [vmem:[#allocation81_spill] sm:$0xff] %v11058_v34  ;;  %v2765_v18 = vmax.f32 %v11046_v51, 0.0  ;;  %15002 = vst [vmem:[#allocation23_spill] sm:$0xff] %v11063_v25  ;;  %v3995_v29 = vrot.slane %v3114_v59, %v10924_v9  ;;  %v11078_v26 = vld [vmem:[#allocation3 + $0xd0] sm:$0xff] }
 0x3bd   : > { %v3981_v16 = vcombine.low %v3107_v56, %v3115_v63  ;;  %v3134_v35 = vcombine.high %v3132_v57, %v3132_v57  ;;  %v3143_v38 = vrot.slane %v3135_v11, %v10924_v9  ;;  %v2766_v4 = vmax.f32 %v2668_v33, 0.0  ;;  %v15004_v63 = vld [vmem:[#allocation29_spill] sm:$0xff]  ;;  %15005 = vst [vmem:[#allocation66_spill] sm:$0xff] %v11078_v26 }
 0x3be   : > { %v3998_v27 = vcombine.low %v3116_v20, %v3125_v39  ;;  %v3999_v32 = vcombine.low %v3133_v6, %v3132_v57  ;;  %v3150_v3 = vrot.slane %v3136_v48, %v10924_v9  ;;  %v15003_v39 = vld [vmem:[#allocation28_spill] sm:$0xff]  ;;  %v2670_v11 = vmul.f32 %v10926_v1, %v15004_v63 }
 0x3bf   : > { %v3988_v15 = vrot.slane %v3981_v16, %v10924_v9  ;;  %v2669_v57 = vmul.f32 %v10921_v30, %v15003_v39  ;;  %v3151_v41 = vcombine.high %v3143_v38, %v3143_v38  ;;  %v4016_v16 = vcombine.low %v3134_v35, %v3143_v38 }
 0x3c0   : > { %v4006_v7 = vrot.slane %v3998_v27, %v10924_v9  ;;  %v4013_v51 = vrot.slane %v3999_v32, %v10924_v9  ;;  %v3152_v36 = vcombine.high %v3150_v3, %v3150_v3  ;;  %v3153_v27 = vcombine.low %v2765_v18, %v2766_v4 }
 0x3c1   : > { %v3996_v33 = vcombine.low %v3988_v15, %v3995_v29  ;;  %v3997_v48 = vcombine.high %v3988_v15, %v3995_v29  ;;  %v4023_v59 = vrot.slane %v4016_v16, %v10924_v9  ;;  %v4030_v39 = vrot.slane %v3151_v41, %v10924_v9 }
 0x3c2   : > { %v4014_v20 = vcombine.low %v4006_v7, %v4013_v51  ;;  %v4015_v6 = vcombine.high %v4006_v7, %v4013_v51  ;;  %v3161_v63 = vrot.slane %v3153_v27, %v10924_v9  ;;  %v4033_v45 = vcombine.low %v3150_v3, %v3152_v36  ;;  %v11088_v36 = vld [vmem:[#allocation3 + $0x350] sm:$0xff]  ;;  %v11093_v3 = vld [vmem:[#allocation3 + $0x220] sm:$0xff] }
 0x3c3   : > { %v4946_v55 = vrot.slane %v3996_v33, 7  ;;  %v4948_v32 = vrot.slane %v3997_v48, 7  ;;  %v2767_v38 = vmax.f32 %v2669_v57, 0.0  ;;  %v2768_v35 = vmax.f32 %v2670_v11, 0.0  ;;  %15006 = vst [vmem:[#allocation67_spill] sm:$0xff] %v11088_v36  ;;  %v11095_v27 = vld [vmem:[#allocation3 + $0x360] sm:$0xff] }
 0x3c4   : > { %v4950_v50 = vrot.slane %v4014_v20, 7  ;;  %v4951_v56 = vrot.slane %v4015_v6, 7  ;;  %v4031_v51 = vcombine.low %v4023_v59, %v4030_v39  ;;  %v4032_v33 = vcombine.high %v4023_v59, %v4030_v39 }
 0x3c5   : > { %v4947_v15 = vsel %vm4943_vm2, %v4944_v8, %v4946_v55  ;;  %v4949_v7 = vsel %vm4943_vm2, %v4945_v42, %v4948_v32  ;;  %v3169_v48 = vcombine.high %v3161_v63, %v3161_v63  ;;  %v4041_v55 = vrot.slane %v4033_v45, %v10924_v9  ;;  %v11091_v8 = vld [vmem:[#allocation3 + $0x378] sm:$0xff] }
 0x3c6   : > { %5229 = vst [vmem:[#allocation3 + $0x150] sm:$0xfe] %v4950_v50  ;;  %5230 = vst [vmem:[#allocation3] sm:$0xfe] %v4951_v56  ;;  %v3154_v42 = vcombine.high %v2765_v18, %v2766_v4  ;;  %v4952_v57 = vrot.slane %v4031_v51, 7  ;;  %v4954_v11 = vrot.slane %v4032_v33, 7  ;;  %v3171_v16 = vcombine.low %v2767_v38, %v2768_v35 }
 0x3c7   : > { %5227 = vst [vmem:[#allocation3 + $0x2d8] sm:$0x7f] %v4947_v15  ;;  %5228 = vst [vmem:[#allocation3 + $0x80] sm:$0x7f] %v4949_v7  ;;  %v4034_v6 = vcombine.low %v3161_v63, %v3169_v48  ;;  %v15008_v32 = vld [vmem:[#allocation30_spill] sm:$0xff]  ;;  %v15009_v15 = vld [vmem:[#allocation31_spill] sm:$0xff]  ;;  %v3172_v45 = vcombine.high %v2767_v38, %v2768_v35 }
 0x3c8   : > { %15007 = vst [vmem:[#allocation68_spill] sm:$0xff] %v11091_v8  ;;  %v3168_v59 = vrot.slane %v3154_v42, %v10924_v9  ;;  %v2671_v39 = vmul.f32 %v10921_v30, %v15008_v32  ;;  %v2672_v7 = vmul.f32 %v10926_v1, %v15009_v15  ;;  %v4953_v18 = vsel %vm4943_vm2, %v4950_v50, %v4952_v57 }
 0x3c9   : > { %v4955_v51 = vsel %vm4943_vm2, %v4951_v56, %v4954_v11  ;;  %v4048_v63 = vrot.slane %v4034_v6, %v10924_v9  ;;  %v5584_v42 = vrot.slane %v11093_v3, 1  ;;  %5231 = vst [vmem:[#allocation3 + $0x2a0] sm:$0x7f] %v4953_v18  ;;  %v5587_v15 = vrot.slane %v11095_v27, 1 }
 0x3ca   : > { %5232 = vst [vmem:[#allocation3 + $0xf0] sm:$0x7f] %v4955_v51  ;;  %v3170_v32 = vcombine.high %v3168_v59, %v3168_v59  ;;  %v3179_v4 = vrot.slane %v3171_v16, %v10924_v9  ;;  %v6005_v50 = vrot.slane %v11093_v3, 2  ;;  %v2769_v11 = vmax.f32 %v2671_v39, 0.0 }
 0x3cb   : > { %v4049_v38 = vcombine.low %v4041_v55, %v4048_v63  ;;  %v4050_v35 = vcombine.high %v4041_v55, %v4048_v63  ;;  %v2770_v6 = vmax.f32 %v2672_v7, 0.0  ;;  %v3186_v33 = vrot.slane %v3172_v45, %v10924_v9 }
 0x3cc   : > { %v6008_v48 = vrot.slane %v11095_v27, 2  ;;  %v4051_v16 = vcombine.low %v3168_v59, %v3170_v32  ;;  %v4065_v7 = vrot.slane %v3179_v4, %v10924_v9  ;;  %v3187_v45 = vcombine.high %v3179_v4, %v3179_v4 }
 0x3cd   : > { %v5345_v29 = vld [vmem:[#allocation3 + $0x150] sm:$0xff]  ;;  %v5346_v40 = vld [vmem:[#allocation3] sm:$0xff]  ;;  %v11114_v24 = vrot.slane %v4049_v38, 7  ;;  %v11116_v55 = vrot.slane %v4050_v35, 7  ;;  %v3188_v5 = vcombine.high %v3186_v33, %v3186_v33  ;;  %v3189_v36 = vcombine.low %v2769_v11, %v2770_v6 }
 0x3ce   : > { %v5343_v56 = vld [vmem:[#allocation3 + $0x2d8] sm:$0xff]  ;;  %v5344_v57 = vld [vmem:[#allocation3 + $0x80] sm:$0xff]  ;;  %v5590_v28 = vrot.slane %v5345_v29, 1  ;;  %v6011_v31 = vrot.slane %v5345_v29, 2  ;;  %v3190_v25 = vcombine.high %v2769_v11, %v2770_v6  ;;  %v6014_v46 = vrot.slane %v5346_v40, 2 }
 0x3cf   : > { %v5585_v20 = vrot.slane %v5343_v56, 1  ;;  %v6006_v18 = vrot.slane %v5343_v56, 2  ;;  %v5588_v51 = vrot.slane %v5344_v57, 1  ;;  %v6009_v41 = vrot.slane %v5344_v57, 2  ;;  %5233 = vst [vmem:[#allocation3 + $0x320] sm:$0xfe] %v11114_v24 }
 0x3d0   : > { %5234 = vst [vmem:[#allocation3 + $0x398] sm:$0xfe] %v11116_v55  ;;  %v5347_v32 = vld [vmem:[#allocation3 + $0x2a0] sm:$0xff]  ;;  %v4068_v19 = vcombine.low %v3187_v45, %v3186_v33 }
 0x3d1   : > { %v5586_v63 = vsel %vm5577_vm0, %v5584_v42, %v5585_v20  ;;  %v5589_v39 = vsel %vm5577_vm0, %v5587_v15, %v5588_v51  ;;  %v5884_v12 = vmax.f32 %v5343_v56, %v5585_v20  ;;  %v6007_v35 = vsel %vm5998_vm1, %v6005_v50, %v6006_v18  ;;  %v5348_v15 = vld [vmem:[#allocation3 + $0xf0] sm:$0xff] }
 0x3d2   : > { %v5882_v38 = vmax.f32 %v11093_v3, %v5586_v63  ;;  %v5883_v59 = vmax.f32 %v11095_v27, %v5589_v39  ;;  %v5593_v42 = vrot.slane %v5346_v40, 1  ;;  %v5885_v23 = vmax.f32 %v5344_v57, %v5588_v51 }
 0x3d3   : > { %v6010_v4 = vsel %vm5998_vm1, %v6008_v48, %v6009_v41  ;;  %v5591_v20 = vrot.slane %v5347_v32, 1  ;;  %v4058_v56 = vrot.slane %v4051_v16, %v10924_v9  ;;  %v6012_v21 = vrot.slane %v5347_v32, 2 }
 0x3d4   : > { %v5594_v26 = vrot.slane %v5348_v15, 1  ;;  %v6305_v34 = vmax.f32 %v5884_v12, %v6006_v18  ;;  %v3197_v50 = vrot.slane %v3189_v36, %v10924_v9  ;;  %v6303_v27 = vmax.f32 %v5882_v38, %v6007_v35 }
 0x3d5   : > { %v5592_v3 = vsel %vm5577_vm0, %v5590_v28, %v5591_v20  ;;  %v6304_v63 = vmax.f32 %v5883_v59, %v6010_v4  ;;  %v6015_v57 = vrot.slane %v5348_v15, 2  ;;  %v6306_v51 = vmax.f32 %v5885_v23, %v6009_v41 }
 0x3d6   : > { %v5595_v39 = vsel %vm5577_vm0, %v5593_v42, %v5594_v26  ;;  %v5886_v48 = vmax.f32 %v5345_v29, %v5592_v3  ;;  %v4066_v14 = vcombine.low %v4058_v56, %v4065_v7  ;;  %v5888_v16 = vmax.f32 %v5347_v32, %v5591_v20  ;;  %v11137_v29 = vld [vmem:[#allocation3 + $0x320] sm:$0xff]  ;;  %v15010_v42 = vld [vmem:[#allocation32_spill] sm:$0xff] }
 0x3d7   : > { %v6013_v47 = vsel %vm5998_vm1, %v6011_v31, %v6012_v21  ;;  %v4067_v17 = vcombine.high %v4058_v56, %v4065_v7  ;;  %v4069_v11 = vcombine.low %v3188_v5, %v3197_v50  ;;  %v5887_v6 = vmax.f32 %v5346_v40, %v5595_v39  ;;  %v11165_v4 = vld [vmem:[#allocation3 + $0x398] sm:$0xff] }
 0x3d8   : > { %v5889_v28 = vmax.f32 %v5348_v15, %v5594_v26  ;;  %v3205_v18 = vcombine.high %v3197_v50, %v3197_v50  ;;  %v6419_v36 = vmax.f32 %v11042_v60, %v6303_v27  ;;  %v6421_v38 = vmax.f32 %v11042_v60, %v6305_v34  ;;  %v15011_v50 = vld [vmem:[#allocation33_spill] sm:$0xff] }
 0x3d9   : > { %v6420_v35 = vmax.f32 %v11042_v60, %v6304_v63  ;;  %v6016_v23 = vsel %vm5998_vm1, %v6014_v46, %v6015_v57  ;;  %v6422_v41 = vmax.f32 %v11042_v60, %v6306_v51  ;;  %v11140_v31 = vmax.f32 %v5886_v48, %v6013_v47 }
 0x3da   : > { %v4958_v5 = vrot.slane %v4066_v14, 7  ;;  %v4960_v33 = vrot.slane %v4067_v17, 7  ;;  %v11142_v7 = vmax.f32 %v5888_v16, %v6012_v21  ;;  %v4076_v40 = vrot.slane %v4068_v19, %v10924_v9 }
 0x3db   : > { %v4083_v26 = vrot.slane %v4069_v11, %v10924_v9  ;;  %v3204_v34 = vrot.slane %v3190_v25, %v10924_v9  ;;  %v11147_v45 = vmax.f32 %v5887_v6, %v6016_v23  ;;  %v11149_v59 = vmax.f32 %v5889_v28, %v6015_v57  ;;  %v15013_v57 = vld [vmem:[#allocation34_spill] sm:$0xff] }
 0x3dc   : > { %v5596_v46 = vrot.slane %v11137_v29, 1  ;;  %v2673_v47 = vmul.f32 %v10921_v30, %v15010_v42  ;;  %v4959_v14 = vsel %vm4943_vm2, %v11114_v24, %v4958_v5  ;;  %v4961_v17 = vsel %vm4943_vm2, %v11116_v55, %v4960_v33 }
 0x3dd   : > { %v4084_v19 = vcombine.low %v4076_v40, %v4083_v26  ;;  %v4085_v21 = vcombine.high %v4076_v40, %v4083_v26  ;;  %v11159_v32 = vmax.f32 %v6419_v36, %v11140_v31  ;;  %v11162_v25 = vmax.f32 %v6420_v35, %v11147_v45  ;;  %5235 = vst [vmem:[#allocation3 + $0x60] sm:$0x7f] %v4959_v14  ;;  %v15018_v14 = vld [vmem:[#allocation38_spill] sm:$0xff] }
 0x3de   : > { %v6017_v15 = vrot.slane %v11137_v29, 2  ;;  %5236 = vst [vmem:[#allocation3 + $0x328] sm:$0x7f] %v4961_v17  ;;  %v3206_v20 = vcombine.high %v3204_v34, %v3204_v34  ;;  %v4086_v3 = vcombine.low %v3205_v18, %v3204_v34  ;;  %v2674_v55 = vmul.f32 %v10926_v1, %v15011_v50  ;;  %v15016_v34 = vld [vmem:[#allocation36_spill] sm:$0xff] }
 0x3df   : > { %v4962_v56 = vrot.slane %v4084_v19, 7  ;;  %v4963_v24 = vrot.slane %v4085_v21, 7  ;;  %v11170_v27 = vmax.f32 %v6421_v38, %v11142_v7  ;;  %v2771_v39 = vmax.f32 %v2673_v47, 0.0  ;;  %v15015_v38 = vld [vmem:[#allocation35_spill] sm:$0xff] }
 0x3e0   : > { %v4100_v63 = vrot.slane %v3206_v20, %v10924_v9  ;;  %v2675_v51 = vmul.f32 %v10921_v30, %v15013_v57  ;;  %v5599_v48 = vrot.slane %v11165_v4, 1  ;;  %v6020_v16 = vrot.slane %v11165_v4, 2 }
 0x3e1   : > { %15012 = vst [vmem:[#allocation69_spill] sm:$0xff] %v11170_v27  ;;  %5237 = vst [vmem:[#allocation3 + $0x230] sm:$0xfe] %v4962_v56  ;;  %v4093_v11 = vrot.slane %v4086_v3, %v10924_v9  ;;  %v2772_v6 = vmax.f32 %v2674_v55, 0.0  ;;  %v11179_v28 = vmax.f32 %v6422_v41, %v11149_v59  ;;  %v2676_v35 = vmul.f32 %v10926_v1, %v15015_v38  ;;  %v15017_v41 = vld [vmem:[#allocation37_spill] sm:$0xff] }
 0x3e2   : > { %5238 = vst [vmem:[#allocation3 + $0x3c0] sm:$0xfe] %v4963_v24  ;;  %v2773_v26 = vmax.f32 %v2675_v51, 0.0  ;;  %v11189_v42 = vmul.f32 %v10921_v30, %v15016_v34  ;;  %v11193_v47 = vmul.f32 %v10926_v1, %v15017_v41  ;;  %v11197_v17 = vmul.f32 %v10921_v30, %v15018_v14 }
 0x3e3   : > { %15014 = vst [vmem:[#allocation116_spill] sm:$0xff] %v11179_v28  ;;  %v4101_v23 = vcombine.low %v4093_v11, %v4100_v63  ;;  %v4102_v5 = vcombine.high %v4093_v11, %v4100_v63  ;;  %v3207_v33 = vcombine.low %v2771_v39, %v2772_v6  ;;  %v3208_v40 = vcombine.high %v2771_v39, %v2772_v6 }
 0x3e4   : > { %v5351_v19 = vld [vmem:[#allocation3 + $0x60] sm:$0xff]  ;;  %v2774_v51 = vmax.f32 %v2676_v35, 0.0 }
 0x3e5   : > { %v5352_v21 = vld [vmem:[#allocation3 + $0x328] sm:$0xff]  ;;  %v4964_v20 = vrot.slane %v4101_v23, 7  ;;  %v4966_v3 = vrot.slane %v4102_v5, 7  ;;  %v3215_v50 = vrot.slane %v3207_v33, %v10924_v9  ;;  %v3222_v55 = vrot.slane %v3208_v40, %v10924_v9 }
 0x3e6   : > { %v5597_v63 = vrot.slane %v5351_v19, 1  ;;  %v6018_v39 = vrot.slane %v5351_v19, 2  ;;  %v5600_v57 = vrot.slane %v5352_v21, 1  ;;  %v6021_v11 = vrot.slane %v5352_v21, 2 }
 0x3e7   : > { %v4965_v6 = vsel %vm4943_vm2, %v4962_v56, %v4964_v20  ;;  %v4967_v38 = vsel %vm4943_vm2, %v4963_v24, %v4966_v3  ;;  %v3223_v34 = vcombine.high %v3215_v50, %v3215_v50  ;;  %v3224_v5 = vcombine.high %v3222_v55, %v3222_v55  ;;  %v15019_v20 = vld [vmem:[#allocation39_spill] sm:$0xff] }
 0x3e8   : > { %v5598_v41 = vsel %vm5577_vm0, %v5596_v46, %v5597_v63  ;;  %v5892_v14 = vmax.f32 %v5351_v19, %v5597_v63  ;;  %v5601_v23 = vsel %vm5577_vm0, %v5599_v48, %v5600_v57  ;;  %5239 = vst [vmem:[#allocation3 + $0x140] sm:$0x7f] %v4965_v6  ;;  %5240 = vst [vmem:[#allocation3 + $0x158] sm:$0x7f] %v4967_v38  ;;  %v5353_v56 = vld [vmem:[#allocation3 + $0x230] sm:$0xff]  ;;  %v2775_v3 = vmax.f32 %v11189_v42, 0.0 }
 0x3e9   : > { %v5890_v40 = vmax.f32 %v11137_v29, %v5598_v41  ;;  %v11212_v24 = vmul.f32 %v10926_v1, %v15019_v20  ;;  %v6019_v46 = vsel %vm5998_vm1, %v6017_v15, %v6018_v39  ;;  %v5891_v48 = vmax.f32 %v11165_v4, %v5601_v23  ;;  %v5354_v19 = vld [vmem:[#allocation3 + $0x3c0] sm:$0xff] }
 0x3ea   : > { %v2776_v63 = vmax.f32 %v11193_v47, 0.0  ;;  %v11218_v6 = vmax.f32 %v5892_v14, %v6018_v39  ;;  %v5893_v38 = vmax.f32 %v5352_v21, %v5600_v57  ;;  %v6022_v35 = vsel %vm5998_vm1, %v6020_v16, %v6021_v11 }
 0x3eb   : > { %v5602_v41 = vrot.slane %v5353_v56, 1  ;;  %v4103_v12 = vcombine.low %v3215_v50, %v3223_v34  ;;  %v4104_v20 = vcombine.low %v3222_v55, %v3224_v5  ;;  %v3225_v33 = vcombine.low %v2773_v26, %v2774_v51 }
 0x3ec   : > { %v6311_v36 = vmax.f32 %v5890_v40, %v6019_v46  ;;  %v6023_v15 = vrot.slane %v5353_v56, 2  ;;  %v5605_v18 = vrot.slane %v5354_v19, 1  ;;  %v3226_v4 = vcombine.high %v2773_v26, %v2774_v51 }
 0x3ed   : > { %v6312_v23 = vmax.f32 %v5891_v48, %v6022_v35  ;;  %v4111_v42 = vrot.slane %v4103_v12, %v10924_v9  ;;  %v4118_v47 = vrot.slane %v4104_v20, %v10924_v9  ;;  %v3233_v39 = vrot.slane %v3225_v33, %v10924_v9 }
 0x3ee   : > { %v11227_v21 = vmax.f32 %v5893_v38, %v6021_v11  ;;  %v6026_v57 = vrot.slane %v5354_v19, 2  ;;  %v3240_v34 = vrot.slane %v3226_v4, %v10924_v9  ;;  %v3243_v46 = vcombine.low %v2775_v3, %v2776_v63 }
 0x3ef   : > { %v5355_v50 = vld [vmem:[#allocation3 + $0x140] sm:$0xff]  ;;  %v5356_v55 = vld [vmem:[#allocation3 + $0x158] sm:$0xff]  ;;  %v4119_v35 = vcombine.low %v4111_v42, %v4118_v47  ;;  %v4120_v12 = vcombine.high %v4111_v42, %v4118_v47  ;;  %v3241_v40 = vcombine.high %v3233_v39, %v3233_v39  ;;  %v3244_v38 = vcombine.high %v2775_v3, %v2776_v63 }
 0x3f0   : > { %v5603_v14 = vrot.slane %v5355_v50, 1  ;;  %v6024_v5 = vrot.slane %v5355_v50, 2  ;;  %v5606_v26 = vrot.slane %v5356_v55, 1  ;;  %v6027_v51 = vrot.slane %v5356_v55, 2 }
 0x3f1   : > { %v4135_v11 = vrot.slane %v3240_v34, %v10924_v9  ;;  %v4968_v60 = vrot.slane %v4119_v35, 7  ;;  %v4969_v44 = vrot.slane %v4120_v12, 7  ;;  %v4121_v10 = vcombine.low %v3233_v39, %v3241_v40  ;;  %v15025_v12 = vld [vmem:[#allocation40_spill] sm:$0xff] }
 0x3f2   : > { %v5604_v33 = vsel %vm5577_vm0, %v5602_v41, %v5603_v14  ;;  %v5607_v48 = vsel %vm5577_vm0, %v5605_v18, %v5606_v26  ;;  %v5896_v16 = vmax.f32 %v5355_v50, %v5603_v14  ;;  %v6025_v29 = vsel %vm5998_vm1, %v6023_v15, %v6024_v5 }
 0x3f3   : > { %v5894_v20 = vmax.f32 %v5353_v56, %v5604_v33  ;;  %v5895_v4 = vmax.f32 %v5354_v19, %v5607_v48  ;;  %v6028_v8 = vsel %vm5998_vm1, %v6026_v57, %v6027_v51  ;;  %v6423_v42 = vmax.f32 %v11140_v31, %v6311_v36  ;;  %5241 = vst [vmem:[#allocation3 + $0x128] sm:$0xfe] %v4968_v60 }
 0x3f4   : > { %v6424_v47 = vmax.f32 %v11147_v45, %v6312_v23  ;;  %v5897_v41 = vmax.f32 %v5356_v55, %v5606_v26  ;;  %v2778_v18 = vmax.f32 %v11212_v24, 0.0  ;;  %5242 = vst [vmem:[#allocation3 + $0x18] sm:$0xfe] %v4969_v44  ;;  %v4128_v56 = vrot.slane %v4121_v10, %v10924_v9 }
 0x3f5   : > { %v3242_v3 = vcombine.high %v3240_v34, %v3240_v34  ;;  %v3251_v63 = vrot.slane %v3243_v46, %v10924_v9  ;;  %v3258_v19 = vrot.slane %v3244_v38, %v10924_v9  ;;  %v6426_v15 = vmax.f32 %v11149_v59, %v11227_v21 }
 0x3f6   : > { %v11243_v39 = vmax.f32 %v5894_v20, %v6025_v29  ;;  %v11245_v31 = vmax.f32 %v5895_v4, %v6028_v8  ;;  %v15020_v45 = vmax.f32 %v11197_v17, 0.0  ;;  %v11249_v24 = vmax.f32 %v5896_v16, %v6024_v5 }
 0x3f7   : > { %v4136_v23 = vcombine.low %v4128_v56, %v4135_v11  ;;  %v4137_v57 = vcombine.high %v4128_v56, %v4135_v11  ;;  %v3259_v10 = vcombine.high %v3251_v63, %v3251_v63  ;;  %v11254_v55 = vmax.f32 %v5897_v41, %v6027_v51 }
 0x3f8   : > { %v3261_v36 = vcombine.low %v15020_v45, %v2778_v18  ;;  %v11252_v50 = vmax.f32 %v6423_v42, %v11243_v39  ;;  %v11257_v34 = vmax.f32 %v6424_v47, %v11245_v31  ;;  %v3260_v59 = vcombine.high %v3258_v19, %v3258_v19  ;;  %v15028_v42 = vld [vmem:[#allocation41_spill] sm:$0xff] }
 0x3f9   : > { %v4970_v29 = vrot.slane %v4136_v23, 7  ;;  %v4972_v8 = vrot.slane %v4137_v57, 7  ;;  %v4138_v21 = vcombine.low %v3242_v3, %v3251_v63  ;;  %v4139_v14 = vcombine.low %v3259_v10, %v3258_v19 }
 0x3fa   : > { %v15021_v16 = vcombine.low %v11159_v32, %v11162_v25  ;;  %v15023_v26 = vcombine.high %v11159_v32, %v11162_v25  ;;  %v3269_v35 = vrot.slane %v3261_v36, %v10924_v9  ;;  %v2681_v40 = vmul.f32 %v10921_v30, %v15025_v12  ;;  %v11284_v25 = vld [vmem:[#allocation3 + $0x128] sm:$0xff] }
 0x3fb   : > { %v4971_v46 = vsel %vm4943_vm2, %v4968_v60, %v4970_v29  ;;  %v4973_v33 = vsel %vm4943_vm2, %v4969_v44, %v4972_v8  ;;  %v4146_v48 = vrot.slane %v4138_v21, %v10924_v9  ;;  %v4153_v11 = vrot.slane %v4139_v14, %v10924_v9  ;;  %v5358_v23 = vld [vmem:[#allocation3 + $0x18] sm:$0xff]  ;;  %v15034_v12 = vld [vmem:[#allocation43_spill] sm:$0xff] }
 0x3fc   : > { %v11263_v5 = vrot.slane %v15021_v16, %v10924_v9  ;;  %v11269_v51 = vrot.slane %v15023_v26, %v10924_v9  ;;  %v15026_v38 = vcombine.low %v11170_v27, %v11179_v28  ;;  %5243 = vst [vmem:[#allocation3 + $0x1c0] sm:$0x7f] %v4971_v46  ;;  %5244 = vst [vmem:[#allocation3 + $0x3b0] sm:$0x7f] %v4973_v33  ;;  %v5608_v3 = vrot.slane %v11284_v25, 1 }
 0x3fd   : > { %v3277_v20 = vcombine.high %v3269_v35, %v3269_v35  ;;  %v4156_v4 = vcombine.low %v3260_v59, %v3269_v35  ;;  %v2682_v60 = vmul.f32 %v10926_v1, %v15028_v42  ;;  %v15029_v44 = vmax.f32 %v11142_v7, %v11218_v6  ;;  %v15033_v59 = vld [vmem:[#allocation42_spill] sm:$0xff] }
 0x3fe   : > { %15022 = vst [vmem:[#allocation117_spill] sm:$0xff] %v11263_v5  ;;  %15024 = vst [vmem:[#allocation118_spill] sm:$0xff] %v11269_v51  ;;  %v11282_v32 = vrot.slane %v15026_v38, %v10924_v9  ;;  %v11295_v41 = vmax.f32 %v6426_v15, %v11254_v55  ;;  %v6622_v56 = vcombine.low %v11252_v50, %v11257_v34  ;;  %v2779_v57 = vmax.f32 %v2681_v40, 0.0 }
 0x3ff   : > { %v11292_v47 = vmax.f32 %v15029_v44, %v11249_v24  ;;  %v4154_v63 = vcombine.low %v4146_v48, %v4153_v11  ;;  %v4155_v19 = vcombine.high %v4146_v48, %v4153_v11  ;;  %v4163_v45 = vrot.slane %v4156_v4, %v10924_v9 }
 0x400   : > { %15027 = vst [vmem:[#allocation119_spill] sm:$0xff] %v11282_v32  ;;  %15031 = vst [vmem:[#allocation121_spill] sm:$0xff] %v11295_v41  ;;  %v4170_v36 = vrot.slane %v3277_v20, %v10924_v9  ;;  %v2780_v10 = vmax.f32 %v2682_v60, 0.0  ;;  %v15032_v7 = vmax.f32 %v11197_v17, 0.0  ;;  %v11306_v15 = vmul.f32 %v10921_v30, %v15033_v59 }
 0x401   : > { %15030 = vst [vmem:[#allocation120_spill] sm:$0xff] %v11292_v47  ;;  %v4974_v29 = vrot.slane %v4154_v63, 7  ;;  %v4975_v8 = vrot.slane %v4155_v19, 7  ;;  %v6029_v16 = vrot.slane %v11284_v25, 2  ;;  %v11312_v40 = vmul.f32 %v10926_v1, %v15034_v12 }
 0x402   : > { %v3262_v6 = vcombine.high %v15032_v7, %v2778_v18  ;;  %v4171_v21 = vcombine.low %v4163_v45, %v4170_v36  ;;  %v4172_v14 = vcombine.high %v4163_v45, %v4170_v36  ;;  %v3279_v35 = vcombine.low %v2779_v57, %v2780_v10 }
 0x403   : > { %v5611_v46 = vrot.slane %v5358_v23, 1  ;;  %v6032_v17 = vrot.slane %v5358_v23, 2  ;;  %5245 = vst [vmem:[#allocation3 + $0x3e8] sm:$0xfe] %v4974_v29  ;;  %5246 = vst [vmem:[#allocation3 + $0x2e0] sm:$0xfe] %v4975_v8  ;;  %v3280_v42 = vcombine.high %v2779_v57, %v2780_v10 }
 0x404   : > { %v3276_v26 = vrot.slane %v3262_v6, %v10924_v9  ;;  %v4976_v18 = vrot.slane %v4171_v21, 7  ;;  %v4978_v33 = vrot.slane %v4172_v14, 7  ;;  %v5359_v48 = vld [vmem:[#allocation3 + $0x1c0] sm:$0xff]  ;;  %v5360_v11 = vld [vmem:[#allocation3 + $0x3b0] sm:$0xff]  ;;  %v3287_v20 = vrot.slane %v3279_v35, %v10924_v9 }
 0x405   : > { %v2781_v4 = vmax.f32 %v11306_v15, 0.0  ;;  %v5609_v60 = vrot.slane %v5359_v48, 1  ;;  %v6030_v44 = vrot.slane %v5359_v48, 2  ;;  %v5612_v63 = vrot.slane %v5360_v11, 1 }
 0x406   : > { %v3278_v38 = vcombine.high %v3276_v26, %v3276_v26  ;;  %v6033_v19 = vrot.slane %v5360_v11, 2  ;;  %v4977_v45 = vsel %vm4943_vm2, %v4974_v29, %v4976_v18  ;;  %v4979_v36 = vsel %vm4943_vm2, %v4975_v8, %v4978_v33 }
 0x407   : > { %v3295_v7 = vcombine.high %v3287_v20, %v3287_v20  ;;  %v2782_v6 = vmax.f32 %v11312_v40, 0.0  ;;  %v5610_v59 = vsel %vm5577_vm0, %v5608_v3, %v5609_v60  ;;  %v5900_v21 = vmax.f32 %v5359_v48, %v5609_v60  ;;  %5247 = vst [vmem:[#allocation3 + $0x1b0] sm:$0x7f] %v4977_v45  ;;  %5248 = vst [vmem:[#allocation3 + $0xc0] sm:$0x7f] %v4979_v36  ;;  %v15037_v48 = vld [vmem:[#allocation44_spill] sm:$0xff] }
 0x408   : > { %v6031_v14 = vsel %vm5998_vm1, %v6029_v16, %v6030_v44  ;;  %v5613_v35 = vsel %vm5577_vm0, %v5611_v46, %v5612_v63  ;;  %v5898_v57 = vmax.f32 %v11284_v25, %v5610_v59  ;;  %v5901_v15 = vmax.f32 %v5360_v11, %v5612_v63 }
 0x409   : > { %v5899_v10 = vmax.f32 %v5358_v23, %v5613_v35  ;;  %v4173_v12 = vcombine.low %v3276_v26, %v3278_v38  ;;  %v11323_v29 = vmax.f32 %v5900_v21, %v6030_v44  ;;  %v6034_v8 = vsel %vm5998_vm1, %v6032_v17, %v6033_v19  ;;  %v15038_v38 = vld [vmem:[#allocation45_spill] sm:$0xff] }
 0x40a   : > { %v4174_v18 = vcombine.low %v3287_v20, %v3295_v7  ;;  %v3294_v40 = vrot.slane %v3280_v42, %v10924_v9  ;;  %v11329_v3 = vcombine.high %v11263_v5, %v11263_v5  ;;  %v6319_v46 = vmax.f32 %v5898_v57, %v6031_v14  ;;  %v5361_v33 = vld [vmem:[#allocation3 + $0x3e8] sm:$0xff]  ;;  %v5362_v25 = vld [vmem:[#allocation3 + $0x2e0] sm:$0xff] }
 0x40b   : > { %v3297_v23 = vcombine.low %v2781_v4, %v2782_v6  ;;  %v11334_v26 = vrot.slane %v6622_v56, %v10924_v9  ;;  %v11340_v11 = vmul.f32 %v10921_v30, %v15037_v48  ;;  %v11344_v20 = vmul.f32 %v10926_v1, %v15038_v38 }
 0x40c   : > { %15035 = vst [vmem:[#allocation122_spill] sm:$0xff] %v11329_v3  ;;  %v6320_v60 = vmax.f32 %v5899_v10, %v6034_v8  ;;  %v11348_v44 = vmax.f32 %v5901_v15, %v6033_v19  ;;  %v4181_v56 = vrot.slane %v4173_v12, %v10924_v9  ;;  %v5614_v63 = vrot.slane %v5361_v33, 1 }
 0x40d   : > { %15036 = vst [vmem:[#allocation25_spill] sm:$0xff] %v11334_v26  ;;  %v5617_v45 = vrot.slane %v5362_v25, 1  ;;  %v4188_v36 = vrot.slane %v4174_v18, %v10924_v9  ;;  %v3296_v7 = vcombine.high %v3294_v40, %v3294_v40  ;;  %v6427_v59 = vmax.f32 %v11243_v39, %v6319_v46 }
 0x40e   : > { %v6035_v21 = vrot.slane %v5361_v33, 2  ;;  %v6038_v14 = vrot.slane %v5362_v25, 2  ;;  %v5363_v35 = vld [vmem:[#allocation3 + $0x1b0] sm:$0xff]  ;;  %v5364_v57 = vld [vmem:[#allocation3 + $0xc0] sm:$0xff]  ;;  %v3305_v48 = vrot.slane %v3297_v23, %v10924_v9  ;;  %v3298_v17 = vcombine.high %v2781_v4, %v2782_v6 }
 0x40f   : > { %v5615_v38 = vrot.slane %v5363_v35, 1  ;;  %v6036_v42 = vrot.slane %v5363_v35, 2  ;;  %v5618_v10 = vrot.slane %v5364_v57, 1  ;;  %v6039_v19 = vrot.slane %v5364_v57, 2 }
 0x410   : > { %v4189_v15 = vcombine.low %v4181_v56, %v4188_v36  ;;  %v4190_v8 = vcombine.high %v4181_v56, %v4188_v36  ;;  %v4191_v12 = vcombine.low %v3294_v40, %v3296_v7  ;;  %v4205_v39 = vrot.slane %v3305_v48, %v10924_v9  ;;  %v15039_v7 = vld [vmem:[#allocation46_spill] sm:$0xff] }
 0x411   : > { %v5616_v16 = vsel %vm5577_vm0, %v5614_v63, %v5615_v38  ;;  %v5619_v18 = vsel %vm5577_vm0, %v5617_v45, %v5618_v10  ;;  %v2783_v46 = vmax.f32 %v11340_v11, 0.0  ;;  %v6037_v5 = vsel %vm5998_vm1, %v6035_v21, %v6036_v42 }
 0x412   : > { %v5902_v3 = vmax.f32 %v5361_v33, %v5616_v16  ;;  %v5903_v23 = vmax.f32 %v5362_v25, %v5619_v18  ;;  %v2784_v32 = vmax.f32 %v11344_v20, 0.0  ;;  %v6040_v28 = vsel %vm5998_vm1, %v6038_v14, %v6039_v19 }
 0x413   : > { %v4980_v27 = vrot.slane %v4189_v15, 7  ;;  %v4981_v56 = vrot.slane %v4190_v8, 7  ;;  %v4198_v4 = vrot.slane %v4191_v12, %v10924_v9  ;;  %v6428_v6 = vmax.f32 %v11245_v31, %v6320_v60  ;;  %v15040_v31 = vld [vmem:[#allocation47_spill] sm:$0xff] }
 0x414   : > { %v5904_v40 = vmax.f32 %v5363_v35, %v5615_v38  ;;  %v5905_v63 = vmax.f32 %v5364_v57, %v5618_v10  ;;  %v3312_v45 = vrot.slane %v3298_v17, %v10924_v9  ;;  %v6430_v16 = vmax.f32 %v11254_v55, %v11348_v44 }
 0x415   : > { %5249 = vst [vmem:[#allocation3 + $0x130] sm:$0xfe] %v4980_v27  ;;  %5250 = vst [vmem:[#allocation3 + $0xa8] sm:$0xfe] %v4981_v56  ;;  %v4206_v33 = vcombine.low %v4198_v4, %v4205_v39  ;;  %v4207_v25 = vcombine.high %v4198_v4, %v4205_v39  ;;  %v3313_v11 = vcombine.high %v3305_v48, %v3305_v48 }
 0x416   : > { %v11366_v20 = vmax.f32 %v5902_v3, %v6037_v5  ;;  %v11368_v36 = vmax.f32 %v5903_v23, %v6040_v28  ;;  %v2687_v21 = vmul.f32 %v10921_v30, %v15039_v7  ;;  %v2688_v60 = vmul.f32 %v10926_v1, %v15040_v31 }
 0x417   : > { %v4982_v14 = vrot.slane %v4206_v33, 7  ;;  %v4984_v17 = vrot.slane %v4207_v25, 7  ;;  %v3314_v35 = vcombine.high %v3312_v45, %v3312_v45  ;;  %v3315_v57 = vcombine.low %v2783_v46, %v2784_v32 }
 0x418   : > { %v11374_v55 = vmax.f32 %v5904_v40, %v6036_v42  ;;  %v11377_v44 = vmax.f32 %v6427_v59, %v11366_v20  ;;  %v11379_v48 = vmax.f32 %v5905_v63, %v6039_v19  ;;  %v4208_v5 = vcombine.low %v3313_v11, %v3312_v45  ;;  %v15049_v45 = vld [vmem:[#allocation48_spill] sm:$0xff] }
 0x419   : > { %v11382_v28 = vmax.f32 %v6428_v6, %v11368_v36  ;;  %v4983_v3 = vsel %vm4943_vm2, %v4980_v27, %v4982_v14  ;;  %v4985_v38 = vsel %vm4943_vm2, %v4981_v56, %v4984_v17  ;;  %v3323_v10 = vrot.slane %v3315_v57, %v10924_v9  ;;  %v15051_v14 = vld [vmem:[#allocation50_spill] sm:$0xff] }
 0x41a   : > { %v15041_v42 = vcombine.high %v11252_v50, %v11257_v34  ;;  %v15043_v19 = vcombine.low %v11292_v47, %v11295_v41  ;;  %5251 = vst [vmem:[#allocation3 + $0x40] sm:$0x7f] %v4983_v3  ;;  %5252 = vst [vmem:[#allocation3 + $0x48] sm:$0x7f] %v4985_v38  ;;  %v3316_v27 = vcombine.high %v2783_v46, %v2784_v32  ;;  %v2785_v39 = vmax.f32 %v2687_v21, 0.0 }
 0x41b   : > { %v3331_v12 = vcombine.high %v3323_v10, %v3323_v10  ;;  %v4209_v18 = vcombine.low %v3314_v35, %v3323_v10  ;;  %v2786_v23 = vmax.f32 %v2688_v60, 0.0  ;;  %v11403_v50 = vcombine.high %v11334_v26, %v11334_v26 }
 0x41c   : > { %v11391_v15 = vrot.slane %v15041_v42, %v10924_v9  ;;  %v11399_v8 = vrot.slane %v15043_v19, %v10924_v9  ;;  %v15046_v34 = vmax.f32 %v11249_v24, %v11323_v29  ;;  %v11411_v4 = vld [vmem:[#allocation3 + $0x130] sm:$0xff]  ;;  %v11413_v6 = vld [vmem:[#allocation3 + $0xa8] sm:$0xff]  ;;  %v4216_v32 = vrot.slane %v4208_v5, %v10924_v9 }
 0x41d   : > { %15045 = vst [vmem:[#allocation28_spill] sm:$0xff] %v11403_v50  ;;  %v3330_v46 = vrot.slane %v3316_v27, %v10924_v9  ;;  %v11418_v40 = vmax.f32 %v6430_v16, %v11379_v48  ;;  %v2689_v33 = vmul.f32 %v10921_v30, %v15049_v45  ;;  %v15050_v24 = vld [vmem:[#allocation49_spill] sm:$0xff]  ;;  %v4223_v25 = vrot.slane %v4209_v18, %v10924_v9 }
 0x41e   : > { %15042 = vst [vmem:[#allocation26_spill] sm:$0xff] %v11391_v15  ;;  %15044 = vst [vmem:[#allocation27_spill] sm:$0xff] %v11399_v8  ;;  %v11409_v56 = vmax.f32 %v15046_v34, %v11374_v55  ;;  %v2690_v29 = vmul.f32 %v10926_v1, %v15050_v24  ;;  %v3333_v21 = vcombine.low %v2785_v39, %v2786_v23  ;;  %v5620_v31 = vrot.slane %v11411_v4, 1  ;;  %v15056_v8 = vld [vmem:[#allocation55_spill] sm:$0xff] }
 0x41f   : > { %15048 = vst [vmem:[#allocation30_spill] sm:$0xff] %v11418_v40  ;;  %v3332_v11 = vcombine.high %v3330_v46, %v3330_v46  ;;  %v4226_v7 = vcombine.low %v3331_v12, %v3330_v46  ;;  %v5623_v60 = vrot.slane %v11413_v6, 1  ;;  %v3334_v16 = vcombine.high %v2785_v39, %v2786_v23 }
 0x420   : > { %15047 = vst [vmem:[#allocation29_spill] sm:$0xff] %v11409_v56  ;;  %v11431_v17 = vmul.f32 %v10921_v30, %v15051_v14  ;;  %v4224_v35 = vcombine.low %v4216_v32, %v4223_v25  ;;  %v4225_v57 = vcombine.high %v4216_v32, %v4223_v25  ;;  %v6041_v38 = vrot.slane %v11411_v4, 2 }
 0x421   : > { %v4233_v5 = vrot.slane %v4226_v7, %v10924_v9  ;;  %v4240_v3 = vrot.slane %v3332_v11, %v10924_v9  ;;  %v5367_v10 = vld [vmem:[#allocation3 + $0x40] sm:$0xff]  ;;  %v5368_v42 = vld [vmem:[#allocation3 + $0x48] sm:$0xff]  ;;  %v3341_v19 = vrot.slane %v3333_v21, %v10924_v9  ;;  %v2787_v27 = vmax.f32 %v2689_v33, 0.0 }
 0x422   : > { %v2788_v12 = vmax.f32 %v2690_v29, 0.0  ;;  %v5621_v18 = vrot.slane %v5367_v10, 1  ;;  %v6042_v39 = vrot.slane %v5367_v10, 2  ;;  %v5624_v23 = vrot.slane %v5368_v42, 1  ;;  %v15052_v21 = vld [vmem:[#allocation51_spill] sm:$0xff] }
 0x423   : > { %v3348_v34 = vrot.slane %v3334_v16, %v10924_v9  ;;  %v4986_v46 = vrot.slane %v4224_v35, 7  ;;  %v4987_v45 = vrot.slane %v4225_v57, 7  ;;  %v4241_v32 = vcombine.low %v4233_v5, %v4240_v3 }
 0x424   : > { %v4242_v24 = vcombine.high %v4233_v5, %v4240_v3  ;;  %v6044_v25 = vrot.slane %v11413_v6, 2  ;;  %v5622_v11 = vsel %vm5577_vm0, %v5620_v31, %v5621_v18  ;;  %v5908_v7 = vmax.f32 %v5367_v10, %v5621_v18 }
 0x425   : > { %v5625_v14 = vsel %vm5577_vm0, %v5623_v60, %v5624_v23  ;;  %v6045_v59 = vrot.slane %v5368_v42, 2  ;;  %5253 = vst [vmem:[#allocation3 + $0x1f8] sm:$0xfe] %v4986_v46  ;;  %5254 = vst [vmem:[#allocation3 + $0x88] sm:$0xfe] %v4987_v45  ;;  %v3351_v33 = vcombine.low %v2787_v27, %v2788_v12  ;;  %v3352_v29 = vcombine.high %v2787_v27, %v2788_v12 }
 0x426   : > { %v2692_v63 = vmul.f32 %v10926_v1, %v15052_v21  ;;  %v6043_v16 = vsel %vm5998_vm1, %v6041_v38, %v6042_v39  ;;  %v4988_v35 = vrot.slane %v4241_v32, 7  ;;  %v4990_v57 = vrot.slane %v4242_v24, 7 }
 0x427   : > { %v3349_v5 = vcombine.high %v3341_v19, %v3341_v19  ;;  %v5906_v3 = vmax.f32 %v11411_v4, %v5622_v11  ;;  %v5907_v31 = vmax.f32 %v11413_v6, %v5625_v14  ;;  %v5909_v10 = vmax.f32 %v5368_v42, %v5624_v23 }
 0x428   : > { %v3350_v18 = vcombine.high %v3348_v34, %v3348_v34  ;;  %v11446_v60 = vmax.f32 %v5908_v7, %v6042_v39  ;;  %v4989_v50 = vsel %vm4943_vm2, %v4986_v46, %v4988_v35  ;;  %v4991_v27 = vsel %vm4943_vm2, %v4987_v45, %v4990_v57 }
 0x429   : > { %v4243_v12 = vcombine.low %v3341_v19, %v3349_v5  ;;  %v6046_v32 = vsel %vm5998_vm1, %v6044_v25, %v6045_v59  ;;  %5255 = vst [vmem:[#allocation3 + $0xd8] sm:$0x7f] %v4989_v50  ;;  %5256 = vst [vmem:[#allocation3 + $0x330] sm:$0x7f] %v4991_v27  ;;  %v3359_v42 = vrot.slane %v3351_v33, %v10924_v9  ;;  %v2789_v23 = vmax.f32 %v11431_v17, 0.0  ;;  %v15055_v27 = vld [vmem:[#allocation54_spill] sm:$0xff] }
 0x42a   : > { %v4244_v4 = vcombine.low %v3348_v34, %v3350_v18  ;;  %v3366_v39 = vrot.slane %v3352_v29, %v10924_v9  ;;  %v11461_v46 = vmax.f32 %v5906_v3, %v6043_v16  ;;  %v2790_v24 = vmax.f32 %v2692_v63, 0.0  ;;  %v15053_v29 = vld [vmem:[#allocation52_spill] sm:$0xff]  ;;  %v15054_v63 = vld [vmem:[#allocation53_spill] sm:$0xff] }
 0x42b   : > { %v4251_v6 = vrot.slane %v4243_v12, %v10924_v9  ;;  %v11466_v34 = vmax.f32 %v5907_v31, %v6046_v32  ;;  %v11468_v25 = vmax.f32 %v5909_v10, %v6045_v59  ;;  %v3367_v17 = vcombine.high %v3359_v42, %v3359_v42 }
 0x42c   : > { %v4258_v45 = vrot.slane %v4244_v4, %v10924_v9  ;;  %v11470_v11 = vld [vmem:[#allocation3 + $0x1f8] sm:$0xff]  ;;  %v11472_v7 = vld [vmem:[#allocation3 + $0x88] sm:$0xff]  ;;  %v4275_v14 = vrot.slane %v3366_v39, %v10924_v9  ;;  %v3368_v33 = vcombine.high %v3366_v39, %v3366_v39  ;;  %v11477_v16 = vmul.f32 %v10921_v30, %v15053_v29 }
 0x42d   : > { %v11481_v35 = vmul.f32 %v10926_v1, %v15054_v63  ;;  %v4261_v59 = vcombine.low %v3359_v42, %v3367_v17  ;;  %v3369_v3 = vcombine.low %v2789_v23, %v2790_v24  ;;  %v5626_v31 = vrot.slane %v11470_v11, 1 }
 0x42e   : > { %v4259_v57 = vcombine.low %v4251_v6, %v4258_v45  ;;  %v4260_v5 = vcombine.high %v4251_v6, %v4258_v45  ;;  %v5629_v10 = vrot.slane %v11472_v7, 1  ;;  %v3370_v18 = vcombine.high %v2789_v23, %v2790_v24 }
 0x42f   : > { %v11487_v12 = vmul.f32 %v10921_v30, %v15055_v27  ;;  %v4268_v63 = vrot.slane %v4261_v59, %v10924_v9  ;;  %v3377_v19 = vrot.slane %v3369_v3, %v10924_v9  ;;  %v6047_v6 = vrot.slane %v11470_v11, 2 }
 0x430   : > { %v5371_v32 = vld [vmem:[#allocation3 + $0xd8] sm:$0xff]  ;;  %v5372_v4 = vld [vmem:[#allocation3 + $0x330] sm:$0xff]  ;;  %v4992_v39 = vrot.slane %v4259_v57, 7  ;;  %v4993_v29 = vrot.slane %v4260_v5, 7  ;;  %v6050_v38 = vrot.slane %v11472_v7, 2  ;;  %v3384_v3 = vrot.slane %v3370_v18, %v10924_v9 }
 0x431   : > { %v5627_v42 = vrot.slane %v5371_v32, 1  ;;  %v6048_v45 = vrot.slane %v5371_v32, 2  ;;  %v5630_v17 = vrot.slane %v5372_v4, 1  ;;  %v6051_v23 = vrot.slane %v5372_v4, 2 }
 0x432   : > { %5257 = vst [vmem:[#allocation3 + $0xb8] sm:$0xfe] %v4992_v39  ;;  %5258 = vst [vmem:[#allocation3 + $0x110] sm:$0xfe] %v4993_v29  ;;  %v4276_v24 = vcombine.low %v4268_v63, %v4275_v14  ;;  %v4277_v27 = vcombine.high %v4268_v63, %v4275_v14  ;;  %v3385_v59 = vcombine.high %v3377_v19, %v3377_v19  ;;  %v2791_v21 = vmax.f32 %v11477_v16, 0.0 }
 0x433   : > { %v5628_v50 = vsel %vm5577_vm0, %v5626_v31, %v5627_v42  ;;  %v5912_v57 = vmax.f32 %v5371_v32, %v5627_v42  ;;  %v5631_v5 = vsel %vm5577_vm0, %v5629_v10, %v5630_v17  ;;  %v2792_v26 = vmax.f32 %v11481_v35, 0.0 }
 0x434   : > { %v11500_v41 = vmul.f32 %v10926_v1, %v15056_v8  ;;  %v5910_v47 = vmax.f32 %v11470_v11, %v5628_v50  ;;  %v6049_v14 = vsel %vm5998_vm1, %v6047_v6, %v6048_v45  ;;  %v4994_v63 = vrot.slane %v4276_v24, 7 }
 0x435   : > { %v4996_v31 = vrot.slane %v4277_v27, 7  ;;  %v5911_v32 = vmax.f32 %v11472_v7, %v5631_v5  ;;  %v5913_v10 = vmax.f32 %v5372_v4, %v5630_v17  ;;  %v6052_v42 = vsel %vm5998_vm1, %v6050_v38, %v6051_v23 }
 0x436   : > { %v4278_v18 = vcombine.low %v3368_v33, %v3377_v19  ;;  %v11506_v15 = vmax.f32 %v5912_v57, %v6048_v45  ;;  %v4995_v16 = vsel %vm4943_vm2, %v4992_v39, %v4994_v63  ;;  %v4279_v8 = vcombine.low %v3385_v59, %v3384_v3 }
 0x437   : > { %v4997_v35 = vsel %vm4943_vm2, %v4993_v29, %v4996_v31  ;;  %v15057_v50 = vcombine.low %v11377_v44, %v11382_v28  ;;  %v6431_v7 = vmax.f32 %v11366_v20, %v11461_v46  ;;  %v6432_v38 = vmax.f32 %v11368_v36, %v11466_v34  ;;  %5259 = vst [vmem:[#allocation3 + $0x120] sm:$0x7f] %v4995_v16 }
 0x438   : > { %5260 = vst [vmem:[#allocation3 + $0x30] sm:$0x7f] %v4997_v35  ;;  %v4286_v19 = vrot.slane %v4278_v18, %v10924_v9  ;;  %v4293_v4 = vrot.slane %v4279_v8, %v10924_v9  ;;  %v3387_v39 = vcombine.low %v2791_v21, %v2792_v26  ;;  %v2793_v29 = vmax.f32 %v11487_v12, 0.0 }
 0x439   : > { %v11514_v11 = vrot.slane %v15057_v50, %v10924_v9  ;;  %v5373_v33 = vld [vmem:[#allocation3 + $0xb8] sm:$0xff]  ;;  %v2794_v6 = vmax.f32 %v11500_v41, 0.0  ;;  %v15059_v45 = vcombine.high %v11377_v44, %v11382_v28  ;;  %v6434_v36 = vmax.f32 %v11379_v48, %v11468_v25  ;;  %v5374_v24 = vld [vmem:[#allocation3 + $0x110] sm:$0xff] }
 0x43a   : > { %v11532_v46 = vmax.f32 %v5910_v47, %v6049_v14  ;;  %v11534_v34 = vmax.f32 %v5911_v32, %v6052_v42  ;;  %v15061_v17 = vmax.f32 %v11374_v55, %v11446_v60  ;;  %v11542_v41 = vmax.f32 %v5913_v10, %v6051_v23 }
 0x43b   : > { %15058 = vst [vmem:[#allocation31_spill] sm:$0xff] %v11514_v11  ;;  %v11528_v20 = vrot.slane %v15059_v45, %v10924_v9  ;;  %v3386_v27 = vcombine.high %v3384_v3, %v3384_v3  ;;  %v4294_v44 = vcombine.low %v4286_v19, %v4293_v4  ;;  %v5632_v47 = vrot.slane %v5373_v33, 1 }
 0x43c   : > { %v11540_v12 = vmax.f32 %v15061_v17, %v11506_v15  ;;  %v11545_v28 = vmax.f32 %v6431_v7, %v11532_v46  ;;  %v11548_v48 = vmax.f32 %v6432_v38, %v11534_v34  ;;  %v4295_v25 = vcombine.high %v4286_v19, %v4293_v4 }
 0x43d   : > { %15060 = vst [vmem:[#allocation32_spill] sm:$0xff] %v11528_v20  ;;  %v4998_v57 = vrot.slane %v4294_v44, 7  ;;  %v3395_v5 = vrot.slane %v3387_v39, %v10924_v9  ;;  %v3388_v59 = vcombine.high %v2791_v21, %v2792_v26  ;;  %v3405_v55 = vcombine.low %v2793_v29, %v2794_v6 }
 0x43e   : > { %15062 = vst [vmem:[#allocation33_spill] sm:$0xff] %v11540_v12  ;;  %v6053_v60 = vrot.slane %v5373_v33, 2  ;;  %v5635_v14 = vrot.slane %v5374_v24, 1  ;;  %v6056_v23 = vrot.slane %v5374_v24, 2  ;;  %v4999_v63 = vrot.slane %v4295_v25, 7  ;;  %v5375_v31 = vld [vmem:[#allocation3 + $0x120] sm:$0xff] }
 0x43f   : > { %v5376_v3 = vld [vmem:[#allocation3 + $0x30] sm:$0xff]  ;;  %5261 = vst [vmem:[#allocation3 + $0x1e8] sm:$0xfe] %v4998_v57  ;;  %v3403_v32 = vcombine.high %v3395_v5, %v3395_v5  ;;  %v4296_v10 = vcombine.low %v3386_v27, %v3395_v5  ;;  %v3402_v42 = vrot.slane %v3388_v59, %v10924_v9  ;;  %v3413_v18 = vrot.slane %v3405_v55, %v10924_v9 }
 0x440   : > { %v5633_v16 = vrot.slane %v5375_v31, 1  ;;  %v6054_v35 = vrot.slane %v5375_v31, 2  ;;  %v5636_v8 = vrot.slane %v5376_v3, 1  ;;  %v6057_v50 = vrot.slane %v5376_v3, 2  ;;  %5262 = vst [vmem:[#allocation3 + $0x308] sm:$0xfe] %v4999_v63 }
 0x441   : > { %v4303_v26 = vrot.slane %v4296_v10, %v10924_v9  ;;  %v4310_v21 = vrot.slane %v3403_v32, %v10924_v9  ;;  %v3404_v7 = vcombine.high %v3402_v42, %v3402_v42  ;;  %v3421_v38 = vcombine.high %v3413_v18, %v3413_v18 }
 0x442   : > { %v11556_v19 = vmax.f32 %v6434_v36, %v11542_v41  ;;  %v5634_v4 = vsel %vm5577_vm0, %v5632_v47, %v5633_v16  ;;  %v5916_v39 = vmax.f32 %v5375_v31, %v5633_v16  ;;  %v5637_v45 = vsel %vm5577_vm0, %v5635_v14, %v5636_v8  ;;  %v15066_v31 = vld [vmem:[#allocation56_spill] sm:$0xff] }
 0x443   : > { %v5914_v17 = vmax.f32 %v5373_v33, %v5634_v4  ;;  %v6055_v27 = vsel %vm5998_vm1, %v6053_v60, %v6054_v35  ;;  %v5915_v44 = vmax.f32 %v5374_v24, %v5637_v45  ;;  %v5917_v25 = vmax.f32 %v5376_v3, %v5636_v8  ;;  %v15067_v33 = vld [vmem:[#allocation57_spill] sm:$0xff] }
 0x444   : > { %15063 = vst [vmem:[#allocation34_spill] sm:$0xff] %v11556_v19  ;;  %v6058_v5 = vsel %vm5998_vm1, %v6056_v23, %v6057_v50  ;;  %v4311_v59 = vcombine.low %v4303_v26, %v4310_v21  ;;  %v4312_v55 = vcombine.high %v4303_v26, %v4310_v21  ;;  %v4313_v32 = vcombine.low %v3402_v42, %v3404_v7 }
 0x445   : > { %v15064_v36 = vcombine.low %v11409_v56, %v11418_v40  ;;  %v4314_v47 = vcombine.low %v3413_v18, %v3421_v38  ;;  %v11570_v14 = vmul.f32 %v10921_v30, %v15066_v31  ;;  %v11574_v24 = vmul.f32 %v10926_v1, %v15067_v33 }
 0x446   : > { %v11576_v60 = vmax.f32 %v5914_v17, %v6055_v27  ;;  %v5000_v23 = vrot.slane %v4311_v59, 7  ;;  %v5002_v3 = vrot.slane %v4312_v55, 7  ;;  %v3406_v42 = vcombine.high %v2793_v29, %v2794_v6  ;;  %v5377_v59 = vld [vmem:[#allocation3 + $0x1e8] sm:$0xff] }
 0x447   : > { %v11566_v10 = vrot.slane %v15064_v36, %v10924_v9  ;;  %v11582_v18 = vmax.f32 %v5915_v44, %v6058_v5  ;;  %v4321_v26 = vrot.slane %v4313_v32, %v10924_v9  ;;  %v11587_v7 = vmax.f32 %v5916_v39, %v6054_v35 }
 0x448   : > { %v11589_v38 = vmax.f32 %v5917_v25, %v6057_v50  ;;  %v5001_v4 = vsel %vm4943_vm2, %v4998_v57, %v5000_v23  ;;  %v5003_v29 = vsel %vm4943_vm2, %v4999_v63, %v5002_v3  ;;  %v4328_v6 = vrot.slane %v4314_v47, %v10924_v9 }
 0x449   : > { %15065 = vst [vmem:[#allocation35_spill] sm:$0xff] %v11566_v10  ;;  %5263 = vst [vmem:[#allocation3 + $0x178] sm:$0x7f] %v5001_v4  ;;  %v14583_v45 = vmax.f32 %v11570_v14, 0.0  ;;  %v14584_v17 = vmax.f32 %v11574_v24, 0.0  ;;  %v3420_v35 = vrot.slane %v3406_v42, %v10924_v9  ;;  %v15068_v50 = vmax.f32 %v10948_v49, 0.0 }
 0x44a   : > { %5264 = vst [vmem:[#allocation3 + $0x290] sm:$0x7f] %v5003_v29  ;;  %v15069_v39 = vmax.f32 %v10934_v62, 0.0  ;;  %v15070_v44 = vmax.f32 %v10954_v52, 0.0  ;;  %v15071_v63 = vmax.f32 %v10940_v2, 0.0  ;;  %v6436_v5 = vmax.f32 %v11534_v34, %v11582_v18  ;;  %v5378_v49 = vld [vmem:[#allocation3 + $0x308] sm:$0xff] }
 0x44b   : > { %v4329_v55 = vcombine.low %v4321_v26, %v4328_v6  ;;  %v4330_v32 = vcombine.high %v4321_v26, %v4328_v6  ;;  %v3423_v36 = vcombine.low %v14583_v45, %v14584_v17  ;;  %v3422_v47 = vcombine.high %v3420_v35, %v3420_v35 }
 0x44c   : > { %v3532_v57 = vcombine.high %v15069_v39, %v15068_v50  ;;  %v3568_v25 = vcombine.high %v15071_v63, %v15070_v44  ;;  %v2717_v2 = vmul.f32 %v10921_v30, %v10804_v13  ;;  %v2718_v23 = vmul.f32 %v10926_v1, %v10808_v37 }
 0x44d   : > { %v5004_v31 = vrot.slane %v4329_v55, 7  ;;  %v5005_v33 = vrot.slane %v4330_v32, 7  ;;  %v11618_v34 = vrot.slane %v3423_v36, %v10924_v9  ;;  %v5638_v3 = vrot.slane %v5377_v59, 1 }
 0x44e   : > { %v3546_v62 = vrot.slane %v3532_v57, %v10924_v9  ;;  %v3582_v52 = vrot.slane %v3568_v25, %v10924_v9  ;;  %v6059_v42 = vrot.slane %v5377_v59, 2  ;;  %v4331_v18 = vcombine.low %v3420_v35, %v3422_v47 }
 0x44f   : > { %v5641_v4 = vrot.slane %v5378_v49, 1  ;;  %v6062_v29 = vrot.slane %v5378_v49, 2  ;;  %5265 = vst [vmem:[#allocation3 + $0x3f8] sm:$0xfe] %v5004_v31  ;;  %5266 = vst [vmem:[#allocation3 + $0xb0] sm:$0xfe] %v5005_v33  ;;  %v4345_v6 = vrot.slane %v11618_v34, %v10924_v9  ;;  %v15072_v13 = vcombine.high %v10989_v54, %v10989_v54 }
 0x450   : > { %v3548_v26 = vcombine.high %v3546_v62, %v3546_v62  ;;  %v5379_v39 = vld [vmem:[#allocation3 + $0x178] sm:$0xff]  ;;  %v4338_v57 = vrot.slane %v4331_v18, %v10924_v9  ;;  %v4485_v37 = vrot.slane %v10985_v43, %v10924_v9  ;;  %v2815_v35 = vmax.f32 %v2717_v2, 0.0 }
 0x451   : > { %v4506_v50 = vcombine.low %v15072_v13, %v3582_v52  ;;  %v5639_v63 = vrot.slane %v5379_v39, 1  ;;  %v6060_v25 = vrot.slane %v5379_v39, 2  ;;  %v5380_v55 = vld [vmem:[#allocation3 + $0x290] sm:$0xff]  ;;  %v3584_v32 = vcombine.high %v3582_v52, %v3582_v52 }
 0x452   : > { %v4471_v44 = vcombine.low %v3546_v62, %v3548_v26  ;;  %v2816_v36 = vmax.f32 %v2718_v23, 0.0  ;;  %v5642_v47 = vrot.slane %v5380_v55, 1  ;;  %v6063_v45 = vrot.slane %v5380_v55, 2 }
 0x453   : > { %v4346_v17 = vcombine.low %v4338_v57, %v4345_v6  ;;  %v4347_v21 = vcombine.high %v4338_v57, %v4345_v6  ;;  %v5640_v54 = vsel %vm5577_vm0, %v5638_v3, %v5639_v63  ;;  %v6061_v13 = vsel %vm5998_vm1, %v6059_v42, %v6060_v25 }
 0x454   : > { %v4478_v18 = vrot.slane %v4471_v44, %v10924_v9  ;;  %v4513_v62 = vrot.slane %v4506_v50, %v10924_v9  ;;  %v5918_v26 = vmax.f32 %v5377_v59, %v5640_v54  ;;  %v5920_v43 = vmax.f32 %v5379_v39, %v5639_v63 }
 0x455   : > { %v5643_v2 = vsel %vm5577_vm0, %v5641_v4, %v5642_v47  ;;  %v6064_v8 = vsel %vm5998_vm1, %v6062_v29, %v6063_v45  ;;  %v5006_v23 = vrot.slane %v4346_v17, 7  ;;  %v5008_v16 = vrot.slane %v4347_v21, 7 }
 0x456   : > { %v5919_v52 = vmax.f32 %v5378_v49, %v5643_v2  ;;  %v4520_v27 = vrot.slane %v3584_v32, %v10924_v9  ;;  %v11637_v6 = vmax.f32 %v5918_v26, %v6061_v13  ;;  %v5921_v3 = vmax.f32 %v5380_v55, %v5642_v47  ;;  %v5382_v55 = vld [vmem:[#allocation3 + $0xb0] sm:$0xff] }
 0x457   : > { %v4486_v57 = vcombine.low %v4478_v18, %v4485_v37  ;;  %v4487_v42 = vcombine.high %v4478_v18, %v4485_v37  ;;  %v6437_v44 = vmax.f32 %v11506_v15, %v11587_v7  ;;  %v6438_v59 = vmax.f32 %v11542_v41, %v11589_v38 }
 0x458   : > { %v11643_v50 = vmax.f32 %v5919_v52, %v6064_v8  ;;  %v3603_v4 = vcombine.low %v2815_v35, %v2816_v36  ;;  %v11645_v29 = vmax.f32 %v5920_v43, %v6060_v25  ;;  %v15073_v21 = vmax.f32 %v11532_v46, %v11576_v60  ;;  %v15092_v52 = vld [vmem:[#allocation79_spill] sm:$0xff] }
 0x459   : > { %v3604_v49 = vcombine.high %v2815_v35, %v2816_v36  ;;  %v2719_v39 = vmul.f32 %v10921_v30, %v10816_v58  ;;  %v5007_v41 = vsel %vm4943_vm2, %v5004_v31, %v5006_v23  ;;  %v5009_v8 = vsel %vm4943_vm2, %v5005_v33, %v5008_v16  ;;  %v15091_v23 = vld [vmem:[#allocation84_spill] sm:$0xff] }
 0x45a   : > { %v11651_v17 = vmax.f32 %v15073_v21, %v11637_v6  ;;  %v11656_v15 = vmax.f32 %v6436_v5, %v11643_v50  ;;  %v5030_v7 = vrot.slane %v4486_v57, 7  ;;  %v11660_v38 = vmax.f32 %v5921_v3, %v6063_v45  ;;  %5267 = vst [vmem:[#allocation3 + $0x3d8] sm:$0x7f] %v5007_v41  ;;  %5268 = vst [vmem:[#allocation3 + $0x100] sm:$0x7f] %v5009_v8  ;;  %v11673_v45 = vld [vmem:[#allocation3 + $0x3f8] sm:$0xff] }
 0x45b   : > { %v5032_v37 = vrot.slane %v4487_v42, 7  ;;  %v4521_v46 = vcombine.low %v4513_v62, %v4520_v27  ;;  %v4522_v60 = vcombine.high %v4513_v62, %v4520_v27  ;;  %v11663_v35 = vmax.f32 %v6437_v44, %v11645_v29  ;;  %v15085_v62 = vld [vmem:[#allocation75_spill] sm:$0xff]  ;;  %v15096_v21 = vld [vmem:[#allocation81_spill] sm:$0xff] }
 0x45c   : > { %15074 = vst [vmem:[#allocation36_spill] sm:$0xff] %v11651_v17  ;;  %15075 = vst [vmem:[#allocation37_spill] sm:$0xff] %v11656_v15  ;;  %v5031_v58 = vsel %vm4943_vm2, %v11004_v0, %v5030_v7  ;;  %v3611_v5 = vrot.slane %v3603_v4, %v10924_v9  ;;  %v2720_v31 = vmul.f32 %v10926_v1, %v10820_v61  ;;  %v5644_v43 = vrot.slane %v11673_v45, 1 }
 0x45d   : > { %15076 = vst [vmem:[#allocation38_spill] sm:$0xff] %v11660_v38  ;;  %15077 = vst [vmem:[#allocation39_spill] sm:$0xff] %v11663_v35  ;;  %v11671_v16 = vmax.f32 %v6438_v59, %v11660_v38  ;;  %v5033_v27 = vsel %vm4943_vm2, %v11006_v22, %v5032_v37  ;;  %v5036_v33 = vrot.slane %v4521_v46, 7  ;;  %v5038_v63 = vrot.slane %v4522_v60, 7  ;;  %v15087_v60 = vld [vmem:[#allocation70_spill] sm:$0xff] }
 0x45e   : > { %5283 = vst [vmem:[#allocation3 + $0x270] sm:$0x7f] %v5031_v58  ;;  %v15079_v0 = vcombine.low %v11545_v28, %v11548_v48  ;;  %v6727_v61 = vcombine.low %v11651_v17, %v11656_v15  ;;  %5284 = vst [vmem:[#allocation3 + $0x208] sm:$0x7f] %v5033_v27  ;;  %v11686_v32 = vrot.slane %v3604_v49, %v10924_v9  ;;  %v6065_v2 = vrot.slane %v11673_v45, 2 }
 0x45f   : > { %15078 = vst [vmem:[#allocation40_spill] sm:$0xff] %v11671_v16  ;;  %v3619_v36 = vcombine.high %v3611_v5, %v3611_v5  ;;  %v15081_v22 = vcombine.high %v11545_v28, %v11548_v48  ;;  %v15083_v54 = vcombine.low %v11540_v12, %v11556_v19  ;;  %v5037_v18 = vsel %vm4943_vm2, %v11008_v53, %v5036_v33  ;;  %v15107_v12 = vld [vmem:[#allocation77_spill] sm:$0xff] }
 0x460   : > { %v11681_v25 = vrot.slane %v15079_v0, %v10924_v9  ;;  %v5039_v26 = vsel %vm4943_vm2, %v15085_v62, %v5038_v63  ;;  %5287 = vst [vmem:[#allocation3 + $0x1d8] sm:$0x7f] %v5037_v18  ;;  %v2817_v28 = vmax.f32 %v2719_v39, 0.0  ;;  %v2818_v48 = vmax.f32 %v2720_v31, 0.0  ;;  %v15088_v31 = vld [vmem:[#allocation71_spill] sm:$0xff]  ;;  %v15089_v0 = vld [vmem:[#allocation82_spill] sm:$0xff] }
 0x461   : > { %v11692_v47 = vrot.slane %v15081_v22, %v10924_v9  ;;  %v11698_v13 = vrot.slane %v15083_v54, %v10924_v9  ;;  %5288 = vst [vmem:[#allocation3 + $0x70] sm:$0x7f] %v5039_v26  ;;  %v5647_v3 = vrot.slane %v5382_v55, 1  ;;  %v6068_v57 = vrot.slane %v5382_v55, 2  ;;  %v5383_v42 = vld [vmem:[#allocation3 + $0x3d8] sm:$0xff]  ;;  %v5384_v44 = vld [vmem:[#allocation3 + $0x100] sm:$0xff] }
 0x462   : > { %15080 = vst [vmem:[#allocation41_spill] sm:$0xff] %v11681_v25  ;;  %v11711_v53 = vrot.slane %v6727_v61, %v10924_v9  ;;  %v4541_v59 = vcombine.low %v3611_v5, %v3619_v36  ;;  %v11715_v4 = vrot.slane %v11686_v32, %v10924_v9  ;;  %v5645_v49 = vrot.slane %v5383_v42, 1  ;;  %v15090_v36 = vld [vmem:[#allocation83_spill] sm:$0xff] }
 0x463   : > { %15082 = vst [vmem:[#allocation42_spill] sm:$0xff] %v11692_v47  ;;  %15084 = vst [vmem:[#allocation43_spill] sm:$0xff] %v11698_v13  ;;  %v6066_v39 = vrot.slane %v5383_v42, 2  ;;  %v5648_v41 = vrot.slane %v5384_v44, 1  ;;  %v6069_v8 = vrot.slane %v5384_v44, 2  ;;  %v3621_v37 = vcombine.low %v2817_v28, %v2818_v48  ;;  %v15106_v13 = vld [vmem:[#allocation76_spill] sm:$0xff] }
 0x464   : > { %15086 = vst [vmem:[#allocation44_spill] sm:$0xff] %v11711_v53  ;;  %v3622_v46 = vcombine.high %v2817_v28, %v2818_v48  ;;  %v11721_v58 = vmul.f32 %v10921_v30, %v15087_v60  ;;  %v11725_v5 = vmul.f32 %v10926_v1, %v15088_v31  ;;  %v5646_v27 = vsel %vm5577_vm0, %v5644_v43, %v5645_v49 }
 0x465   : > { %v5403_v7 = vld [vmem:[#allocation3 + $0x270] sm:$0xff]  ;;  %v5649_v33 = vsel %vm5577_vm0, %v5647_v3, %v5648_v41  ;;  %v5404_v63 = vld [vmem:[#allocation3 + $0x208] sm:$0xff]  ;;  %v11731_v61 = vmul.f32 %v10921_v30, %v15089_v0  ;;  %v11735_v22 = vmul.f32 %v10926_v1, %v15090_v36  ;;  %v5922_v54 = vmax.f32 %v11673_v45, %v5646_v27 }
 0x466   : > { %v5924_v18 = vmax.f32 %v5383_v42, %v5645_v49  ;;  %v6067_v62 = vsel %vm5998_vm1, %v6065_v2, %v6066_v39  ;;  %v5923_v26 = vmax.f32 %v5382_v55, %v5649_v33  ;;  %v5925_v28 = vmax.f32 %v5384_v44, %v5648_v41 }
 0x467   : > { %v6070_v43 = vsel %vm5998_vm1, %v6068_v57, %v6069_v8  ;;  %v5675_v48 = vrot.slane %v5403_v7, 1  ;;  %v5678_v3 = vrot.slane %v5404_v63, 1  ;;  %v6096_v60 = vrot.slane %v5403_v7, 2  ;;  %v5407_v55 = vld [vmem:[#allocation3 + $0x1d8] sm:$0xff] }
 0x468   : > { %v4548_v31 = vrot.slane %v4541_v59, %v10924_v9  ;;  %v3629_v0 = vrot.slane %v3621_v37, %v10924_v9  ;;  %v11744_v36 = vmul.f32 %v10921_v30, %v15091_v23  ;;  %v15093_v45 = vrot.slane %v15092_v52, 1  ;;  %v8790_v37 = vld [vmem:[#allocation3 + $0x268] sm:$0xff]  ;;  %v5408_v27 = vld [vmem:[#allocation3 + $0x70] sm:$0xff] }
 0x469   : > { %v5944_v2 = vmax.f32 %v5403_v7, %v5675_v48  ;;  %v11750_v44 = vrot.slane %v3622_v46, %v10924_v9  ;;  %v2819_v57 = vmax.f32 %v11721_v58, 0.0  ;;  %v11753_v49 = vmax.f32 %v5922_v54, %v6067_v62 }
 0x46a   : > { %v5676_v42 = vsel %vm5577_vm0, %v15093_v45, %v5675_v48  ;;  %v11755_v59 = vmax.f32 %v5924_v18, %v6066_v39  ;;  %v11757_v41 = vmax.f32 %v5923_v26, %v6070_v43  ;;  %v11759_v33 = vmax.f32 %v5925_v28, %v6069_v8 }
 0x46b   : > { %v5942_v23 = vmax.f32 %v8790_v37, %v5676_v42  ;;  %v15097_v45 = vrot.slane %v15096_v21, 1  ;;  %v5945_v48 = vmax.f32 %v5404_v63, %v5678_v3  ;;  %v6099_v46 = vrot.slane %v5404_v63, 2  ;;  %v8791_v42 = vld [vmem:[#allocation3 + $0x3a0] sm:$0xff] }
 0x46c   : > { %15094 = vst [vmem:[#allocation45_spill] sm:$0xff] %v11755_v59  ;;  %15095 = vst [vmem:[#allocation46_spill] sm:$0xff] %v11759_v33  ;;  %v15098_v35 = vrot.slane %v15092_v52, 2  ;;  %v11767_v54 = vmax.f32 %v5944_v2, %v6096_v60  ;;  %v5681_v39 = vrot.slane %v5407_v55, 1  ;;  %v4556_v18 = vcombine.low %v4548_v31, %v11715_v4  ;;  %v15100_v37 = vld [vmem:[#allocation78_spill] sm:$0xff] }
 0x46d   : > { %v5679_v7 = vsel %vm5577_vm0, %v15097_v45, %v5678_v3  ;;  %v5684_v26 = vrot.slane %v5408_v27, 1  ;;  %v4557_v8 = vcombine.high %v4548_v31, %v11715_v4  ;;  %v3637_v28 = vcombine.high %v3629_v0, %v3629_v0  ;;  %v15101_v45 = vld [vmem:[#allocation23_spill] sm:$0xff]  ;;  %v15103_v52 = vld [vmem:[#allocation66_spill] sm:$0xff] }
 0x46e   : > { %v6097_v58 = vsel %vm5998_vm1, %v15098_v35, %v6096_v60  ;;  %v5943_v3 = vmax.f32 %v8791_v42, %v5679_v7  ;;  %v11773_v63 = vmax.f32 %v5945_v48, %v6099_v46  ;;  %v3638_v35 = vcombine.high %v11750_v44, %v11750_v44 }
 0x46f   : > { %v6363_v62 = vmax.f32 %v5942_v23, %v6097_v58  ;;  %v15099_v31 = vrot.slane %v15096_v21, 2  ;;  %v15102_v7 = vrot.slane %v15101_v45, 1  ;;  %v6102_v58 = vrot.slane %v5407_v55, 2 }
 0x470   : > { %v6105_v42 = vrot.slane %v5408_v27, 2  ;;  %v15104_v60 = vrot.slane %v15103_v52, 1  ;;  %v5042_v4 = vrot.slane %v4556_v18, 7  ;;  %v5044_v53 = vrot.slane %v4557_v8, 7  ;;  %v8793_v8 = vld [vmem:[#allocation3 + $0xd0] sm:$0xff] }
 0x471   : > { %v6100_v2 = vsel %vm5998_vm1, %v15099_v31, %v6099_v46  ;;  %v5682_v48 = vsel %vm5577_vm0, %v15102_v7, %v5681_v39  ;;  %v6447_v43 = vmax.f32 %v15100_v37, %v6363_v62  ;;  %v5948_v31 = vmax.f32 %v5407_v55, %v5681_v39  ;;  %v8792_v7 = vld [vmem:[#allocation3 + $0x50] sm:$0xff]  ;;  %v15116_v46 = vld [vmem:[#allocation86_spill] sm:$0xff] }
 0x472   : > { %v5685_v16 = vsel %vm5577_vm0, %v15104_v60, %v5684_v26  ;;  %v6364_v21 = vmax.f32 %v5943_v3, %v6100_v2  ;;  %v15105_v23 = vcombine.high %v11686_v32, %v11686_v32  ;;  %v5946_v17 = vmax.f32 %v8792_v7, %v5682_v48 }
 0x473   : > { %v5043_v62 = vsel %vm4943_vm2, %v15106_v13, %v5042_v4  ;;  %v5045_v19 = vsel %vm4943_vm2, %v15107_v12, %v5044_v53  ;;  %v4559_v18 = vcombine.low %v3637_v28, %v11750_v44  ;;  %v5947_v3 = vmax.f32 %v8793_v8, %v5685_v16  ;;  %v15110_v8 = vld [vmem:[#allocation85_spill] sm:$0xff] }
 0x474   : > { %v4558_v15 = vcombine.low %v15105_v23, %v3629_v0  ;;  %v5949_v60 = vmax.f32 %v5408_v27, %v5684_v26  ;;  %5291 = vst [vmem:[#allocation3 + $0x38] sm:$0x7f] %v5043_v62  ;;  %5292 = vst [vmem:[#allocation3 + $0x3c8] sm:$0x7f] %v5045_v19  ;;  %v2820_v32 = vmax.f32 %v11725_v5, 0.0  ;;  %v15108_v0 = vrot.slane %v15101_v45, 2 }
 0x475   : > { %v4573_v13 = vrot.slane %v4559_v18, %v10924_v9  ;;  %v2821_v4 = vmax.f32 %v11731_v61, 0.0  ;;  %v2822_v12 = vmax.f32 %v11735_v22, 0.0  ;;  %v6448_v53 = vmax.f32 %v15100_v37, %v6364_v21 }
 0x476   : > { %v4566_v55 = vrot.slane %v4558_v15, %v10924_v9  ;;  %v6103_v39 = vsel %vm5998_vm1, %v15108_v0, %v6102_v58  ;;  %v11814_v16 = vmax.f32 %v5948_v31, %v6102_v58  ;;  %v15109_v19 = vrot.slane %v15103_v52, 2 }
 0x477   : > { %v3639_v44 = vcombine.low %v2819_v57, %v2820_v32  ;;  %v3640_v26 = vcombine.high %v2819_v57, %v2820_v32  ;;  %v3657_v28 = vcombine.low %v2821_v4, %v2822_v12  ;;  %v11819_v2 = vmax.f32 %v5946_v17, %v6103_v39 }
 0x478   : > { %v6106_v15 = vsel %vm5998_vm1, %v15109_v19, %v6105_v42  ;;  %v4574_v5 = vcombine.low %v4566_v55, %v4573_v13  ;;  %v4575_v27 = vcombine.high %v4566_v55, %v4573_v13  ;;  %v11823_v61 = vmax.f32 %v5949_v60, %v6105_v42  ;;  %v15111_v19 = vld [vmem:[#allocation67_spill] sm:$0xff] }
 0x479   : > { %v11821_v23 = vmax.f32 %v5947_v3, %v6106_v15  ;;  %v3647_v22 = vrot.slane %v3639_v44, %v10924_v9  ;;  %v3654_v58 = vrot.slane %v3640_v26, %v10924_v9  ;;  %v3665_v52 = vrot.slane %v3657_v28, %v10924_v9 }
 0x47a   : > { %v5046_v45 = vrot.slane %v4574_v5, 7  ;;  %v5047_v48 = vrot.slane %v4575_v27, 7  ;;  %v11829_v21 = vmax.f32 %v6447_v43, %v11819_v2  ;;  %v2726_v3 = vmul.f32 %v10926_v1, %v15110_v8  ;;  %v15113_v27 = vld [vmem:[#allocation68_spill] sm:$0xff] }
 0x47b   : > { %v11832_v57 = vmax.f32 %v6448_v53, %v11821_v23  ;;  %v3655_v17 = vcombine.high %v3647_v22, %v3647_v22  ;;  %v4576_v31 = vcombine.low %v3638_v35, %v3647_v22  ;;  %v5411_v7 = vld [vmem:[#allocation3 + $0x38] sm:$0xff]  ;;  %v5412_v62 = vld [vmem:[#allocation3 + $0x3c8] sm:$0xff]  ;;  %v3656_v42 = vcombine.high %v3654_v58, %v3654_v58  ;;  %v8794_v22 = vld [vmem:[#allocation3 + $0x350] sm:$0xff] }
 0x47c   : > { %5293 = vst [vmem:[#allocation3 + $0x2b8] sm:$0xfe] %v5046_v45  ;;  %5294 = vst [vmem:[#allocation3 + $0x3d0] sm:$0xfe] %v5047_v48  ;;  %v3673_v18 = vcombine.high %v3665_v52, %v3665_v52  ;;  %v2823_v60 = vmax.f32 %v11744_v36, 0.0  ;;  %v5687_v55 = vrot.slane %v5411_v7, 1  ;;  %v3658_v0 = vcombine.high %v2821_v4, %v2822_v12 }
 0x47d   : > { %v6108_v32 = vrot.slane %v5411_v7, 2  ;;  %v5690_v43 = vrot.slane %v5412_v62, 1  ;;  %v4583_v39 = vrot.slane %v4576_v31, %v10924_v9  ;;  %v4590_v13 = vrot.slane %v3655_v17, %v10924_v9  ;;  %v8795_v31 = vld [vmem:[#allocation3 + $0x378] sm:$0xff] }
 0x47e   : > { %v4593_v35 = vcombine.low %v3654_v58, %v3656_v42  ;;  %v4594_v53 = vcombine.low %v3665_v52, %v3673_v18  ;;  %v15112_v15 = vrot.slane %v15111_v19, 1  ;;  %v5952_v5 = vmax.f32 %v5411_v7, %v5687_v55 }
 0x47f   : > { %v15114_v26 = vrot.slane %v15113_v27, 1  ;;  %v6111_v36 = vrot.slane %v5412_v62, 2  ;;  %v15115_v4 = vrot.slane %v15111_v19, 2  ;;  %v2824_v58 = vmax.f32 %v2726_v3, 0.0 }
 0x480   : > { %v5688_v44 = vsel %vm5577_vm0, %v15112_v15, %v5687_v55  ;;  %v11848_v52 = vmax.f32 %v5952_v5, %v6108_v32  ;;  %v5953_v42 = vmax.f32 %v5412_v62, %v5690_v43  ;;  %v4591_v18 = vcombine.low %v4583_v39, %v4590_v13 }
 0x481   : > { %v5691_v28 = vsel %vm5577_vm0, %v15114_v26, %v5690_v43  ;;  %v5950_v8 = vmax.f32 %v8794_v22, %v5688_v44  ;;  %v6109_v12 = vsel %vm5998_vm1, %v15115_v4, %v6108_v32  ;;  %v4592_v15 = vcombine.high %v4583_v39, %v4590_v13 }
 0x482   : > { %v5951_v17 = vmax.f32 %v8795_v31, %v5691_v28  ;;  %v4601_v55 = vrot.slane %v4593_v35, %v10924_v9  ;;  %v4608_v26 = vrot.slane %v4594_v53, %v10924_v9  ;;  %v2727_v44 = vmul.f32 %v10921_v30, %v15116_v46  ;;  %v15122_v31 = vld [vmem:[#allocation87_spill] sm:$0xff] }
 0x483   : > { %v11850_v7 = vmax.f32 %v5950_v8, %v6109_v12  ;;  %v15117_v19 = vrot.slane %v15113_v27, 2  ;;  %v5048_v28 = vrot.slane %v4591_v18, 7  ;;  %v5050_v3 = vrot.slane %v4592_v15, 7  ;;  %v11884_v4 = vld [vmem:[#allocation3 + $0x2b8] sm:$0xff] }
 0x484   : > { %v3672_v32 = vrot.slane %v3658_v0, %v10924_v9  ;;  %v15118_v62 = vmax.f32 %v15100_v37, %v11767_v54  ;;  %v15120_v39 = vmax.f32 %v15100_v37, %v11773_v63  ;;  %v11880_v54 = vmax.f32 %v5953_v42, %v6111_v36 }
 0x485   : > { %v6112_v22 = vsel %vm5998_vm1, %v15117_v19, %v6111_v36  ;;  %v5049_v5 = vsel %vm4943_vm2, %v5046_v45, %v5048_v28  ;;  %v5051_v63 = vsel %vm4943_vm2, %v5047_v48, %v5050_v3  ;;  %v4609_v37 = vcombine.low %v4601_v55, %v4608_v26 }
 0x486   : > { %v11864_v43 = vmax.f32 %v15118_v62, %v11814_v16  ;;  %v11870_v13 = vmax.f32 %v15120_v39, %v11823_v61  ;;  %v11874_v35 = vmax.f32 %v5951_v17, %v6112_v22  ;;  %5295 = vst [vmem:[#allocation3 + $0x118] sm:$0x7f] %v5049_v5  ;;  %v4610_v27 = vcombine.high %v4601_v55, %v4608_v26  ;;  %v15123_v22 = vld [vmem:[#allocation88_spill] sm:$0xff]  ;;  %v15124_v5 = vld [vmem:[#allocation89_spill] sm:$0xff] }
 0x487   : > { %v3674_v8 = vcombine.high %v3672_v32, %v3672_v32  ;;  %5296 = vst [vmem:[#allocation3 + $0x2e8] sm:$0x7f] %v5051_v63  ;;  %v3675_v12 = vcombine.low %v2823_v60, %v2824_v58  ;;  %v2728_v17 = vmul.f32 %v10926_v1, %v15122_v31  ;;  %v2825_v18 = vmax.f32 %v2727_v44, 0.0  ;;  %v11894_v55 = vld [vmem:[#allocation3 + $0x3d0] sm:$0xff] }
 0x488   : > { %15119 = vst [vmem:[#allocation47_spill] sm:$0xff] %v11864_v43  ;;  %15121 = vst [vmem:[#allocation48_spill] sm:$0xff] %v11870_v13  ;;  %v3676_v15 = vcombine.high %v2823_v60, %v2824_v58  ;;  %v5052_v19 = vrot.slane %v4609_v37, 7  ;;  %v5053_v36 = vrot.slane %v4610_v27, 7  ;;  %v11890_v45 = vmul.f32 %v10921_v30, %v15123_v22  ;;  %v15125_v37 = vld [vmem:[#allocation90_spill] sm:$0xff] }
 0x489   : > { %v4611_v42 = vcombine.low %v3672_v32, %v3674_v8  ;;  %v3683_v26 = vrot.slane %v3675_v12, %v10924_v9  ;;  %v2826_v28 = vmax.f32 %v2728_v17, 0.0  ;;  %v5692_v58 = vrot.slane %v11884_v4, 1  ;;  %v15126_v17 = vld [vmem:[#allocation91_spill] sm:$0xff] }
 0x48a   : > { %v3690_v3 = vrot.slane %v3676_v15, %v10924_v9  ;;  %v6113_v44 = vrot.slane %v11884_v4, 2  ;;  %5297 = vst [vmem:[#allocation3 + $0x98] sm:$0xfe] %v5052_v19  ;;  %5298 = vst [vmem:[#allocation3 + $0x250] sm:$0xfe] %v5053_v36  ;;  %v2730_v63 = vmul.f32 %v10926_v1, %v15124_v5  ;;  %v11908_v27 = vmul.f32 %v10921_v30, %v15125_v37 }
 0x48b   : > { %v4618_v32 = vrot.slane %v4611_v42, %v10924_v9  ;;  %v4625_v62 = vrot.slane %v3683_v26, %v10924_v9  ;;  %v3693_v39 = vcombine.low %v2825_v18, %v2826_v28  ;;  %v5695_v8 = vrot.slane %v11894_v55, 1 }
 0x48c   : > { %v6116_v12 = vrot.slane %v11894_v55, 2  ;;  %v2827_v31 = vmax.f32 %v11890_v45, 0.0  ;;  %v11915_v15 = vmul.f32 %v10926_v1, %v15126_v17  ;;  %v3691_v60 = vcombine.high %v3683_v26, %v3683_v26 }
 0x48d   : > { %v5415_v42 = vld [vmem:[#allocation3 + $0x118] sm:$0xff]  ;;  %v4626_v22 = vcombine.low %v4618_v32, %v4625_v62  ;;  %v4627_v46 = vcombine.high %v4618_v32, %v4625_v62  ;;  %v3692_v48 = vcombine.high %v3690_v3, %v3690_v3  ;;  %v3701_v37 = vrot.slane %v3693_v39, %v10924_v9 }
 0x48e   : > { %v5693_v5 = vrot.slane %v5415_v42, 1  ;;  %v6114_v0 = vrot.slane %v5415_v42, 2  ;;  %v5416_v53 = vld [vmem:[#allocation3 + $0x2e8] sm:$0xff]  ;;  %v3694_v47 = vcombine.high %v2825_v18, %v2826_v28  ;;  %v2828_v40 = vmax.f32 %v2730_v63, 0.0 }
 0x48f   : > { %v5696_v25 = vrot.slane %v5416_v53, 1  ;;  %v6117_v10 = vrot.slane %v5416_v53, 2  ;;  %v2829_v45 = vmax.f32 %v11908_v27, 0.0  ;;  %v5054_v20 = vrot.slane %v4626_v22, 7 }
 0x490   : > { %v5694_v56 = vsel %vm5577_vm0, %v5692_v58, %v5693_v5  ;;  %v5956_v17 = vmax.f32 %v5415_v42, %v5693_v5  ;;  %v5056_v11 = vrot.slane %v4627_v46, 7  ;;  %v4628_v33 = vcombine.low %v3691_v60, %v3690_v3 }
 0x491   : > { %v5954_v32 = vmax.f32 %v11884_v4, %v5694_v56  ;;  %v5697_v26 = vsel %vm5577_vm0, %v5695_v8, %v5696_v25  ;;  %v5957_v62 = vmax.f32 %v5416_v53, %v5696_v25  ;;  %v11922_v51 = vld [vmem:[#allocation3 + $0x98] sm:$0xff]  ;;  %v6115_v18 = vsel %vm5998_vm1, %v6113_v44, %v6114_v0  ;;  %v11931_v56 = vld [vmem:[#allocation3 + $0x250] sm:$0xff] }
 0x492   : > { %v3709_v28 = vcombine.high %v3701_v37, %v3701_v37  ;;  %v3708_v39 = vrot.slane %v3694_v47, %v10924_v9  ;;  %v2830_v63 = vmax.f32 %v11915_v15, 0.0  ;;  %v11927_v27 = vmax.f32 %v5956_v17, %v6114_v0 }
 0x493   : > { %v5955_v58 = vmax.f32 %v11894_v55, %v5697_v26  ;;  %v6118_v46 = vsel %vm5998_vm1, %v6116_v12, %v6117_v10  ;;  %v3711_v4 = vcombine.low %v2827_v31, %v2828_v40  ;;  %v5698_v25 = vrot.slane %v11922_v51, 1 }
 0x494   : > { %v6119_v53 = vrot.slane %v11922_v51, 2  ;;  %v5055_v3 = vsel %vm4943_vm2, %v5052_v19, %v5054_v20  ;;  %v5057_v60 = vsel %vm4943_vm2, %v5053_v36, %v5056_v11  ;;  %v11937_v47 = vmax.f32 %v5954_v32, %v6115_v18 }
 0x495   : > { %v11939_v44 = vmax.f32 %v5957_v62, %v6117_v10  ;;  %5299 = vst [vmem:[#allocation3 + $0x278] sm:$0x7f] %v5055_v3  ;;  %5300 = vst [vmem:[#allocation3 + $0x188] sm:$0x7f] %v5057_v60  ;;  %v4629_v0 = vcombine.low %v3692_v48, %v3701_v37  ;;  %v4636_v55 = vrot.slane %v4628_v33, %v10924_v9  ;;  %v5701_v8 = vrot.slane %v11931_v56, 1 }
 0x496   : > { %v3710_v12 = vcombine.high %v3708_v39, %v3708_v39  ;;  %v4646_v15 = vcombine.low %v3709_v28, %v3708_v39  ;;  %v3712_v42 = vcombine.high %v2827_v31, %v2828_v40  ;;  %v15127_v20 = vmax.f32 %v11814_v16, %v11848_v52 }
 0x497   : > { %v6122_v11 = vrot.slane %v11931_v56, 2  ;;  %v4643_v10 = vrot.slane %v4629_v0, %v10924_v9  ;;  %v3719_v36 = vrot.slane %v3711_v4, %v10924_v9  ;;  %v11952_v48 = vmax.f32 %v5955_v58, %v6118_v46 }
 0x498   : > { %v11947_v19 = vmax.f32 %v15127_v20, %v11927_v27  ;;  %v4653_v33 = vrot.slane %v4646_v15, %v10924_v9  ;;  %v4660_v22 = vrot.slane %v3710_v12, %v10924_v9  ;;  %v3729_v5 = vcombine.low %v2829_v45, %v2830_v63 }
 0x499   : > { %v15129_v40 = vmax.f32 %v11819_v2, %v11850_v7  ;;  %v4644_v52 = vcombine.low %v4636_v55, %v4643_v10  ;;  %v4645_v31 = vcombine.high %v4636_v55, %v4643_v10  ;;  %v3726_v37 = vrot.slane %v3712_v42, %v10924_v9 }
 0x49a   : > { %15128 = vst [vmem:[#allocation49_spill] sm:$0xff] %v11947_v19  ;;  %v15130_v17 = vmax.f32 %v11821_v23, %v11874_v35  ;;  %v15131_v26 = vmax.f32 %v11823_v61, %v11880_v54  ;;  %v4661_v18 = vcombine.low %v4653_v33, %v4660_v22  ;;  %v4662_v2 = vcombine.high %v4653_v33, %v4660_v22 }
 0x49b   : > { %v11960_v16 = vmax.f32 %v15129_v40, %v11937_v47  ;;  %v5058_v7 = vrot.slane %v4644_v52, 7  ;;  %v5059_v28 = vrot.slane %v4645_v31, 7  ;;  %v3727_v39 = vcombine.high %v3719_v36, %v3719_v36 }
 0x49c   : > { %v11967_v32 = vmax.f32 %v15130_v17, %v11952_v48  ;;  %v11973_v62 = vmax.f32 %v15131_v26, %v11939_v44  ;;  %v3728_v58 = vcombine.high %v3726_v37, %v3726_v37  ;;  %v5419_v46 = vld [vmem:[#allocation3 + $0x278] sm:$0xff]  ;;  %v5420_v4 = vld [vmem:[#allocation3 + $0x188] sm:$0xff]  ;;  %v5060_v3 = vrot.slane %v4661_v18, 7 }
 0x49d   : > { %v5062_v60 = vrot.slane %v4662_v2, 7  ;;  %v3730_v0 = vcombine.high %v2829_v45, %v2830_v63  ;;  %v3737_v23 = vrot.slane %v3729_v5, %v10924_v9  ;;  %v5699_v35 = vrot.slane %v5419_v46, 1  ;;  %5301 = vst [vmem:[#allocation3 + $0x260] sm:$0xfe] %v5058_v7  ;;  %5302 = vst [vmem:[#allocation3 + $0x8] sm:$0xfe] %v5059_v28 }
 0x49e   : > { %15132 = vst [vmem:[#allocation50_spill] sm:$0xff] %v11973_v62  ;;  %v6120_v55 = vrot.slane %v5419_v46, 2  ;;  %v5702_v12 = vrot.slane %v5420_v4, 1  ;;  %v6123_v15 = vrot.slane %v5420_v4, 2  ;;  %v5061_v61 = vsel %vm4943_vm2, %v5058_v7, %v5060_v3 }
 0x49f   : > { %v5063_v54 = vsel %vm4943_vm2, %v5059_v28, %v5062_v60  ;;  %v4663_v42 = vcombine.low %v3719_v36, %v3727_v39  ;;  %v4664_v20 = vcombine.low %v3726_v37, %v3728_v58  ;;  %v6833_v10 = vcombine.high %v11829_v21, %v11832_v57  ;;  %5303 = vst [vmem:[#allocation3 + $0x10] sm:$0x7f] %v5061_v61 }
 0x4a0   : > { %v5700_v33 = vsel %vm5577_vm0, %v5698_v25, %v5699_v35  ;;  %v5960_v45 = vmax.f32 %v5419_v46, %v5699_v35  ;;  %v5703_v63 = vsel %vm5577_vm0, %v5701_v8, %v5702_v12  ;;  %5304 = vst [vmem:[#allocation3 + $0x388] sm:$0x7f] %v5063_v54  ;;  %v6121_v52 = vsel %vm5998_vm1, %v6119_v53, %v6120_v55 }
 0x4a1   : > { %v5958_v40 = vmax.f32 %v11922_v51, %v5700_v33  ;;  %v5959_v36 = vmax.f32 %v11931_v56, %v5703_v63  ;;  %v6124_v31 = vsel %vm5998_vm1, %v6122_v11, %v6123_v15  ;;  %v4671_v25 = vrot.slane %v4663_v42, %v10924_v9 }
 0x4a2   : > { %v4678_v8 = vrot.slane %v4664_v20, %v10924_v9  ;;  %v11997_v26 = vrot.slane %v3730_v0, %v10924_v9  ;;  %v3745_v51 = vcombine.high %v3737_v23, %v3737_v23  ;;  %v11999_v18 = vmax.f32 %v5960_v45, %v6120_v55 }
 0x4a3   : > { %v5961_v56 = vmax.f32 %v5420_v4, %v5702_v12  ;;  %v6379_v11 = vmax.f32 %v5958_v40, %v6121_v52  ;;  %v6380_v7 = vmax.f32 %v5959_v36, %v6124_v31  ;;  %v15133_v12 = vld [vmem:[#allocation92_spill] sm:$0xff]  ;;  %v15134_v31 = vld [vmem:[#allocation93_spill] sm:$0xff] }
 0x4a4   : > { %v4679_v53 = vcombine.low %v4671_v25, %v4678_v8  ;;  %v4680_v2 = vcombine.high %v4671_v25, %v4678_v8  ;;  %v5421_v28 = vld [vmem:[#allocation3 + $0x260] sm:$0xff]  ;;  %v5422_v39 = vld [vmem:[#allocation3 + $0x8] sm:$0xff]  ;;  %v4681_v58 = vcombine.low %v3737_v23, %v3745_v51  ;;  %v4695_v46 = vrot.slane %v11997_v26, %v10924_v9 }
 0x4a5   : > { %v5704_v3 = vrot.slane %v5421_v28, 1  ;;  %v6125_v60 = vrot.slane %v5421_v28, 2  ;;  %v5707_v35 = vrot.slane %v5422_v39, 1  ;;  %v6128_v61 = vrot.slane %v5422_v39, 2 }
 0x4a6   : > { %v5423_v0 = vld [vmem:[#allocation3 + $0x10] sm:$0xff]  ;;  %v5064_v42 = vrot.slane %v4679_v53, 7  ;;  %v5065_v55 = vrot.slane %v4680_v2, 7  ;;  %v4688_v4 = vrot.slane %v4681_v58, %v10924_v9  ;;  %v2733_v20 = vmul.f32 %v10921_v30, %v15133_v12 }
 0x4a7   : > { %v5424_v54 = vld [vmem:[#allocation3 + $0x388] sm:$0xff]  ;;  %v5705_v33 = vrot.slane %v5423_v0, 1  ;;  %v6126_v45 = vrot.slane %v5423_v0, 2  ;;  %v6382_v40 = vmax.f32 %v5961_v56, %v6123_v15  ;;  %v2734_v25 = vmul.f32 %v10926_v1, %v15134_v31 }
 0x4a8   : > { %v5708_v63 = vrot.slane %v5424_v54, 1  ;;  %v6129_v23 = vrot.slane %v5424_v54, 2  ;;  %5305 = vst [vmem:[#allocation3 + $0x68] sm:$0xfe] %v5064_v42  ;;  %5306 = vst [vmem:[#allocation3 + $0x1a0] sm:$0xfe] %v5065_v55  ;;  %v4696_v36 = vcombine.low %v4688_v4, %v4695_v46  ;;  %v4697_v52 = vcombine.high %v4688_v4, %v4695_v46 }
 0x4a9   : > { %v5706_v8 = vsel %vm5577_vm0, %v5704_v3, %v5705_v33  ;;  %v5964_v51 = vmax.f32 %v5423_v0, %v5705_v33  ;;  %v2831_v2 = vmax.f32 %v2733_v20, 0.0  ;;  %v6127_v12 = vsel %vm5998_vm1, %v6125_v60, %v6126_v45 }
 0x4aa   : > { %v5709_v53 = vsel %vm5577_vm0, %v5707_v35, %v5708_v63  ;;  %v5962_v58 = vmax.f32 %v5421_v28, %v5706_v8  ;;  %v5965_v17 = vmax.f32 %v5424_v54, %v5708_v63  ;;  %v6130_v15 = vsel %vm5998_vm1, %v6128_v61, %v6129_v23 }
 0x4ab   : > { %v5963_v5 = vmax.f32 %v5422_v39, %v5709_v53  ;;  %v5066_v56 = vrot.slane %v4696_v36, 7  ;;  %v5068_v37 = vrot.slane %v4697_v52, 7  ;;  %v2832_v22 = vmax.f32 %v2734_v25, 0.0 }
 0x4ac   : > { %v6455_v46 = vmax.f32 %v11937_v47, %v6379_v11  ;;  %v6457_v4 = vmax.f32 %v11927_v27, %v11999_v18  ;;  %v6456_v3 = vmax.f32 %v11952_v48, %v6380_v7  ;;  %v6458_v35 = vmax.f32 %v11939_v44, %v6382_v40  ;;  %v15137_v48 = vld [vmem:[#allocation94_spill] sm:$0xff]  ;;  %v15138_v11 = vld [vmem:[#allocation95_spill] sm:$0xff] }
 0x4ad   : > { %v12017_v0 = vmax.f32 %v5964_v51, %v6126_v45  ;;  %v5067_v28 = vsel %vm4943_vm2, %v5064_v42, %v5066_v56  ;;  %v5069_v39 = vsel %vm4943_vm2, %v5065_v55, %v5068_v37  ;;  %v3747_v60 = vcombine.low %v2831_v2, %v2832_v22  ;;  %v15152_v51 = vld [vmem:[#allocation96_spill] sm:$0xff] }
 0x4ae   : > { %v12021_v61 = vmax.f32 %v5962_v58, %v6127_v12  ;;  %v12023_v54 = vmax.f32 %v5963_v5, %v6130_v15  ;;  %v12025_v20 = vmax.f32 %v5965_v17, %v6129_v23  ;;  %5307 = vst [vmem:[#allocation3 + $0x390] sm:$0x7f] %v5067_v28  ;;  %5308 = vst [vmem:[#allocation3 + $0x3f0] sm:$0x7f] %v5069_v39 }
 0x4af   : > { %15135 = vst [vmem:[#allocation51_spill] sm:$0xff] %v12017_v0  ;;  %v3748_v27 = vcombine.high %v2831_v2, %v2832_v22  ;;  %v3746_v47 = vcombine.high %v11997_v26, %v11997_v26  ;;  %v3755_v44 = vrot.slane %v3747_v60, %v10924_v9  ;;  %v2735_v18 = vmul.f32 %v10921_v30, %v15137_v48  ;;  %v12076_v23 = vld [vmem:[#allocation3 + $0x68] sm:$0xff] }
 0x4b0   : > { %15136 = vst [vmem:[#allocation52_spill] sm:$0xff] %v12025_v20  ;;  %v2736_v37 = vmul.f32 %v10926_v1, %v15138_v11  ;;  %v15139_v5 = vcombine.low %v11829_v21, %v11832_v57  ;;  %v12044_v22 = vrot.slane %v6833_v10, %v10924_v9  ;;  %v12047_v26 = vmax.f32 %v6455_v46, %v12021_v61 }
 0x4b1   : > { %v12050_v7 = vmax.f32 %v6456_v3, %v12023_v54  ;;  %v15142_v42 = vcombine.low %v11864_v43, %v11870_v13  ;;  %v15144_v33 = vcombine.low %v11960_v16, %v11967_v32  ;;  %v15146_v21 = vcombine.high %v11960_v16, %v11967_v32  ;;  %v12085_v16 = vld [vmem:[#allocation3 + $0x1a0] sm:$0xff]  ;;  %v15195_v13 = vld [vmem:[#allocation60_spill] sm:$0xff] }
 0x4b2   : > { %v12038_v17 = vrot.slane %v15139_v5, %v10924_v9  ;;  %15141 = vst [vmem:[#allocation54_spill] sm:$0xff] %v12044_v22  ;;  %v15148_v10 = vcombine.low %v11947_v19, %v11973_v62  ;;  %v12079_v40 = vmax.f32 %v6457_v4, %v12017_v0  ;;  %v12082_v36 = vmax.f32 %v6458_v35, %v12025_v20  ;;  %v15153_v35 = vld [vmem:[#allocation97_spill] sm:$0xff] }
 0x4b3   : > { %v12056_v55 = vrot.slane %v15142_v42, %v10924_v9  ;;  %v12062_v45 = vrot.slane %v15144_v33, %v10924_v9  ;;  %v12068_v57 = vrot.slane %v15146_v21, %v10924_v9  ;;  %v3762_v52 = vrot.slane %v3748_v27, %v10924_v9  ;;  %v15154_v33 = vld [vmem:[#allocation98_spill] sm:$0xff] }
 0x4b4   : > { %15140 = vst [vmem:[#allocation53_spill] sm:$0xff] %v12038_v17  ;;  %v12074_v63 = vrot.slane %v15148_v10, %v10924_v9  ;;  %15150 = vst [vmem:[#allocation70_spill] sm:$0xff] %v12079_v40  ;;  %v3763_v31 = vcombine.high %v3755_v44, %v3755_v44  ;;  %v4698_v32 = vcombine.low %v3746_v47, %v3755_v44  ;;  %v2833_v25 = vmax.f32 %v2735_v18, 0.0  ;;  %v15155_v10 = vld [vmem:[#allocation99_spill] sm:$0xff] }
 0x4b5   : > { %15143 = vst [vmem:[#allocation55_spill] sm:$0xff] %v12056_v55  ;;  %15145 = vst [vmem:[#allocation56_spill] sm:$0xff] %v12062_v45  ;;  %v2834_v8 = vmax.f32 %v2736_v37, 0.0  ;;  %v2737_v53 = vmul.f32 %v10921_v30, %v15152_v51  ;;  %v5710_v12 = vrot.slane %v12076_v23, 1  ;;  %v6131_v56 = vrot.slane %v12076_v23, 2  ;;  %v12095_v46 = vld [vmem:[#allocation3 + $0x390] sm:$0xff] }
 0x4b6   : > { %15147 = vst [vmem:[#allocation57_spill] sm:$0xff] %v12068_v57  ;;  %15149 = vst [vmem:[#allocation75_spill] sm:$0xff] %v12074_v63  ;;  %v4699_v15 = vcombine.low %v3763_v31, %v3762_v52  ;;  %v12097_v4 = vld [vmem:[#allocation3 + $0x3f0] sm:$0xff]  ;;  %v2738_v28 = vmul.f32 %v10926_v1, %v15153_v35  ;;  %v5713_v60 = vrot.slane %v12085_v16, 1  ;;  %v5711_v27 = vrot.slane %v12095_v46, 1 }
 0x4b7   : > { %15151 = vst [vmem:[#allocation71_spill] sm:$0xff] %v12082_v36  ;;  %v3765_v3 = vcombine.low %v2833_v25, %v2834_v8  ;;  %v3766_v39 = vcombine.high %v2833_v25, %v2834_v8  ;;  %v5714_v47 = vrot.slane %v12097_v4, 1  ;;  %v4706_v44 = vrot.slane %v4698_v32, %v10924_v9 }
 0x4b8   : > { %v14604_v48 = vrot.slane %v12095_v46, 2  ;;  %v3764_v18 = vcombine.high %v3762_v52, %v3762_v52  ;;  %v4713_v11 = vrot.slane %v4699_v15, %v10924_v9  ;;  %v6134_v5 = vrot.slane %v12085_v16, 2 }
 0x4b9   : > { %v3773_v37 = vrot.slane %v3765_v3, %v10924_v9  ;;  %v2835_v42 = vmax.f32 %v2737_v53, 0.0  ;;  %v2739_v21 = vmul.f32 %v10921_v30, %v15154_v33  ;;  %v2740_v31 = vmul.f32 %v10926_v1, %v15155_v10 }
 0x4ba   : > { %v5712_v25 = vsel %vm5577_vm0, %v5710_v12, %v5711_v27  ;;  %v14605_v32 = vrot.slane %v12097_v4, 2  ;;  %v2836_v8 = vmax.f32 %v2738_v28, 0.0  ;;  %v3780_v52 = vrot.slane %v3766_v39, %v10924_v9 }
 0x4bb   : > { %v5715_v51 = vsel %vm5577_vm0, %v5713_v60, %v5714_v47  ;;  %v4714_v15 = vcombine.low %v4706_v44, %v4713_v11  ;;  %v4715_v3 = vcombine.high %v4706_v44, %v4713_v11  ;;  %v3781_v35 = vcombine.high %v3773_v37, %v3773_v37 }
 0x4bc   : > { %v12120_v33 = vmax.f32 %v12095_v46, %v5711_v27  ;;  %v6133_v12 = vsel %vm5998_vm1, %v6131_v56, %v14604_v48  ;;  %v4716_v10 = vcombine.low %v3764_v18, %v3773_v37  ;;  %v5966_v28 = vmax.f32 %v12076_v23, %v5712_v25  ;;  %v15157_v48 = vld [vmem:[#allocation101_spill] sm:$0xff] }
 0x4bd   : > { %v5070_v58 = vrot.slane %v4714_v15, 7  ;;  %v5071_v39 = vrot.slane %v4715_v3, 7  ;;  %v4730_v60 = vrot.slane %v3781_v35, %v10924_v9  ;;  %v5967_v44 = vmax.f32 %v12085_v16, %v5715_v51  ;;  %v15156_v35 = vld [vmem:[#allocation100_spill] sm:$0xff] }
 0x4be   : > { %v12129_v11 = vmax.f32 %v12097_v4, %v5714_v47  ;;  %v6136_v27 = vsel %vm5998_vm1, %v6134_v5, %v14605_v32  ;;  %v4723_v53 = vrot.slane %v4716_v10, %v10924_v9  ;;  %v3782_v56 = vcombine.high %v3780_v52, %v3780_v52 }
 0x4bf   : > { %5309 = vst [vmem:[#allocation3 + $0x108] sm:$0xfe] %v5070_v58  ;;  %5310 = vst [vmem:[#allocation3 + $0x2a8] sm:$0xfe] %v5071_v39  ;;  %v3783_v18 = vcombine.low %v2835_v42, %v2836_v8  ;;  %v2837_v23 = vmax.f32 %v2739_v21, 0.0  ;;  %v2838_v37 = vmax.f32 %v2740_v31, 0.0  ;;  %v3784_v3 = vcombine.high %v2835_v42, %v2836_v8 }
 0x4c0   : > { %v4731_v25 = vcombine.low %v4723_v53, %v4730_v60  ;;  %v4732_v15 = vcombine.high %v4723_v53, %v4730_v60  ;;  %v2741_v16 = vmul.f32 %v10921_v30, %v15156_v35  ;;  %v4733_v51 = vcombine.low %v3780_v52, %v3782_v56 }
 0x4c1   : > { %v3791_v47 = vrot.slane %v3783_v18, %v10924_v9  ;;  %v3801_v2 = vcombine.low %v2837_v23, %v2838_v37  ;;  %v2742_v5 = vmul.f32 %v10926_v1, %v15157_v48  ;;  %v3798_v63 = vrot.slane %v3784_v3, %v10924_v9 }
 0x4c2   : > { %v5072_v10 = vrot.slane %v4731_v25, 7  ;;  %v5074_v32 = vrot.slane %v4732_v15, 7  ;;  %v2839_v57 = vmax.f32 %v2741_v16, 0.0  ;;  %v12141_v21 = vmax.f32 %v5966_v28, %v6133_v12 }
 0x4c3   : > { %v3799_v31 = vcombine.high %v3791_v47, %v3791_v47  ;;  %v3809_v42 = vrot.slane %v3801_v2, %v10924_v9  ;;  %v2840_v8 = vmax.f32 %v2742_v5, 0.0  ;;  %v3800_v52 = vcombine.high %v3798_v63, %v3798_v63 }
 0x4c4   : > { %v5073_v53 = vsel %vm4943_vm2, %v5070_v58, %v5072_v10  ;;  %v5075_v60 = vsel %vm4943_vm2, %v5071_v39, %v5074_v32  ;;  %v3802_v56 = vcombine.high %v2837_v23, %v2838_v37  ;;  %v4741_v18 = vrot.slane %v4733_v51, %v10924_v9  ;;  %v15158_v37 = vld [vmem:[#allocation102_spill] sm:$0xff] }
 0x4c5   : > { %5311 = vst [vmem:[#allocation3 + $0x358] sm:$0x7f] %v5073_v53  ;;  %5312 = vst [vmem:[#allocation3 + $0x200] sm:$0x7f] %v5075_v60  ;;  %v4734_v48 = vcombine.low %v3791_v47, %v3799_v31  ;;  %v3817_v25 = vcombine.high %v3809_v42, %v3809_v42  ;;  %v3819_v15 = vcombine.low %v2839_v57, %v2840_v8 }
 0x4c6   : > { %v12147_v3 = vld [vmem:[#allocation3 + $0x108] sm:$0xff]  ;;  %v4751_v28 = vcombine.low %v3798_v63, %v3800_v52  ;;  %v4765_v2 = vrot.slane %v3809_v42, %v10924_v9  ;;  %v3816_v58 = vrot.slane %v3802_v56, %v10924_v9  ;;  %v3820_v35 = vcombine.high %v2839_v57, %v2840_v8 }
 0x4c7   : > { %v12149_v12 = vld [vmem:[#allocation3 + $0x2a8] sm:$0xff]  ;;  %v12153_v32 = vmax.f32 %v5967_v44, %v6136_v27  ;;  %v5716_v39 = vrot.slane %v12147_v3, 1  ;;  %v6137_v23 = vrot.slane %v12147_v3, 2  ;;  %v12159_v16 = vmul.f32 %v10921_v30, %v15158_v37 }
 0x4c8   : > { %v4748_v47 = vrot.slane %v4734_v48, %v10924_v9  ;;  %v4758_v51 = vrot.slane %v4751_v28, %v10924_v9  ;;  %v3818_v63 = vcombine.high %v3816_v58, %v3816_v58  ;;  %v3827_v5 = vrot.slane %v3819_v15, %v10924_v9 }
 0x4c9   : > { %v5719_v10 = vrot.slane %v12149_v12, 1  ;;  %v6140_v57 = vrot.slane %v12149_v12, 2  ;;  %v4768_v44 = vcombine.low %v3817_v25, %v3816_v58  ;;  %v3834_v27 = vrot.slane %v3820_v35, %v10924_v9 }
 0x4ca   : > { %v4749_v31 = vcombine.low %v4741_v18, %v4748_v47  ;;  %v4750_v42 = vcombine.high %v4741_v18, %v4748_v47  ;;  %v4766_v8 = vcombine.low %v4758_v51, %v4765_v2  ;;  %v4767_v53 = vcombine.high %v4758_v51, %v4765_v2 }
 0x4cb   : > { %v3835_v60 = vcombine.high %v3827_v5, %v3827_v5  ;;  %v4769_v52 = vcombine.low %v3818_v63, %v3827_v5  ;;  %v4776_v56 = vrot.slane %v4768_v44, %v10924_v9  ;;  %v3836_v48 = vcombine.high %v3834_v27, %v3834_v27 }
 0x4cc   : > { %v5431_v28 = vld [vmem:[#allocation3 + $0x358] sm:$0xff]  ;;  %v12168_v37 = vld [vmem:[#allocation3 + $0x200] sm:$0xff]  ;;  %v5076_v15 = vrot.slane %v4749_v31, 7  ;;  %v5077_v45 = vrot.slane %v4750_v42, 7  ;;  %v5078_v55 = vrot.slane %v4766_v8, 7  ;;  %v5080_v22 = vrot.slane %v4767_v53, 7 }
 0x4cd   : > { %v5717_v17 = vrot.slane %v5431_v28, 1  ;;  %v6138_v25 = vrot.slane %v5431_v28, 2  ;;  %v5720_v58 = vrot.slane %v12168_v37, 1  ;;  %v6141_v18 = vrot.slane %v12168_v37, 2  ;;  %v15161_v42 = vld [vmem:[#allocation103_spill] sm:$0xff] }
 0x4ce   : > { %5313 = vst [vmem:[#allocation3 + $0x310] sm:$0xfe] %v5076_v15  ;;  %5314 = vst [vmem:[#allocation3 + $0x138] sm:$0xfe] %v5077_v45  ;;  %v5079_v2 = vsel %vm4943_vm2, %v5076_v15, %v5078_v55  ;;  %v5081_v35 = vsel %vm4943_vm2, %v5077_v45, %v5080_v22  ;;  %v4783_v47 = vrot.slane %v4769_v52, %v10924_v9  ;;  %v15159_v63 = vrot.slane %v12095_v46, 2 }
 0x4cf   : > { %v4786_v51 = vcombine.low %v3835_v60, %v3834_v27  ;;  %v5718_v44 = vsel %vm5577_vm0, %v5716_v39, %v5717_v17  ;;  %v5721_v31 = vsel %vm5577_vm0, %v5719_v10, %v5720_v58  ;;  %5315 = vst [vmem:[#allocation3 + $0x28] sm:$0x7f] %v5079_v2  ;;  %5316 = vst [vmem:[#allocation3 + $0x198] sm:$0x7f] %v5081_v35  ;;  %v15162_v55 = vrot.slane %v12097_v4, 2 }
 0x4d0   : > { %v12178_v5 = vmax.f32 %v12120_v33, %v15159_v63  ;;  %v2744_v8 = vmul.f32 %v10926_v1, %v15161_v42  ;;  %v5970_v45 = vmax.f32 %v12147_v3, %v5718_v44  ;;  %v6139_v46 = vsel %vm5998_vm1, %v6137_v23, %v6138_v25 }
 0x4d1   : > { %v12187_v22 = vmax.f32 %v12129_v11, %v15162_v55  ;;  %v5971_v33 = vmax.f32 %v12149_v12, %v5721_v31  ;;  %v6142_v39 = vsel %vm5998_vm1, %v6140_v57, %v6141_v18  ;;  %v4784_v27 = vcombine.low %v4776_v56, %v4783_v47 }
 0x4d2   : > { %15160 = vst [vmem:[#allocation82_spill] sm:$0xff] %v12178_v5  ;;  %v4785_v10 = vcombine.high %v4776_v56, %v4783_v47  ;;  %v4793_v53 = vrot.slane %v4786_v51, %v10924_v9  ;;  %v6459_v60 = vmax.f32 %v12021_v61, %v12141_v21  ;;  %v6460_v4 = vmax.f32 %v12023_v54, %v12153_v32 }
 0x4d3   : > { %15163 = vst [vmem:[#allocation83_spill] sm:$0xff] %v12187_v22  ;;  %v4800_v11 = vrot.slane %v3836_v48, %v10924_v9  ;;  %v2841_v3 = vmax.f32 %v12159_v16, 0.0  ;;  %v5972_v52 = vmax.f32 %v5431_v28, %v5717_v17  ;;  %v5082_v23 = vrot.slane %v4784_v27, 7 }
 0x4d4   : > { %v5083_v15 = vrot.slane %v4785_v10, 7  ;;  %v2842_v12 = vmax.f32 %v2744_v8, 0.0  ;;  %v15164_v57 = vcombine.low %v12047_v26, %v12050_v7  ;;  %v12206_v2 = vmax.f32 %v5970_v45, %v6139_v46  ;;  %v15172_v10 = vld [vmem:[#allocation104_spill] sm:$0xff] }
 0x4d5   : > { %v12208_v61 = vmax.f32 %v5971_v33, %v6142_v39  ;;  %v4801_v21 = vcombine.low %v4793_v53, %v4800_v11  ;;  %v15166_v54 = vcombine.high %v12047_v26, %v12050_v7  ;;  %v15168_v17 = vcombine.low %v12079_v40, %v12082_v36  ;;  %v5433_v28 = vld [vmem:[#allocation3 + $0x310] sm:$0xff]  ;;  %v12223_v35 = vld [vmem:[#allocation3 + $0x138] sm:$0xff]  ;;  %5317 = vst [vmem:[#allocation3 + $0x2d0] sm:$0xfe] %v5082_v23 }
 0x4d6   : > { %v12204_v56 = vrot.slane %v15164_v57, %v10924_v9  ;;  %v5973_v48 = vmax.f32 %v12168_v37, %v5720_v58  ;;  %5318 = vst [vmem:[#allocation3 + $0x300] sm:$0xfe] %v5083_v15  ;;  %v4802_v47 = vcombine.high %v4793_v53, %v4800_v11  ;;  %v12228_v26 = vmax.f32 %v6459_v60, %v12206_v2  ;;  %v5435_v44 = vld [vmem:[#allocation3 + $0x28] sm:$0xff]  ;;  %v5436_v31 = vld [vmem:[#allocation3 + $0x198] sm:$0xff] }
 0x4d7   : > { %v12214_v32 = vrot.slane %v15166_v54, %v10924_v9  ;;  %v12220_v16 = vrot.slane %v15168_v17, %v10924_v9  ;;  %v12231_v7 = vmax.f32 %v6460_v4, %v12208_v61  ;;  %v5722_v63 = vrot.slane %v5433_v28, 1  ;;  %v15173_v60 = vld [vmem:[#allocation105_spill] sm:$0xff] }
 0x4d8   : > { %15165 = vst [vmem:[#allocation84_spill] sm:$0xff] %v12204_v56  ;;  %15170 = vst [vmem:[#allocation78_spill] sm:$0xff] %v12228_v26  ;;  %v12235_v58 = vmax.f32 %v5972_v52, %v6138_v25  ;;  %v5723_v42 = vrot.slane %v5435_v44, 1  ;;  %v3837_v8 = vcombine.low %v2841_v3, %v2842_v12  ;;  %v5725_v55 = vrot.slane %v12223_v35, 1 }
 0x4d9   : > { %15167 = vst [vmem:[#allocation79_spill] sm:$0xff] %v12214_v32  ;;  %15169 = vst [vmem:[#allocation81_spill] sm:$0xff] %v12220_v16  ;;  %v5726_v45 = vrot.slane %v5436_v31, 1  ;;  %v5084_v46 = vrot.slane %v4801_v21, 7  ;;  %v3838_v33 = vcombine.high %v2841_v3, %v2842_v12  ;;  %v12238_v39 = vmax.f32 %v5973_v48, %v6141_v18 }
 0x4da   : > { %15171 = vst [vmem:[#allocation23_spill] sm:$0xff] %v12231_v7  ;;  %v5086_v27 = vrot.slane %v4802_v47, 7  ;;  %v2745_v53 = vmul.f32 %v10921_v30, %v15172_v10  ;;  %v2746_v4 = vmul.f32 %v10926_v1, %v15173_v60  ;;  %v6937_v25 = vcombine.low %v12228_v26, %v12231_v7 }
 0x4db   : > { %v6143_v11 = vrot.slane %v5433_v28, 2  ;;  %v5724_v52 = vsel %vm5577_vm0, %v5722_v63, %v5723_v42  ;;  %v6144_v57 = vrot.slane %v5435_v44, 2  ;;  %v6146_v54 = vrot.slane %v12223_v35, 2 }
 0x4dc   : > { %v6147_v21 = vrot.slane %v5436_v31, 2  ;;  %v5085_v18 = vsel %vm4943_vm2, %v5082_v23, %v5084_v46  ;;  %v5087_v3 = vsel %vm4943_vm2, %v5083_v15, %v5086_v27  ;;  %v5976_v12 = vmax.f32 %v5435_v44, %v5723_v42  ;;  %v15175_v46 = vld [vmem:[#allocation106_spill] sm:$0xff] }
 0x4dd   : > { %v5727_v17 = vsel %vm5577_vm0, %v5725_v55, %v5726_v45  ;;  %5319 = vst [vmem:[#allocation3 + $0x170] sm:$0x7f] %v5085_v18  ;;  %5320 = vst [vmem:[#allocation3 + $0x160] sm:$0x7f] %v5087_v3  ;;  %v3845_v48 = vrot.slane %v3837_v8, %v10924_v9  ;;  %v3852_v47 = vrot.slane %v3838_v33, %v10924_v9  ;;  %v2843_v37 = vmax.f32 %v2745_v53, 0.0  ;;  %v15176_v33 = vld [vmem:[#allocation107_spill] sm:$0xff] }
 0x4de   : > { %v5974_v10 = vmax.f32 %v5433_v28, %v5724_v52  ;;  %v5977_v60 = vmax.f32 %v5436_v31, %v5726_v45  ;;  %v12256_v51 = vrot.slane %v6937_v25, %v10924_v9  ;;  %v6145_v23 = vsel %vm5998_vm1, %v6143_v11, %v6144_v57  ;;  %v12271_v11 = vld [vmem:[#allocation3 + $0x2d0] sm:$0xff] }
 0x4df   : > { %v3853_v15 = vcombine.high %v3845_v48, %v3845_v48  ;;  %v3854_v44 = vcombine.high %v3852_v47, %v3852_v47  ;;  %v5975_v42 = vmax.f32 %v12223_v35, %v5727_v17  ;;  %v2844_v55 = vmax.f32 %v2746_v4, 0.0  ;;  %v12273_v35 = vld [vmem:[#allocation3 + $0x300] sm:$0xff] }
 0x4e0   : > { %15174 = vst [vmem:[#allocation66_spill] sm:$0xff] %v12256_v51  ;;  %v2747_v8 = vmul.f32 %v10921_v30, %v15175_v46  ;;  %v2748_v27 = vmul.f32 %v10926_v1, %v15176_v33  ;;  %v12264_v18 = vmax.f32 %v5976_v12, %v6144_v57  ;;  %v6148_v28 = vsel %vm5998_vm1, %v6146_v54, %v6147_v21 }
 0x4e1   : > { %v4803_v31 = vcombine.low %v3845_v48, %v3853_v15  ;;  %v4804_v45 = vcombine.low %v3852_v47, %v3854_v44  ;;  %v12267_v53 = vmax.f32 %v5974_v10, %v6145_v23  ;;  %v12269_v25 = vmax.f32 %v5977_v60, %v6147_v21  ;;  %v15177_v21 = vld [vmem:[#allocation108_spill] sm:$0xff]  ;;  %v15178_v10 = vld [vmem:[#allocation109_spill] sm:$0xff] }
 0x4e2   : > { %v3855_v4 = vcombine.low %v2843_v37, %v2844_v55  ;;  %v3856_v52 = vcombine.high %v2843_v37, %v2844_v55  ;;  %v2845_v57 = vmax.f32 %v2747_v8, 0.0  ;;  %v2846_v12 = vmax.f32 %v2748_v27, 0.0 }
 0x4e3   : > { %v4811_v3 = vrot.slane %v4803_v31, %v10924_v9  ;;  %v4818_v17 = vrot.slane %v4804_v45, %v10924_v9  ;;  %v12277_v46 = vmax.f32 %v5975_v42, %v6148_v28  ;;  %v2749_v47 = vmul.f32 %v10921_v30, %v15177_v21 }
 0x4e4   : > { %v12279_v54 = vld [vmem:[#allocation3 + $0x170] sm:$0xff]  ;;  %v3863_v48 = vrot.slane %v3855_v4, %v10924_v9  ;;  %v2750_v60 = vmul.f32 %v10926_v1, %v15178_v10  ;;  %v5728_v37 = vrot.slane %v12271_v11, 1  ;;  %v6149_v23 = vrot.slane %v12271_v11, 2  ;;  %v12294_v31 = vld [vmem:[#allocation3 + $0x160] sm:$0xff] }
 0x4e5   : > { %v5731_v15 = vrot.slane %v12273_v35, 1  ;;  %v3870_v44 = vrot.slane %v3856_v52, %v10924_v9  ;;  %v5729_v42 = vrot.slane %v12279_v54, 1  ;;  %v4819_v55 = vcombine.low %v4811_v3, %v4818_v17 }
 0x4e6   : > { %v4820_v8 = vcombine.high %v4811_v3, %v4818_v17  ;;  %v3871_v33 = vcombine.high %v3863_v48, %v3863_v48  ;;  %v6152_v28 = vrot.slane %v12273_v35, 2  ;;  %v3873_v45 = vcombine.low %v2845_v57, %v2846_v12 }
 0x4e7   : > { %v3874_v4 = vcombine.high %v2845_v57, %v2846_v12  ;;  %v14621_v10 = vrot.slane %v12279_v54, 2  ;;  %v2847_v52 = vmax.f32 %v2749_v47, 0.0  ;;  %v2848_v63 = vmax.f32 %v2750_v60, 0.0 }
 0x4e8   : > { %v5088_v51 = vrot.slane %v4819_v55, 7  ;;  %v5089_v7 = vrot.slane %v4820_v8, 7  ;;  %v4821_v3 = vcombine.low %v3863_v48, %v3871_v33  ;;  %v4835_v17 = vrot.slane %v3870_v44, %v10924_v9  ;;  %v15179_v55 = vld [vmem:[#allocation110_spill] sm:$0xff] }
 0x4e9   : > { %v5730_v27 = vsel %vm5577_vm0, %v5728_v37, %v5729_v42  ;;  %v5732_v26 = vrot.slane %v12294_v31, 1  ;;  %v3872_v40 = vcombine.high %v3870_v44, %v3870_v44  ;;  %v3881_v12 = vrot.slane %v3873_v45, %v10924_v9  ;;  %v15180_v44 = vld [vmem:[#allocation111_spill] sm:$0xff] }
 0x4ea   : > { %5321 = vst [vmem:[#allocation3 + $0x90] sm:$0xfe] %v5088_v51  ;;  %5322 = vst [vmem:[#allocation3 + $0xf8] sm:$0xfe] %v5089_v7  ;;  %v4828_v57 = vrot.slane %v4821_v3, %v10924_v9  ;;  %v3888_v47 = vrot.slane %v3874_v4, %v10924_v9  ;;  %v3891_v60 = vcombine.low %v2847_v52, %v2848_v63 }
 0x4eb   : > { %v12307_v48 = vmax.f32 %v12279_v54, %v5729_v42  ;;  %v6151_v37 = vsel %vm5998_vm1, %v6149_v23, %v14621_v10  ;;  %v2751_v8 = vmul.f32 %v10921_v30, %v15179_v55  ;;  %v2752_v33 = vmul.f32 %v10926_v1, %v15180_v44 }
 0x4ec   : > { %v4836_v21 = vcombine.low %v4828_v57, %v4835_v17  ;;  %v4837_v3 = vcombine.high %v4828_v57, %v4835_v17  ;;  %v3889_v16 = vcombine.high %v3881_v12, %v3881_v12  ;;  %v3890_v45 = vcombine.high %v3888_v47, %v3888_v47 }
 0x4ed   : > { %v5978_v4 = vmax.f32 %v12271_v11, %v5730_v27  ;;  %v5733_v36 = vsel %vm5577_vm0, %v5731_v15, %v5732_v26  ;;  %v4838_v42 = vcombine.low %v3872_v40, %v3881_v12  ;;  %v3899_v32 = vrot.slane %v3891_v60, %v10924_v9 }
 0x4ee   : > { %v5090_v56 = vrot.slane %v4836_v21, 7  ;;  %v5092_v19 = vrot.slane %v4837_v3, 7  ;;  %v4839_v23 = vcombine.low %v3889_v16, %v3888_v47  ;;  %v2849_v10 = vmax.f32 %v2751_v8, 0.0  ;;  %v15181_v21 = vld [vmem:[#allocation112_spill] sm:$0xff] }
 0x4ef   : > { %v4846_v55 = vrot.slane %v4838_v42, %v10924_v9  ;;  %v3907_v62 = vcombine.high %v3899_v32, %v3899_v32  ;;  %v4856_v43 = vcombine.low %v3890_v45, %v3899_v32  ;;  %v2850_v44 = vmax.f32 %v2752_v33, 0.0 }
 0x4f0   : > { %v5091_v17 = vsel %vm4943_vm2, %v5088_v51, %v5090_v56  ;;  %v5093_v57 = vsel %vm4943_vm2, %v5089_v7, %v5092_v19  ;;  %v4853_v11 = vrot.slane %v4839_v23, %v10924_v9  ;;  %v3892_v27 = vcombine.high %v2847_v52, %v2848_v63 }
 0x4f1   : > { %5323 = vst [vmem:[#allocation3 + $0x280] sm:$0x7f] %v5091_v17  ;;  %5324 = vst [vmem:[#allocation3 + $0xa0] sm:$0x7f] %v5093_v57  ;;  %v4863_v40 = vrot.slane %v4856_v43, %v10924_v9  ;;  %v4870_v15 = vrot.slane %v3907_v62, %v10924_v9  ;;  %v3909_v16 = vcombine.low %v2849_v10, %v2850_v44  ;;  %v15182_v51 = vrot.slane %v12294_v31, 2  ;;  %v12336_v62 = vld [vmem:[#allocation3 + $0x90] sm:$0xff] }
 0x4f2   : > { %v12327_v12 = vmul.f32 %v10921_v30, %v15181_v21  ;;  %v12329_v32 = vmax.f32 %v5978_v4, %v6151_v37  ;;  %v5979_v56 = vmax.f32 %v12273_v35, %v5733_v36  ;;  %v5981_v19 = vmax.f32 %v12294_v31, %v5732_v26  ;;  %v15183_v37 = vld [vmem:[#allocation113_spill] sm:$0xff] }
 0x4f3   : > { %v6154_v7 = vsel %vm5998_vm1, %v6152_v28, %v15182_v51  ;;  %v4854_v63 = vcombine.low %v4846_v55, %v4853_v11  ;;  %v4855_v52 = vcombine.high %v4846_v55, %v4853_v11  ;;  %v4871_v43 = vcombine.low %v4863_v40, %v4870_v15  ;;  %v12345_v26 = vld [vmem:[#allocation3 + $0xf8] sm:$0xff] }
 0x4f4   : > { %v4872_v47 = vcombine.high %v4863_v40, %v4870_v15  ;;  %v3906_v60 = vrot.slane %v3892_v27, %v10924_v9  ;;  %v3917_v8 = vrot.slane %v3909_v16, %v10924_v9  ;;  %v12342_v33 = vmul.f32 %v10926_v1, %v15183_v37 }
 0x4f5   : > { %v14624_v36 = vmax.f32 %v12327_v12, 0.0  ;;  %v5094_v35 = vrot.slane %v4854_v63, 7  ;;  %v5095_v28 = vrot.slane %v4855_v52, 7  ;;  %v5096_v3 = vrot.slane %v4871_v43, 7 }
 0x4f6   : > { %v5098_v45 = vrot.slane %v4872_v47, 7  ;;  %v3908_v4 = vcombine.high %v3906_v60, %v3906_v60  ;;  %v3925_v42 = vcombine.high %v3917_v8, %v3917_v8  ;;  %v14625_v23 = vmax.f32 %v12342_v33, 0.0 }
 0x4f7   : > { %v3910_v55 = vcombine.high %v2849_v10, %v2850_v44  ;;  %v12348_v17 = vmax.f32 %v5979_v56, %v6154_v7  ;;  %v5734_v57 = vrot.slane %v12336_v62, 1  ;;  %5325 = vst [vmem:[#allocation3 + $0x1e0] sm:$0xfe] %v5094_v35  ;;  %5326 = vst [vmem:[#allocation3 + $0x78] sm:$0xfe] %v5095_v28  ;;  %v5097_v11 = vsel %vm4943_vm2, %v5094_v35, %v5096_v3 }
 0x4f8   : > { %v5099_v27 = vsel %vm4943_vm2, %v5095_v28, %v5098_v45  ;;  %v5737_v40 = vrot.slane %v12345_v26, 1  ;;  %v12354_v15 = vld [vmem:[#allocation3 + $0x280] sm:$0xff]  ;;  %5327 = vst [vmem:[#allocation3 + $0x258] sm:$0x7f] %v5097_v11  ;;  %v4873_v21 = vcombine.low %v3906_v60, %v3908_v4  ;;  %v4874_v10 = vcombine.low %v3917_v8, %v3925_v42 }
 0x4f9   : > { %v12356_v16 = vld [vmem:[#allocation3 + $0xa0] sm:$0xff]  ;;  %5328 = vst [vmem:[#allocation3 + $0xe8] sm:$0x7f] %v5099_v27  ;;  %v3924_v44 = vrot.slane %v3910_v55, %v10924_v9  ;;  %v15184_v56 = vmax.f32 %v12206_v2, %v12267_v53  ;;  %v15186_v7 = vmax.f32 %v12208_v61, %v12277_v46  ;;  %v5735_v52 = vrot.slane %v12354_v15, 1 }
 0x4fa   : > { %v5738_v43 = vrot.slane %v12356_v16, 1  ;;  %v4881_v47 = vrot.slane %v4873_v21, %v10924_v9  ;;  %v4888_v60 = vrot.slane %v4874_v10, %v10924_v9  ;;  %v3927_v2 = vcombine.low %v14624_v36, %v14625_v23  ;;  %v15190_v21 = vld [vmem:[#allocation58_spill] sm:$0xff]  ;;  %v15191_v10 = vld [vmem:[#allocation59_spill] sm:$0xff] }
 0x4fb   : > { %v12363_v51 = vmax.f32 %v15184_v56, %v12329_v32  ;;  %v12369_v63 = vmax.f32 %v15186_v7, %v12348_v17  ;;  %v3926_v8 = vcombine.high %v3924_v44, %v3924_v44  ;;  %v15188_v53 = vrot.slane %v12279_v54, 2 }
 0x4fc   : > { %v15189_v46 = vrot.slane %v12294_v31, 2  ;;  %v6155_v35 = vrot.slane %v12336_v62, 2  ;;  %v14627_v28 = vrot.slane %v12354_v15, 2  ;;  %v6158_v3 = vrot.slane %v12345_v26, 2 }
 0x4fd   : > { %15185 = vst [vmem:[#allocation76_spill] sm:$0xff] %v12363_v51  ;;  %15187 = vst [vmem:[#allocation77_spill] sm:$0xff] %v12369_v63  ;;  %v12382_v61 = vmax.f32 %v12307_v48, %v15188_v53  ;;  %v5736_v45 = vsel %vm5577_vm0, %v5734_v57, %v5735_v52  ;;  %v5739_v4 = vsel %vm5577_vm0, %v5737_v40, %v5738_v43  ;;  %v14626_v42 = vrot.slane %v12356_v16, 2 }
 0x4fe   : > { %v12386_v37 = vmax.f32 %v5981_v19, %v15189_v46  ;;  %v4889_v48 = vcombine.low %v4881_v47, %v4888_v60  ;;  %v4890_v19 = vcombine.high %v4881_v47, %v4888_v60  ;;  %v12398_v55 = vld [vmem:[#allocation3 + $0x1e0] sm:$0xff]  ;;  %v12400_v11 = vld [vmem:[#allocation3 + $0x78] sm:$0xff]  ;;  %v12403_v27 = vrot.slane %v3927_v2, %v10924_v9 }
 0x4ff   : > { %v4891_v57 = vcombine.low %v3924_v44, %v3926_v8  ;;  %v2699_v40 = vmul.f32 %v10921_v30, %v15190_v21  ;;  %v2700_v56 = vmul.f32 %v10926_v1, %v15191_v10  ;;  %v5982_v7 = vmax.f32 %v12336_v62, %v5736_v45  ;;  %v12415_v46 = vld [vmem:[#allocation3 + $0x258] sm:$0xff] }
 0x500   : > { %v5984_v53 = vmax.f32 %v12354_v15, %v5735_v52  ;;  %v6157_v47 = vsel %vm5998_vm1, %v6155_v35, %v14627_v28  ;;  %v5983_v60 = vmax.f32 %v12345_v26, %v5739_v4  ;;  %v12417_v2 = vld [vmem:[#allocation3 + $0xe8] sm:$0xff]  ;;  %v6160_v44 = vsel %vm5998_vm1, %v6158_v3, %v14626_v42 }
 0x501   : > { %v5740_v8 = vrot.slane %v12398_v55, 1  ;;  %v5741_v62 = vrot.slane %v12415_v46, 1  ;;  %v4905_v52 = vrot.slane %v12403_v27, %v10924_v9  ;;  %v5743_v45 = vrot.slane %v12400_v11, 1 }
 0x502   : > { %v5744_v35 = vrot.slane %v12417_v2, 1  ;;  %v5100_v26 = vrot.slane %v4889_v48, 7  ;;  %v5101_v4 = vrot.slane %v4890_v19, 7  ;;  %v5985_v21 = vmax.f32 %v12356_v16, %v5738_v43 }
 0x503   : > { %v6161_v10 = vrot.slane %v12398_v55, 2  ;;  %v4898_v3 = vrot.slane %v4891_v57, %v10924_v9  ;;  %v6403_v54 = vmax.f32 %v5982_v7, %v6157_v47  ;;  %v6404_v36 = vmax.f32 %v5983_v60, %v6160_v44 }
 0x504   : > { %v6164_v23 = vrot.slane %v12400_v11, 2  ;;  %5329 = vst [vmem:[#allocation3 + $0x1b8] sm:$0xfe] %v5100_v26  ;;  %5330 = vst [vmem:[#allocation3 + $0x190] sm:$0xfe] %v5101_v4  ;;  %v5742_v28 = vsel %vm5577_vm0, %v5740_v8, %v5741_v62  ;;  %v2797_v63 = vmax.f32 %v2699_v40, 0.0  ;;  %v5745_v43 = vsel %vm5577_vm0, %v5743_v45, %v5744_v35 }
 0x505   : > { %v4906_v48 = vcombine.low %v4898_v3, %v4905_v52  ;;  %v4907_v19 = vcombine.high %v4898_v3, %v4905_v52  ;;  %v2798_v51 = vmax.f32 %v2700_v56, 0.0  ;;  %v15192_v31 = vmax.f32 %v11574_v24, 0.0  ;;  %v15196_v3 = vld [vmem:[#allocation61_spill] sm:$0xff] }
 0x506   : > { %v15193_v57 = vmax.f32 %v11570_v14, 0.0  ;;  %v3439_v47 = vcombine.high %v11618_v34, %v11618_v34  ;;  %v15194_v60 = vrot.slane %v12415_v46, 2  ;;  %v2701_v40 = vmul.f32 %v10921_v30, %v15195_v13 }
 0x507   : > { %v5102_v42 = vrot.slane %v4906_v48, 7  ;;  %v5104_v8 = vrot.slane %v4907_v19, 7  ;;  %v5986_v52 = vmax.f32 %v12398_v55, %v5742_v28  ;;  %v3441_v24 = vcombine.low %v2797_v63, %v2798_v51 }
 0x508   : > { %v3424_v7 = vcombine.high %v15193_v57, %v15192_v31  ;;  %v6163_v44 = vsel %vm5998_vm1, %v6161_v10, %v15194_v60  ;;  %v3442_v45 = vcombine.high %v2797_v63, %v2798_v51  ;;  %v5987_v14 = vmax.f32 %v12400_v11, %v5745_v43 }
 0x509   : > { %v5103_v31 = vsel %vm4943_vm2, %v5100_v26, %v5102_v42  ;;  %v5105_v34 = vsel %vm4943_vm2, %v5101_v4, %v5104_v8  ;;  %v2702_v10 = vmul.f32 %v10926_v1, %v15196_v3  ;;  %v3449_v13 = vrot.slane %v3441_v24, %v10924_v9 }
 0x50a   : > { %v3438_v56 = vrot.slane %v3424_v7, %v10924_v9  ;;  %5331 = vst [vmem:[#allocation3 + $0x1d0] sm:$0x7f] %v5103_v31  ;;  %5332 = vst [vmem:[#allocation3 + $0x1c8] sm:$0x7f] %v5105_v34  ;;  %v3456_v28 = vrot.slane %v3442_v45, %v10924_v9  ;;  %v15197_v55 = vrot.slane %v12354_v15, 2  ;;  %v15198_v63 = vrot.slane %v12417_v2, 2 }
 0x50b   : > { %v2799_v11 = vmax.f32 %v2701_v40, 0.0  ;;  %v2800_v26 = vmax.f32 %v2702_v10, 0.0  ;;  %v6467_v4 = vmax.f32 %v12329_v32, %v6403_v54  ;;  %v6468_v43 = vmax.f32 %v12348_v17, %v6404_v36  ;;  %v15200_v7 = vld [vmem:[#allocation62_spill] sm:$0xff]  ;;  %v15201_v40 = vld [vmem:[#allocation63_spill] sm:$0xff] }
 0x50c   : > { %v3440_v48 = vcombine.high %v3438_v56, %v3438_v56  ;;  %v4348_v19 = vcombine.low %v3439_v47, %v3438_v56  ;;  %v12458_v51 = vmax.f32 %v5984_v53, %v15197_v55  ;;  %v6166_v42 = vsel %vm5998_vm1, %v6164_v23, %v15198_v63  ;;  %v15205_v63 = vld [vmem:[#allocation114_spill] sm:$0xff] }
 0x50d   : > { %v12465_v57 = vmax.f32 %v5986_v52, %v6163_v44  ;;  %v2703_v47 = vmul.f32 %v10921_v30, %v15200_v7  ;;  %v3457_v60 = vcombine.high %v3449_v13, %v3449_v13  ;;  %v3458_v53 = vcombine.high %v3456_v28, %v3456_v28 }
 0x50e   : > { %v4349_v8 = vcombine.low %v3440_v48, %v3449_v13  ;;  %v4356_v15 = vrot.slane %v4348_v19, %v10924_v9  ;;  %v12470_v56 = vmax.f32 %v5987_v14, %v6166_v42  ;;  %v3459_v24 = vcombine.low %v2799_v11, %v2800_v26 }
 0x50f   : > { %15199 = vst [vmem:[#allocation85_spill] sm:$0xff] %v12465_v57  ;;  %v3460_v23 = vcombine.high %v2799_v11, %v2800_v26  ;;  %v2704_v45 = vmul.f32 %v10926_v1, %v15201_v40  ;;  %v15202_v32 = vrot.slane %v12356_v16, 2  ;;  %v4366_v54 = vcombine.low %v3457_v60, %v3456_v28  ;;  %v12492_v16 = vld [vmem:[#allocation3 + $0x1b8] sm:$0xff] }
 0x510   : > { %v4363_v17 = vrot.slane %v4349_v8, %v10924_v9  ;;  %v4380_v44 = vrot.slane %v3458_v53, %v10924_v9  ;;  %v12481_v52 = vmax.f32 %v12415_v46, %v5741_v62  ;;  %v12484_v14 = vmax.f32 %v6467_v4, %v12465_v57 }
 0x511   : > { %v12476_v36 = vmax.f32 %v5985_v21, %v15202_v32  ;;  %v12487_v31 = vmax.f32 %v12417_v2, %v5744_v35  ;;  %v12490_v34 = vmax.f32 %v6468_v43, %v12470_v56  ;;  %v12494_v21 = vld [vmem:[#allocation3 + $0x190] sm:$0xff]  ;;  %v4373_v48 = vrot.slane %v4366_v54, %v10924_v9  ;;  %v12499_v19 = vld [vmem:[#allocation3 + $0x1c8] sm:$0xff] }
 0x512   : > { %15203 = vst [vmem:[#allocation67_spill] sm:$0xff] %v12484_v14  ;;  %v4364_v3 = vcombine.low %v4356_v15, %v4363_v17  ;;  %v4365_v10 = vcombine.high %v4356_v15, %v4363_v17  ;;  %v2801_v13 = vmax.f32 %v2703_v47, 0.0  ;;  %v12497_v62 = vld [vmem:[#allocation3 + $0x1d0] sm:$0xff]  ;;  %v3467_v28 = vrot.slane %v3459_v24, %v10924_v9 }
 0x513   : > { %15204 = vst [vmem:[#allocation68_spill] sm:$0xff] %v12490_v34  ;;  %v3474_v35 = vrot.slane %v3460_v23, %v10924_v9  ;;  %v2802_v55 = vmax.f32 %v2704_v45, 0.0  ;;  %v12505_v42 = vmul.f32 %v10921_v30, %v15205_v63  ;;  %v4381_v4 = vcombine.low %v4373_v48, %v4380_v44  ;;  %v15206_v23 = vld [vmem:[#allocation115_spill] sm:$0xff] }
 0x514   : > { %v5010_v11 = vrot.slane %v4364_v3, 7  ;;  %v5011_v26 = vrot.slane %v4365_v10, 7  ;;  %v4382_v43 = vcombine.high %v4373_v48, %v4380_v44  ;;  %v5746_v47 = vrot.slane %v12492_v16, 1 }
 0x515   : > { %v6167_v60 = vrot.slane %v12492_v16, 2  ;;  %v5749_v8 = vrot.slane %v12494_v21, 1  ;;  %v6170_v15 = vrot.slane %v12494_v21, 2  ;;  %v2756_v40 = vmul.f32 %v10926_v1, %v15206_v23 }
 0x516   : > { %5269 = vst [vmem:[#allocation3 + $0x58] sm:$0xfe] %v5010_v11  ;;  %5270 = vst [vmem:[#allocation3 + $0x3b8] sm:$0xfe] %v5011_v26  ;;  %v5012_v45 = vrot.slane %v4381_v4, 7  ;;  %v5014_v32 = vrot.slane %v4382_v43, 7  ;;  %v3475_v17 = vcombine.high %v3467_v28, %v3467_v28  ;;  %v3476_v54 = vcombine.high %v3474_v35, %v3474_v35 }
 0x517   : > { %v3477_v3 = vcombine.low %v2801_v13, %v2802_v55  ;;  %v3478_v10 = vcombine.high %v2801_v13, %v2802_v55  ;;  %v2853_v48 = vmax.f32 %v12505_v42, 0.0  ;;  %v15207_v14 = vrot.slane %v12497_v62, 1 }
 0x518   : > { %v5013_v63 = vsel %vm4943_vm2, %v5010_v11, %v5012_v45  ;;  %v5015_v7 = vsel %vm4943_vm2, %v5011_v26, %v5014_v32  ;;  %v4383_v24 = vcombine.low %v3467_v28, %v3475_v17  ;;  %v4384_v53 = vcombine.low %v3474_v35, %v3476_v54 }
 0x519   : > { %v5748_v23 = vsel %vm5577_vm0, %v5746_v47, %v15207_v14  ;;  %v15208_v4 = vrot.slane %v12499_v19, 1  ;;  %v14635_v44 = vrot.slane %v12499_v19, 2  ;;  %5271 = vst [vmem:[#allocation3 + $0x380] sm:$0x7f] %v5013_v63  ;;  %5272 = vst [vmem:[#allocation3 + $0xe0] sm:$0x7f] %v5015_v7  ;;  %v3485_v13 = vrot.slane %v3477_v3, %v10924_v9 }
 0x51a   : > { %v4391_v55 = vrot.slane %v4383_v24, %v10924_v9  ;;  %v4398_v28 = vrot.slane %v4384_v53, %v10924_v9  ;;  %v2854_v35 = vmax.f32 %v2756_v40, 0.0  ;;  %v15209_v42 = vmax.f32 %v12342_v33, 0.0 }
 0x51b   : > { %v12527_v43 = vsel %vm5577_vm0, %v5749_v8, %v15208_v4  ;;  %v15210_v14 = vmax.f32 %v12327_v12, 0.0  ;;  %v15211_v26 = vrot.slane %v12497_v62, 2  ;;  %v12541_v8 = vrot.slane %v3478_v10, %v10924_v9 }
 0x51c   : > { %v3493_v7 = vcombine.high %v3485_v13, %v3485_v13  ;;  %v3943_v45 = vcombine.high %v12403_v27, %v12403_v27  ;;  %v4399_v53 = vcombine.low %v4391_v55, %v4398_v28  ;;  %v4400_v40 = vcombine.high %v4391_v55, %v4398_v28 }
 0x51d   : > { %v3928_v11 = vcombine.high %v15210_v14, %v15209_v42  ;;  %v6169_v47 = vsel %vm5998_vm1, %v6167_v60, %v15211_v26  ;;  %v5385_v24 = vld [vmem:[#allocation3 + $0x58] sm:$0xff]  ;;  %v3945_v17 = vcombine.low %v2853_v48, %v2854_v35  ;;  %v5990_v12 = vmax.f32 %v12492_v16, %v5748_v23  ;;  %v15212_v14 = vld [vmem:[#allocation64_spill] sm:$0xff] }
 0x51e   : > { %v5386_v32 = vld [vmem:[#allocation3 + $0x3b8] sm:$0xff]  ;;  %v5991_v54 = vmax.f32 %v12494_v21, %v12527_v43  ;;  %v6172_v60 = vsel %vm5998_vm1, %v6170_v15, %v14635_v44  ;;  %v4415_v3 = vrot.slane %v12541_v8, %v10924_v9  ;;  %v5016_v27 = vrot.slane %v4399_v53, 7 }
 0x51f   : > { %v3942_v33 = vrot.slane %v3928_v11, %v10924_v9  ;;  %v5017_v10 = vrot.slane %v4400_v40, 7  ;;  %v4401_v63 = vcombine.low %v3485_v13, %v3493_v7  ;;  %v5650_v55 = vrot.slane %v5385_v24, 1 }
 0x520   : > { %v6071_v28 = vrot.slane %v5385_v24, 2  ;;  %v5653_v42 = vrot.slane %v5386_v32, 1  ;;  %v2705_v16 = vmul.f32 %v10921_v30, %v15212_v14  ;;  %v6074_v23 = vrot.slane %v5386_v32, 2  ;;  %v12556_v11 = vld [vmem:[#allocation3 + $0x380] sm:$0xff]  ;;  %5273 = vst [vmem:[#allocation3 + $0x348] sm:$0xfe] %v5016_v27 }
 0x521   : > { %v3944_v4 = vcombine.high %v3942_v33, %v3942_v33  ;;  %v12558_v21 = vld [vmem:[#allocation3 + $0xe0] sm:$0xff]  ;;  %5274 = vst [vmem:[#allocation3 + $0x210] sm:$0xfe] %v5017_v10  ;;  %v4408_v15 = vrot.slane %v4401_v63, %v10924_v9  ;;  %v3953_v43 = vrot.slane %v3945_v17, %v10924_v9  ;;  %v4908_v26 = vcombine.low %v3943_v45, %v3942_v33  ;;  %v15213_v33 = vld [vmem:[#allocation65_spill] sm:$0xff] }
 0x522   : > { %v5651_v13 = vrot.slane %v12556_v11, 1  ;;  %v14643_v7 = vrot.slane %v12556_v11, 2  ;;  %v5654_v53 = vrot.slane %v12558_v21, 1  ;;  %v14642_v30 = vrot.slane %v12558_v21, 2 }
 0x523   : > { %v4416_v40 = vcombine.low %v4408_v15, %v4415_v3  ;;  %v4417_v14 = vcombine.high %v4408_v15, %v4415_v3  ;;  %v4909_v44 = vcombine.low %v3944_v4, %v3953_v43  ;;  %v3946_v34 = vcombine.high %v2853_v48, %v2854_v35 }
 0x524   : > { %v5652_v22 = vsel %vm5577_vm0, %v5650_v55, %v5651_v13  ;;  %v6073_v63 = vsel %vm5998_vm1, %v6071_v28, %v14643_v7  ;;  %v5655_v45 = vsel %vm5577_vm0, %v5653_v42, %v5654_v53  ;;  %v2706_v17 = vmul.f32 %v10926_v1, %v15213_v33 }
 0x525   : > { %v12573_v20 = vmax.f32 %v5990_v12, %v6169_v47  ;;  %v5926_v5 = vmax.f32 %v5385_v24, %v5652_v22  ;;  %v5927_v0 = vmax.f32 %v5386_v32, %v5655_v45  ;;  %v6076_v3 = vsel %vm5998_vm1, %v6074_v23, %v14642_v30 }
 0x526   : > { %v5018_v48 = vrot.slane %v4416_v40, 7  ;;  %v5020_v35 = vrot.slane %v4417_v14, 7  ;;  %v4916_v4 = vrot.slane %v4908_v26, %v10924_v9  ;;  %v2803_v55 = vmax.f32 %v2705_v16, 0.0 }
 0x527   : > { %15214 = vst [vmem:[#allocation86_spill] sm:$0xff] %v12573_v20  ;;  %v12579_v15 = vmax.f32 %v5926_v5, %v6073_v63  ;;  %v12581_v28 = vmax.f32 %v5927_v0, %v6076_v3  ;;  %v3961_v42 = vcombine.high %v3953_v43, %v3953_v43  ;;  %v4923_v1 = vrot.slane %v4909_v44, %v10924_v9  ;;  %v15217_v44 = vld [vmem:[#allocation74_spill] sm:$0xff] }
 0x528   : > { %v5019_v47 = vsel %vm4943_vm2, %v5016_v27, %v5018_v48  ;;  %v5021_v22 = vsel %vm4943_vm2, %v5017_v10, %v5020_v35  ;;  %v3960_v24 = vrot.slane %v3946_v34, %v10924_v9  ;;  %v2804_v32 = vmax.f32 %v2706_v17, 0.0  ;;  %v15219_v10 = vld [vmem:[#allocation73_spill] sm:$0xff]  ;;  %v5389_v17 = vld [vmem:[#allocation3 + $0x348] sm:$0xff] }
 0x529   : > { %v15215_v12 = vrot.slane %v12497_v62, 1  ;;  %v15216_v5 = vrot.slane %v12499_v19, 1  ;;  %v12597_v16 = vmax.f32 %v5991_v54, %v6172_v60  ;;  %5275 = vst [vmem:[#allocation3 + $0x248] sm:$0x7f] %v5019_v47  ;;  %5276 = vst [vmem:[#allocation3 + $0x318] sm:$0x7f] %v5021_v22  ;;  %v4924_v40 = vcombine.low %v4916_v4, %v4923_v1 }
 0x52a   : > { %v15218_v27 = vmax.f32 %v15217_v44, 0.0  ;;  %v15220_v43 = vmax.f32 %v15219_v10, 0.0  ;;  %v4925_v14 = vcombine.high %v4916_v4, %v4923_v1  ;;  %v3494_v63 = vcombine.high %v12541_v8, %v12541_v8  ;;  %v5390_v35 = vld [vmem:[#allocation3 + $0x210] sm:$0xff] }
 0x52b   : > { %v12590_v23 = vmax.f32 %v12497_v62, %v15215_v12  ;;  %v12595_v0 = vmax.f32 %v12499_v19, %v15216_v5  ;;  %v15221_v54 = vmax.f32 %v11637_v6, %v11753_v49  ;;  %v15222_v45 = vmax.f32 %v11643_v50, %v11757_v41 }
 0x52c   : > { %v3513_v34 = vcombine.low %v15220_v43, %v15218_v27  ;;  %v3962_v3 = vcombine.high %v3960_v24, %v3960_v24  ;;  %v4926_v48 = vcombine.low %v3961_v42, %v3960_v24  ;;  %v5106_v4 = vrot.slane %v4924_v40, 7 }
 0x52d   : > { %v12611_v60 = vmax.f32 %v15221_v54, %v12579_v15  ;;  %v12617_v33 = vmax.f32 %v15222_v45, %v12581_v28  ;;  %v5107_v1 = vrot.slane %v4925_v14, 7  ;;  %v3495_v47 = vcombine.low %v2803_v55, %v2804_v32 }
 0x52e   : > { %v3496_v8 = vcombine.high %v2803_v55, %v2804_v32  ;;  %v5928_v22 = vmax.f32 %v12556_v11, %v5651_v13  ;;  %v4933_v6 = vrot.slane %v4926_v48, %v10924_v9  ;;  %v4940_v49 = vrot.slane %v3962_v3, %v10924_v9  ;;  %5333 = vst [vmem:[#allocation3 + $0x340] sm:$0xfe] %v5106_v4 }
 0x52f   : > { %v3521_v12 = vrot.slane %v3513_v34, %v10924_v9  ;;  %v5929_v50 = vmax.f32 %v12558_v21, %v5654_v53  ;;  %v5656_v41 = vrot.slane %v5389_v17, 1  ;;  %v6077_v5 = vrot.slane %v5389_v17, 2  ;;  %5334 = vst [vmem:[#allocation3 + $0x288] sm:$0xfe] %v5107_v1 }
 0x530   : > { %v3503_v42 = vrot.slane %v3495_v47, %v10924_v9  ;;  %v5659_v24 = vrot.slane %v5390_v35, 1  ;;  %v4941_v44 = vcombine.low %v4933_v6, %v4940_v49  ;;  %v4942_v27 = vcombine.high %v4933_v6, %v4940_v49  ;;  %v5391_v10 = vld [vmem:[#allocation3 + $0x248] sm:$0xff]  ;;  %v5392_v43 = vld [vmem:[#allocation3 + $0x318] sm:$0xff] }
 0x531   : > { %v3510_v55 = vrot.slane %v3496_v8, %v10924_v9  ;;  %v6762_v13 = vcombine.low %v12611_v60, %v12617_v33  ;;  %v6080_v32 = vrot.slane %v5390_v35, 2  ;;  %v5657_v53 = vrot.slane %v5391_v10, 1 }
 0x532   : > { %v3511_v34 = vcombine.high %v3503_v42, %v3503_v42  ;;  %v4418_v40 = vcombine.low %v3494_v63, %v3503_v42  ;;  %v6078_v14 = vrot.slane %v5391_v10, 2  ;;  %v5660_v54 = vrot.slane %v5392_v43, 1 }
 0x533   : > { %v3529_v45 = vcombine.high %v3521_v12, %v3521_v12  ;;  %v6081_v3 = vrot.slane %v5392_v43, 2  ;;  %v5108_v48 = vrot.slane %v4941_v44, 7  ;;  %v5110_v47 = vrot.slane %v4942_v27, 7 }
 0x534   : > { %v4419_v26 = vcombine.low %v3511_v34, %v3510_v55  ;;  %v5658_v6 = vsel %vm5577_vm0, %v5656_v41, %v5657_v53  ;;  %v5661_v8 = vsel %vm5577_vm0, %v5659_v24, %v5660_v54  ;;  %v3512_v49 = vcombine.high %v3510_v55, %v3510_v55 }
 0x535   : > { %v4426_v30 = vrot.slane %v4418_v40, %v10924_v9  ;;  %v5930_v7 = vmax.f32 %v5389_v17, %v5658_v6  ;;  %v5932_v20 = vmax.f32 %v5391_v10, %v5657_v53  ;;  %v6079_v57 = vsel %vm5998_vm1, %v6077_v5, %v6078_v14 }
 0x536   : > { %v5931_v63 = vmax.f32 %v5390_v35, %v5661_v8  ;;  %v5933_v42 = vmax.f32 %v5392_v43, %v5660_v54  ;;  %v5109_v38 = vsel %vm4943_vm2, %v5106_v4, %v5108_v48  ;;  %v5111_v59 = vsel %vm4943_vm2, %v5107_v1, %v5110_v47 }
 0x537   : > { %v4433_v44 = vrot.slane %v4419_v26, %v10924_v9  ;;  %v6472_v41 = vmax.f32 %v12470_v56, %v12597_v16  ;;  %v15223_v24 = vrot.slane %v12556_v11, 2  ;;  %v15224_v17 = vrot.slane %v12558_v21, 2  ;;  %5335 = vst [vmem:[#allocation3 + $0x338] sm:$0x7f] %v5109_v38  ;;  %5336 = vst [vmem:[#allocation3 + $0x228] sm:$0x7f] %v5111_v59 }
 0x538   : > { %v6082_v35 = vsel %vm5998_vm1, %v6080_v32, %v6081_v3  ;;  %v12649_v26 = vrot.slane %v6762_v13, %v10924_v9  ;;  %v15225_v5 = vrot.slane %v12415_v46, 2  ;;  %v12658_v21 = vmax.f32 %v5932_v20, %v6078_v14  ;;  %v5454_v32 = vld [vmem:[#allocation3 + $0x288] sm:$0xff]  ;;  %v15252_v16 = vld [vmem:[#allocation121_spill] sm:$0xff] }
 0x539   : > { %v12639_v27 = vmax.f32 %v5928_v22, %v15223_v24  ;;  %v12643_v55 = vmax.f32 %v5929_v50, %v15224_v17  ;;  %v4434_v1 = vcombine.low %v4426_v30, %v4433_v44  ;;  %v12656_v22 = vmax.f32 %v5930_v7, %v6079_v57  ;;  %v5453_v50 = vld [vmem:[#allocation3 + $0x340] sm:$0xff]  ;;  %v15251_v56 = vld [vmem:[#allocation120_spill] sm:$0xff] }
 0x53a   : > { %v12654_v11 = vmax.f32 %v12481_v52, %v15225_v5  ;;  %v4435_v38 = vcombine.high %v4426_v30, %v4433_v44  ;;  %v4436_v59 = vcombine.low %v3512_v49, %v3521_v12  ;;  %v12660_v10 = vmax.f32 %v5931_v63, %v6082_v35 }
 0x53b   : > { %v12662_v43 = vmax.f32 %v5933_v42, %v6081_v3  ;;  %v5022_v13 = vrot.slane %v4434_v1, 7  ;;  %v4450_v34 = vrot.slane %v3529_v45, %v10924_v9  ;;  %v15226_v52 = vrot.slane %v12417_v2, 2 }
 0x53c   : > { %v5023_v40 = vrot.slane %v4435_v38, 7  ;;  %v4443_v46 = vrot.slane %v4436_v59, %v10924_v9  ;;  %v15227_v20 = vrot.slane %v12497_v62, 2  ;;  %v5752_v30 = vrot.slane %v5453_v50, 1  ;;  %v15270_v62 = vld [vmem:[#allocation34_spill] sm:$0xff] }
 0x53d   : > { %v12669_v57 = vmax.f32 %v12487_v31, %v15226_v52  ;;  %v6173_v12 = vrot.slane %v5453_v50, 2  ;;  %v5755_v53 = vrot.slane %v5454_v32, 1  ;;  %5277 = vst [vmem:[#allocation3 + $0x1f0] sm:$0xfe] %v5022_v13  ;;  %v15228_v14 = vrot.slane %v12499_v19, 2 }
 0x53e   : > { %v6413_v7 = vmax.f32 %v12590_v23, %v15227_v20  ;;  %v6176_v3 = vrot.slane %v5454_v32, 2  ;;  %5278 = vst [vmem:[#allocation3 + $0x218] sm:$0xfe] %v5023_v40  ;;  %v4451_v2 = vcombine.low %v4443_v46, %v4450_v34  ;;  %v4452_v31 = vcombine.high %v4443_v46, %v4450_v34  ;;  %v5455_v48 = vld [vmem:[#allocation3 + $0x338] sm:$0xff]  ;;  %v5456_v23 = vld [vmem:[#allocation3 + $0x228] sm:$0xff] }
 0x53f   : > { %v6414_v54 = vmax.f32 %v12595_v0, %v15228_v14  ;;  %v6465_v0 = vmax.f32 %v12235_v58, %v12264_v18  ;;  %v5753_v6 = vrot.slane %v5455_v48, 1  ;;  %v6174_v8 = vrot.slane %v5455_v48, 2 }
 0x540   : > { %v5756_v49 = vrot.slane %v5456_v23, 1  ;;  %v6177_v63 = vrot.slane %v5456_v23, 2  ;;  %v5024_v42 = vrot.slane %v4451_v2, 7  ;;  %v5026_v44 = vrot.slane %v4452_v31, 7  ;;  %v15232_v31 = vld [vmem:[#allocation46_spill] sm:$0xff] }
 0x541   : > { %v6466_v24 = vmax.f32 %v12238_v39, %v12269_v25  ;;  %v6469_v17 = vmax.f32 %v12382_v61, %v12458_v51  ;;  %v5754_v35 = vsel %vm5577_vm0, %v5752_v30, %v5753_v6  ;;  %v5996_v1 = vmax.f32 %v5455_v48, %v5753_v6  ;;  %v15235_v6 = vld [vmem:[#allocation82_spill] sm:$0xff] }
 0x542   : > { %v6175_v5 = vsel %vm5998_vm1, %v6173_v12, %v6174_v8  ;;  %v5757_v38 = vsel %vm5577_vm0, %v5755_v53, %v5756_v49  ;;  %v5994_v18 = vmax.f32 %v5453_v50, %v5754_v35  ;;  %v5997_v34 = vmax.f32 %v5456_v23, %v5756_v49  ;;  %v15234_v23 = vld [vmem:[#allocation51_spill] sm:$0xff]  ;;  %v15237_v49 = vld [vmem:[#allocation52_spill] sm:$0xff] }
 0x543   : > { %v5995_v59 = vmax.f32 %v5454_v32, %v5757_v38  ;;  %v6178_v46 = vsel %vm5998_vm1, %v6176_v3, %v6177_v63  ;;  %v5025_v52 = vsel %vm4943_vm2, %v5022_v13, %v5024_v42  ;;  %v5027_v20 = vsel %vm4943_vm2, %v5023_v40, %v5026_v44  ;;  %v15229_v32 = vld [vmem:[#allocation45_spill] sm:$0xff] }
 0x544   : > { %v6470_v25 = vmax.f32 %v12386_v37, %v12476_v36  ;;  %v6473_v51 = vmax.f32 %v12654_v11, %v6413_v7  ;;  %v6415_v30 = vmax.f32 %v5994_v18, %v6175_v5  ;;  %v5393_v14 = vld [vmem:[#allocation3 + $0x1f0] sm:$0xff]  ;;  %5279 = vst [vmem:[#allocation3 + $0x2f0] sm:$0x7f] %v5025_v52  ;;  %5280 = vst [vmem:[#allocation3 + $0x168] sm:$0x7f] %v5027_v20  ;;  %v15231_v36 = vld [vmem:[#allocation38_spill] sm:$0xff] }
 0x545   : > { %v6417_v12 = vmax.f32 %v5996_v1, %v6174_v8  ;;  %v6474_v50 = vmax.f32 %v12669_v57, %v6414_v54  ;;  %v15230_v53 = vmax.f32 %v11645_v29, %v15229_v32  ;;  %v6416_v13 = vmax.f32 %v5995_v59, %v6178_v46  ;;  %v5394_v40 = vld [vmem:[#allocation3 + $0x218] sm:$0xff]  ;;  %v15238_v29 = vld [vmem:[#allocation83_spill] sm:$0xff]  ;;  %v15245_v52 = vld [vmem:[#allocation116_spill] sm:$0xff] }
 0x546   : > { %v6418_v2 = vmax.f32 %v5997_v34, %v6177_v63  ;;  %v15233_v7 = vmax.f32 %v15231_v36, %v15232_v31  ;;  %v15236_v8 = vmax.f32 %v15234_v23, %v15235_v6  ;;  %v15239_v42 = vmax.f32 %v15237_v49, %v15238_v29  ;;  %v15240_v18 = vld [vmem:[#allocation118_spill] sm:$0xff]  ;;  %v15248_v32 = vld [vmem:[#allocation119_spill] sm:$0xff]  ;;  %v15258_v23 = vld [vmem:[#allocation32_spill] sm:$0xff] }
 0x547   : > { %v12705_v3 = vmax.f32 %v15230_v53, %v12639_v27  ;;  %v12726_v63 = vmax.f32 %v6465_v0, %v12382_v61  ;;  %v12729_v35 = vmax.f32 %v6466_v24, %v12386_v37  ;;  %v12732_v1 = vmax.f32 %v6469_v17, %v12654_v11  ;;  %v15242_v34 = vld [vmem:[#allocation86_spill] sm:$0xff]  ;;  %v15244_v17 = vld [vmem:[#allocation69_spill] sm:$0xff] }
 0x548   : > { %v12711_v48 = vmax.f32 %v15233_v7, %v12643_v55  ;;  %v12717_v54 = vmax.f32 %v15236_v8, %v12235_v58  ;;  %v12723_v44 = vmax.f32 %v15239_v42, %v12238_v39  ;;  %v5662_v5 = vrot.slane %v5393_v14, 1  ;;  %v15241_v39 = vld [vmem:[#allocation85_spill] sm:$0xff]  ;;  %v15250_v53 = vld [vmem:[#allocation26_spill] sm:$0xff] }
 0x549   : > { %v6083_v38 = vrot.slane %v5393_v14, 2  ;;  %v12735_v58 = vmax.f32 %v6470_v25, %v12669_v57  ;;  %v12739_v59 = vcombine.high %v15240_v18, %v15240_v18  ;;  %v15243_v46 = vmax.f32 %v15241_v39, %v15242_v34  ;;  %v15260_v8 = vld [vmem:[#allocation29_spill] sm:$0xff]  ;;  %v15261_v49 = vld [vmem:[#allocation30_spill] sm:$0xff]  ;;  %v15264_v39 = vld [vmem:[#allocation35_spill] sm:$0xff] }
 0x54a   : > { %v5665_v0 = vrot.slane %v5394_v40, 1  ;;  %v6086_v37 = vrot.slane %v5394_v40, 2  ;;  %v12746_v24 = vmax.f32 %v6473_v51, %v6417_v12  ;;  %v12751_v11 = vmax.f32 %v6472_v41, %v6416_v13 }
 0x54b   : > { %v12744_v61 = vmax.f32 %v15243_v46, %v6415_v30  ;;  %v12753_v57 = vmax.f32 %v6474_v50, %v6418_v2  ;;  %v15246_v20 = vcombine.high %v15244_v17, %v15245_v52  ;;  %v12763_v30 = vcombine.high %v15248_v32, %v15248_v32  ;;  %v15255_v50 = vld [vmem:[#allocation27_spill] sm:$0xff]  ;;  %v5395_v31 = vld [vmem:[#allocation3 + $0x2f0] sm:$0xff] }
 0x54c   : > { %v12767_v51 = vcombine.high %v15250_v53, %v15250_v53  ;;  %v15253_v41 = vcombine.high %v15251_v56, %v15252_v16  ;;  %v12777_v13 = vcombine.high %v15255_v50, %v15255_v50  ;;  %v15257_v2 = vld [vmem:[#allocation31_spill] sm:$0xff]  ;;  %v12785_v6 = vcombine.high %v15258_v23, %v15258_v23  ;;  %v15266_v46 = vld [vmem:[#allocation41_spill] sm:$0xff]  ;;  %v15277_v23 = vld [vmem:[#allocation44_spill] sm:$0xff] }
 0x54d   : > { %v12759_v25 = vrot.slane %v15246_v20, %v10924_v9  ;;  %15249 = vst [vmem:[#allocation88_spill] sm:$0xff] %v12763_v30  ;;  %v12781_v36 = vcombine.high %v15257_v2, %v15257_v2  ;;  %v5396_v7 = vld [vmem:[#allocation3 + $0x168] sm:$0xff]  ;;  %v15262_v29 = vcombine.high %v15260_v8, %v15261_v49  ;;  %v12795_v34 = vcombine.high %v15264_v39, %v15264_v39  ;;  %v15271_v8 = vld [vmem:[#allocation33_spill] sm:$0xff] }
 0x54e   : > { %v12773_v12 = vrot.slane %v15253_v41, %v10924_v9  ;;  %15256 = vst [vmem:[#allocation90_spill] sm:$0xff] %v12777_v13  ;;  %15259 = vst [vmem:[#allocation91_spill] sm:$0xff] %v12785_v6  ;;  %v12799_v17 = vcombine.high %v15266_v46, %v15266_v46  ;;  %v5663_v52 = vrot.slane %v5395_v31, 1  ;;  %v6084_v20 = vrot.slane %v5395_v31, 2  ;;  %v15268_v41 = vld [vmem:[#allocation42_spill] sm:$0xff]  ;;  %v15361_v13 = vld [vmem:[#allocation43_spill] sm:$0xff] }
 0x54f   : > { %15247 = vst [vmem:[#allocation87_spill] sm:$0xff] %v12759_v25  ;;  %v12791_v42 = vrot.slane %v15262_v29, %v10924_v9  ;;  %15265 = vst [vmem:[#allocation93_spill] sm:$0xff] %v12795_v34  ;;  %v5666_v56 = vrot.slane %v5396_v7, 1  ;;  %v6087_v16 = vrot.slane %v5396_v7, 2  ;;  %v12803_v19 = vcombine.high %v15268_v41, %v15268_v41  ;;  %v15272_v29 = vld [vmem:[#allocation43_spill] sm:$0xff]  ;;  %v15359_v25 = vld [vmem:[#allocation42_spill] sm:$0xff] }
 0x550   : > { %15254 = vst [vmem:[#allocation89_spill] sm:$0xff] %v12773_v12  ;;  %15267 = vst [vmem:[#allocation94_spill] sm:$0xff] %v12799_v17  ;;  %v6711_v49 = vcombine.high %v15271_v8, %v15270_v62  ;;  %v12809_v45 = vcombine.high %v15272_v29, %v15272_v29  ;;  %v6780_v4 = vcombine.low %v12705_v3, %v12711_v48  ;;  %v15274_v8 = vld [vmem:[#allocation36_spill] sm:$0xff]  ;;  %v15275_v29 = vld [vmem:[#allocation37_spill] sm:$0xff] }
 0x551   : > { %15263 = vst [vmem:[#allocation92_spill] sm:$0xff] %v12791_v42  ;;  %15269 = vst [vmem:[#allocation95_spill] sm:$0xff] %v12803_v19  ;;  %v5664_v47 = vsel %vm5577_vm0, %v5662_v5, %v5663_v52  ;;  %v5936_v17 = vmax.f32 %v5395_v31, %v5663_v52  ;;  %v6085_v46 = vsel %vm5998_vm1, %v6083_v38, %v6084_v20  ;;  %v15278_v31 = vld [vmem:[#allocation40_spill] sm:$0xff]  ;;  %v15279_v38 = vld [vmem:[#allocation39_spill] sm:$0xff] }
 0x552   : > { %15273 = vst [vmem:[#allocation96_spill] sm:$0xff] %v12809_v45  ;;  %v5667_v42 = vsel %vm5577_vm0, %v5665_v0, %v5666_v56  ;;  %v5934_v34 = vmax.f32 %v5393_v14, %v5664_v47  ;;  %v5937_v19 = vmax.f32 %v5396_v7, %v5666_v56  ;;  %v6088_v39 = vsel %vm5998_vm1, %v6086_v37, %v6087_v16  ;;  %v15376_v32 = vld [vmem:[#allocation79_spill] sm:$0xff] }
 0x553   : > { %v5935_v41 = vmax.f32 %v5394_v40, %v5667_v42  ;;  %v6357_v62 = vmax.f32 %v5936_v17, %v6084_v20  ;;  %v15276_v45 = vcombine.high %v15274_v8, %v15275_v29  ;;  %v12825_v5 = vcombine.high %v15277_v23, %v15277_v23  ;;  %v15291_v8 = vld [vmem:[#allocation53_spill] sm:$0xff] }
 0x554   : > { %v6746_v52 = vcombine.high %v15279_v38, %v15278_v31  ;;  %v6355_v0 = vmax.f32 %v5934_v34, %v6085_v46  ;;  %v6358_v14 = vmax.f32 %v5937_v19, %v6087_v16  ;;  %v15280_v40 = vcombine.low %v15279_v38, %v15278_v31 }
 0x555   : > { %v12821_v6 = vrot.slane %v15276_v45, %v10924_v9  ;;  %v6356_v47 = vmax.f32 %v5935_v41, %v6088_v39  ;;  %v15281_v45 = vmax.f32 %v12639_v27, %v12658_v21  ;;  %v12839_v42 = vrot.slane %v6711_v49, %v10924_v9 }
 0x556   : > { %v12833_v37 = vrot.slane %v15280_v40, %v10924_v9  ;;  %v15282_v17 = vcombine.high %v12611_v60, %v12617_v33  ;;  %v6781_v19 = vcombine.high %v12705_v3, %v12711_v48  ;;  %v15283_v39 = vmax.f32 %v12579_v15, %v12656_v22  ;;  %v15288_v22 = vld [vmem:[#allocation47_spill] sm:$0xff]  ;;  %v15289_v48 = vld [vmem:[#allocation50_spill] sm:$0xff] }
 0x557   : > { %v6501_v7 = vmax.f32 %v15281_v45, %v6357_v62  ;;  %v15284_v27 = vmax.f32 %v12581_v28, %v12660_v10  ;;  %v15285_v20 = vmax.f32 %v12643_v55, %v12662_v43  ;;  %v12859_v16 = vrot.slane %v6780_v4, %v10924_v9  ;;  %v15287_v28 = vld [vmem:[#allocation48_spill] sm:$0xff]  ;;  %v15290_v4 = vld [vmem:[#allocation49_spill] sm:$0xff] }
 0x558   : > { %v12845_v34 = vrot.slane %v15282_v17, %v10924_v9  ;;  %v6499_v46 = vmax.f32 %v15283_v39, %v6355_v0  ;;  %v12863_v60 = vcombine.high %v12821_v6, %v12821_v6  ;;  %v12866_v33 = vrot.slane %v6746_v52, %v10924_v9  ;;  %v15294_v0 = vld [vmem:[#allocation54_spill] sm:$0xff]  ;;  %v15360_v12 = vld [vmem:[#allocation95_spill] sm:$0xff] }
 0x559   : > { %v6500_v21 = vmax.f32 %v15284_v27, %v6356_v47  ;;  %v6502_v56 = vmax.f32 %v15285_v20, %v6358_v14  ;;  %v12870_v15 = vcombine.high %v12649_v26, %v12649_v26  ;;  %v6851_v10 = vcombine.high %v15288_v22, %v15287_v28  ;;  %v15296_v14 = vld [vmem:[#allocation55_spill] sm:$0xff]  ;;  %v15301_v27 = vld [vmem:[#allocation57_spill] sm:$0xff]  ;;  %v15362_v30 = vld [vmem:[#allocation96_spill] sm:$0xff] }
 0x55a   : > { %15286 = vst [vmem:[#allocation97_spill] sm:$0xff] %v12866_v33  ;;  %v6886_v41 = vcombine.high %v15290_v4, %v15289_v48  ;;  %v12878_v49 = vcombine.high %v12833_v37, %v12833_v37  ;;  %v12882_v29 = vcombine.high %v12845_v34, %v12845_v34  ;;  %v12886_v31 = vcombine.high %v15291_v8, %v15291_v8  ;;  %v15305_v22 = vld [vmem:[#allocation75_spill] sm:$0xff] }
 0x55b   : > { %v6797_v3 = vcombine.low %v6499_v46, %v6500_v21  ;;  %v6798_v55 = vcombine.high %v6499_v46, %v6500_v21  ;;  %v6815_v43 = vcombine.low %v6501_v7, %v6502_v56  ;;  %v6816_v62 = vcombine.high %v6501_v7, %v6502_v56  ;;  %v15311_v4 = vld [vmem:[#allocation71_spill] sm:$0xff] }
 0x55c   : > { %v12889_v38 = vrot.slane %v6781_v19, %v10924_v9  ;;  %v12893_v52 = vcombine.high %v12859_v16, %v12859_v16  ;;  %v12897_v47 = vcombine.high %v15294_v0, %v15294_v0  ;;  %v12901_v40 = vcombine.high %v15296_v14, %v15296_v14  ;;  %v15299_v19 = vld [vmem:[#allocation56_spill] sm:$0xff] }
 0x55d   : > { %v12904_v45 = vrot.slane %v6797_v3, %v10924_v9  ;;  %v12907_v7 = vrot.slane %v6798_v55, %v10924_v9  ;;  %v12910_v17 = vrot.slane %v6851_v10, %v10924_v9  ;;  %v12914_v39 = vcombine.high %v15299_v19, %v15299_v19  ;;  %v15307_v3 = vld [vmem:[#allocation84_spill] sm:$0xff] }
 0x55e   : > { %15292 = vst [vmem:[#allocation98_spill] sm:$0xff] %v12889_v38  ;;  %15293 = vst [vmem:[#allocation99_spill] sm:$0xff] %v12893_v52  ;;  %v12917_v46 = vrot.slane %v6815_v43, %v10924_v9  ;;  %v12921_v21 = vcombine.high %v15301_v27, %v15301_v27  ;;  %v12924_v20 = vrot.slane %v6886_v41, %v10924_v9  ;;  %v15309_v43 = vld [vmem:[#allocation79_spill] sm:$0xff]  ;;  %v15312_v41 = vld [vmem:[#allocation70_spill] sm:$0xff] }
 0x55f   : > { %15295 = vst [vmem:[#allocation100_spill] sm:$0xff] %v12897_v47  ;;  %15297 = vst [vmem:[#allocation101_spill] sm:$0xff] %v12901_v40  ;;  %v6955_v56 = vcombine.low %v12717_v54, %v12723_v44  ;;  %v12929_v28 = vrot.slane %v6816_v62, %v10924_v9  ;;  %v12933_v10 = vcombine.high %v15305_v22, %v15305_v22  ;;  %v15315_v62 = vld [vmem:[#allocation78_spill] sm:$0xff]  ;;  %v15323_v19 = vld [vmem:[#allocation76_spill] sm:$0xff] }
 0x560   : > { %15298 = vst [vmem:[#allocation102_spill] sm:$0xff] %v12910_v17  ;;  %15300 = vst [vmem:[#allocation103_spill] sm:$0xff] %v12914_v39  ;;  %v12937_v55 = vcombine.high %v15307_v3, %v15307_v3  ;;  %v12941_v48 = vcombine.high %v15309_v43, %v15309_v43  ;;  %v15316_v39 = vld [vmem:[#allocation23_spill] sm:$0xff]  ;;  %v12959_v43 = vcombine.high %v12904_v45, %v12904_v45  ;;  %v15324_v17 = vld [vmem:[#allocation77_spill] sm:$0xff] }
 0x561   : > { %15302 = vst [vmem:[#allocation104_spill] sm:$0xff] %v12921_v21  ;;  %15303 = vst [vmem:[#allocation105_spill] sm:$0xff] %v12924_v20  ;;  %v6921_v20 = vcombine.high %v15312_v41, %v15311_v4  ;;  %v15313_v21 = vld [vmem:[#allocation81_spill] sm:$0xff]  ;;  %v15317_v22 = vcombine.high %v15315_v62, %v15316_v39  ;;  %v12963_v4 = vcombine.high %v12907_v7, %v12907_v7  ;;  %v15318_v41 = vld [vmem:[#allocation66_spill] sm:$0xff] }
 0x562   : > { %15304 = vst [vmem:[#allocation106_spill] sm:$0xff] %v12929_v28  ;;  %15306 = vst [vmem:[#allocation107_spill] sm:$0xff] %v12933_v10  ;;  %v12947_v27 = vcombine.high %v15313_v21, %v15313_v21  ;;  %v15320_v21 = vld [vmem:[#allocation68_spill] sm:$0xff]  ;;  %v6956_v62 = vcombine.high %v12717_v54, %v12723_v44  ;;  %v12978_v3 = vrot.slane %v6955_v56, %v10924_v9  ;;  %v15380_v28 = vld [vmem:[#allocation66_spill] sm:$0xff] }
 0x563   : > { %15308 = vst [vmem:[#allocation108_spill] sm:$0xff] %v12937_v55  ;;  %15310 = vst [vmem:[#allocation109_spill] sm:$0xff] %v12941_v48  ;;  %v12953_v10 = vrot.slane %v15317_v22, %v10924_v9  ;;  %v6990_v55 = vcombine.low %v12726_v63, %v12729_v35  ;;  %v15321_v48 = vld [vmem:[#allocation67_spill] sm:$0xff]  ;;  %v12973_v22 = vcombine.high %v12917_v46, %v12917_v46 }
 0x564   : > { %15314 = vst [vmem:[#allocation110_spill] sm:$0xff] %v12947_v27  ;;  %v12967_v27 = vcombine.high %v15318_v41, %v15318_v41  ;;  %v7008_v39 = vcombine.high %v15321_v48, %v15320_v21  ;;  %v15325_v40 = vcombine.low %v15323_v19, %v15324_v17  ;;  %v6991_v47 = vcombine.high %v12726_v63, %v12729_v35 }
 0x565   : > { %15322 = vst [vmem:[#allocation112_spill] sm:$0xff] %v12973_v22  ;;  %v15327_v54 = vcombine.low %v15321_v48, %v15320_v21  ;;  %v7025_v56 = vcombine.low %v12732_v1, %v12735_v58  ;;  %v7060_v63 = vcombine.low %v12746_v24, %v12753_v57  ;;  %v13012_v35 = vrot.slane %v6921_v20, %v10924_v9 }
 0x566   : > { %15319 = vst [vmem:[#allocation111_spill] sm:$0xff] %v12967_v27  ;;  %v12984_v14 = vrot.slane %v15325_v40, %v10924_v9  ;;  %v15326_v27 = vcombine.high %v15323_v19, %v15324_v17  ;;  %v13003_v40 = vrot.slane %v6990_v55, %v10924_v9  ;;  %v7042_v17 = vcombine.low %v12744_v61, %v12751_v11 }
 0x567   : > { %v12998_v44 = vrot.slane %v15327_v54, %v10924_v9  ;;  %v7043_v19 = vcombine.high %v12744_v61, %v12751_v11  ;;  %15330 = vst [vmem:[#allocation59_spill] sm:$0xff] %v13012_v35  ;;  %v7026_v21 = vcombine.high %v12732_v1, %v12735_v58  ;;  %v13020_v55 = vrot.slane %v7025_v56, %v10924_v9 }
 0x568   : > { %v12990_v41 = vrot.slane %v15326_v27, %v10924_v9  ;;  %15329 = vst [vmem:[#allocation58_spill] sm:$0xff] %v13003_v40  ;;  %v13015_v27 = vrot.slane %v7008_v39, %v10924_v9  ;;  %v13024_v48 = vcombine.high %v12953_v10, %v12953_v10  ;;  %v13027_v61 = vrot.slane %v6956_v62, %v10924_v9 }
 0x569   : > { %15328 = vst [vmem:[#allocation113_spill] sm:$0xff] %v12998_v44  ;;  %15332 = vst [vmem:[#allocation61_spill] sm:$0xff] %v13020_v55  ;;  %v13030_v11 = vrot.slane %v7042_v17, %v10924_v9  ;;  %v7061_v20 = vcombine.high %v12746_v24, %v12753_v57  ;;  %v13036_v39 = vcombine.high %v12978_v3, %v12978_v3 }
 0x56a   : > { %15331 = vst [vmem:[#allocation60_spill] sm:$0xff] %v13015_v27  ;;  %15333 = vst [vmem:[#allocation62_spill] sm:$0xff] %v13027_v61  ;;  %v13040_v1 = vcombine.high %v12984_v14, %v12984_v14  ;;  %v13043_v58 = vrot.slane %v7043_v19, %v10924_v9  ;;  %v13046_v62 = vrot.slane %v7060_v63, %v10924_v9 }
 0x56b   : > { %15334 = vst [vmem:[#allocation63_spill] sm:$0xff] %v13036_v39  ;;  %v13050_v54 = vcombine.high %v12990_v41, %v12990_v41  ;;  %v13053_v24 = vrot.slane %v6991_v47, %v10924_v9  ;;  %v13057_v57 = vcombine.high %v13003_v40, %v13003_v40  ;;  %v13061_v56 = vcombine.high %v12998_v44, %v12998_v44  ;;  %v15343_v47 = vld [vmem:[#allocation24_spill] sm:$0xff] }
 0x56c   : > { %15335 = vst [vmem:[#allocation114_spill] sm:$0xff] %v13046_v62  ;;  %v13065_v17 = vcombine.high %v13015_v27, %v13015_v27  ;;  %v13068_v19 = vrot.slane %v7026_v21, %v10924_v9  ;;  %v13072_v63 = vcombine.high %v13020_v55, %v13020_v55  ;;  %v15347_v44 = vld [vmem:[#allocation80_spill] sm:$0xff]  ;;  %v15348_v21 = vld [vmem:[#allocation122_spill] sm:$0xff]  ;;  %v13089_v55 = vcombine.high %v13043_v58, %v13043_v58 }
 0x56d   : > { %15336 = vst [vmem:[#allocation115_spill] sm:$0xff] %v13050_v54  ;;  %15337 = vst [vmem:[#allocation64_spill] sm:$0xff] %v13053_v24  ;;  %v15344_v24 = vld [vmem:[#allocation117_spill] sm:$0xff]  ;;  %v13093_v54 = vcombine.high %v13046_v62, %v13046_v62  ;;  %v15381_v38 = vld [vmem:[#allocation111_spill] sm:$0xff]  ;;  %v15392_v33 = vrot.slane %v15348_v21, %v15343_v47  ;;  %v15394_v35 = vrot.slane %v15348_v21, %v15347_v44 }
 0x56e   : > { %15338 = vst [vmem:[#allocation65_spill] sm:$0xff] %v13057_v57  ;;  %15339 = vst [vmem:[#allocation74_spill] sm:$0xff] %v13061_v56  ;;  %v13078_v57 = vcombine.high %v13030_v11, %v13030_v11  ;;  %v13081_v56 = vrot.slane %v7061_v20, %v10924_v9  ;;  %v15350_v9 = vld [vmem:[#allocation25_spill] sm:$0xff]  ;;  %v15393_v52 = vrot.slane %v15344_v24, %v15347_v44 }
 0x56f   : > { %15340 = vst [vmem:[#allocation73_spill] sm:$0xff] %v13065_v17  ;;  %15341 = vst [vmem:[#allocation45_spill] sm:$0xff] %v13068_v19  ;;  %v15363_v17 = vld [vmem:[#allocation100_spill] sm:$0xff]  ;;  %v15395_v27 = vrot.slane %v15240_v18, %v15343_v47  ;;  %v15403_v21 = vrot.slane %v15250_v53, %v15343_v47 }
 0x570   : > { %15342 = vst [vmem:[#allocation38_spill] sm:$0xff] %v13072_v63  ;;  %15345 = vst [vmem:[#allocation46_spill] sm:$0xff] %v13078_v57  ;;  %v15385_v20 = vld [vmem:[#allocation113_spill] sm:$0xff]  ;;  %v15391_v57 = vrot.slane %v15344_v24, %v15343_v47  ;;  %v15396_v63 = vrot.slane %v15240_v18, %v15347_v44  ;;  %v15401_v18 = vrot.slane %v12739_v59, %v15343_v47 }
 0x571   : > { %15346 = vst [vmem:[#allocation51_spill] sm:$0xff] %v13081_v56  ;;  %15349 = vst [vmem:[#allocation82_spill] sm:$0xff] %v13093_v54  ;;  %v15351_v54 = vld [vmem:[#allocation28_spill] sm:$0xff]  ;;  %v7873_v56 = vsel %vm7861_vm3, %v15394_v35, %v15393_v52  ;;  %v15399_v52 = vrot.slane %v15350_v9, %v15347_v44 }
 0x572   : > { %v7862_v62 = vsel %vm7861_vm3, %v15392_v33, %v15391_v57  ;;  %v7874_v61 = vsel %vm7863_vm4, %v15396_v63, %v7873_v56  ;;  %v15397_v33 = vrot.slane %v15350_v9, %v15343_v47  ;;  %v15398_v24 = vrot.slane %v15351_v54, %v15343_v47 }
 0x573   : > { %v7864_v39 = vsel %vm7863_vm4, %v15395_v27, %v7862_v62  ;;  %v15400_v35 = vrot.slane %v15351_v54, %v15347_v44  ;;  %v15402_v56 = vrot.slane %v12739_v59, %v15347_v44  ;;  %v15404_v54 = vrot.slane %v15250_v53, %v15347_v44 }
 0x574   : > { %v15382_v22 = vld [vmem:[#allocation115_spill] sm:$0xff]  ;;  %v7879_v57 = vsel %vm7861_vm3, %v15398_v24, %v15397_v33  ;;  %v7866_v62 = vsel %vm7865_vm5, %v15401_v18, %v7864_v39  ;;  %v15405_v59 = vrot.slane %v12767_v51, %v15343_v47  ;;  %v15412_v18 = vrot.slane %v15255_v50, %v15343_v47  ;;  %v15421_v39 = vld [vmem:[#allocation41_spill] sm:$0xff] }
 0x575   : > { %v15386_v19 = vld [vmem:[#allocation74_spill] sm:$0xff]  ;;  %v7885_v27 = vsel %vm7861_vm3, %v15400_v35, %v15399_v52  ;;  %v7875_v63 = vsel %vm7865_vm5, %v15402_v56, %v7874_v61  ;;  %v7880_v9 = vsel %vm7863_vm4, %v15403_v21, %v7879_v57  ;;  %v15406_v52 = vrot.slane %v12767_v51, %v15347_v44  ;;  %v15433_v56 = vld [vmem:[#allocation35_spill] sm:$0xff] }
 0x576   : > { %v7886_v33 = vsel %vm7863_vm4, %v15404_v54, %v7885_v27  ;;  %v7881_v61 = vsel %vm7865_vm5, %v15405_v59, %v7880_v9  ;;  %v15407_v35 = vld [vmem:[#allocation114_spill] sm:$0xff]  ;;  %v15409_v54 = vld [vmem:[#allocation119_spill] sm:$0xff]  ;;  %v15413_v21 = vrot.slane %v15255_v50, %v15347_v44  ;;  %v15414_v53 = vrot.slane %v15257_v2, %v15343_v47 }
 0x577   : > { %v15390_v40 = vld [vmem:[#allocation46_spill] sm:$0xff]  ;;  %v7887_v57 = vsel %vm7865_vm5, %v15406_v52, %v7886_v33  ;;  %v15410_v51 = vrot.slane %v15409_v54, %v15343_v47  ;;  %v15411_v59 = vrot.slane %v15409_v54, %v15347_v44  ;;  %v7882_v27 = vsel %vm7867_vm6, %v15412_v18, %v7881_v61  ;;  %v15418_v18 = vld [vmem:[#allocation32_spill] sm:$0xff] }
 0x578   : > { %v7888_v9 = vsel %vm7867_vm6, %v15413_v21, %v7887_v57  ;;  %v15419_v50 = vrot.slane %v15418_v18, %v15343_v47  ;;  %v15420_v21 = vrot.slane %v15418_v18, %v15347_v44 }
 0x579   : > { %v7868_v33 = vsel %vm7867_vm6, %v15410_v51, %v7866_v62  ;;  %v7876_v52 = vsel %vm7867_vm6, %v15411_v59, %v7875_v63  ;;  %v15415_v62 = vrot.slane %v12781_v36, %v15343_v47  ;;  %v15416_v63 = vrot.slane %v15257_v2, %v15347_v44 }
 0x57a   : > { %v15417_v51 = vrot.slane %v12781_v36, %v15347_v44 }
 0x57b   : > { %v7891_v54 = vsel %vm7861_vm3, %v15415_v62, %v15414_v53  ;;  %v15422_v53 = vrot.slane %v15421_v39, %v15343_v47  ;;  %v15423_v62 = vld [vmem:[#allocation94_spill] sm:$0xff] }
 0x57c   : > { %v7897_v61 = vsel %vm7861_vm3, %v15417_v51, %v15416_v63  ;;  %v7892_v57 = vsel %vm7863_vm4, %v15419_v50, %v7891_v54  ;;  %v15424_v2 = vrot.slane %v15423_v62, %v15343_v47  ;;  %v15425_v63 = vrot.slane %v15421_v39, %v15347_v44  ;;  %v15427_v50 = vld [vmem:[#allocation91_spill] sm:$0xff] }
 0x57d   : > { %v7898_v59 = vsel %vm7863_vm4, %v15420_v21, %v7897_v61  ;;  %v15426_v51 = vrot.slane %v15423_v62, %v15347_v44  ;;  %v15428_v18 = vrot.slane %v15427_v50, %v15343_v47  ;;  %v15429_v21 = vrot.slane %v15427_v50, %v15347_v44 }
 0x57e   : > { %v7903_v36 = vsel %vm7861_vm3, %v15424_v2, %v15422_v53  ;;  %v15430_v53 = vrot.slane %v15359_v25, %v15343_v47  ;;  %v15431_v62 = vrot.slane %v15359_v25, %v15347_v44 }
 0x57f   : > { %v7909_v54 = vsel %vm7861_vm3, %v15426_v51, %v15425_v63  ;;  %v7893_v61 = vsel %vm7865_vm5, %v15428_v18, %v7892_v57  ;;  %v7899_v24 = vsel %vm7865_vm5, %v15429_v21, %v7898_v59  ;;  %v15432_v63 = vld [vmem:[#allocation51_spill] sm:$0xff]  ;;  %v15434_v57 = vrot.slane %v15433_v56, %v15343_v47  ;;  %v15437_v21 = vld [vmem:[#allocation88_spill] sm:$0xff] }
 0x580   : > { %v7904_v39 = vsel %vm7863_vm4, %v15430_v53, %v7903_v36  ;;  %v7910_v2 = vsel %vm7863_vm4, %v15431_v62, %v7909_v54  ;;  %v15435_v59 = vrot.slane %v15360_v12, %v15343_v47  ;;  %v15436_v36 = vrot.slane %v15360_v12, %v15347_v44  ;;  %v15443_v54 = vld [vmem:[#allocation93_spill] sm:$0xff] }
 0x581   : > { %v7894_v50 = vsel %vm7867_vm6, %v15434_v57, %v7893_v61  ;;  %v15438_v53 = vrot.slane %v15437_v21, %v15343_v47  ;;  %v15439_v61 = vrot.slane %v15437_v21, %v15347_v44  ;;  %v15444_v51 = vrot.slane %v15443_v54, %v15343_v47 }
 0x582   : > { %v7905_v18 = vsel %vm7865_vm5, %v15435_v59, %v7904_v39  ;;  %v7911_v25 = vsel %vm7865_vm5, %v15436_v36, %v7910_v2  ;;  %v15440_v39 = vld [vmem:[#allocation90_spill] sm:$0xff]  ;;  %v15445_v21 = vrot.slane %v15433_v56, %v15347_v44 }
 0x583   : > { %v7870_v62 = vsel %vm7869_vm7, %v15438_v53, %v7868_v33  ;;  %v7877_v57 = vsel %vm7869_vm7, %v15439_v61, %v7876_v52  ;;  %v15441_v59 = vrot.slane %v15440_v39, %v15343_v47  ;;  %v15442_v2 = vrot.slane %v15440_v39, %v15347_v44 }
 0x584   : > { %v7895_v33 = vsel %vm7869_vm7, %v15444_v51, %v7894_v50  ;;  %v7900_v52 = vsel %vm7867_vm6, %v15445_v21, %v7899_v24  ;;  %v15446_v53 = vrot.slane %v15361_v13, %v15343_v47  ;;  %v15447_v61 = vrot.slane %v15361_v13, %v15347_v44 }
 0x585   : > { %v7883_v12 = vsel %vm7869_vm7, %v15441_v59, %v7882_v27  ;;  %v7889_v36 = vsel %vm7869_vm7, %v15442_v2, %v7888_v9  ;;  %v15448_v39 = vrot.slane %v15277_v23, %v15343_v47  ;;  %v15449_v51 = vrot.slane %v12825_v5, %v15343_v47 }
 0x586   : > { %v7906_v27 = vsel %vm7867_vm6, %v15446_v53, %v7905_v18  ;;  %v7912_v9 = vsel %vm7867_vm6, %v15447_v61, %v7911_v25  ;;  %v15450_v24 = vrot.slane %v15277_v23, %v15347_v44  ;;  %v15451_v50 = vrot.slane %v12825_v5, %v15347_v44 }
 0x587   : > { %v7915_v56 = vsel %vm7861_vm3, %v15449_v51, %v15448_v39  ;;  %v15452_v13 = vrot.slane %v12821_v6, %v15343_v47  ;;  %v15453_v59 = vrot.slane %v12821_v6, %v15347_v44  ;;  %v15454_v21 = vrot.slane %v12649_v26, %v15343_v47 }
 0x588   : > { %v7921_v18 = vsel %vm7861_vm3, %v15451_v50, %v15450_v24  ;;  %v15455_v23 = vrot.slane %v12870_v15, %v15343_v47  ;;  %v15456_v53 = vrot.slane %v12649_v26, %v15347_v44  ;;  %v15457_v61 = vrot.slane %v12870_v15, %v15347_v44 }
 0x589   : > { %v7916_v25 = vsel %vm7863_vm4, %v15452_v13, %v7915_v56  ;;  %v7922_v2 = vsel %vm7863_vm4, %v15453_v59, %v7921_v18  ;;  %v15458_v6 = vrot.slane %v12863_v60, %v15343_v47  ;;  %v15459_v56 = vrot.slane %v12863_v60, %v15347_v44  ;;  %v15462_v13 = vld [vmem:[#allocation87_spill] sm:$0xff] }
 0x58a   : > { %v7927_v5 = vsel %vm7861_vm3, %v15455_v23, %v15454_v21  ;;  %v7933_v39 = vsel %vm7861_vm3, %v15457_v61, %v15456_v53  ;;  %v15460_v50 = vrot.slane %v12845_v34, %v15343_v47  ;;  %v15461_v15 = vrot.slane %v12845_v34, %v15347_v44  ;;  %v15467_v53 = vld [vmem:[#allocation89_spill] sm:$0xff] }
 0x58b   : > { %v7917_v51 = vsel %vm7865_vm5, %v15458_v6, %v7916_v25  ;;  %v7923_v24 = vsel %vm7865_vm5, %v15459_v56, %v7922_v2  ;;  %v15463_v59 = vrot.slane %v15462_v13, %v15343_v47  ;;  %v15464_v60 = vrot.slane %v15462_v13, %v15347_v44  ;;  %v15470_v6 = vld [vmem:[#allocation92_spill] sm:$0xff] }
 0x58c   : > { %v7928_v26 = vsel %vm7863_vm4, %v15460_v50, %v7927_v5  ;;  %v7934_v18 = vsel %vm7863_vm4, %v15461_v15, %v7933_v39  ;;  %v15465_v21 = vrot.slane %v12882_v29, %v15343_v47  ;;  %v15466_v34 = vrot.slane %v12882_v29, %v15347_v44 }
 0x58d   : > { %v13709_v25 = vsel %vm7871_vm8, %v15463_v59, %v7870_v62  ;;  %v13715_v2 = vsel %vm7871_vm8, %v15464_v60, %v7877_v57  ;;  %v15468_v62 = vrot.slane %v15467_v53, %v15343_v47  ;;  %v15469_v57 = vrot.slane %v15467_v53, %v15347_v44 }
 0x58e   : > { %v7929_v23 = vsel %vm7865_vm5, %v15465_v21, %v7928_v26  ;;  %v7935_v5 = vsel %vm7865_vm5, %v15466_v34, %v7934_v18  ;;  %v15471_v56 = vrot.slane %v15470_v6, %v15343_v47  ;;  %v15472_v29 = vrot.slane %v15443_v54, %v15347_v44 }
 0x58f   : > { %v13729_v61 = vsel %vm7871_vm8, %v15468_v62, %v7883_v12  ;;  %v13735_v39 = vsel %vm7871_vm8, %v15469_v57, %v7889_v36  ;;  %v15473_v12 = vrot.slane %v15362_v30, %v15343_v47  ;;  %v15474_v36 = vrot.slane %v15362_v30, %v15347_v44 }
 0x590   : > { %v13741_v50 = vsel %vm7871_vm8, %v15471_v56, %v7895_v33  ;;  %v7901_v26 = vsel %vm7869_vm7, %v15472_v29, %v7900_v52  ;;  %v15475_v13 = vrot.slane %v12833_v37, %v15343_v47  ;;  %v15476_v54 = vrot.slane %v12833_v37, %v15347_v44 }
 0x591   : > { %v7907_v15 = vsel %vm7869_vm7, %v15473_v12, %v7906_v27  ;;  %v7913_v18 = vsel %vm7869_vm7, %v15474_v36, %v7912_v9  ;;  %v15477_v59 = vrot.slane %v12859_v16, %v15343_v47  ;;  %v15478_v30 = vrot.slane %v12859_v16, %v15347_v44 }
 0x592   : > { %v7918_v33 = vsel %vm7867_vm6, %v15475_v13, %v7917_v51  ;;  %v7924_v52 = vsel %vm7867_vm6, %v15476_v54, %v7923_v24  ;;  %v15479_v60 = vrot.slane %v12904_v45, %v15343_v47  ;;  %v15480_v51 = vrot.slane %v12959_v43, %v15343_v47 }
 0x593   : > { %v7930_v27 = vsel %vm7867_vm6, %v15477_v59, %v7929_v23  ;;  %v7936_v9 = vsel %vm7867_vm6, %v15478_v30, %v7935_v5  ;;  %v15481_v24 = vrot.slane %v12904_v45, %v15347_v44  ;;  %v15482_v21 = vrot.slane %v12959_v43, %v15347_v44 }
 0x594   : > { %v7939_v37 = vsel %vm7861_vm3, %v15480_v51, %v15479_v60  ;;  %v15483_v16 = vrot.slane %v12907_v7, %v15343_v47  ;;  %v15484_v5 = vrot.slane %v12907_v7, %v15347_v44  ;;  %v15485_v62 = vrot.slane %v15291_v8, %v15343_v47 }
 0x595   : > { %v7945_v23 = vsel %vm7861_vm3, %v15482_v21, %v15481_v24  ;;  %v15486_v45 = vrot.slane %v12886_v31, %v15343_v47  ;;  %v15487_v57 = vrot.slane %v15291_v8, %v15347_v44  ;;  %v15488_v56 = vrot.slane %v12886_v31, %v15347_v44 }
 0x596   : > { %v7940_v34 = vsel %vm7863_vm4, %v15483_v16, %v7939_v37  ;;  %v7946_v53 = vsel %vm7863_vm4, %v15484_v5, %v7945_v23  ;;  %v15489_v7 = vrot.slane %v12963_v4, %v15343_v47  ;;  %v15490_v36 = vrot.slane %v12963_v4, %v15347_v44 }
 0x597   : > { %v7951_v43 = vsel %vm7861_vm3, %v15486_v45, %v15485_v62  ;;  %v7957_v29 = vsel %vm7861_vm3, %v15488_v56, %v15487_v57  ;;  %v15491_v54 = vrot.slane %v15294_v0, %v15343_v47  ;;  %v15492_v31 = vrot.slane %v15294_v0, %v15347_v44  ;;  %v15501_v62 = vld [vmem:[#allocation99_spill] sm:$0xff] }
 0x598   : > { %v7941_v12 = vsel %vm7865_vm5, %v15489_v7, %v7940_v34  ;;  %v7947_v13 = vsel %vm7865_vm5, %v15490_v36, %v7946_v53  ;;  %v15493_v30 = vrot.slane %v15470_v6, %v15347_v44  ;;  %v15494_v4 = vrot.slane %v12917_v46, %v15343_v47  ;;  %v15507_v56 = vld [vmem:[#allocation55_spill] sm:$0xff] }
 0x599   : > { %v7952_v8 = vsel %vm7863_vm4, %v15491_v54, %v7951_v43  ;;  %v7958_v59 = vsel %vm7863_vm4, %v15492_v31, %v7957_v29  ;;  %v15495_v37 = vrot.slane %v15363_v17, %v15343_v47  ;;  %v15496_v0 = vrot.slane %v15363_v17, %v15347_v44  ;;  %v15504_v43 = vld [vmem:[#allocation112_spill] sm:$0xff]  ;;  %v15512_v54 = vld [vmem:[#allocation103_spill] sm:$0xff] }
 0x59a   : > { %v13827_v60 = vsel %vm7871_vm8, %v15493_v30, %v7901_v26  ;;  %v7942_v51 = vsel %vm7867_vm6, %v15494_v4, %v7941_v12  ;;  %v15497_v6 = vrot.slane %v12839_v42, %v15343_v47  ;;  %v15498_v23 = vrot.slane %v12839_v42, %v15347_v44  ;;  %v15510_v12 = vld [vmem:[#allocation56_spill] sm:$0xff]  ;;  %v15516_v30 = vld [vmem:[#allocation57_spill] sm:$0xff] }
 0x59b   : > { %v7953_v24 = vsel %vm7865_vm5, %v15495_v37, %v7952_v8  ;;  %v7959_v21 = vsel %vm7865_vm5, %v15496_v0, %v7958_v59  ;;  %v15499_v34 = vrot.slane %v12878_v49, %v15343_v47  ;;  %v15500_v17 = vrot.slane %v12878_v49, %v15347_v44  ;;  %v15519_v0 = vld [vmem:[#allocation84_spill] sm:$0xff] }
 0x59c   : > { %v13845_v26 = vsel %vm7871_vm8, %v15497_v6, %v7907_v15  ;;  %v13851_v16 = vsel %vm7871_vm8, %v15498_v23, %v7913_v18  ;;  %v15502_v15 = vrot.slane %v15501_v62, %v15343_v47  ;;  %v15503_v42 = vrot.slane %v15501_v62, %v15347_v44  ;;  %v15521_v6 = vld [vmem:[#allocation108_spill] sm:$0xff] }
 0x59d   : > { %v7919_v5 = vsel %vm7869_vm7, %v15499_v34, %v7918_v33  ;;  %v7925_v53 = vsel %vm7869_vm7, %v15500_v17, %v7924_v52  ;;  %v15505_v57 = vrot.slane %v15504_v43, %v15343_v47  ;;  %v15506_v49 = vrot.slane %v12917_v46, %v15347_v44 }
 0x59e   : > { %v7931_v45 = vsel %vm7869_vm7, %v15502_v15, %v7930_v27  ;;  %v7937_v18 = vsel %vm7869_vm7, %v15503_v42, %v7936_v9  ;;  %v15508_v29 = vrot.slane %v15507_v56, %v15343_v47  ;;  %v15509_v7 = vrot.slane %v15507_v56, %v15347_v44  ;;  %v15525_v42 = vld [vmem:[#allocation104_spill] sm:$0xff] }
 0x59f   : > { %v7943_v33 = vsel %vm7869_vm7, %v15505_v57, %v7942_v51  ;;  %v7948_v52 = vsel %vm7867_vm6, %v15506_v49, %v7947_v13  ;;  %v15511_v36 = vrot.slane %v15510_v12, %v15343_v47  ;;  %v15513_v8 = vrot.slane %v15512_v54, %v15343_v47 }
 0x5a0   : > { %v7954_v27 = vsel %vm7867_vm6, %v15508_v29, %v7953_v24  ;;  %v7960_v9 = vsel %vm7867_vm6, %v15509_v7, %v7959_v21  ;;  %v15514_v13 = vrot.slane %v15510_v12, %v15347_v44  ;;  %v15515_v31 = vrot.slane %v15512_v54, %v15347_v44 }
 0x5a1   : > { %v7963_v46 = vsel %vm7861_vm3, %v15513_v8, %v15511_v36  ;;  %v15517_v4 = vrot.slane %v15516_v30, %v15343_v47  ;;  %v15518_v37 = vrot.slane %v15516_v30, %v15347_v44  ;;  %v15520_v21 = vrot.slane %v15519_v0, %v15343_v47  ;;  %v15530_v8 = vld [vmem:[#allocation97_spill] sm:$0xff] }
 0x5a2   : > { %v7969_v59 = vsel %vm7861_vm3, %v15515_v31, %v15514_v13  ;;  %v15522_v23 = vrot.slane %v15521_v6, %v15343_v47  ;;  %v15523_v17 = vrot.slane %v15519_v0, %v15347_v44  ;;  %v15524_v62 = vrot.slane %v15521_v6, %v15347_v44  ;;  %v15533_v30 = vld [vmem:[#allocation109_spill] sm:$0xff]  ;;  %v15539_v6 = vld [vmem:[#allocation106_spill] sm:$0xff] }
 0x5a3   : > { %v7964_v51 = vsel %vm7863_vm4, %v15517_v4, %v7963_v46  ;;  %v7970_v24 = vsel %vm7863_vm4, %v15518_v37, %v7969_v59  ;;  %v15526_v57 = vrot.slane %v15525_v42, %v15343_v47  ;;  %v15527_v56 = vrot.slane %v15525_v42, %v15347_v44 }
 0x5a4   : > { %v7975_v34 = vsel %vm7861_vm3, %v15522_v23, %v15520_v21  ;;  %v7981_v15 = vsel %vm7861_vm3, %v15524_v62, %v15523_v17  ;;  %v15528_v7 = vrot.slane %v15376_v32, %v15343_v47  ;;  %v15529_v36 = vrot.slane %v15376_v32, %v15347_v44 }
 0x5a5   : > { %v7965_v49 = vsel %vm7865_vm5, %v15526_v57, %v7964_v51  ;;  %v7971_v29 = vsel %vm7865_vm5, %v15527_v56, %v7970_v24  ;;  %v15531_v46 = vrot.slane %v15530_v8, %v15343_v47  ;;  %v15532_v31 = vrot.slane %v15530_v8, %v15347_v44  ;;  %v15536_v24 = vld [vmem:[#allocation98_spill] sm:$0xff]  ;;  %v15545_v56 = vld [vmem:[#allocation75_spill] sm:$0xff] }
 0x5a6   : > { %v7976_v12 = vsel %vm7863_vm4, %v15528_v7, %v7975_v34  ;;  %v7982_v54 = vsel %vm7863_vm4, %v15529_v36, %v7981_v15  ;;  %v15534_v4 = vrot.slane %v15533_v30, %v15343_v47  ;;  %v15535_v32 = vrot.slane %v15533_v30, %v15347_v44  ;;  %v15542_v15 = vld [vmem:[#allocation101_spill] sm:$0xff] }
 0x5a7   : > { %v13941_v13 = vsel %vm7871_vm8, %v15531_v46, %v7919_v5  ;;  %v13947_v59 = vsel %vm7871_vm8, %v15532_v31, %v7925_v53  ;;  %v15537_v5 = vrot.slane %v15536_v24, %v15343_v47  ;;  %v15538_v53 = vrot.slane %v15536_v24, %v15347_v44 }
 0x5a8   : > { %v7977_v51 = vsel %vm7865_vm5, %v15534_v4, %v7976_v12  ;;  %v7983_v37 = vsel %vm7865_vm5, %v15535_v32, %v7982_v54  ;;  %v15540_v23 = vrot.slane %v15539_v6, %v15343_v47  ;;  %v15541_v17 = vrot.slane %v15504_v43, %v15347_v44  ;;  %v15548_v12 = vld [vmem:[#allocation81_spill] sm:$0xff] }
 0x5a9   : > { %v13961_v0 = vsel %vm7871_vm8, %v15537_v5, %v7931_v45  ;;  %v13967_v21 = vsel %vm7871_vm8, %v15538_v53, %v7937_v18  ;;  %v15543_v45 = vrot.slane %v15542_v15, %v15343_v47  ;;  %v15544_v18 = vrot.slane %v15542_v15, %v15347_v44 }
 0x5aa   : > { %v13973_v34 = vsel %vm7871_vm8, %v15540_v23, %v7943_v33  ;;  %v7949_v62 = vsel %vm7869_vm7, %v15541_v17, %v7948_v52  ;;  %v15546_v7 = vrot.slane %v15545_v56, %v15343_v47  ;;  %v15547_v43 = vrot.slane %v15545_v56, %v15347_v44 }
 0x5ab   : > { %v7955_v42 = vsel %vm7869_vm7, %v15543_v45, %v7954_v27  ;;  %v7961_v57 = vsel %vm7869_vm7, %v15544_v18, %v7960_v9  ;;  %v15549_v36 = vrot.slane %v15548_v12, %v15343_v47  ;;  %v15550_v54 = vrot.slane %v15548_v12, %v15347_v44 }
 0x5ac   : > { %v7966_v33 = vsel %vm7867_vm6, %v15546_v7, %v7965_v49  ;;  %v7972_v52 = vsel %vm7867_vm6, %v15547_v43, %v7971_v29  ;;  %v15551_v8 = vrot.slane %v15380_v28, %v15343_v47  ;;  %v15552_v49 = vrot.slane %v15381_v38, %v15343_v47 }
 0x5ad   : > { %v7978_v27 = vsel %vm7867_vm6, %v15549_v36, %v7977_v51  ;;  %v7984_v9 = vsel %vm7867_vm6, %v15550_v54, %v7983_v37  ;;  %v15553_v29 = vrot.slane %v15380_v28, %v15347_v44  ;;  %v15554_v31 = vrot.slane %v15381_v38, %v15347_v44 }
 0x5ae   : > { %v7987_v46 = vsel %vm7861_vm3, %v15552_v49, %v15551_v8  ;;  %v15555_v4 = vrot.slane %v12953_v10, %v15343_v47  ;;  %v15556_v32 = vrot.slane %v12953_v10, %v15347_v44  ;;  %v15557_v24 = vrot.slane %v12984_v14, %v15343_v47  ;;  %v15569_v49 = vld [vmem:[#allocation102_spill] sm:$0xff] }
 0x5af   : > { %v7993_v30 = vsel %vm7861_vm3, %v15554_v31, %v15553_v29  ;;  %v15558_v28 = vrot.slane %v13040_v1, %v15343_v47  ;;  %v15559_v5 = vrot.slane %v12984_v14, %v15347_v44  ;;  %v15560_v53 = vrot.slane %v13040_v1, %v15347_v44  ;;  %v15572_v31 = vld [vmem:[#allocation107_spill] sm:$0xff] }
 0x5b0   : > { %v7988_v51 = vsel %vm7863_vm4, %v15555_v4, %v7987_v46  ;;  %v7994_v37 = vsel %vm7863_vm4, %v15556_v32, %v7993_v30  ;;  %v15561_v10 = vrot.slane %v13024_v48, %v15343_v47  ;;  %v15562_v15 = vrot.slane %v13024_v48, %v15347_v44  ;;  %v15575_v32 = vld [vmem:[#allocation110_spill] sm:$0xff] }
 0x5b1   : > { %v7999_v38 = vsel %vm7861_vm3, %v15558_v28, %v15557_v24  ;;  %v8005_v23 = vsel %vm7861_vm3, %v15560_v53, %v15559_v5  ;;  %v15563_v18 = vrot.slane %v12990_v41, %v15343_v47  ;;  %v15564_v1 = vrot.slane %v12990_v41, %v15347_v44  ;;  %v15578_v28 = vld [vmem:[#allocation63_spill] sm:$0xff]  ;;  %v15581_v53 = vld [vmem:[#allocation58_spill] sm:$0xff] }
 0x5b2   : > { %v7989_v17 = vsel %vm7865_vm5, %v15561_v10, %v7988_v51  ;;  %v7995_v45 = vsel %vm7865_vm5, %v15562_v15, %v7994_v37  ;;  %v15565_v7 = vrot.slane %v15539_v6, %v15347_v44  ;;  %v15566_v48 = vrot.slane %v12978_v3, %v15343_v47 }
 0x5b3   : > { %v8000_v14 = vsel %vm7863_vm4, %v15563_v18, %v7999_v38  ;;  %v8006_v56 = vsel %vm7863_vm4, %v15564_v1, %v8005_v23  ;;  %v15567_v36 = vrot.slane %v15382_v22, %v15343_v47  ;;  %v15568_v41 = vrot.slane %v15382_v22, %v15347_v44  ;;  %v15588_v1 = vld [vmem:[#allocation60_spill] sm:$0xff] }
 0x5b4   : > { %v14059_v43 = vsel %vm7871_vm8, %v15565_v7, %v7949_v62  ;;  %v7990_v12 = vsel %vm7867_vm6, %v15566_v48, %v7989_v17  ;;  %v15570_v6 = vrot.slane %v15569_v49, %v15343_v47  ;;  %v15571_v46 = vrot.slane %v15569_v49, %v15347_v44 }
 0x5b5   : > { %v8001_v54 = vsel %vm7865_vm5, %v15567_v36, %v8000_v14  ;;  %v8007_v8 = vsel %vm7865_vm5, %v15568_v41, %v8006_v56  ;;  %v15573_v30 = vrot.slane %v15572_v31, %v15343_v47  ;;  %v15574_v22 = vrot.slane %v15572_v31, %v15347_v44 }
 0x5b6   : > { %v7956_v62 = vsel %vm7871_vm8, %v15570_v6, %v7955_v42  ;;  %v7962_v29 = vsel %vm7871_vm8, %v15571_v46, %v7961_v57  ;;  %v15576_v37 = vrot.slane %v15575_v32, %v15343_v47  ;;  %v15577_v24 = vrot.slane %v15575_v32, %v15347_v44  ;;  %v15596_v46 = vld [vmem:[#allocation73_spill] sm:$0xff] }
 0x5b7   : > { %v7967_v4 = vsel %vm7869_vm7, %v15573_v30, %v7966_v33  ;;  %v7973_v51 = vsel %vm7869_vm7, %v15574_v22, %v7972_v52  ;;  %v15579_v38 = vrot.slane %v15578_v28, %v15343_v47  ;;  %v15580_v5 = vrot.slane %v12978_v3, %v15347_v44 }
 0x5b8   : > { %v7979_v42 = vsel %vm7869_vm7, %v15576_v37, %v7978_v27  ;;  %v7985_v57 = vsel %vm7869_vm7, %v15577_v24, %v7984_v9  ;;  %v15582_v23 = vrot.slane %v15581_v53, %v15343_v47  ;;  %v15583_v10 = vrot.slane %v15581_v53, %v15347_v44  ;;  %v15600_v37 = vld [vmem:[#allocation105_spill] sm:$0xff] }
 0x5b9   : > { %v7991_v33 = vsel %vm7869_vm7, %v15579_v38, %v7990_v12  ;;  %v7996_v52 = vsel %vm7867_vm6, %v15580_v5, %v7995_v45  ;;  %v15584_v17 = vrot.slane %v15385_v20, %v15343_v47  ;;  %v15585_v15 = vrot.slane %v15386_v19, %v15343_v47 }
 0x5ba   : > { %v8002_v27 = vsel %vm7867_vm6, %v15582_v23, %v8001_v54  ;;  %v8008_v9 = vsel %vm7867_vm6, %v15583_v10, %v8007_v8  ;;  %v15586_v45 = vrot.slane %v15385_v20, %v15347_v44  ;;  %v15587_v18 = vrot.slane %v15386_v19, %v15347_v44 }
 0x5bb   : > { %v8011_v3 = vsel %vm7861_vm3, %v15585_v15, %v15584_v17  ;;  %v15589_v56 = vrot.slane %v15588_v1, %v15343_v47  ;;  %v15590_v48 = vrot.slane %v15588_v1, %v15347_v44  ;;  %v15591_v36 = vrot.slane %v13030_v11, %v15343_v47  ;;  %v15606_v15 = vld [vmem:[#allocation59_spill] sm:$0xff] }
 0x5bc   : > { %v8017_v14 = vsel %vm7861_vm3, %v15587_v18, %v15586_v45  ;;  %v15592_v20 = vrot.slane %v15390_v40, %v15343_v47  ;;  %v15593_v54 = vrot.slane %v13030_v11, %v15347_v44  ;;  %v15594_v41 = vrot.slane %v15390_v40, %v15347_v44  ;;  %v15608_v45 = vld [vmem:[#allocation65_spill] sm:$0xff] }
 0x5bd   : > { %v8012_v7 = vsel %vm7863_vm4, %v15589_v56, %v8011_v3  ;;  %v8018_v12 = vsel %vm7863_vm4, %v15590_v48, %v8017_v14  ;;  %v15595_v49 = vrot.slane %v15578_v28, %v15347_v44  ;;  %v15597_v31 = vrot.slane %v15596_v46, %v15343_v47  ;;  %v15613_v48 = vld [vmem:[#allocation62_spill] sm:$0xff] }
 0x5be   : > { %v8023_v19 = vsel %vm7861_vm3, %v15592_v20, %v15591_v36  ;;  %v8029_v8 = vsel %vm7861_vm3, %v15594_v41, %v15593_v54  ;;  %v15598_v22 = vrot.slane %v15596_v46, %v15347_v44  ;;  %v15599_v40 = vrot.slane %v13043_v58, %v15343_v47  ;;  %v15617_v54 = vld [vmem:[#allocation38_spill] sm:$0xff]  ;;  %v15620_v46 = vld [vmem:[#allocation64_spill] sm:$0xff] }
 0x5bf   : > { %v7997_v6 = vsel %vm7869_vm7, %v15595_v49, %v7996_v52  ;;  %v8013_v30 = vsel %vm7865_vm5, %v15597_v31, %v8012_v7  ;;  %v15601_v24 = vrot.slane %v15600_v37, %v15343_v47  ;;  %v15602_v38 = vrot.slane %v15600_v37, %v15347_v44  ;;  %v15603_v52 = vld [vmem:[#allocation61_spill] sm:$0xff] }
 0x5c0   : > { %v8019_v11 = vsel %vm7865_vm5, %v15598_v22, %v8018_v12  ;;  %v8024_v32 = vsel %vm7863_vm4, %v15599_v40, %v8023_v19  ;;  %v15604_v53 = vrot.slane %v15603_v52, %v15343_v47  ;;  %v15605_v10 = vrot.slane %v13043_v58, %v15347_v44 }
 0x5c1   : > { %v7968_v28 = vsel %vm7871_vm8, %v15601_v24, %v7967_v4  ;;  %v7974_v5 = vsel %vm7871_vm8, %v15602_v38, %v7973_v51  ;;  %v15607_v3 = vrot.slane %v15606_v15, %v15343_v47  ;;  %v15609_v18 = vrot.slane %v15608_v45, %v15343_v47 }
 0x5c2   : > { %v8014_v23 = vsel %vm7867_vm6, %v15604_v53, %v8013_v30  ;;  %v8030_v17 = vsel %vm7863_vm4, %v15605_v10, %v8029_v8  ;;  %v15610_v14 = vrot.slane %v15608_v45, %v15347_v44  ;;  %v15611_v58 = vrot.slane %v15603_v52, %v15347_v44  ;;  %v15625_v52 = vld [vmem:[#allocation45_spill] sm:$0xff] }
 0x5c3   : > { %v7980_v4 = vsel %vm7871_vm8, %v15607_v3, %v7979_v42  ;;  %v8003_v51 = vsel %vm7869_vm7, %v15609_v18, %v8002_v27  ;;  %v15612_v7 = vrot.slane %v15606_v15, %v15347_v44  ;;  %v15614_v12 = vrot.slane %v15613_v48, %v15343_v47 }
 0x5c4   : > { %v8009_v1 = vsel %vm7869_vm7, %v15610_v14, %v8008_v9  ;;  %v8020_v56 = vsel %vm7867_vm6, %v15611_v58, %v8019_v11  ;;  %v15615_v36 = vrot.slane %v15613_v48, %v15347_v44  ;;  %v15616_v20 = vrot.slane %v13089_v55, %v15343_v47 }
 0x5c5   : > { %v7986_v42 = vsel %vm7871_vm8, %v15612_v7, %v7985_v57  ;;  %v7992_v27 = vsel %vm7871_vm8, %v15614_v12, %v7991_v33  ;;  %v15618_v41 = vrot.slane %v15617_v54, %v15343_v47  ;;  %v15619_v8 = vrot.slane %v13089_v55, %v15347_v44 }
 0x5c6   : > { %v7998_v9 = vsel %vm7871_vm8, %v15615_v36, %v7997_v6  ;;  %v8025_v19 = vsel %vm7865_vm5, %v15616_v20, %v8024_v32  ;;  %v8063_v49 = vsel %vm5577_vm0, %v13709_v25, 0.0  ;;  %v8064_v6 = vsel %vm5577_vm0, %v13729_v61, 0.0 }
 0x5c7   : > { %v8015_v57 = vsel %vm7869_vm7, %v15618_v41, %v8014_v23  ;;  %v8031_v33 = vsel %vm7865_vm5, %v15619_v8, %v8030_v17  ;;  %v15621_v31 = vrot.slane %v15620_v46, %v15343_v47  ;;  %v15622_v22 = vrot.slane %v15620_v46, %v15347_v44 }
 0x5c8   : > { %v15623_v55 = vrot.slane %v15617_v54, %v15347_v44  ;;  %v8065_v32 = vadd.f32 %v8064_v6, %v8063_v49  ;;  %v15624_v25 = vrot.slane %v15407_v35, %v15343_v47  ;;  %v8066_v37 = vsel %vm5577_vm0, %v13741_v50, 0.0 }
 0x5c9   : > { %v8004_v30 = vsel %vm7871_vm8, %v15621_v31, %v8003_v51  ;;  %v8010_v11 = vsel %vm7871_vm8, %v15622_v22, %v8009_v1  ;;  %v8082_v24 = vsel %vm5577_vm0, %v13715_v2, 0.0  ;;  %v8083_v38 = vsel %vm5577_vm0, %v13735_v39, 0.0  ;;  %v15629_v51 = vld [vmem:[#allocation82_spill] sm:$0xff] }
 0x5ca   : > { %v8021_v40 = vsel %vm7869_vm7, %v15623_v55, %v8020_v56  ;;  %v8026_v61 = vsel %vm7867_vm6, %v15624_v25, %v8025_v19  ;;  %v15626_v53 = vrot.slane %v15625_v52, %v15343_v47  ;;  %v15627_v10 = vrot.slane %v15407_v35, %v15347_v44 }
 0x5cb   : > { %v8067_v15 = vadd.f32 %v8066_v37, %v8065_v32  ;;  %v8084_v3 = vadd.f32 %v8083_v38, %v8082_v24  ;;  %v15628_v50 = vrot.slane %v15625_v52, %v15347_v44  ;;  %v8068_v39 = vsel %vm5577_vm0, %v13845_v26, 0.0 }
 0x5cc   : > { %v8016_v23 = vsel %vm7871_vm8, %v15626_v53, %v8015_v57  ;;  %v8032_v17 = vsel %vm7867_vm6, %v15627_v10, %v8031_v33  ;;  %v8085_v45 = vsel %vm5577_vm0, %v13827_v60, 0.0  ;;  %v8101_v18 = vsel %vm5577_vm0, %v7956_v62, 0.0 }
 0x5cd   : > { %v8022_v2 = vsel %vm7871_vm8, %v15628_v50, %v8021_v40  ;;  %v15630_v35 = vrot.slane %v15629_v51, %v15343_v47  ;;  %v8069_v1 = vadd.f32 %v8068_v39, %v8067_v15  ;;  %v8086_v58 = vadd.f32 %v8085_v45, %v8084_v3 }
 0x5ce   : > { %v8102_v56 = vsel %vm5577_vm0, %v7968_v28, 0.0  ;;  %v15631_v7 = vrot.slane %v15629_v51, %v15347_v44  ;;  %v8070_v26 = vsel %vm5577_vm0, %v13941_v13, 0.0  ;;  %v8087_v60 = vsel %vm5577_vm0, %v13851_v16, 0.0 }
 0x5cf   : > { %v8027_v14 = vsel %vm7869_vm7, %v15630_v35, %v8026_v61  ;;  %v8103_v62 = vadd.f32 %v8102_v56, %v8101_v18  ;;  %v8071_v12 = vadd.f32 %v8070_v26, %v8069_v1  ;;  %v8088_v36 = vadd.f32 %v8087_v60, %v8086_v58 }
 0x5d0   : > { %v8033_v48 = vsel %vm7869_vm7, %v15631_v7, %v8032_v17  ;;  %v8104_v20 = vsel %vm5577_vm0, %v7980_v4, 0.0  ;;  %v8120_v19 = vsel %vm5577_vm0, %v7962_v29, 0.0  ;;  %v8072_v28 = vsel %vm5577_vm0, %v13961_v0, 0.0 }
 0x5d1   : > { %v8089_v54 = vsel %vm5577_vm0, %v13947_v59, 0.0  ;;  %v8105_v41 = vadd.f32 %v8104_v20, %v8103_v62  ;;  %v8121_v57 = vsel %vm5577_vm0, %v7974_v5, 0.0  ;;  %v8073_v13 = vadd.f32 %v8072_v28, %v8071_v12 }
 0x5d2   : > { %v8090_v8 = vadd.f32 %v8089_v54, %v8088_v36  ;;  %v8106_v16 = vsel %vm5577_vm0, %v7992_v27, 0.0  ;;  %v8122_v33 = vadd.f32 %v8121_v57, %v8120_v19  ;;  %v8074_v49 = vsel %vm5577_vm0, %v13973_v34, 0.0  ;;  %v15634_v54 = vld [vmem:[#allocation72_spill] sm:$0xff] }
 0x5d3   : > { %v8091_v29 = vsel %vm5577_vm0, %v13967_v21, 0.0  ;;  %v8107_v4 = vadd.f32 %v8106_v16, %v8105_v41  ;;  %v8123_v0 = vsel %vm5577_vm0, %v7986_v42, 0.0  ;;  %v8075_v6 = vadd.f32 %v8074_v49, %v8073_v13 }
 0x5d4   : > { %v8092_v46 = vadd.f32 %v8091_v29, %v8090_v8  ;;  %v8108_v59 = vsel %vm5577_vm0, %v8004_v30, 0.0  ;;  %v8124_v31 = vadd.f32 %v8123_v0, %v8122_v33  ;;  %v15632_v5 = vrot.slane %v15432_v63, %v15343_v47 }
 0x5d5   : > { %v8093_v22 = vsel %vm5577_vm0, %v14059_v43, 0.0  ;;  %v8109_v34 = vadd.f32 %v8108_v59, %v8107_v4  ;;  %v8125_v55 = vsel %vm5577_vm0, %v7998_v9, 0.0  ;;  %v8076_v21 = vrot.slane %v8075_v6, 4 }
 0x5d6   : > { %v8028_v27 = vsel %vm7871_vm8, %v15632_v5, %v8027_v14  ;;  %v8094_v40 = vadd.f32 %v8093_v22, %v8092_v46  ;;  %v8110_v42 = vsel %vm5577_vm0, %v8016_v23, 0.0  ;;  %v8126_v32 = vadd.f32 %v8125_v55, %v8124_v31 }
 0x5d7   : > { %v15633_v30 = vrot.slane %v15432_v63, %v15347_v44  ;;  %v8111_v61 = vadd.f32 %v8110_v42, %v8109_v34  ;;  %v8127_v47 = vsel %vm5577_vm0, %v8010_v11, 0.0  ;;  %v8077_v37 = vadd.f32 %v8076_v21, %v8075_v6 }
 0x5d8   : > { %v8095_v24 = vrot.slane %v8094_v40, 4  ;;  %v8112_v43 = vsel %vm5577_vm0, %v8028_v27, 0.0  ;;  %v8128_v38 = vadd.f32 %v8127_v47, %v8126_v32  ;;  %v8129_v9 = vsel %vm5577_vm0, %v8022_v2, 0.0 }
 0x5d9   : > { %v8034_v25 = vsel %vm7871_vm8, %v15633_v30, %v8033_v48  ;;  %v8113_v52 = vadd.f32 %v8112_v43, %v8111_v61  ;;  %v8078_v53 = vrot.slane %v8077_v37, 2 }
 0x5da   : > { %v8096_v10 = vadd.f32 %v8095_v24, %v8094_v40  ;;  %v8130_v23 = vadd.f32 %v8129_v9, %v8128_v38  ;;  %v8131_v15 = vsel %vm5577_vm0, %v8034_v25, 0.0 }
 0x5db   : > { %v8114_v17 = vrot.slane %v8113_v52, 4  ;;  %v8079_v44 = vadd.f32 %v8078_v53, %v8077_v37 }
 0x5dc   : > { %v8097_v63 = vrot.slane %v8096_v10, 2  ;;  %v8132_v3 = vadd.f32 %v8131_v15, %v8130_v23 }
 0x5dd   : > { %v8115_v50 = vadd.f32 %v8114_v17, %v8113_v52  ;;  %v8080_v18 = vrot.slane %v8079_v44, 1 }
 0x5de   : > { %v8098_v39 = vadd.f32 %v8097_v63, %v8096_v10  ;;  %v8133_v11 = vrot.slane %v8132_v3, 4 }
 0x5df   : > { %v8116_v45 = vrot.slane %v8115_v50, 2  ;;  %v8081_v2 = vadd.f32 %v8080_v18, %v8079_v44 }
 0x5e0   : > { %v8099_v51 = vrot.slane %v8098_v39, 1  ;;  %v8134_v35 = vadd.f32 %v8133_v11, %v8132_v3 }
 0x5e1   : > { %v8117_v14 = vadd.f32 %v8116_v45, %v8115_v50  ;;  %v8140_v62 = vmul.f32 0.020408163, %v8081_v2 }
 0x5e2   : > { %v8135_v1 = vrot.slane %v8134_v35, 2  ;;  %v8100_v56 = vadd.f32 %v8099_v51, %v8098_v39 }
 0x5e3   : > { %v8118_v58 = vrot.slane %v8117_v14, 1 }
 0x5e4   : > { %v8136_v7 = vadd.f32 %v8135_v1, %v8134_v35  ;;  %v8141_v12 = vmul.f32 0.020408163, %v8100_v56 }
 0x5e5   : > { %v8119_v48 = vadd.f32 %v8118_v58, %v8117_v14 }
 0x5e6   : > { %v8137_v26 = vrot.slane %v8136_v7, 1  ;;  %v8148_v19 = vcombine.low %v8140_v62, %v8141_v12 }
 0x5e7   : > { %v8142_v36 = vmul.f32 0.020408163, %v8119_v48 }
 0x5e8   : > { %v8138_v60 = vadd.f32 %v8137_v26, %v8136_v7  ;;  %v8155_v57 = vrot.slane %v8148_v19, %v15634_v54 }
 0x5ea   : > { %v8143_v20 = vmul.f32 0.020408163, %v8138_v60 }
 0x5ec   : > { %v8156_v28 = vcombine.low %v8142_v36, %v8143_v20 }
 0x5ee   : > { %v8163_v41 = vrot.slane %v8156_v28, %v15634_v54 }
 0x5f0   : > { %v8166_v13 = vrot.slane %v8163_v41, 7 }
 0x5f2   : > { %v8167_v8 = vsel %vm7861_vm3, %v8166_v13, %v8155_v57 }
 0x5f3   : > { %v8168_v16 = vsel %vm7865_vm5, %v8166_v13, %v8167_v8 }
 0x5f4   : > { %v8169_v33 = vsel %vm7869_vm7, %v8166_v13, %v8168_v16 }
 0x5f5   : > { %v8171_v49 = vsel %vm8170_vm9, %v8166_v13, %v8169_v33 }
 0x5f6   : > { %8173 = vst [vmem:[%s9325_s30] sm:$0xf] %v8171_v49 }
 0x5f7 PF: > { %s15635_s18 = sld [smem:[#allocation18_spill]]  ;;  %s8189_s21 = sshll.u32 %s9325_s30, 4  ;;  %s8190_s21 = int_to_ptr.vmem [resolvable:$true] %s8189_s21 }
 0x5f8   : > { %s15636_s8 = sld [smem:[#allocation126_spill]]  ;;  %s8175_s1 = scalar_lea.sflag [#allocation6], %s9315_s7 }
 0x5f9   : > { %s8880_s0 = scalar_lea.vmem %s8190_s21, 64  ;;  %p15637_p9 = scmp.ne.s32.totalorder %s14765_s3, 0 }
 0x5fa   : > { %p8881_p8 = scmp.ne.s32.totalorder %s8190_s21, %s8880_s0  ;;  %s9047_s23 = smov [#allocation10]  }
 0x5fb   : > { %s8884_s24 = sshll.u32 %s9047_s23, 4  ;;  %s8885_s24 = int_to_ptr.vmem [resolvable:$false] %s8884_s24 }
 0x5fc   : > { %p8882_p0 = pnand %p8881_p8, %p15637_p9  ;;  %s8886_s28 = scalar_lea.vmem %s8885_s24, 128 }
 0x5fd   : > { %s8463_s5 = sshll.u32 %s15635_s18, 6  ;;  %p8887_p10 = scmp.lt.s32.totalorder %s8190_s21, %s8885_s24 }
 0x5fe   : > { %s8187_s22 = scalar_lea.hbm %s15636_s8, %s8463_s5  ;;  %p8883_p6 = pneg %p8882_p0 }
 0x5ff   : > { %p8888_p1 = scmp.lt.s32.totalorder %s8886_s28, %s8880_s0 }
 0x601   : > { %p8889_p5 = por %p8888_p1, %p8887_p10 }
 0x603   : > { %p8890_p4 = pnand %p8889_p5, %p8883_p6 }
 0x605   : > { %8893 = shalt.err (!%p8890_p4)
}
 0x606   : > { %s8894_s6 = scalar_lea.hbm %s8187_s22, 64  ;;  %s8898_s2 = scalar_lea.hbm %s15636_s8, 128 }
 0x607   : > { %p8895_p11 = scmp.ne.s32.totalorder %s8187_s22, %s8894_s6  ;;  %p8899_p7 = scmp.lt.s32.totalorder %s8187_s22, %s15636_s8 }
 0x608   : > { %p8900_p12 = scmp.lt.s32.totalorder %s8898_s2, %s8894_s6 }
 0x609   : > { %p8896_p13 = pnand %p8895_p11, %p15637_p9 }
 0x60a   : > { %p8901_p3 = por %p8900_p12, %p8899_p7 }
 0x60b   : > { %p8897_p2 = pneg %p8896_p13 }
 0x60d   : > { %p8902_p8 = pnand %p8901_p3, %p8897_p2 }
 0x60f   : > { %8905 = shalt.err (!%p8902_p8)
}
 0x610   : > { %8474 = dma.vmem_to_hbm [thread:$0]  (%p15637_p9), %s8190_s21, 64, %s8187_s22, %s8175_s1  }
 0x611 PF: > { %s15638_s27 = sld [smem:[#allocation15_spill]]  ;;  %p8491_p0 = scmp.ge.s32.totalorder %s9032_s25, 2 }
 0x612   : > { %p15639_p6 = scmp.ne.s32.totalorder %s14766_s4, 0 }
 0x614   : > { %p8487_p10 = pnand %p8491_p0, %p15639_p6 }
 0x616   : > { %p8488_p1 = pneg %p8487_p10 }
 0x617   : > { %s8201_s18 = sand.u32 1, %s15638_s27  }
 0x618   : > { %s8202_s5 = scalar_lea.sflag [#allocation6], %s8201_s18 }
 0x619   : > { %8975 = dma.done.wait (%p8488_p1), %s8202_s5, 64  }
 0x61a   : > { %8977 = vsyncadd (%p8488_p1), %s8202_s5, 4294967232  ;;  %s22_s25 = sadd.s32 1, %s9032_s25   ;;  %s15641_s21 = sld [smem:[#allocation19_spill]] }
 0x61b   : > { %p14336_p5 = scmp.ge.s32.totalorder %s22_s25, 8   ;;  %s15642_s22 = sld [smem:[#allocation20_spill]] }
 0x61c   : > { %s15643_s23 = sld [smem:[#allocation21_spill]]  ;;  %s15645_s12 = smov %s8984_s13 }
 0x61d   : > { %s15644_s24 = sld [smem:[#allocation22_spill]]  ;;  %s15646_s13 = smov %s8988_s14 }
 0x61e   : > { %s15647_s14 = smov %s9256_s15  ;;  %s15648_s15 = smov %s8996_s16 }
 0x61f   : > { %s15649_s16 = smov %s9000_s17  ;;  %s15650_s17 = smov %s9174_s11 }
 0x620   : > { %s15651_s18 = smov %s9008_s19  ;;  %s15652_s19 = smov %s9012_s20 }
 0x621   : > { %s15653_s20 = smov %s9210_s9  ;;  %21 = sbr.rel (!%p14336_p5) target bundleno = 17 (0x11), region = 110 }
 0x626   :  { %8207 = vsyncpa [#allocation5], 1 }
 0x627   :  { %8209 = vsyncpa [#allocation5 + $0x1], 1 }
 0x628   :  { %8210 = vsyncpa [#allocation8], 1 }
 0x629   :  { %8212 = vsyncpa [#allocation8 + $0x1], 1 }
 0x62a   :  { %8213 = vsyncpa [#allocation6], 1 }
 0x62b   :  { %8215 = vsyncpa [#allocation6 + $0x1], 1 }

</bundles_post_ra>
